<compile_context>
chip_gen: v6e
topology: v6e:2x2x1
jax: 0.10.0
libtpu: 0.0.40
codegen_flags: <defaults>
</compile_context>

<pallas_src>
import functools

import numpy as np

import jax
import jax.numpy as jnp
from jax.experimental import pallas as pl
from jax.experimental.pallas import tpu as pltpu

EP_CLIP = 0.1

# Network geometry (92x100 input -> 22x24 -> 10x11 ; 32*10*11 == 3520).
H_IN, W_IN, C_IN = 92, 100, 2
C1, K1, S1, OH1, OW1 = 16, 8, 4, 22, 24
C2, K2, S2, OH2, OW2 = 32, 4, 2, 10, 11
N_FC1, N_ACT = 256, 3

HPAD = 96                      # H padded so it splits into 8 stride phases.
WPAD = 128                     # W padded to a full lane tile.
N1 = C1 * OW1                  # 384  conv1 output lanes (co1*24 + ow1)
N2P = 384                      # conv2 output lanes, 352 real + 32 zero pad
NLOG = 128                     # fc2 output lanes, 3 real + 125 zero pad
KC1 = K1 * C_IN * WPAD         # 2048 conv1 contraction dim (kh, c, w)
KC2 = K2 * N1                  # 1536 conv2 contraction dim (kh, ci, w1)
KF1 = OH2 * N2P                # 3840 fc1 contraction dim (oh2, col)


# ------------------------------ fused kernel --------------------------------

def _policy_kernel(x_ref, a1_ref, b1_ref, a2_ref, b2_ref, wf1_ref, bf1_ref,
                   wf2_ref, bf2_ref, act_ref, prob_ref, adv_ref, out_ref,
                   s1_ref, y1_ref, s2_ref, y2_ref, f1_ref, *, batch):
    # ---- conv1: build row-expanded slab (static contiguous slices only),
    #      then a single MXU dot. Slab rows: b*32 + p1*16 + q1 (oh1 = 2*q1+p1).
    s1_ref[...] = jnp.zeros_like(s1_ref)
    for b in range(batch):
        for kh in range(K1):
            for c in range(C_IN):
                lane0 = (kh * C_IN + c) * WPAD
                for p1 in range(2):
                    t = 4 * p1 + kh              # h = 8*q1 + t
                    p8, d = t % 8, t // 8
                    row0 = b * 32 + p1 * 16
                    s1_ref[row0:row0 + 11, lane0:lane0 + WPAD] = \
                        x_ref[b, c, p8, d:d + 11, :]
    acc1 = jnp.dot(s1_ref[...], a1_ref[...],
                   preferred_element_type=jnp.float32)          # (B*32, 384)
    y1_ref[...] = jnp.maximum(acc1 + b1_ref[...], 0.0).astype(jnp.bfloat16)

    # ---- conv2: phase-split conv1 rows make the stride-2 H window contiguous.
    s2_ref[...] = jnp.zeros_like(s2_ref)
    for b in range(batch):
        for kh in range(K2):
            srow = b * 32 + (kh % 2) * 16 + kh // 2
            s2_ref[b * 16:b * 16 + OH2, kh * N1:(kh + 1) * N1] = \
                y1_ref[srow:srow + OH2, :]
    acc2 = jnp.dot(s2_ref[...], a2_ref[...],
                   preferred_element_type=jnp.float32)          # (B*16, 384)
    y2_ref[...] = jnp.maximum(acc2 + b2_ref[...], 0.0).astype(jnp.bfloat16)

    # ---- flatten (torch NCHW .view(B,-1) order is folded into wf1) ----------
    for b in range(batch):
        for oh2 in range(OH2):
            f1_ref[b:b + 1, oh2 * N2P:(oh2 + 1) * N2P] = \
                y2_ref[b * 16 + oh2:b * 16 + oh2 + 1, :]

    # ---- fc1 + ReLU, fc2 ------------------------------------------------------
    h = jnp.dot(f1_ref[...], wf1_ref[...],
                preferred_element_type=jnp.float32)             # (B, 256)
    h = jnp.maximum(h + bf1_ref[...], 0.0).astype(jnp.bfloat16)
    logits = jnp.dot(h, wf2_ref[...],
                     preferred_element_type=jnp.float32) + bf2_ref[...]  # (B,128)

    # ---- PPO clipped-surrogate loss (f32) -------------------------------------
    col = jax.lax.broadcasted_iota(jnp.int32, (batch, NLOG), 1)
    logits = jnp.where(col < N_ACT, logits, -1e30)   # mask padded action lanes
    m = jnp.max(logits, axis=1, keepdims=True)
    e = jnp.exp(logits - m)
    sm = e / jnp.sum(e, axis=1, keepdims=True)
    onehot = (act_ref[...] == col).astype(jnp.float32)
    r = jnp.sum(sm * onehot, axis=1, keepdims=True) / prob_ref[...]
    adv = adv_ref[...]
    loss1 = r * adv
    loss2 = jnp.clip(r, 1.0 - EP_CLIP, 1.0 + EP_CLIP) * adv
    loss = -jnp.minimum(loss1, loss2)
    out_ref[...] = jnp.mean(loss, keepdims=True)                 # (1, 1)


# --------------------------- init / weight prep ------------------------------

def init_params(key):
    """Raw PyTorch-layout parameters (same init scheme as torch defaults)."""
    ks = jax.random.split(key, 8)

    def u(k, shape, fan_in):
        bound = 1.0 / float(np.sqrt(fan_in))
        return jax.random.uniform(k, shape, jnp.float32, -bound, bound)

    return dict(
        conv1_w=u(ks[0], (C1, C_IN, K1, K1), C_IN * K1 * K1),
        conv1_b=u(ks[1], (C1,), C_IN * K1 * K1),
        conv2_w=u(ks[2], (C2, C1, K2, K2), C1 * K2 * K2),
        conv2_b=u(ks[3], (C2,), C1 * K2 * K2),
        fc1_w=u(ks[4], (N_FC1, 3520), 3520),
        fc1_b=u(ks[5], (N_FC1,), 3520),
        fc2_w=u(ks[6], (N_ACT, N_FC1), N_FC1),
        fc2_b=u(ks[7], (N_ACT,), N_FC1),
    )


def prepare_policy_params(params):
    """One-time repack of torch-layout weights into bf16 kernel operands."""
    w1 = np.asarray(params["conv1_w"], np.float32)       # (16, 2, 8, 8)
    b1 = np.asarray(params["conv1_b"], np.float32)
    w2 = np.asarray(params["conv2_w"], np.float32)       # (32, 16, 4, 4)
    b2 = np.asarray(params["conv2_b"], np.float32)
    wf1 = np.asarray(params["fc1_w"], np.float32)        # (256, 3520)
    bf1 = np.asarray(params["fc1_b"], np.float32)
    wf2 = np.asarray(params["fc2_w"], np.float32)        # (3, 256)
    bf2 = np.asarray(params["fc2_b"], np.float32)

    # conv1 Toeplitz weight: rows = (kh, c, w<128), cols = co1*24 + ow1.
    a1 = np.zeros((KC1, N1), np.float32)
    for kh in range(K1):
        for c in range(C_IN):
            base = (kh * C_IN + c) * WPAD
            for ow in range(OW1):
                cols = np.arange(C1) * OW1 + ow
                for kw in range(K1):
                    a1[base + S1 * ow + kw, cols] = w1[:, c, kh, kw]
    b1r = np.repeat(b1, OW1).reshape(1, N1)

    # conv2 Toeplitz weight: rows = (kh, ci, w1), cols = co2*11 + ow2 (+32 pad).
    a2 = np.zeros((KC2, N2P), np.float32)
    for kh in range(K2):
        for ci in range(C1):
            for ow in range(OW2):
                cols = np.arange(C2) * OW2 + ow
                for kw in range(K2):
                    a2[kh * N1 + ci * OW1 + S2 * ow + kw, cols] = w2[:, ci, kh, kw]
    b2r = np.zeros((1, N2P), np.float32)
    b2r[0, :C2 * OW2] = np.repeat(b2, OW2)

    # fc1: torch flatten order (co2, oh2, ow2) -> rows (oh2, co2*11+ow2, +pad).
    wf1p = np.zeros((KF1, N_FC1), np.float32)
    wt = wf1.reshape(N_FC1, C2, OH2, OW2)
    for oh2 in range(OH2):
        blk = wt[:, :, oh2, :].reshape(N_FC1, C2 * OW2).T    # (352, 256)
        wf1p[oh2 * N2P: oh2 * N2P + C2 * OW2, :] = blk
    bf1r = bf1.reshape(1, N_FC1)

    # fc2 padded to 128 output lanes (zeros beyond the 3 actions).
    wf2p = np.zeros((N_FC1, NLOG), np.float32)
    wf2p[:, :N_ACT] = wf2.T
    bf2r = np.zeros((1, NLOG), np.float32)
    bf2r[0, :N_ACT] = bf2

    return dict(
        a1=jnp.asarray(a1, jnp.bfloat16), b1=jnp.asarray(b1r),
        a2=jnp.asarray(a2, jnp.bfloat16), b2=jnp.asarray(b2r),
        wf1=jnp.asarray(wf1p, jnp.bfloat16), bf1=jnp.asarray(bf1r),
        wf2=jnp.asarray(wf2p, jnp.bfloat16), bf2=jnp.asarray(bf2r),
    )


# -------------------------------- wrapper ------------------------------------

def _full_block(shape):
    n = len(shape)
    return pl.BlockSpec(tuple(shape), lambda i, _n=n: (0,) * _n)


@jax.jit
def policy_forward(prep, obs_batch, action_batch, action_prob_batch,
                   advantage_batch):
    bsz = obs_batch.shape[0]

    # Cheap host/XLA-side prep: bf16 cast, zero-pad H->96 / W->128, and split H
    # into its 8 stride phases so every in-kernel row window is contiguous.
    x = obs_batch.astype(jnp.bfloat16)
    x = jnp.pad(x, ((0, 0), (0, 0), (0, HPAD - H_IN), (0, WPAD - W_IN)))
    x = x.reshape(bsz, C_IN, HPAD // 8, 8, WPAD).transpose(0, 1, 3, 2, 4)

    act = action_batch.reshape(bsz, 1).astype(jnp.int32)
    prob = action_prob_batch.reshape(bsz, 1).astype(jnp.float32)
    adv = advantage_batch.reshape(bsz, 1).astype(jnp.float32)

    operands = (x,
                prep["a1"], prep["b1"], prep["a2"], prep["b2"],
                prep["wf1"], prep["bf1"], prep["wf2"], prep["bf2"],
                act, prob, adv)

    out = pl.pallas_call(
        functools.partial(_policy_kernel, batch=bsz),
        out_shape=jax.ShapeDtypeStruct((1, 1), jnp.float32),
        grid=(1,),
        in_specs=[_full_block(a.shape) for a in operands],
        out_specs=pl.BlockSpec((1, 1), lambda i: (0, 0)),
        scratch_shapes=[
            pltpu.VMEM((bsz * 32, KC1), jnp.bfloat16),   # conv1 slab
            pltpu.VMEM((bsz * 32, N1), jnp.bfloat16),    # conv1 output (relu)
            pltpu.VMEM((bsz * 16, KC2), jnp.bfloat16),   # conv2 slab
            pltpu.VMEM((bsz * 16, N2P), jnp.bfloat16),   # conv2 output (relu)
            pltpu.VMEM((bsz, KF1), jnp.bfloat16),        # flattened fc1 input
        ],
        compiler_params=pltpu.CompilerParams(
            dimension_semantics=("arbitrary",),
            vmem_limit_bytes=24 * 1024 * 1024),
    )(*operands)
    return out[0, 0]


# --------------------------------- main ---------------------------------------

if __name__ == "__main__":
    key = jax.random.PRNGKey(0)
    kp, ko, ka, kpr, kad = jax.random.split(key, 5)

    params = init_params(kp)
    prep = prepare_policy_params(params)     # one-time weight re-layout

    B = 2
    obs_batch = jax.random.normal(ko, (B, C_IN, H_IN, W_IN), jnp.float32)
    action_batch = jax.random.randint(ka, (B,), 0, N_ACT)
    action_prob_batch = jax.random.uniform(kpr, (B,), jnp.float32, 0.1, 0.9)
    advantage_batch = jax.random.normal(kad, (B,), jnp.float32)

    loss = policy_forward(prep, obs_batch, action_batch, action_prob_batch,
                          advantage_batch)
    jax.block_until_ready(loss)
    print("KERNEL_OK")
</pallas_src>

<mosaic_0001>
module attributes {stable_mosaic.version = 11 : i64} {
  func.func @_policy_kernel(%arg0: i32, %arg1: memref<2x2x8x12x128xbf16, #tpu.memory_space<vmem>>, %arg2: memref<2048x384xbf16, #tpu.memory_space<vmem>>, %arg3: memref<1x384xf32, #tpu.memory_space<vmem>>, %arg4: memref<1536x384xbf16, #tpu.memory_space<vmem>>, %arg5: memref<1x384xf32, #tpu.memory_space<vmem>>, %arg6: memref<3840x256xbf16, #tpu.memory_space<vmem>>, %arg7: memref<1x256xf32, #tpu.memory_space<vmem>>, %arg8: memref<256x128xbf16, #tpu.memory_space<vmem>>, %arg9: memref<1x128xf32, #tpu.memory_space<vmem>>, %arg10: memref<2x1xi32, #tpu.memory_space<vmem>>, %arg11: memref<2x1xf32, #tpu.memory_space<vmem>>, %arg12: memref<2x1xf32, #tpu.memory_space<vmem>>, %arg13: memref<1x1xf32, #tpu.memory_space<vmem>>, %arg14: memref<64x2048xbf16, #tpu.memory_space<vmem>>, %arg15: memref<64x384xbf16, #tpu.memory_space<vmem>>, %arg16: memref<32x1536xbf16, #tpu.memory_space<vmem>>, %arg17: memref<32x384xbf16, #tpu.memory_space<vmem>>, %arg18: memref<2x3840xbf16, #tpu.memory_space<vmem>>) attributes {dimension_semantics = [#tpu.dimension_semantics<arbitrary>], iteration_bounds = array<i64: 1>, scalar_prefetch = 0 : i64, scratch_operands = 5 : i64, tpu.core_type = #tpu.core_type<tc>, window_params = [{pipeline_mode = #tpu.pipeline_mode<synchronous>, transform_indices = @transform_0, window_bounds = array<i64: 2, 2, 8, 12, 128>}, {pipeline_mode = #tpu.pipeline_mode<synchronous>, transform_indices = @transform_1, window_bounds = array<i64: 2048, 384>}, {pipeline_mode = #tpu.pipeline_mode<synchronous>, transform_indices = @transform_2, window_bounds = array<i64: 1, 384>}, {pipeline_mode = #tpu.pipeline_mode<synchronous>, transform_indices = @transform_3, window_bounds = array<i64: 1536, 384>}, {pipeline_mode = #tpu.pipeline_mode<synchronous>, transform_indices = @transform_4, window_bounds = array<i64: 1, 384>}, {pipeline_mode = #tpu.pipeline_mode<synchronous>, transform_indices = @transform_5, window_bounds = array<i64: 3840, 256>}, {pipeline_mode = #tpu.pipeline_mode<synchronous>, transform_indices = @transform_6, window_bounds = array<i64: 1, 256>}, {pipeline_mode = #tpu.pipeline_mode<synchronous>, transform_indices = @transform_7, window_bounds = array<i64: 256, 128>}, {pipeline_mode = #tpu.pipeline_mode<synchronous>, transform_indices = @transform_8, window_bounds = array<i64: 1, 128>}, {pipeline_mode = #tpu.pipeline_mode<synchronous>, transform_indices = @transform_9, window_bounds = array<i64: 2, 1>}, {pipeline_mode = #tpu.pipeline_mode<synchronous>, transform_indices = @transform_10, window_bounds = array<i64: 2, 1>}, {pipeline_mode = #tpu.pipeline_mode<synchronous>, transform_indices = @transform_11, window_bounds = array<i64: 2, 1>}, {pipeline_mode = #tpu.pipeline_mode<synchronous>, transform_indices = @transform_12, window_bounds = array<i64: 1, 1>}]} {
    %cst = arith.constant 0.000000e+00 : bf16
    %0 = vector.broadcast %cst : bf16 to vector<64x2048xbf16>
    %c0 = arith.constant 0 : index
    %c0_0 = arith.constant 0 : index
    %1 = vector.load %arg14[%c0, %c0_0] : memref<64x2048xbf16, #tpu.memory_space<vmem>>, vector<64x2048xbf16>
    tpu.vector_store %arg14[%c0, %c0_0], %0 {strides = array<i32>} : memref<64x2048xbf16, #tpu.memory_space<vmem>>, vector<64x2048xbf16>,
    %c0_1 = arith.constant 0 : index
    %c0_2 = arith.constant 0 : index
    %c0_3 = arith.constant 0 : index
    %c0_4 = arith.constant 0 : index
    %c0_5 = arith.constant 0 : index
    %2 = vector.load %arg1[%c0_1, %c0_2, %c0_3, %c0_4, %c0_5] : memref<2x2x8x12x128xbf16, #tpu.memory_space<vmem>>, vector<1x1x1x11x128xbf16>
    %3 = vector.shape_cast %2 : vector<1x1x1x11x128xbf16> to vector<11x128xbf16>
    %c0_6 = arith.constant 0 : index
    %c0_7 = arith.constant 0 : index
    %4 = vector.load %arg14[%c0_6, %c0_7] : memref<64x2048xbf16, #tpu.memory_space<vmem>>, vector<11x128xbf16>
    tpu.vector_store %arg14[%c0_6, %c0_7], %3 {strides = array<i32>} : memref<64x2048xbf16, #tpu.memory_space<vmem>>, vector<11x128xbf16>,
    %c0_8 = arith.constant 0 : index
    %c0_9 = arith.constant 0 : index
    %c4 = arith.constant 4 : index
    %c0_10 = arith.constant 0 : index
    %c0_11 = arith.constant 0 : index
    %5 = vector.load %arg1[%c0_8, %c0_9, %c4, %c0_10, %c0_11] : memref<2x2x8x12x128xbf16, #tpu.memory_space<vmem>>, vector<1x1x1x11x128xbf16>
    %6 = vector.shape_cast %5 : vector<1x1x1x11x128xbf16> to vector<11x128xbf16>
    %c16 = arith.constant 16 : index
    %c0_12 = arith.constant 0 : index
    %7 = vector.load %arg14[%c16, %c0_12] : memref<64x2048xbf16, #tpu.memory_space<vmem>>, vector<11x128xbf16>
    tpu.vector_store %arg14[%c16, %c0_12], %6 {strides = array<i32>} : memref<64x2048xbf16, #tpu.memory_space<vmem>>, vector<11x128xbf16>,
    %c0_13 = arith.constant 0 : index
    %c1 = arith.constant 1 : index
    %c0_14 = arith.constant 0 : index
    %c0_15 = arith.constant 0 : index
    %c0_16 = arith.constant 0 : index
    %8 = vector.load %arg1[%c0_13, %c1, %c0_14, %c0_15, %c0_16] : memref<2x2x8x12x128xbf16, #tpu.memory_space<vmem>>, vector<1x1x1x11x128xbf16>
    %9 = vector.shape_cast %8 : vector<1x1x1x11x128xbf16> to vector<11x128xbf16>
    %c0_17 = arith.constant 0 : index
    %c128 = arith.constant 128 : index
    %10 = vector.load %arg14[%c0_17, %c128] : memref<64x2048xbf16, #tpu.memory_space<vmem>>, vector<11x128xbf16>
    tpu.vector_store %arg14[%c0_17, %c128], %9 {strides = array<i32>} : memref<64x2048xbf16, #tpu.memory_space<vmem>>, vector<11x128xbf16>,
    %c0_18 = arith.constant 0 : index
    %c1_19 = arith.constant 1 : index
    %c4_20 = arith.constant 4 : index
    %c0_21 = arith.constant 0 : index
    %c0_22 = arith.constant 0 : index
    %11 = vector.load %arg1[%c0_18, %c1_19, %c4_20, %c0_21, %c0_22] : memref<2x2x8x12x128xbf16, #tpu.memory_space<vmem>>, vector<1x1x1x11x128xbf16>
    %12 = vector.shape_cast %11 : vector<1x1x1x11x128xbf16> to vector<11x128xbf16>
    %c16_23 = arith.constant 16 : index
    %c128_24 = arith.constant 128 : index
    %13 = vector.load %arg14[%c16_23, %c128_24] : memref<64x2048xbf16, #tpu.memory_space<vmem>>, vector<11x128xbf16>
    tpu.vector_store %arg14[%c16_23, %c128_24], %12 {strides = array<i32>} : memref<64x2048xbf16, #tpu.memory_space<vmem>>, vector<11x128xbf16>,
    %c0_25 = arith.constant 0 : index
    %c0_26 = arith.constant 0 : index
    %c1_27 = arith.constant 1 : index
    %c0_28 = arith.constant 0 : index
    %c0_29 = arith.constant 0 : index
    %14 = vector.load %arg1[%c0_25, %c0_26, %c1_27, %c0_28, %c0_29] : memref<2x2x8x12x128xbf16, #tpu.memory_space<vmem>>, vector<1x1x1x11x128xbf16>
    %15 = vector.shape_cast %14 : vector<1x1x1x11x128xbf16> to vector<11x128xbf16>
    %c0_30 = arith.constant 0 : index
    %c256 = arith.constant 256 : index
    %16 = vector.load %arg14[%c0_30, %c256] : memref<64x2048xbf16, #tpu.memory_space<vmem>>, vector<11x128xbf16>
    tpu.vector_store %arg14[%c0_30, %c256], %15 {strides = array<i32>} : memref<64x2048xbf16, #tpu.memory_space<vmem>>, vector<11x128xbf16>,
    %c0_31 = arith.constant 0 : index
    %c0_32 = arith.constant 0 : index
    %c5 = arith.constant 5 : index
    %c0_33 = arith.constant 0 : index
    %c0_34 = arith.constant 0 : index
    %17 = vector.load %arg1[%c0_31, %c0_32, %c5, %c0_33, %c0_34] : memref<2x2x8x12x128xbf16, #tpu.memory_space<vmem>>, vector<1x1x1x11x128xbf16>
    %18 = vector.shape_cast %17 : vector<1x1x1x11x128xbf16> to vector<11x128xbf16>
    %c16_35 = arith.constant 16 : index
    %c256_36 = arith.constant 256 : index
    %19 = vector.load %arg14[%c16_35, %c256_36] : memref<64x2048xbf16, #tpu.memory_space<vmem>>, vector<11x128xbf16>
    tpu.vector_store %arg14[%c16_35, %c256_36], %18 {strides = array<i32>} : memref<64x2048xbf16, #tpu.memory_space<vmem>>, vector<11x128xbf16>,
    %c0_37 = arith.constant 0 : index
    %c1_38 = arith.constant 1 : index
    %c1_39 = arith.constant 1 : index
    %c0_40 = arith.constant 0 : index
    %c0_41 = arith.constant 0 : index
    %20 = vector.load %arg1[%c0_37, %c1_38, %c1_39, %c0_40, %c0_41] : memref<2x2x8x12x128xbf16, #tpu.memory_space<vmem>>, vector<1x1x1x11x128xbf16>
    %21 = vector.shape_cast %20 : vector<1x1x1x11x128xbf16> to vector<11x128xbf16>
    %c0_42 = arith.constant 0 : index
    %c384 = arith.constant 384 : index
    %22 = vector.load %arg14[%c0_42, %c384] : memref<64x2048xbf16, #tpu.memory_space<vmem>>, vector<11x128xbf16>
    tpu.vector_store %arg14[%c0_42, %c384], %21 {strides = array<i32>} : memref<64x2048xbf16, #tpu.memory_space<vmem>>, vector<11x128xbf16>,
    %c0_43 = arith.constant 0 : index
    %c1_44 = arith.constant 1 : index
    %c5_45 = arith.constant 5 : index
    %c0_46 = arith.constant 0 : index
    %c0_47 = arith.constant 0 : index
    %23 = vector.load %arg1[%c0_43, %c1_44, %c5_45, %c0_46, %c0_47] : memref<2x2x8x12x128xbf16, #tpu.memory_space<vmem>>, vector<1x1x1x11x128xbf16>
    %24 = vector.shape_cast %23 : vector<1x1x1x11x128xbf16> to vector<11x128xbf16>
    %c16_48 = arith.constant 16 : index
    %c384_49 = arith.constant 384 : index
    %25 = vector.load %arg14[%c16_48, %c384_49] : memref<64x2048xbf16, #tpu.memory_space<vmem>>, vector<11x128xbf16>
    tpu.vector_store %arg14[%c16_48, %c384_49], %24 {strides = array<i32>} : memref<64x2048xbf16, #tpu.memory_space<vmem>>, vector<11x128xbf16>,
    %c0_50 = arith.constant 0 : index
    %c0_51 = arith.constant 0 : index
    %c2 = arith.constant 2 : index
    %c0_52 = arith.constant 0 : index
    %c0_53 = arith.constant 0 : index
    %26 = vector.load %arg1[%c0_50, %c0_51, %c2, %c0_52, %c0_53] : memref<2x2x8x12x128xbf16, #tpu.memory_space<vmem>>, vector<1x1x1x11x128xbf16>
    %27 = vector.shape_cast %26 : vector<1x1x1x11x128xbf16> to vector<11x128xbf16>
    %c0_54 = arith.constant 0 : index
    %c512 = arith.constant 512 : index
    %28 = vector.load %arg14[%c0_54, %c512] : memref<64x2048xbf16, #tpu.memory_space<vmem>>, vector<11x128xbf16>
    tpu.vector_store %arg14[%c0_54, %c512], %27 {strides = array<i32>} : memref<64x2048xbf16, #tpu.memory_space<vmem>>, vector<11x128xbf16>,
    %c0_55 = arith.constant 0 : index
    %c0_56 = arith.constant 0 : index
    %c6 = arith.constant 6 : index
    %c0_57 = arith.constant 0 : index
    %c0_58 = arith.constant 0 : index
    %29 = vector.load %arg1[%c0_55, %c0_56, %c6, %c0_57, %c0_58] : memref<2x2x8x12x128xbf16, #tpu.memory_space<vmem>>, vector<1x1x1x11x128xbf16>
    %30 = vector.shape_cast %29 : vector<1x1x1x11x128xbf16> to vector<11x128xbf16>
    %c16_59 = arith.constant 16 : index
    %c512_60 = arith.constant 512 : index
    %31 = vector.load %arg14[%c16_59, %c512_60] : memref<64x2048xbf16, #tpu.memory_space<vmem>>, vector<11x128xbf16>
    tpu.vector_store %arg14[%c16_59, %c512_60], %30 {strides = array<i32>} : memref<64x2048xbf16, #tpu.memory_space<vmem>>, vector<11x128xbf16>,
    %c0_61 = arith.constant 0 : index
    %c1_62 = arith.constant 1 : index
    %c2_63 = arith.constant 2 : index
    %c0_64 = arith.constant 0 : index
    %c0_65 = arith.constant 0 : index
    %32 = vector.load %arg1[%c0_61, %c1_62, %c2_63, %c0_64, %c0_65] : memref<2x2x8x12x128xbf16, #tpu.memory_space<vmem>>, vector<1x1x1x11x128xbf16>
    %33 = vector.shape_cast %32 : vector<1x1x1x11x128xbf16> to vector<11x128xbf16>
    %c0_66 = arith.constant 0 : index
    %c640 = arith.constant 640 : index
    %34 = vector.load %arg14[%c0_66, %c640] : memref<64x2048xbf16, #tpu.memory_space<vmem>>, vector<11x128xbf16>
    tpu.vector_store %arg14[%c0_66, %c640], %33 {strides = array<i32>} : memref<64x2048xbf16, #tpu.memory_space<vmem>>, vector<11x128xbf16>,
    %c0_67 = arith.constant 0 : index
    %c1_68 = arith.constant 1 : index
    %c6_69 = arith.constant 6 : index
    %c0_70 = arith.constant 0 : index
    %c0_71 = arith.constant 0 : index
    %35 = vector.load %arg1[%c0_67, %c1_68, %c6_69, %c0_70, %c0_71] : memref<2x2x8x12x128xbf16, #tpu.memory_space<vmem>>, vector<1x1x1x11x128xbf16>
    %36 = vector.shape_cast %35 : vector<1x1x1x11x128xbf16> to vector<11x128xbf16>
    %c16_72 = arith.constant 16 : index
    %c640_73 = arith.constant 640 : index
    %37 = vector.load %arg14[%c16_72, %c640_73] : memref<64x2048xbf16, #tpu.memory_space<vmem>>, vector<11x128xbf16>
    tpu.vector_store %arg14[%c16_72, %c640_73], %36 {strides = array<i32>} : memref<64x2048xbf16, #tpu.memory_space<vmem>>, vector<11x128xbf16>,
    %c0_74 = arith.constant 0 : index
    %c0_75 = arith.constant 0 : index
    %c3 = arith.constant 3 : index
    %c0_76 = arith.constant 0 : index
    %c0_77 = arith.constant 0 : index
    %38 = vector.load %arg1[%c0_74, %c0_75, %c3, %c0_76, %c0_77] : memref<2x2x8x12x128xbf16, #tpu.memory_space<vmem>>, vector<1x1x1x11x128xbf16>
    %39 = vector.shape_cast %38 : vector<1x1x1x11x128xbf16> to vector<11x128xbf16>
    %c0_78 = arith.constant 0 : index
    %c768 = arith.constant 768 : index
    %40 = vector.load %arg14[%c0_78, %c768] : memref<64x2048xbf16, #tpu.memory_space<vmem>>, vector<11x128xbf16>
    tpu.vector_store %arg14[%c0_78, %c768], %39 {strides = array<i32>} : memref<64x2048xbf16, #tpu.memory_space<vmem>>, vector<11x128xbf16>,
    %c0_79 = arith.constant 0 : index
    %c0_80 = arith.constant 0 : index
    %c7 = arith.constant 7 : index
    %c0_81 = arith.constant 0 : index
    %c0_82 = arith.constant 0 : index
    %41 = vector.load %arg1[%c0_79, %c0_80, %c7, %c0_81, %c0_82] : memref<2x2x8x12x128xbf16, #tpu.memory_space<vmem>>, vector<1x1x1x11x128xbf16>
    %42 = vector.shape_cast %41 : vector<1x1x1x11x128xbf16> to vector<11x128xbf16>
    %c16_83 = arith.constant 16 : index
    %c768_84 = arith.constant 768 : index
    %43 = vector.load %arg14[%c16_83, %c768_84] : memref<64x2048xbf16, #tpu.memory_space<vmem>>, vector<11x128xbf16>
    tpu.vector_store %arg14[%c16_83, %c768_84], %42 {strides = array<i32>} : memref<64x2048xbf16, #tpu.memory_space<vmem>>, vector<11x128xbf16>,
    %c0_85 = arith.constant 0 : index
    %c1_86 = arith.constant 1 : index
    %c3_87 = arith.constant 3 : index
    %c0_88 = arith.constant 0 : index
    %c0_89 = arith.constant 0 : index
    %44 = vector.load %arg1[%c0_85, %c1_86, %c3_87, %c0_88, %c0_89] : memref<2x2x8x12x128xbf16, #tpu.memory_space<vmem>>, vector<1x1x1x11x128xbf16>
    %45 = vector.shape_cast %44 : vector<1x1x1x11x128xbf16> to vector<11x128xbf16>
    %c0_90 = arith.constant 0 : index
    %c896 = arith.constant 896 : index
    %46 = vector.load %arg14[%c0_90, %c896] : memref<64x2048xbf16, #tpu.memory_space<vmem>>, vector<11x128xbf16>
    tpu.vector_store %arg14[%c0_90, %c896], %45 {strides = array<i32>} : memref<64x2048xbf16, #tpu.memory_space<vmem>>, vector<11x128xbf16>,
    %c0_91 = arith.constant 0 : index
    %c1_92 = arith.constant 1 : index
    %c7_93 = arith.constant 7 : index
    %c0_94 = arith.constant 0 : index
    %c0_95 = arith.constant 0 : index
    %47 = vector.load %arg1[%c0_91, %c1_92, %c7_93, %c0_94, %c0_95] : memref<2x2x8x12x128xbf16, #tpu.memory_space<vmem>>, vector<1x1x1x11x128xbf16>
    %48 = vector.shape_cast %47 : vector<1x1x1x11x128xbf16> to vector<11x128xbf16>
    %c16_96 = arith.constant 16 : index
    %c896_97 = arith.constant 896 : index
    %49 = vector.load %arg14[%c16_96, %c896_97] : memref<64x2048xbf16, #tpu.memory_space<vmem>>, vector<11x128xbf16>
    tpu.vector_store %arg14[%c16_96, %c896_97], %48 {strides = array<i32>} : memref<64x2048xbf16, #tpu.memory_space<vmem>>, vector<11x128xbf16>,
    %c0_98 = arith.constant 0 : index
    %c0_99 = arith.constant 0 : index
    %c4_100 = arith.constant 4 : index
    %c0_101 = arith.constant 0 : index
    %c0_102 = arith.constant 0 : index
    %50 = vector.load %arg1[%c0_98, %c0_99, %c4_100, %c0_101, %c0_102] : memref<2x2x8x12x128xbf16, #tpu.memory_space<vmem>>, vector<1x1x1x11x128xbf16>
    %51 = vector.shape_cast %50 : vector<1x1x1x11x128xbf16> to vector<11x128xbf16>
    %c0_103 = arith.constant 0 : index
    %c1024 = arith.constant 1024 : index
    %52 = vector.load %arg14[%c0_103, %c1024] : memref<64x2048xbf16, #tpu.memory_space<vmem>>, vector<11x128xbf16>
    tpu.vector_store %arg14[%c0_103, %c1024], %51 {strides = array<i32>} : memref<64x2048xbf16, #tpu.memory_space<vmem>>, vector<11x128xbf16>,
    %c0_104 = arith.constant 0 : index
    %c0_105 = arith.constant 0 : index
    %c0_106 = arith.constant 0 : index
    %c1_107 = arith.constant 1 : index
    %c0_108 = arith.constant 0 : index
    %53 = vector.load %arg1[%c0_104, %c0_105, %c0_106, %c1_107, %c0_108] : memref<2x2x8x12x128xbf16, #tpu.memory_space<vmem>>, vector<1x1x1x11x128xbf16>
    %54 = vector.shape_cast %53 : vector<1x1x1x11x128xbf16> to vector<11x128xbf16>
    %c16_109 = arith.constant 16 : index
    %c1024_110 = arith.constant 1024 : index
    %55 = vector.load %arg14[%c16_109, %c1024_110] : memref<64x2048xbf16, #tpu.memory_space<vmem>>, vector<11x128xbf16>
    tpu.vector_store %arg14[%c16_109, %c1024_110], %54 {strides = array<i32>} : memref<64x2048xbf16, #tpu.memory_space<vmem>>, vector<11x128xbf16>,
    %c0_111 = arith.constant 0 : index
    %c1_112 = arith.constant 1 : index
    %c4_113 = arith.constant 4 : index
    %c0_114 = arith.constant 0 : index
    %c0_115 = arith.constant 0 : index
    %56 = vector.load %arg1[%c0_111, %c1_112, %c4_113, %c0_114, %c0_115] : memref<2x2x8x12x128xbf16, #tpu.memory_space<vmem>>, vector<1x1x1x11x128xbf16>
    %57 = vector.shape_cast %56 : vector<1x1x1x11x128xbf16> to vector<11x128xbf16>
    %c0_116 = arith.constant 0 : index
    %c1152 = arith.constant 1152 : index
    %58 = vector.load %arg14[%c0_116, %c1152] : memref<64x2048xbf16, #tpu.memory_space<vmem>>, vector<11x128xbf16>
    tpu.vector_store %arg14[%c0_116, %c1152], %57 {strides = array<i32>} : memref<64x2048xbf16, #tpu.memory_space<vmem>>, vector<11x128xbf16>,
    %c0_117 = arith.constant 0 : index
    %c1_118 = arith.constant 1 : index
    %c0_119 = arith.constant 0 : index
    %c1_120 = arith.constant 1 : index
    %c0_121 = arith.constant 0 : index
    %59 = vector.load %arg1[%c0_117, %c1_118, %c0_119, %c1_120, %c0_121] : memref<2x2x8x12x128xbf16, #tpu.memory_space<vmem>>, vector<1x1x1x11x128xbf16>
    %60 = vector.shape_cast %59 : vector<1x1x1x11x128xbf16> to vector<11x128xbf16>
    %c16_122 = arith.constant 16 : index
    %c1152_123 = arith.constant 1152 : index
    %61 = vector.load %arg14[%c16_122, %c1152_123] : memref<64x2048xbf16, #tpu.memory_space<vmem>>, vector<11x128xbf16>
    tpu.vector_store %arg14[%c16_122, %c1152_123], %60 {strides = array<i32>} : memref<64x2048xbf16, #tpu.memory_space<vmem>>, vector<11x128xbf16>,
    %c0_124 = arith.constant 0 : index
    %c0_125 = arith.constant 0 : index
    %c5_126 = arith.constant 5 : index
    %c0_127 = arith.constant 0 : index
    %c0_128 = arith.constant 0 : index
    %62 = vector.load %arg1[%c0_124, %c0_125, %c5_126, %c0_127, %c0_128] : memref<2x2x8x12x128xbf16, #tpu.memory_space<vmem>>, vector<1x1x1x11x128xbf16>
    %63 = vector.shape_cast %62 : vector<1x1x1x11x128xbf16> to vector<11x128xbf16>
    %c0_129 = arith.constant 0 : index
    %c1280 = arith.constant 1280 : index
    %64 = vector.load %arg14[%c0_129, %c1280] : memref<64x2048xbf16, #tpu.memory_space<vmem>>, vector<11x128xbf16>
    tpu.vector_store %arg14[%c0_129, %c1280], %63 {strides = array<i32>} : memref<64x2048xbf16, #tpu.memory_space<vmem>>, vector<11x128xbf16>,
    %c0_130 = arith.constant 0 : index
    %c0_131 = arith.constant 0 : index
    %c1_132 = arith.constant 1 : index
    %c1_133 = arith.constant 1 : index
    %c0_134 = arith.constant 0 : index
    %65 = vector.load %arg1[%c0_130, %c0_131, %c1_132, %c1_133, %c0_134] : memref<2x2x8x12x128xbf16, #tpu.memory_space<vmem>>, vector<1x1x1x11x128xbf16>
    %66 = vector.shape_cast %65 : vector<1x1x1x11x128xbf16> to vector<11x128xbf16>
    %c16_135 = arith.constant 16 : index
    %c1280_136 = arith.constant 1280 : index
    %67 = vector.load %arg14[%c16_135, %c1280_136] : memref<64x2048xbf16, #tpu.memory_space<vmem>>, vector<11x128xbf16>
    tpu.vector_store %arg14[%c16_135, %c1280_136], %66 {strides = array<i32>} : memref<64x2048xbf16, #tpu.memory_space<vmem>>, vector<11x128xbf16>,
    %c0_137 = arith.constant 0 : index
    %c1_138 = arith.constant 1 : index
    %c5_139 = arith.constant 5 : index
    %c0_140 = arith.constant 0 : index
    %c0_141 = arith.constant 0 : index
    %68 = vector.load %arg1[%c0_137, %c1_138, %c5_139, %c0_140, %c0_141] : memref<2x2x8x12x128xbf16, #tpu.memory_space<vmem>>, vector<1x1x1x11x128xbf16>
    %69 = vector.shape_cast %68 : vector<1x1x1x11x128xbf16> to vector<11x128xbf16>
    %c0_142 = arith.constant 0 : index
    %c1408 = arith.constant 1408 : index
    %70 = vector.load %arg14[%c0_142, %c1408] : memref<64x2048xbf16, #tpu.memory_space<vmem>>, vector<11x128xbf16>
    tpu.vector_store %arg14[%c0_142, %c1408], %69 {strides = array<i32>} : memref<64x2048xbf16, #tpu.memory_space<vmem>>, vector<11x128xbf16>,
    %c0_143 = arith.constant 0 : index
    %c1_144 = arith.constant 1 : index
    %c1_145 = arith.constant 1 : index
    %c1_146 = arith.constant 1 : index
    %c0_147 = arith.constant 0 : index
    %71 = vector.load %arg1[%c0_143, %c1_144, %c1_145, %c1_146, %c0_147] : memref<2x2x8x12x128xbf16, #tpu.memory_space<vmem>>, vector<1x1x1x11x128xbf16>
    %72 = vector.shape_cast %71 : vector<1x1x1x11x128xbf16> to vector<11x128xbf16>
    %c16_148 = arith.constant 16 : index
    %c1408_149 = arith.constant 1408 : index
    %73 = vector.load %arg14[%c16_148, %c1408_149] : memref<64x2048xbf16, #tpu.memory_space<vmem>>, vector<11x128xbf16>
    tpu.vector_store %arg14[%c16_148, %c1408_149], %72 {strides = array<i32>} : memref<64x2048xbf16, #tpu.memory_space<vmem>>, vector<11x128xbf16>,
    %c0_150 = arith.constant 0 : index
    %c0_151 = arith.constant 0 : index
    %c6_152 = arith.constant 6 : index
    %c0_153 = arith.constant 0 : index
    %c0_154 = arith.constant 0 : index
    %74 = vector.load %arg1[%c0_150, %c0_151, %c6_152, %c0_153, %c0_154] : memref<2x2x8x12x128xbf16, #tpu.memory_space<vmem>>, vector<1x1x1x11x128xbf16>
    %75 = vector.shape_cast %74 : vector<1x1x1x11x128xbf16> to vector<11x128xbf16>
    %c0_155 = arith.constant 0 : index
    %c1536 = arith.constant 1536 : index
    %76 = vector.load %arg14[%c0_155, %c1536] : memref<64x2048xbf16, #tpu.memory_space<vmem>>, vector<11x128xbf16>
    tpu.vector_store %arg14[%c0_155, %c1536], %75 {strides = array<i32>} : memref<64x2048xbf16, #tpu.memory_space<vmem>>, vector<11x128xbf16>,
    %c0_156 = arith.constant 0 : index
    %c0_157 = arith.constant 0 : index
    %c2_158 = arith.constant 2 : index
    %c1_159 = arith.constant 1 : index
    %c0_160 = arith.constant 0 : index
    %77 = vector.load %arg1[%c0_156, %c0_157, %c2_158, %c1_159, %c0_160] : memref<2x2x8x12x128xbf16, #tpu.memory_space<vmem>>, vector<1x1x1x11x128xbf16>
    %78 = vector.shape_cast %77 : vector<1x1x1x11x128xbf16> to vector<11x128xbf16>
    %c16_161 = arith.constant 16 : index
    %c1536_162 = arith.constant 1536 : index
    %79 = vector.load %arg14[%c16_161, %c1536_162] : memref<64x2048xbf16, #tpu.memory_space<vmem>>, vector<11x128xbf16>
    tpu.vector_store %arg14[%c16_161, %c1536_162], %78 {strides = array<i32>} : memref<64x2048xbf16, #tpu.memory_space<vmem>>, vector<11x128xbf16>,
    %c0_163 = arith.constant 0 : index
    %c1_164 = arith.constant 1 : index
    %c6_165 = arith.constant 6 : index
    %c0_166 = arith.constant 0 : index
    %c0_167 = arith.constant 0 : index
    %80 = vector.load %arg1[%c0_163, %c1_164, %c6_165, %c0_166, %c0_167] : memref<2x2x8x12x128xbf16, #tpu.memory_space<vmem>>, vector<1x1x1x11x128xbf16>
    %81 = vector.shape_cast %80 : vector<1x1x1x11x128xbf16> to vector<11x128xbf16>
    %c0_168 = arith.constant 0 : index
    %c1664 = arith.constant 1664 : index
    %82 = vector.load %arg14[%c0_168, %c1664] : memref<64x2048xbf16, #tpu.memory_space<vmem>>, vector<11x128xbf16>
    tpu.vector_store %arg14[%c0_168, %c1664], %81 {strides = array<i32>} : memref<64x2048xbf16, #tpu.memory_space<vmem>>, vector<11x128xbf16>,
    %c0_169 = arith.constant 0 : index
    %c1_170 = arith.constant 1 : index
    %c2_171 = arith.constant 2 : index
    %c1_172 = arith.constant 1 : index
    %c0_173 = arith.constant 0 : index
    %83 = vector.load %arg1[%c0_169, %c1_170, %c2_171, %c1_172, %c0_173] : memref<2x2x8x12x128xbf16, #tpu.memory_space<vmem>>, vector<1x1x1x11x128xbf16>
    %84 = vector.shape_cast %83 : vector<1x1x1x11x128xbf16> to vector<11x128xbf16>
    %c16_174 = arith.constant 16 : index
    %c1664_175 = arith.constant 1664 : index
    %85 = vector.load %arg14[%c16_174, %c1664_175] : memref<64x2048xbf16, #tpu.memory_space<vmem>>, vector<11x128xbf16>
    tpu.vector_store %arg14[%c16_174, %c1664_175], %84 {strides = array<i32>} : memref<64x2048xbf16, #tpu.memory_space<vmem>>, vector<11x128xbf16>,
    %c0_176 = arith.constant 0 : index
    %c0_177 = arith.constant 0 : index
    %c7_178 = arith.constant 7 : index
    %c0_179 = arith.constant 0 : index
    %c0_180 = arith.constant 0 : index
    %86 = vector.load %arg1[%c0_176, %c0_177, %c7_178, %c0_179, %c0_180] : memref<2x2x8x12x128xbf16, #tpu.memory_space<vmem>>, vector<1x1x1x11x128xbf16>
    %87 = vector.shape_cast %86 : vector<1x1x1x11x128xbf16> to vector<11x128xbf16>
    %c0_181 = arith.constant 0 : index
    %c1792 = arith.constant 1792 : index
    %88 = vector.load %arg14[%c0_181, %c1792] : memref<64x2048xbf16, #tpu.memory_space<vmem>>, vector<11x128xbf16>
    tpu.vector_store %arg14[%c0_181, %c1792], %87 {strides = array<i32>} : memref<64x2048xbf16, #tpu.memory_space<vmem>>, vector<11x128xbf16>,
    %c0_182 = arith.constant 0 : index
    %c0_183 = arith.constant 0 : index
    %c3_184 = arith.constant 3 : index
    %c1_185 = arith.constant 1 : index
    %c0_186 = arith.constant 0 : index
    %89 = vector.load %arg1[%c0_182, %c0_183, %c3_184, %c1_185, %c0_186] : memref<2x2x8x12x128xbf16, #tpu.memory_space<vmem>>, vector<1x1x1x11x128xbf16>
    %90 = vector.shape_cast %89 : vector<1x1x1x11x128xbf16> to vector<11x128xbf16>
    %c16_187 = arith.constant 16 : index
    %c1792_188 = arith.constant 1792 : index
    %91 = vector.load %arg14[%c16_187, %c1792_188] : memref<64x2048xbf16, #tpu.memory_space<vmem>>, vector<11x128xbf16>
    tpu.vector_store %arg14[%c16_187, %c1792_188], %90 {strides = array<i32>} : memref<64x2048xbf16, #tpu.memory_space<vmem>>, vector<11x128xbf16>,
    %c0_189 = arith.constant 0 : index
    %c1_190 = arith.constant 1 : index
    %c7_191 = arith.constant 7 : index
    %c0_192 = arith.constant 0 : index
    %c0_193 = arith.constant 0 : index
    %92 = vector.load %arg1[%c0_189, %c1_190, %c7_191, %c0_192, %c0_193] : memref<2x2x8x12x128xbf16, #tpu.memory_space<vmem>>, vector<1x1x1x11x128xbf16>
    %93 = vector.shape_cast %92 : vector<1x1x1x11x128xbf16> to vector<11x128xbf16>
    %c0_194 = arith.constant 0 : index
    %c1920 = arith.constant 1920 : index
    %94 = vector.load %arg14[%c0_194, %c1920] : memref<64x2048xbf16, #tpu.memory_space<vmem>>, vector<11x128xbf16>
    tpu.vector_store %arg14[%c0_194, %c1920], %93 {strides = array<i32>} : memref<64x2048xbf16, #tpu.memory_space<vmem>>, vector<11x128xbf16>,
    %c0_195 = arith.constant 0 : index
    %c1_196 = arith.constant 1 : index
    %c3_197 = arith.constant 3 : index
    %c1_198 = arith.constant 1 : index
    %c0_199 = arith.constant 0 : index
    %95 = vector.load %arg1[%c0_195, %c1_196, %c3_197, %c1_198, %c0_199] : memref<2x2x8x12x128xbf16, #tpu.memory_space<vmem>>, vector<1x1x1x11x128xbf16>
    %96 = vector.shape_cast %95 : vector<1x1x1x11x128xbf16> to vector<11x128xbf16>
    %c16_200 = arith.constant 16 : index
    %c1920_201 = arith.constant 1920 : index
    %97 = vector.load %arg14[%c16_200, %c1920_201] : memref<64x2048xbf16, #tpu.memory_space<vmem>>, vector<11x128xbf16>
    tpu.vector_store %arg14[%c16_200, %c1920_201], %96 {strides = array<i32>} : memref<64x2048xbf16, #tpu.memory_space<vmem>>, vector<11x128xbf16>,
    %c1_202 = arith.constant 1 : index
    %c0_203 = arith.constant 0 : index
    %c0_204 = arith.constant 0 : index
    %c0_205 = arith.constant 0 : index
    %c0_206 = arith.constant 0 : index
    %98 = vector.load %arg1[%c1_202, %c0_203, %c0_204, %c0_205, %c0_206] : memref<2x2x8x12x128xbf16, #tpu.memory_space<vmem>>, vector<1x1x1x11x128xbf16>
    %99 = vector.shape_cast %98 : vector<1x1x1x11x128xbf16> to vector<11x128xbf16>
    %c32 = arith.constant 32 : index
    %c0_207 = arith.constant 0 : index
    %100 = vector.load %arg14[%c32, %c0_207] : memref<64x2048xbf16, #tpu.memory_space<vmem>>, vector<11x128xbf16>
    tpu.vector_store %arg14[%c32, %c0_207], %99 {strides = array<i32>} : memref<64x2048xbf16, #tpu.memory_space<vmem>>, vector<11x128xbf16>,
    %c1_208 = arith.constant 1 : index
    %c0_209 = arith.constant 0 : index
    %c4_210 = arith.constant 4 : index
    %c0_211 = arith.constant 0 : index
    %c0_212 = arith.constant 0 : index
    %101 = vector.load %arg1[%c1_208, %c0_209, %c4_210, %c0_211, %c0_212] : memref<2x2x8x12x128xbf16, #tpu.memory_space<vmem>>, vector<1x1x1x11x128xbf16>
    %102 = vector.shape_cast %101 : vector<1x1x1x11x128xbf16> to vector<11x128xbf16>
    %c48 = arith.constant 48 : index
    %c0_213 = arith.constant 0 : index
    %103 = vector.load %arg14[%c48, %c0_213] : memref<64x2048xbf16, #tpu.memory_space<vmem>>, vector<11x128xbf16>
    tpu.vector_store %arg14[%c48, %c0_213], %102 {strides = array<i32>} : memref<64x2048xbf16, #tpu.memory_space<vmem>>, vector<11x128xbf16>,
    %c1_214 = arith.constant 1 : index
    %c1_215 = arith.constant 1 : index
    %c0_216 = arith.constant 0 : index
    %c0_217 = arith.constant 0 : index
    %c0_218 = arith.constant 0 : index
    %104 = vector.load %arg1[%c1_214, %c1_215, %c0_216, %c0_217, %c0_218] : memref<2x2x8x12x128xbf16, #tpu.memory_space<vmem>>, vector<1x1x1x11x128xbf16>
    %105 = vector.shape_cast %104 : vector<1x1x1x11x128xbf16> to vector<11x128xbf16>
    %c32_219 = arith.constant 32 : index
    %c128_220 = arith.constant 128 : index
    %106 = vector.load %arg14[%c32_219, %c128_220] : memref<64x2048xbf16, #tpu.memory_space<vmem>>, vector<11x128xbf16>
    tpu.vector_store %arg14[%c32_219, %c128_220], %105 {strides = array<i32>} : memref<64x2048xbf16, #tpu.memory_space<vmem>>, vector<11x128xbf16>,
    %c1_221 = arith.constant 1 : index
    %c1_222 = arith.constant 1 : index
    %c4_223 = arith.constant 4 : index
    %c0_224 = arith.constant 0 : index
    %c0_225 = arith.constant 0 : index
    %107 = vector.load %arg1[%c1_221, %c1_222, %c4_223, %c0_224, %c0_225] : memref<2x2x8x12x128xbf16, #tpu.memory_space<vmem>>, vector<1x1x1x11x128xbf16>
    %108 = vector.shape_cast %107 : vector<1x1x1x11x128xbf16> to vector<11x128xbf16>
    %c48_226 = arith.constant 48 : index
    %c128_227 = arith.constant 128 : index
    %109 = vector.load %arg14[%c48_226, %c128_227] : memref<64x2048xbf16, #tpu.memory_space<vmem>>, vector<11x128xbf16>
    tpu.vector_store %arg14[%c48_226, %c128_227], %108 {strides = array<i32>} : memref<64x2048xbf16, #tpu.memory_space<vmem>>, vector<11x128xbf16>,
    %c1_228 = arith.constant 1 : index
    %c0_229 = arith.constant 0 : index
    %c1_230 = arith.constant 1 : index
    %c0_231 = arith.constant 0 : index
    %c0_232 = arith.constant 0 : index
    %110 = vector.load %arg1[%c1_228, %c0_229, %c1_230, %c0_231, %c0_232] : memref<2x2x8x12x128xbf16, #tpu.memory_space<vmem>>, vector<1x1x1x11x128xbf16>
    %111 = vector.shape_cast %110 : vector<1x1x1x11x128xbf16> to vector<11x128xbf16>
    %c32_233 = arith.constant 32 : index
    %c256_234 = arith.constant 256 : index
    %112 = vector.load %arg14[%c32_233, %c256_234] : memref<64x2048xbf16, #tpu.memory_space<vmem>>, vector<11x128xbf16>
    tpu.vector_store %arg14[%c32_233, %c256_234], %111 {strides = array<i32>} : memref<64x2048xbf16, #tpu.memory_space<vmem>>, vector<11x128xbf16>,
    %c1_235 = arith.constant 1 : index
    %c0_236 = arith.constant 0 : index
    %c5_237 = arith.constant 5 : index
    %c0_238 = arith.constant 0 : index
    %c0_239 = arith.constant 0 : index
    %113 = vector.load %arg1[%c1_235, %c0_236, %c5_237, %c0_238, %c0_239] : memref<2x2x8x12x128xbf16, #tpu.memory_space<vmem>>, vector<1x1x1x11x128xbf16>
    %114 = vector.shape_cast %113 : vector<1x1x1x11x128xbf16> to vector<11x128xbf16>
    %c48_240 = arith.constant 48 : index
    %c256_241 = arith.constant 256 : index
    %115 = vector.load %arg14[%c48_240, %c256_241] : memref<64x2048xbf16, #tpu.memory_space<vmem>>, vector<11x128xbf16>
    tpu.vector_store %arg14[%c48_240, %c256_241], %114 {strides = array<i32>} : memref<64x2048xbf16, #tpu.memory_space<vmem>>, vector<11x128xbf16>,
    %c1_242 = arith.constant 1 : index
    %c1_243 = arith.constant 1 : index
    %c1_244 = arith.constant 1 : index
    %c0_245 = arith.constant 0 : index
    %c0_246 = arith.constant 0 : index
    %116 = vector.load %arg1[%c1_242, %c1_243, %c1_244, %c0_245, %c0_246] : memref<2x2x8x12x128xbf16, #tpu.memory_space<vmem>>, vector<1x1x1x11x128xbf16>
    %117 = vector.shape_cast %116 : vector<1x1x1x11x128xbf16> to vector<11x128xbf16>
    %c32_247 = arith.constant 32 : index
    %c384_248 = arith.constant 384 : index
    %118 = vector.load %arg14[%c32_247, %c384_248] : memref<64x2048xbf16, #tpu.memory_space<vmem>>, vector<11x128xbf16>
    tpu.vector_store %arg14[%c32_247, %c384_248], %117 {strides = array<i32>} : memref<64x2048xbf16, #tpu.memory_space<vmem>>, vector<11x128xbf16>,
    %c1_249 = arith.constant 1 : index
    %c1_250 = arith.constant 1 : index
    %c5_251 = arith.constant 5 : index
    %c0_252 = arith.constant 0 : index
    %c0_253 = arith.constant 0 : index
    %119 = vector.load %arg1[%c1_249, %c1_250, %c5_251, %c0_252, %c0_253] : memref<2x2x8x12x128xbf16, #tpu.memory_space<vmem>>, vector<1x1x1x11x128xbf16>
    %120 = vector.shape_cast %119 : vector<1x1x1x11x128xbf16> to vector<11x128xbf16>
    %c48_254 = arith.constant 48 : index
    %c384_255 = arith.constant 384 : index
    %121 = vector.load %arg14[%c48_254, %c384_255] : memref<64x2048xbf16, #tpu.memory_space<vmem>>, vector<11x128xbf16>
    tpu.vector_store %arg14[%c48_254, %c384_255], %120 {strides = array<i32>} : memref<64x2048xbf16, #tpu.memory_space<vmem>>, vector<11x128xbf16>,
    %c1_256 = arith.constant 1 : index
    %c0_257 = arith.constant 0 : index
    %c2_258 = arith.constant 2 : index
    %c0_259 = arith.constant 0 : index
    %c0_260 = arith.constant 0 : index
    %122 = vector.load %arg1[%c1_256, %c0_257, %c2_258, %c0_259, %c0_260] : memref<2x2x8x12x128xbf16, #tpu.memory_space<vmem>>, vector<1x1x1x11x128xbf16>
    %123 = vector.shape_cast %122 : vector<1x1x1x11x128xbf16> to vector<11x128xbf16>
    %c32_261 = arith.constant 32 : index
    %c512_262 = arith.constant 512 : index
    %124 = vector.load %arg14[%c32_261, %c512_262] : memref<64x2048xbf16, #tpu.memory_space<vmem>>, vector<11x128xbf16>
    tpu.vector_store %arg14[%c32_261, %c512_262], %123 {strides = array<i32>} : memref<64x2048xbf16, #tpu.memory_space<vmem>>, vector<11x128xbf16>,
    %c1_263 = arith.constant 1 : index
    %c0_264 = arith.constant 0 : index
    %c6_265 = arith.constant 6 : index
    %c0_266 = arith.constant 0 : index
    %c0_267 = arith.constant 0 : index
    %125 = vector.load %arg1[%c1_263, %c0_264, %c6_265, %c0_266, %c0_267] : memref<2x2x8x12x128xbf16, #tpu.memory_space<vmem>>, vector<1x1x1x11x128xbf16>
    %126 = vector.shape_cast %125 : vector<1x1x1x11x128xbf16> to vector<11x128xbf16>
    %c48_268 = arith.constant 48 : index
    %c512_269 = arith.constant 512 : index
    %127 = vector.load %arg14[%c48_268, %c512_269] : memref<64x2048xbf16, #tpu.memory_space<vmem>>, vector<11x128xbf16>
    tpu.vector_store %arg14[%c48_268, %c512_269], %126 {strides = array<i32>} : memref<64x2048xbf16, #tpu.memory_space<vmem>>, vector<11x128xbf16>,
    %c1_270 = arith.constant 1 : index
    %c1_271 = arith.constant 1 : index
    %c2_272 = arith.constant 2 : index
    %c0_273 = arith.constant 0 : index
    %c0_274 = arith.constant 0 : index
    %128 = vector.load %arg1[%c1_270, %c1_271, %c2_272, %c0_273, %c0_274] : memref<2x2x8x12x128xbf16, #tpu.memory_space<vmem>>, vector<1x1x1x11x128xbf16>
    %129 = vector.shape_cast %128 : vector<1x1x1x11x128xbf16> to vector<11x128xbf16>
    %c32_275 = arith.constant 32 : index
    %c640_276 = arith.constant 640 : index
    %130 = vector.load %arg14[%c32_275, %c640_276] : memref<64x2048xbf16, #tpu.memory_space<vmem>>, vector<11x128xbf16>
    tpu.vector_store %arg14[%c32_275, %c640_276], %129 {strides = array<i32>} : memref<64x2048xbf16, #tpu.memory_space<vmem>>, vector<11x128xbf16>,
    %c1_277 = arith.constant 1 : index
    %c1_278 = arith.constant 1 : index
    %c6_279 = arith.constant 6 : index
    %c0_280 = arith.constant 0 : index
    %c0_281 = arith.constant 0 : index
    %131 = vector.load %arg1[%c1_277, %c1_278, %c6_279, %c0_280, %c0_281] : memref<2x2x8x12x128xbf16, #tpu.memory_space<vmem>>, vector<1x1x1x11x128xbf16>
    %132 = vector.shape_cast %131 : vector<1x1x1x11x128xbf16> to vector<11x128xbf16>
    %c48_282 = arith.constant 48 : index
    %c640_283 = arith.constant 640 : index
    %133 = vector.load %arg14[%c48_282, %c640_283] : memref<64x2048xbf16, #tpu.memory_space<vmem>>, vector<11x128xbf16>
    tpu.vector_store %arg14[%c48_282, %c640_283], %132 {strides = array<i32>} : memref<64x2048xbf16, #tpu.memory_space<vmem>>, vector<11x128xbf16>,
    %c1_284 = arith.constant 1 : index
    %c0_285 = arith.constant 0 : index
    %c3_286 = arith.constant 3 : index
    %c0_287 = arith.constant 0 : index
    %c0_288 = arith.constant 0 : index
    %134 = vector.load %arg1[%c1_284, %c0_285, %c3_286, %c0_287, %c0_288] : memref<2x2x8x12x128xbf16, #tpu.memory_space<vmem>>, vector<1x1x1x11x128xbf16>
    %135 = vector.shape_cast %134 : vector<1x1x1x11x128xbf16> to vector<11x128xbf16>
    %c32_289 = arith.constant 32 : index
    %c768_290 = arith.constant 768 : index
    %136 = vector.load %arg14[%c32_289, %c768_290] : memref<64x2048xbf16, #tpu.memory_space<vmem>>, vector<11x128xbf16>
    tpu.vector_store %arg14[%c32_289, %c768_290], %135 {strides = array<i32>} : memref<64x2048xbf16, #tpu.memory_space<vmem>>, vector<11x128xbf16>,
    %c1_291 = arith.constant 1 : index
    %c0_292 = arith.constant 0 : index
    %c7_293 = arith.constant 7 : index
    %c0_294 = arith.constant 0 : index
    %c0_295 = arith.constant 0 : index
    %137 = vector.load %arg1[%c1_291, %c0_292, %c7_293, %c0_294, %c0_295] : memref<2x2x8x12x128xbf16, #tpu.memory_space<vmem>>, vector<1x1x1x11x128xbf16>
    %138 = vector.shape_cast %137 : vector<1x1x1x11x128xbf16> to vector<11x128xbf16>
    %c48_296 = arith.constant 48 : index
    %c768_297 = arith.constant 768 : index
    %139 = vector.load %arg14[%c48_296, %c768_297] : memref<64x2048xbf16, #tpu.memory_space<vmem>>, vector<11x128xbf16>
    tpu.vector_store %arg14[%c48_296, %c768_297], %138 {strides = array<i32>} : memref<64x2048xbf16, #tpu.memory_space<vmem>>, vector<11x128xbf16>,
    %c1_298 = arith.constant 1 : index
    %c1_299 = arith.constant 1 : index
    %c3_300 = arith.constant 3 : index
    %c0_301 = arith.constant 0 : index
    %c0_302 = arith.constant 0 : index
    %140 = vector.load %arg1[%c1_298, %c1_299, %c3_300, %c0_301, %c0_302] : memref<2x2x8x12x128xbf16, #tpu.memory_space<vmem>>, vector<1x1x1x11x128xbf16>
    %141 = vector.shape_cast %140 : vector<1x1x1x11x128xbf16> to vector<11x128xbf16>
    %c32_303 = arith.constant 32 : index
    %c896_304 = arith.constant 896 : index
    %142 = vector.load %arg14[%c32_303, %c896_304] : memref<64x2048xbf16, #tpu.memory_space<vmem>>, vector<11x128xbf16>
    tpu.vector_store %arg14[%c32_303, %c896_304], %141 {strides = array<i32>} : memref<64x2048xbf16, #tpu.memory_space<vmem>>, vector<11x128xbf16>,
    %c1_305 = arith.constant 1 : index
    %c1_306 = arith.constant 1 : index
    %c7_307 = arith.constant 7 : index
    %c0_308 = arith.constant 0 : index
    %c0_309 = arith.constant 0 : index
    %143 = vector.load %arg1[%c1_305, %c1_306, %c7_307, %c0_308, %c0_309] : memref<2x2x8x12x128xbf16, #tpu.memory_space<vmem>>, vector<1x1x1x11x128xbf16>
    %144 = vector.shape_cast %143 : vector<1x1x1x11x128xbf16> to vector<11x128xbf16>
    %c48_310 = arith.constant 48 : index
    %c896_311 = arith.constant 896 : index
    %145 = vector.load %arg14[%c48_310, %c896_311] : memref<64x2048xbf16, #tpu.memory_space<vmem>>, vector<11x128xbf16>
    tpu.vector_store %arg14[%c48_310, %c896_311], %144 {strides = array<i32>} : memref<64x2048xbf16, #tpu.memory_space<vmem>>, vector<11x128xbf16>,
    %c1_312 = arith.constant 1 : index
    %c0_313 = arith.constant 0 : index
    %c4_314 = arith.constant 4 : index
    %c0_315 = arith.constant 0 : index
    %c0_316 = arith.constant 0 : index
    %146 = vector.load %arg1[%c1_312, %c0_313, %c4_314, %c0_315, %c0_316] : memref<2x2x8x12x128xbf16, #tpu.memory_space<vmem>>, vector<1x1x1x11x128xbf16>
    %147 = vector.shape_cast %146 : vector<1x1x1x11x128xbf16> to vector<11x128xbf16>
    %c32_317 = arith.constant 32 : index
    %c1024_318 = arith.constant 1024 : index
    %148 = vector.load %arg14[%c32_317, %c1024_318] : memref<64x2048xbf16, #tpu.memory_space<vmem>>, vector<11x128xbf16>
    tpu.vector_store %arg14[%c32_317, %c1024_318], %147 {strides = array<i32>} : memref<64x2048xbf16, #tpu.memory_space<vmem>>, vector<11x128xbf16>,
    %c1_319 = arith.constant 1 : index
    %c0_320 = arith.constant 0 : index
    %c0_321 = arith.constant 0 : index
    %c1_322 = arith.constant 1 : index
    %c0_323 = arith.constant 0 : index
    %149 = vector.load %arg1[%c1_319, %c0_320, %c0_321, %c1_322, %c0_323] : memref<2x2x8x12x128xbf16, #tpu.memory_space<vmem>>, vector<1x1x1x11x128xbf16>
    %150 = vector.shape_cast %149 : vector<1x1x1x11x128xbf16> to vector<11x128xbf16>
    %c48_324 = arith.constant 48 : index
    %c1024_325 = arith.constant 1024 : index
    %151 = vector.load %arg14[%c48_324, %c1024_325] : memref<64x2048xbf16, #tpu.memory_space<vmem>>, vector<11x128xbf16>
    tpu.vector_store %arg14[%c48_324, %c1024_325], %150 {strides = array<i32>} : memref<64x2048xbf16, #tpu.memory_space<vmem>>, vector<11x128xbf16>,
    %c1_326 = arith.constant 1 : index
    %c1_327 = arith.constant 1 : index
    %c4_328 = arith.constant 4 : index
    %c0_329 = arith.constant 0 : index
    %c0_330 = arith.constant 0 : index
    %152 = vector.load %arg1[%c1_326, %c1_327, %c4_328, %c0_329, %c0_330] : memref<2x2x8x12x128xbf16, #tpu.memory_space<vmem>>, vector<1x1x1x11x128xbf16>
    %153 = vector.shape_cast %152 : vector<1x1x1x11x128xbf16> to vector<11x128xbf16>
    %c32_331 = arith.constant 32 : index
    %c1152_332 = arith.constant 1152 : index
    %154 = vector.load %arg14[%c32_331, %c1152_332] : memref<64x2048xbf16, #tpu.memory_space<vmem>>, vector<11x128xbf16>
    tpu.vector_store %arg14[%c32_331, %c1152_332], %153 {strides = array<i32>} : memref<64x2048xbf16, #tpu.memory_space<vmem>>, vector<11x128xbf16>,
    %c1_333 = arith.constant 1 : index
    %c1_334 = arith.constant 1 : index
    %c0_335 = arith.constant 0 : index
    %c1_336 = arith.constant 1 : index
    %c0_337 = arith.constant 0 : index
    %155 = vector.load %arg1[%c1_333, %c1_334, %c0_335, %c1_336, %c0_337] : memref<2x2x8x12x128xbf16, #tpu.memory_space<vmem>>, vector<1x1x1x11x128xbf16>
    %156 = vector.shape_cast %155 : vector<1x1x1x11x128xbf16> to vector<11x128xbf16>
    %c48_338 = arith.constant 48 : index
    %c1152_339 = arith.constant 1152 : index
    %157 = vector.load %arg14[%c48_338, %c1152_339] : memref<64x2048xbf16, #tpu.memory_space<vmem>>, vector<11x128xbf16>
    tpu.vector_store %arg14[%c48_338, %c1152_339], %156 {strides = array<i32>} : memref<64x2048xbf16, #tpu.memory_space<vmem>>, vector<11x128xbf16>,
    %c1_340 = arith.constant 1 : index
    %c0_341 = arith.constant 0 : index
    %c5_342 = arith.constant 5 : index
    %c0_343 = arith.constant 0 : index
    %c0_344 = arith.constant 0 : index
    %158 = vector.load %arg1[%c1_340, %c0_341, %c5_342, %c0_343, %c0_344] : memref<2x2x8x12x128xbf16, #tpu.memory_space<vmem>>, vector<1x1x1x11x128xbf16>
    %159 = vector.shape_cast %158 : vector<1x1x1x11x128xbf16> to vector<11x128xbf16>
    %c32_345 = arith.constant 32 : index
    %c1280_346 = arith.constant 1280 : index
    %160 = vector.load %arg14[%c32_345, %c1280_346] : memref<64x2048xbf16, #tpu.memory_space<vmem>>, vector<11x128xbf16>
    tpu.vector_store %arg14[%c32_345, %c1280_346], %159 {strides = array<i32>} : memref<64x2048xbf16, #tpu.memory_space<vmem>>, vector<11x128xbf16>,
    %c1_347 = arith.constant 1 : index
    %c0_348 = arith.constant 0 : index
    %c1_349 = arith.constant 1 : index
    %c1_350 = arith.constant 1 : index
    %c0_351 = arith.constant 0 : index
    %161 = vector.load %arg1[%c1_347, %c0_348, %c1_349, %c1_350, %c0_351] : memref<2x2x8x12x128xbf16, #tpu.memory_space<vmem>>, vector<1x1x1x11x128xbf16>
    %162 = vector.shape_cast %161 : vector<1x1x1x11x128xbf16> to vector<11x128xbf16>
    %c48_352 = arith.constant 48 : index
    %c1280_353 = arith.constant 1280 : index
    %163 = vector.load %arg14[%c48_352, %c1280_353] : memref<64x2048xbf16, #tpu.memory_space<vmem>>, vector<11x128xbf16>
    tpu.vector_store %arg14[%c48_352, %c1280_353], %162 {strides = array<i32>} : memref<64x2048xbf16, #tpu.memory_space<vmem>>, vector<11x128xbf16>,
    %c1_354 = arith.constant 1 : index
    %c1_355 = arith.constant 1 : index
    %c5_356 = arith.constant 5 : index
    %c0_357 = arith.constant 0 : index
    %c0_358 = arith.constant 0 : index
    %164 = vector.load %arg1[%c1_354, %c1_355, %c5_356, %c0_357, %c0_358] : memref<2x2x8x12x128xbf16, #tpu.memory_space<vmem>>, vector<1x1x1x11x128xbf16>
    %165 = vector.shape_cast %164 : vector<1x1x1x11x128xbf16> to vector<11x128xbf16>
    %c32_359 = arith.constant 32 : index
    %c1408_360 = arith.constant 1408 : index
    %166 = vector.load %arg14[%c32_359, %c1408_360] : memref<64x2048xbf16, #tpu.memory_space<vmem>>, vector<11x128xbf16>
    tpu.vector_store %arg14[%c32_359, %c1408_360], %165 {strides = array<i32>} : memref<64x2048xbf16, #tpu.memory_space<vmem>>, vector<11x128xbf16>,
    %c1_361 = arith.constant 1 : index
    %c1_362 = arith.constant 1 : index
    %c1_363 = arith.constant 1 : index
    %c1_364 = arith.constant 1 : index
    %c0_365 = arith.constant 0 : index
    %167 = vector.load %arg1[%c1_361, %c1_362, %c1_363, %c1_364, %c0_365] : memref<2x2x8x12x128xbf16, #tpu.memory_space<vmem>>, vector<1x1x1x11x128xbf16>
    %168 = vector.shape_cast %167 : vector<1x1x1x11x128xbf16> to vector<11x128xbf16>
    %c48_366 = arith.constant 48 : index
    %c1408_367 = arith.constant 1408 : index
    %169 = vector.load %arg14[%c48_366, %c1408_367] : memref<64x2048xbf16, #tpu.memory_space<vmem>>, vector<11x128xbf16>
    tpu.vector_store %arg14[%c48_366, %c1408_367], %168 {strides = array<i32>} : memref<64x2048xbf16, #tpu.memory_space<vmem>>, vector<11x128xbf16>,
    %c1_368 = arith.constant 1 : index
    %c0_369 = arith.constant 0 : index
    %c6_370 = arith.constant 6 : index
    %c0_371 = arith.constant 0 : index
    %c0_372 = arith.constant 0 : index
    %170 = vector.load %arg1[%c1_368, %c0_369, %c6_370, %c0_371, %c0_372] : memref<2x2x8x12x128xbf16, #tpu.memory_space<vmem>>, vector<1x1x1x11x128xbf16>
    %171 = vector.shape_cast %170 : vector<1x1x1x11x128xbf16> to vector<11x128xbf16>
    %c32_373 = arith.constant 32 : index
    %c1536_374 = arith.constant 1536 : index
    %172 = vector.load %arg14[%c32_373, %c1536_374] : memref<64x2048xbf16, #tpu.memory_space<vmem>>, vector<11x128xbf16>
    tpu.vector_store %arg14[%c32_373, %c1536_374], %171 {strides = array<i32>} : memref<64x2048xbf16, #tpu.memory_space<vmem>>, vector<11x128xbf16>,
    %c1_375 = arith.constant 1 : index
    %c0_376 = arith.constant 0 : index
    %c2_377 = arith.constant 2 : index
    %c1_378 = arith.constant 1 : index
    %c0_379 = arith.constant 0 : index
    %173 = vector.load %arg1[%c1_375, %c0_376, %c2_377, %c1_378, %c0_379] : memref<2x2x8x12x128xbf16, #tpu.memory_space<vmem>>, vector<1x1x1x11x128xbf16>
    %174 = vector.shape_cast %173 : vector<1x1x1x11x128xbf16> to vector<11x128xbf16>
    %c48_380 = arith.constant 48 : index
    %c1536_381 = arith.constant 1536 : index
    %175 = vector.load %arg14[%c48_380, %c1536_381] : memref<64x2048xbf16, #tpu.memory_space<vmem>>, vector<11x128xbf16>
    tpu.vector_store %arg14[%c48_380, %c1536_381], %174 {strides = array<i32>} : memref<64x2048xbf16, #tpu.memory_space<vmem>>, vector<11x128xbf16>,
    %c1_382 = arith.constant 1 : index
    %c1_383 = arith.constant 1 : index
    %c6_384 = arith.constant 6 : index
    %c0_385 = arith.constant 0 : index
    %c0_386 = arith.constant 0 : index
    %176 = vector.load %arg1[%c1_382, %c1_383, %c6_384, %c0_385, %c0_386] : memref<2x2x8x12x128xbf16, #tpu.memory_space<vmem>>, vector<1x1x1x11x128xbf16>
    %177 = vector.shape_cast %176 : vector<1x1x1x11x128xbf16> to vector<11x128xbf16>
    %c32_387 = arith.constant 32 : index
    %c1664_388 = arith.constant 1664 : index
    %178 = vector.load %arg14[%c32_387, %c1664_388] : memref<64x2048xbf16, #tpu.memory_space<vmem>>, vector<11x128xbf16>
    tpu.vector_store %arg14[%c32_387, %c1664_388], %177 {strides = array<i32>} : memref<64x2048xbf16, #tpu.memory_space<vmem>>, vector<11x128xbf16>,
    %c1_389 = arith.constant 1 : index
    %c1_390 = arith.constant 1 : index
    %c2_391 = arith.constant 2 : index
    %c1_392 = arith.constant 1 : index
    %c0_393 = arith.constant 0 : index
    %179 = vector.load %arg1[%c1_389, %c1_390, %c2_391, %c1_392, %c0_393] : memref<2x2x8x12x128xbf16, #tpu.memory_space<vmem>>, vector<1x1x1x11x128xbf16>
    %180 = vector.shape_cast %179 : vector<1x1x1x11x128xbf16> to vector<11x128xbf16>
    %c48_394 = arith.constant 48 : index
    %c1664_395 = arith.constant 1664 : index
    %181 = vector.load %arg14[%c48_394, %c1664_395] : memref<64x2048xbf16, #tpu.memory_space<vmem>>, vector<11x128xbf16>
    tpu.vector_store %arg14[%c48_394, %c1664_395], %180 {strides = array<i32>} : memref<64x2048xbf16, #tpu.memory_space<vmem>>, vector<11x128xbf16>,
    %c1_396 = arith.constant 1 : index
    %c0_397 = arith.constant 0 : index
    %c7_398 = arith.constant 7 : index
    %c0_399 = arith.constant 0 : index
    %c0_400 = arith.constant 0 : index
    %182 = vector.load %arg1[%c1_396, %c0_397, %c7_398, %c0_399, %c0_400] : memref<2x2x8x12x128xbf16, #tpu.memory_space<vmem>>, vector<1x1x1x11x128xbf16>
    %183 = vector.shape_cast %182 : vector<1x1x1x11x128xbf16> to vector<11x128xbf16>
    %c32_401 = arith.constant 32 : index
    %c1792_402 = arith.constant 1792 : index
    %184 = vector.load %arg14[%c32_401, %c1792_402] : memref<64x2048xbf16, #tpu.memory_space<vmem>>, vector<11x128xbf16>
    tpu.vector_store %arg14[%c32_401, %c1792_402], %183 {strides = array<i32>} : memref<64x2048xbf16, #tpu.memory_space<vmem>>, vector<11x128xbf16>,
    %c1_403 = arith.constant 1 : index
    %c0_404 = arith.constant 0 : index
    %c3_405 = arith.constant 3 : index
    %c1_406 = arith.constant 1 : index
    %c0_407 = arith.constant 0 : index
    %185 = vector.load %arg1[%c1_403, %c0_404, %c3_405, %c1_406, %c0_407] : memref<2x2x8x12x128xbf16, #tpu.memory_space<vmem>>, vector<1x1x1x11x128xbf16>
    %186 = vector.shape_cast %185 : vector<1x1x1x11x128xbf16> to vector<11x128xbf16>
    %c48_408 = arith.constant 48 : index
    %c1792_409 = arith.constant 1792 : index
    %187 = vector.load %arg14[%c48_408, %c1792_409] : memref<64x2048xbf16, #tpu.memory_space<vmem>>, vector<11x128xbf16>
    tpu.vector_store %arg14[%c48_408, %c1792_409], %186 {strides = array<i32>} : memref<64x2048xbf16, #tpu.memory_space<vmem>>, vector<11x128xbf16>,
    %c1_410 = arith.constant 1 : index
    %c1_411 = arith.constant 1 : index
    %c7_412 = arith.constant 7 : index
    %c0_413 = arith.constant 0 : index
    %c0_414 = arith.constant 0 : index
    %188 = vector.load %arg1[%c1_410, %c1_411, %c7_412, %c0_413, %c0_414] : memref<2x2x8x12x128xbf16, #tpu.memory_space<vmem>>, vector<1x1x1x11x128xbf16>
    %189 = vector.shape_cast %188 : vector<1x1x1x11x128xbf16> to vector<11x128xbf16>
    %c32_415 = arith.constant 32 : index
    %c1920_416 = arith.constant 1920 : index
    %190 = vector.load %arg14[%c32_415, %c1920_416] : memref<64x2048xbf16, #tpu.memory_space<vmem>>, vector<11x128xbf16>
    tpu.vector_store %arg14[%c32_415, %c1920_416], %189 {strides = array<i32>} : memref<64x2048xbf16, #tpu.memory_space<vmem>>, vector<11x128xbf16>,
    %c1_417 = arith.constant 1 : index
    %c1_418 = arith.constant 1 : index
    %c3_419 = arith.constant 3 : index
    %c1_420 = arith.constant 1 : index
    %c0_421 = arith.constant 0 : index
    %191 = vector.load %arg1[%c1_417, %c1_418, %c3_419, %c1_420, %c0_421] : memref<2x2x8x12x128xbf16, #tpu.memory_space<vmem>>, vector<1x1x1x11x128xbf16>
    %192 = vector.shape_cast %191 : vector<1x1x1x11x128xbf16> to vector<11x128xbf16>
    %c48_422 = arith.constant 48 : index
    %c1920_423 = arith.constant 1920 : index
    %193 = vector.load %arg14[%c48_422, %c1920_423] : memref<64x2048xbf16, #tpu.memory_space<vmem>>, vector<11x128xbf16>
    tpu.vector_store %arg14[%c48_422, %c1920_423], %192 {strides = array<i32>} : memref<64x2048xbf16, #tpu.memory_space<vmem>>, vector<11x128xbf16>,
    %c0_424 = arith.constant 0 : index
    %c0_425 = arith.constant 0 : index
    %194 = vector.load %arg14[%c0_424, %c0_425] : memref<64x2048xbf16, #tpu.memory_space<vmem>>, vector<64x2048xbf16>
    %c0_426 = arith.constant 0 : index
    %c0_427 = arith.constant 0 : index
    %195 = vector.load %arg2[%c0_426, %c0_427] : memref<2048x384xbf16, #tpu.memory_space<vmem>>, vector<2048x384xbf16>
    %cst_428 = arith.constant dense<0.000000e+00> : vector<64x384xf32>
    %196 = tpu.matmul %194, %195, %cst_428 {dimension_numbers = #tpu.dot_dimension_numbers<[1], [0], [0], [1], [0, 0, 1, 1], [], []>} : vector<64x2048xbf16>, vector<2048x384xbf16>, vector<64x384xf32> -> vector<64x384xf32>
    %c0_429 = arith.constant 0 : index
    %c0_430 = arith.constant 0 : index
    %197 = vector.load %arg3[%c0_429, %c0_430] : memref<1x384xf32, #tpu.memory_space<vmem>>, vector<1x384xf32>
    %198 = vector.broadcast %197 : vector<1x384xf32> to vector<64x384xf32>
    %199 = arith.addf %196, %198 : vector<64x384xf32>
    %cst_431 = arith.constant 0.000000e+00 : f32
    %200 = vector.broadcast %cst_431 : f32 to vector<64x384xf32>
    %201 = arith.maximumf %199, %200 : vector<64x384xf32>
    %202 = arith.truncf %201 : vector<64x384xf32> to vector<64x384xbf16>
    %c0_432 = arith.constant 0 : index
    %c0_433 = arith.constant 0 : index
    %203 = vector.load %arg15[%c0_432, %c0_433] : memref<64x384xbf16, #tpu.memory_space<vmem>>, vector<64x384xbf16>
    tpu.vector_store %arg15[%c0_432, %c0_433], %202 {strides = array<i32>} : memref<64x384xbf16, #tpu.memory_space<vmem>>, vector<64x384xbf16>,
    %cst_434 = arith.constant 0.000000e+00 : bf16
    %204 = vector.broadcast %cst_434 : bf16 to vector<32x1536xbf16>
    %c0_435 = arith.constant 0 : index
    %c0_436 = arith.constant 0 : index
    %205 = vector.load %arg16[%c0_435, %c0_436] : memref<32x1536xbf16, #tpu.memory_space<vmem>>, vector<32x1536xbf16>
    tpu.vector_store %arg16[%c0_435, %c0_436], %204 {strides = array<i32>} : memref<32x1536xbf16, #tpu.memory_space<vmem>>, vector<32x1536xbf16>,
    %c0_437 = arith.constant 0 : index
    %c0_438 = arith.constant 0 : index
    %206 = vector.load %arg15[%c0_437, %c0_438] : memref<64x384xbf16, #tpu.memory_space<vmem>>, vector<10x384xbf16>
    %c0_439 = arith.constant 0 : index
    %c0_440 = arith.constant 0 : index
    %207 = vector.load %arg16[%c0_439, %c0_440] : memref<32x1536xbf16, #tpu.memory_space<vmem>>, vector<10x384xbf16>
    tpu.vector_store %arg16[%c0_439, %c0_440], %206 {strides = array<i32>} : memref<32x1536xbf16, #tpu.memory_space<vmem>>, vector<10x384xbf16>,
    %c16_441 = arith.constant 16 : index
    %c0_442 = arith.constant 0 : index
    %208 = vector.load %arg15[%c16_441, %c0_442] : memref<64x384xbf16, #tpu.memory_space<vmem>>, vector<10x384xbf16>
    %c0_443 = arith.constant 0 : index
    %c384_444 = arith.constant 384 : index
    %209 = vector.load %arg16[%c0_443, %c384_444] : memref<32x1536xbf16, #tpu.memory_space<vmem>>, vector<10x384xbf16>
    tpu.vector_store %arg16[%c0_443, %c384_444], %208 {strides = array<i32>} : memref<32x1536xbf16, #tpu.memory_space<vmem>>, vector<10x384xbf16>,
    %c1_445 = arith.constant 1 : index
    %c0_446 = arith.constant 0 : index
    %210 = vector.load %arg15[%c1_445, %c0_446] : memref<64x384xbf16, #tpu.memory_space<vmem>>, vector<10x384xbf16>
    %c0_447 = arith.constant 0 : index
    %c768_448 = arith.constant 768 : index
    %211 = vector.load %arg16[%c0_447, %c768_448] : memref<32x1536xbf16, #tpu.memory_space<vmem>>, vector<10x384xbf16>
    tpu.vector_store %arg16[%c0_447, %c768_448], %210 {strides = array<i32>} : memref<32x1536xbf16, #tpu.memory_space<vmem>>, vector<10x384xbf16>,
    %c17 = arith.constant 17 : index
    %c0_449 = arith.constant 0 : index
    %212 = vector.load %arg15[%c17, %c0_449] : memref<64x384xbf16, #tpu.memory_space<vmem>>, vector<10x384xbf16>
    %c0_450 = arith.constant 0 : index
    %c1152_451 = arith.constant 1152 : index
    %213 = vector.load %arg16[%c0_450, %c1152_451] : memref<32x1536xbf16, #tpu.memory_space<vmem>>, vector<10x384xbf16>
    tpu.vector_store %arg16[%c0_450, %c1152_451], %212 {strides = array<i32>} : memref<32x1536xbf16, #tpu.memory_space<vmem>>, vector<10x384xbf16>,
    %c32_452 = arith.constant 32 : index
    %c0_453 = arith.constant 0 : index
    %214 = vector.load %arg15[%c32_452, %c0_453] : memref<64x384xbf16, #tpu.memory_space<vmem>>, vector<10x384xbf16>
    %c16_454 = arith.constant 16 : index
    %c0_455 = arith.constant 0 : index
    %215 = vector.load %arg16[%c16_454, %c0_455] : memref<32x1536xbf16, #tpu.memory_space<vmem>>, vector<10x384xbf16>
    tpu.vector_store %arg16[%c16_454, %c0_455], %214 {strides = array<i32>} : memref<32x1536xbf16, #tpu.memory_space<vmem>>, vector<10x384xbf16>,
    %c48_456 = arith.constant 48 : index
    %c0_457 = arith.constant 0 : index
    %216 = vector.load %arg15[%c48_456, %c0_457] : memref<64x384xbf16, #tpu.memory_space<vmem>>, vector<10x384xbf16>
    %c16_458 = arith.constant 16 : index
    %c384_459 = arith.constant 384 : index
    %217 = vector.load %arg16[%c16_458, %c384_459] : memref<32x1536xbf16, #tpu.memory_space<vmem>>, vector<10x384xbf16>
    tpu.vector_store %arg16[%c16_458, %c384_459], %216 {strides = array<i32>} : memref<32x1536xbf16, #tpu.memory_space<vmem>>, vector<10x384xbf16>,
    %c33 = arith.constant 33 : index
    %c0_460 = arith.constant 0 : index
    %218 = vector.load %arg15[%c33, %c0_460] : memref<64x384xbf16, #tpu.memory_space<vmem>>, vector<10x384xbf16>
    %c16_461 = arith.constant 16 : index
    %c768_462 = arith.constant 768 : index
    %219 = vector.load %arg16[%c16_461, %c768_462] : memref<32x1536xbf16, #tpu.memory_space<vmem>>, vector<10x384xbf16>
    tpu.vector_store %arg16[%c16_461, %c768_462], %218 {strides = array<i32>} : memref<32x1536xbf16, #tpu.memory_space<vmem>>, vector<10x384xbf16>,
    %c49 = arith.constant 49 : index
    %c0_463 = arith.constant 0 : index
    %220 = vector.load %arg15[%c49, %c0_463] : memref<64x384xbf16, #tpu.memory_space<vmem>>, vector<10x384xbf16>
    %c16_464 = arith.constant 16 : index
    %c1152_465 = arith.constant 1152 : index
    %221 = vector.load %arg16[%c16_464, %c1152_465] : memref<32x1536xbf16, #tpu.memory_space<vmem>>, vector<10x384xbf16>
    tpu.vector_store %arg16[%c16_464, %c1152_465], %220 {strides = array<i32>} : memref<32x1536xbf16, #tpu.memory_space<vmem>>, vector<10x384xbf16>,
    %c0_466 = arith.constant 0 : index
    %c0_467 = arith.constant 0 : index
    %222 = vector.load %arg16[%c0_466, %c0_467] : memref<32x1536xbf16, #tpu.memory_space<vmem>>, vector<32x1536xbf16>
    %c0_468 = arith.constant 0 : index
    %c0_469 = arith.constant 0 : index
    %223 = vector.load %arg4[%c0_468, %c0_469] : memref<1536x384xbf16, #tpu.memory_space<vmem>>, vector<1536x384xbf16>
    %cst_470 = arith.constant dense<0.000000e+00> : vector<32x384xf32>
    %224 = tpu.matmul %222, %223, %cst_470 {dimension_numbers = #tpu.dot_dimension_numbers<[1], [0], [0], [1], [0, 0, 1, 1], [], []>} : vector<32x1536xbf16>, vector<1536x384xbf16>, vector<32x384xf32> -> vector<32x384xf32>
    %c0_471 = arith.constant 0 : index
    %c0_472 = arith.constant 0 : index
    %225 = vector.load %arg5[%c0_471, %c0_472] : memref<1x384xf32, #tpu.memory_space<vmem>>, vector<1x384xf32>
    %226 = vector.broadcast %225 : vector<1x384xf32> to vector<32x384xf32>
    %227 = arith.addf %224, %226 : vector<32x384xf32>
    %cst_473 = arith.constant 0.000000e+00 : f32
    %228 = vector.broadcast %cst_473 : f32 to vector<32x384xf32>
    %229 = arith.maximumf %227, %228 : vector<32x384xf32>
    %230 = arith.truncf %229 : vector<32x384xf32> to vector<32x384xbf16>
    %c0_474 = arith.constant 0 : index
    %c0_475 = arith.constant 0 : index
    %231 = vector.load %arg17[%c0_474, %c0_475] : memref<32x384xbf16, #tpu.memory_space<vmem>>, vector<32x384xbf16>
    tpu.vector_store %arg17[%c0_474, %c0_475], %230 {strides = array<i32>} : memref<32x384xbf16, #tpu.memory_space<vmem>>, vector<32x384xbf16>,
    %c0_476 = arith.constant 0 : index
    %c0_477 = arith.constant 0 : index
    %232 = vector.load %arg17[%c0_476, %c0_477] : memref<32x384xbf16, #tpu.memory_space<vmem>>, vector<1x384xbf16>
    %c0_478 = arith.constant 0 : index
    %c0_479 = arith.constant 0 : index
    %233 = vector.load %arg18[%c0_478, %c0_479] : memref<2x3840xbf16, #tpu.memory_space<vmem>>, vector<1x384xbf16>
    tpu.vector_store %arg18[%c0_478, %c0_479], %232 {strides = array<i32>} : memref<2x3840xbf16, #tpu.memory_space<vmem>>, vector<1x384xbf16>,
    %c1_480 = arith.constant 1 : index
    %c0_481 = arith.constant 0 : index
    %234 = vector.load %arg17[%c1_480, %c0_481] : memref<32x384xbf16, #tpu.memory_space<vmem>>, vector<1x384xbf16>
    %c0_482 = arith.constant 0 : index
    %c384_483 = arith.constant 384 : index
    %235 = vector.load %arg18[%c0_482, %c384_483] : memref<2x3840xbf16, #tpu.memory_space<vmem>>, vector<1x384xbf16>
    tpu.vector_store %arg18[%c0_482, %c384_483], %234 {strides = array<i32>} : memref<2x3840xbf16, #tpu.memory_space<vmem>>, vector<1x384xbf16>,
    %c2_484 = arith.constant 2 : index
    %c0_485 = arith.constant 0 : index
    %236 = vector.load %arg17[%c2_484, %c0_485] : memref<32x384xbf16, #tpu.memory_space<vmem>>, vector<1x384xbf16>
    %c0_486 = arith.constant 0 : index
    %c768_487 = arith.constant 768 : index
    %237 = vector.load %arg18[%c0_486, %c768_487] : memref<2x3840xbf16, #tpu.memory_space<vmem>>, vector<1x384xbf16>
    tpu.vector_store %arg18[%c0_486, %c768_487], %236 {strides = array<i32>} : memref<2x3840xbf16, #tpu.memory_space<vmem>>, vector<1x384xbf16>,
    %c3_488 = arith.constant 3 : index
    %c0_489 = arith.constant 0 : index
    %238 = vector.load %arg17[%c3_488, %c0_489] : memref<32x384xbf16, #tpu.memory_space<vmem>>, vector<1x384xbf16>
    %c0_490 = arith.constant 0 : index
    %c1152_491 = arith.constant 1152 : index
    %239 = vector.load %arg18[%c0_490, %c1152_491] : memref<2x3840xbf16, #tpu.memory_space<vmem>>, vector<1x384xbf16>
    tpu.vector_store %arg18[%c0_490, %c1152_491], %238 {strides = array<i32>} : memref<2x3840xbf16, #tpu.memory_space<vmem>>, vector<1x384xbf16>,
    %c4_492 = arith.constant 4 : index
    %c0_493 = arith.constant 0 : index
    %240 = vector.load %arg17[%c4_492, %c0_493] : memref<32x384xbf16, #tpu.memory_space<vmem>>, vector<1x384xbf16>
    %c0_494 = arith.constant 0 : index
    %c1536_495 = arith.constant 1536 : index
    %241 = vector.load %arg18[%c0_494, %c1536_495] : memref<2x3840xbf16, #tpu.memory_space<vmem>>, vector<1x384xbf16>
    tpu.vector_store %arg18[%c0_494, %c1536_495], %240 {strides = array<i32>} : memref<2x3840xbf16, #tpu.memory_space<vmem>>, vector<1x384xbf16>,
    %c5_496 = arith.constant 5 : index
    %c0_497 = arith.constant 0 : index
    %242 = vector.load %arg17[%c5_496, %c0_497] : memref<32x384xbf16, #tpu.memory_space<vmem>>, vector<1x384xbf16>
    %c0_498 = arith.constant 0 : index
    %c1920_499 = arith.constant 1920 : index
    %243 = vector.load %arg18[%c0_498, %c1920_499] : memref<2x3840xbf16, #tpu.memory_space<vmem>>, vector<1x384xbf16>
    tpu.vector_store %arg18[%c0_498, %c1920_499], %242 {strides = array<i32>} : memref<2x3840xbf16, #tpu.memory_space<vmem>>, vector<1x384xbf16>,
    %c6_500 = arith.constant 6 : index
    %c0_501 = arith.constant 0 : index
    %244 = vector.load %arg17[%c6_500, %c0_501] : memref<32x384xbf16, #tpu.memory_space<vmem>>, vector<1x384xbf16>
    %c0_502 = arith.constant 0 : index
    %c2304 = arith.constant 2304 : index
    %245 = vector.load %arg18[%c0_502, %c2304] : memref<2x3840xbf16, #tpu.memory_space<vmem>>, vector<1x384xbf16>
    tpu.vector_store %arg18[%c0_502, %c2304], %244 {strides = array<i32>} : memref<2x3840xbf16, #tpu.memory_space<vmem>>, vector<1x384xbf16>,
    %c7_503 = arith.constant 7 : index
    %c0_504 = arith.constant 0 : index
    %246 = vector.load %arg17[%c7_503, %c0_504] : memref<32x384xbf16, #tpu.memory_space<vmem>>, vector<1x384xbf16>
    %c0_505 = arith.constant 0 : index
    %c2688 = arith.constant 2688 : index
    %247 = vector.load %arg18[%c0_505, %c2688] : memref<2x3840xbf16, #tpu.memory_space<vmem>>, vector<1x384xbf16>
    tpu.vector_store %arg18[%c0_505, %c2688], %246 {strides = array<i32>} : memref<2x3840xbf16, #tpu.memory_space<vmem>>, vector<1x384xbf16>,
    %c8 = arith.constant 8 : index
    %c0_506 = arith.constant 0 : index
    %248 = vector.load %arg17[%c8, %c0_506] : memref<32x384xbf16, #tpu.memory_space<vmem>>, vector<1x384xbf16>
    %c0_507 = arith.constant 0 : index
    %c3072 = arith.constant 3072 : index
    %249 = vector.load %arg18[%c0_507, %c3072] : memref<2x3840xbf16, #tpu.memory_space<vmem>>, vector<1x384xbf16>
    tpu.vector_store %arg18[%c0_507, %c3072], %248 {strides = array<i32>} : memref<2x3840xbf16, #tpu.memory_space<vmem>>, vector<1x384xbf16>,
    %c9 = arith.constant 9 : index
    %c0_508 = arith.constant 0 : index
    %250 = vector.load %arg17[%c9, %c0_508] : memref<32x384xbf16, #tpu.memory_space<vmem>>, vector<1x384xbf16>
    %c0_509 = arith.constant 0 : index
    %c3456 = arith.constant 3456 : index
    %251 = vector.load %arg18[%c0_509, %c3456] : memref<2x3840xbf16, #tpu.memory_space<vmem>>, vector<1x384xbf16>
    tpu.vector_store %arg18[%c0_509, %c3456], %250 {strides = array<i32>} : memref<2x3840xbf16, #tpu.memory_space<vmem>>, vector<1x384xbf16>,
    %c16_510 = arith.constant 16 : index
    %c0_511 = arith.constant 0 : index
    %252 = vector.load %arg17[%c16_510, %c0_511] : memref<32x384xbf16, #tpu.memory_space<vmem>>, vector<1x384xbf16>
    %c1_512 = arith.constant 1 : index
    %c0_513 = arith.constant 0 : index
    %253 = vector.load %arg18[%c1_512, %c0_513] : memref<2x3840xbf16, #tpu.memory_space<vmem>>, vector<1x384xbf16>
    tpu.vector_store %arg18[%c1_512, %c0_513], %252 {strides = array<i32>} : memref<2x3840xbf16, #tpu.memory_space<vmem>>, vector<1x384xbf16>,
    %c17_514 = arith.constant 17 : index
    %c0_515 = arith.constant 0 : index
    %254 = vector.load %arg17[%c17_514, %c0_515] : memref<32x384xbf16, #tpu.memory_space<vmem>>, vector<1x384xbf16>
    %c1_516 = arith.constant 1 : index
    %c384_517 = arith.constant 384 : index
    %255 = vector.load %arg18[%c1_516, %c384_517] : memref<2x3840xbf16, #tpu.memory_space<vmem>>, vector<1x384xbf16>
    tpu.vector_store %arg18[%c1_516, %c384_517], %254 {strides = array<i32>} : memref<2x3840xbf16, #tpu.memory_space<vmem>>, vector<1x384xbf16>,
    %c18 = arith.constant 18 : index
    %c0_518 = arith.constant 0 : index
    %256 = vector.load %arg17[%c18, %c0_518] : memref<32x384xbf16, #tpu.memory_space<vmem>>, vector<1x384xbf16>
    %c1_519 = arith.constant 1 : index
    %c768_520 = arith.constant 768 : index
    %257 = vector.load %arg18[%c1_519, %c768_520] : memref<2x3840xbf16, #tpu.memory_space<vmem>>, vector<1x384xbf16>
    tpu.vector_store %arg18[%c1_519, %c768_520], %256 {strides = array<i32>} : memref<2x3840xbf16, #tpu.memory_space<vmem>>, vector<1x384xbf16>,
    %c19 = arith.constant 19 : index
    %c0_521 = arith.constant 0 : index
    %258 = vector.load %arg17[%c19, %c0_521] : memref<32x384xbf16, #tpu.memory_space<vmem>>, vector<1x384xbf16>
    %c1_522 = arith.constant 1 : index
    %c1152_523 = arith.constant 1152 : index
    %259 = vector.load %arg18[%c1_522, %c1152_523] : memref<2x3840xbf16, #tpu.memory_space<vmem>>, vector<1x384xbf16>
    tpu.vector_store %arg18[%c1_522, %c1152_523], %258 {strides = array<i32>} : memref<2x3840xbf16, #tpu.memory_space<vmem>>, vector<1x384xbf16>,
    %c20 = arith.constant 20 : index
    %c0_524 = arith.constant 0 : index
    %260 = vector.load %arg17[%c20, %c0_524] : memref<32x384xbf16, #tpu.memory_space<vmem>>, vector<1x384xbf16>
    %c1_525 = arith.constant 1 : index
    %c1536_526 = arith.constant 1536 : index
    %261 = vector.load %arg18[%c1_525, %c1536_526] : memref<2x3840xbf16, #tpu.memory_space<vmem>>, vector<1x384xbf16>
    tpu.vector_store %arg18[%c1_525, %c1536_526], %260 {strides = array<i32>} : memref<2x3840xbf16, #tpu.memory_space<vmem>>, vector<1x384xbf16>,
    %c21 = arith.constant 21 : index
    %c0_527 = arith.constant 0 : index
    %262 = vector.load %arg17[%c21, %c0_527] : memref<32x384xbf16, #tpu.memory_space<vmem>>, vector<1x384xbf16>
    %c1_528 = arith.constant 1 : index
    %c1920_529 = arith.constant 1920 : index
    %263 = vector.load %arg18[%c1_528, %c1920_529] : memref<2x3840xbf16, #tpu.memory_space<vmem>>, vector<1x384xbf16>
    tpu.vector_store %arg18[%c1_528, %c1920_529], %262 {strides = array<i32>} : memref<2x3840xbf16, #tpu.memory_space<vmem>>, vector<1x384xbf16>,
    %c22 = arith.constant 22 : index
    %c0_530 = arith.constant 0 : index
    %264 = vector.load %arg17[%c22, %c0_530] : memref<32x384xbf16, #tpu.memory_space<vmem>>, vector<1x384xbf16>
    %c1_531 = arith.constant 1 : index
    %c2304_532 = arith.constant 2304 : index
    %265 = vector.load %arg18[%c1_531, %c2304_532] : memref<2x3840xbf16, #tpu.memory_space<vmem>>, vector<1x384xbf16>
    tpu.vector_store %arg18[%c1_531, %c2304_532], %264 {strides = array<i32>} : memref<2x3840xbf16, #tpu.memory_space<vmem>>, vector<1x384xbf16>,
    %c23 = arith.constant 23 : index
    %c0_533 = arith.constant 0 : index
    %266 = vector.load %arg17[%c23, %c0_533] : memref<32x384xbf16, #tpu.memory_space<vmem>>, vector<1x384xbf16>
    %c1_534 = arith.constant 1 : index
    %c2688_535 = arith.constant 2688 : index
    %267 = vector.load %arg18[%c1_534, %c2688_535] : memref<2x3840xbf16, #tpu.memory_space<vmem>>, vector<1x384xbf16>
    tpu.vector_store %arg18[%c1_534, %c2688_535], %266 {strides = array<i32>} : memref<2x3840xbf16, #tpu.memory_space<vmem>>, vector<1x384xbf16>,
    %c24 = arith.constant 24 : index
    %c0_536 = arith.constant 0 : index
    %268 = vector.load %arg17[%c24, %c0_536] : memref<32x384xbf16, #tpu.memory_space<vmem>>, vector<1x384xbf16>
    %c1_537 = arith.constant 1 : index
    %c3072_538 = arith.constant 3072 : index
    %269 = vector.load %arg18[%c1_537, %c3072_538] : memref<2x3840xbf16, #tpu.memory_space<vmem>>, vector<1x384xbf16>
    tpu.vector_store %arg18[%c1_537, %c3072_538], %268 {strides = array<i32>} : memref<2x3840xbf16, #tpu.memory_space<vmem>>, vector<1x384xbf16>,
    %c25 = arith.constant 25 : index
    %c0_539 = arith.constant 0 : index
    %270 = vector.load %arg17[%c25, %c0_539] : memref<32x384xbf16, #tpu.memory_space<vmem>>, vector<1x384xbf16>
    %c1_540 = arith.constant 1 : index
    %c3456_541 = arith.constant 3456 : index
    %271 = vector.load %arg18[%c1_540, %c3456_541] : memref<2x3840xbf16, #tpu.memory_space<vmem>>, vector<1x384xbf16>
    tpu.vector_store %arg18[%c1_540, %c3456_541], %270 {strides = array<i32>} : memref<2x3840xbf16, #tpu.memory_space<vmem>>, vector<1x384xbf16>,
    %c0_542 = arith.constant 0 : index
    %c0_543 = arith.constant 0 : index
    %272 = vector.load %arg18[%c0_542, %c0_543] : memref<2x3840xbf16, #tpu.memory_space<vmem>>, vector<2x3840xbf16>
    %c0_544 = arith.constant 0 : index
    %c0_545 = arith.constant 0 : index
    %273 = vector.load %arg6[%c0_544, %c0_545] : memref<3840x256xbf16, #tpu.memory_space<vmem>>, vector<3840x256xbf16>
    %cst_546 = arith.constant dense<0.000000e+00> : vector<2x256xf32>
    %274 = tpu.matmul %272, %273, %cst_546 {dimension_numbers = #tpu.dot_dimension_numbers<[1], [0], [0], [1], [0, 0, 1, 1], [], []>} : vector<2x3840xbf16>, vector<3840x256xbf16>, vector<2x256xf32> -> vector<2x256xf32>
    %c0_547 = arith.constant 0 : index
    %c0_548 = arith.constant 0 : index
    %275 = vector.load %arg7[%c0_547, %c0_548] : memref<1x256xf32, #tpu.memory_space<vmem>>, vector<1x256xf32>
    %276 = vector.broadcast %275 : vector<1x256xf32> to vector<2x256xf32>
    %277 = arith.addf %274, %276 : vector<2x256xf32>
    %cst_549 = arith.constant 0.000000e+00 : f32
    %278 = vector.broadcast %cst_549 : f32 to vector<2x256xf32>
    %279 = arith.maximumf %277, %278 : vector<2x256xf32>
    %280 = arith.truncf %279 : vector<2x256xf32> to vector<2x256xbf16>
    %c0_550 = arith.constant 0 : index
    %c0_551 = arith.constant 0 : index
    %281 = vector.load %arg8[%c0_550, %c0_551] : memref<256x128xbf16, #tpu.memory_space<vmem>>, vector<256x128xbf16>
    %cst_552 = arith.constant dense<0.000000e+00> : vector<2x128xf32>
    %282 = tpu.matmul %280, %281, %cst_552 {dimension_numbers = #tpu.dot_dimension_numbers<[1], [0], [0], [1], [0, 0, 1, 1], [], []>} : vector<2x256xbf16>, vector<256x128xbf16>, vector<2x128xf32> -> vector<2x128xf32>
    %c0_553 = arith.constant 0 : index
    %c0_554 = arith.constant 0 : index
    %283 = vector.load %arg9[%c0_553, %c0_554] : memref<1x128xf32, #tpu.memory_space<vmem>>, vector<1x128xf32>
    %284 = vector.broadcast %283 : vector<1x128xf32> to vector<2x128xf32>
    %285 = arith.addf %282, %284 : vector<2x128xf32>
    %286 = tpu.iota {dimensions = array<i32: 1>} : vector<2x128xi32>
    %c3_i32 = arith.constant 3 : i32
    %287 = vector.broadcast %c3_i32 : i32 to vector<2x128xi32>
    %288 = arith.cmpi slt, %286, %287 : vector<2x128xi32>
    %cst_555 = arith.constant -1.000000e+30 : f32
    %289 = vector.broadcast %cst_555 : f32 to vector<2x128xf32>
    %290 = arith.select %288, %285, %289 : vector<2x128xi1>, vector<2x128xf32>
    %cst_556 = arith.constant dense<0xFF800000> : vector<2xf32>
    %291 = vector.multi_reduction <maximumf>, %290, %cst_556 [1] : vector<2x128xf32> to vector<2xf32>
    %292 = vector.shape_cast %291 : vector<2xf32> to vector<2x1xf32>
    %293 = vector.broadcast %292 : vector<2x1xf32> to vector<2x128xf32>
    %294 = arith.subf %290, %293 : vector<2x128xf32>
    %295 = math.exp %294 : vector<2x128xf32>
    %cst_557 = arith.constant dense<0.000000e+00> : vector<2xf32>
    %296 = vector.multi_reduction <add>, %295, %cst_557 [1] : vector<2x128xf32> to vector<2xf32>
    %297 = vector.shape_cast %296 : vector<2xf32> to vector<2x1xf32>
    %298 = vector.broadcast %297 : vector<2x1xf32> to vector<2x128xf32>
    %299 = arith.divf %295, %298 : vector<2x128xf32>
    %c0_558 = arith.constant 0 : index
    %c0_559 = arith.constant 0 : index
    %300 = vector.load %arg10[%c0_558, %c0_559] : memref<2x1xi32, #tpu.memory_space<vmem>>, vector<2x1xi32>
    %301 = vector.broadcast %300 : vector<2x1xi32> to vector<2x128xi32>
    %302 = arith.cmpi eq, %301, %286 : vector<2x128xi32>
    %303 = arith.extui %302 : vector<2x128xi1> to vector<2x128xi32>
    %304 = arith.sitofp %303 : vector<2x128xi32> to vector<2x128xf32>
    %305 = arith.mulf %299, %304 : vector<2x128xf32>
    %cst_560 = arith.constant dense<0.000000e+00> : vector<2xf32>
    %306 = vector.multi_reduction <add>, %305, %cst_560 [1] : vector<2x128xf32> to vector<2xf32>
    %307 = vector.shape_cast %306 : vector<2xf32> to vector<2x1xf32>
    %c0_561 = arith.constant 0 : index
    %c0_562 = arith.constant 0 : index
    %308 = vector.load %arg11[%c0_561, %c0_562] : memref<2x1xf32, #tpu.memory_space<vmem>>, vector<2x1xf32>
    %309 = arith.divf %307, %308 : vector<2x1xf32>
    %c0_563 = arith.constant 0 : index
    %c0_564 = arith.constant 0 : index
    %310 = vector.load %arg12[%c0_563, %c0_564] : memref<2x1xf32, #tpu.memory_space<vmem>>, vector<2x1xf32>
    %311 = arith.mulf %309, %310 : vector<2x1xf32>
    %cst_565 = arith.constant 0.899999976 : f32
    %cst_566 = arith.constant 1.100000e+00 : f32
    %312 = vector.broadcast %cst_565 : f32 to vector<2x1xf32>
    %313 = arith.maximumf %312, %309 : vector<2x1xf32>
    %314 = vector.broadcast %cst_566 : f32 to vector<2x1xf32>
    %315 = arith.minimumf %314, %313 : vector<2x1xf32>
    %316 = arith.mulf %315, %310 : vector<2x1xf32>
    %317 = arith.minimumf %311, %316 : vector<2x1xf32>
    %cst_567 = arith.constant 0.000000e+00 : f32
    %318 = vector.broadcast %cst_567 : f32 to vector<2x1xf32>
    %319 = arith.subf %318, %317 : vector<2x1xf32>
    %320 = vector.shape_cast %319 : vector<2x1xf32> to vector<1x2x1xf32>
    %cst_568 = arith.constant dense<0.000000e+00> : vector<1xf32>
    %321 = vector.multi_reduction <add>, %320, %cst_568 [1, 2] : vector<1x2x1xf32> to vector<1xf32>
    %322 = vector.shape_cast %321 : vector<1xf32> to vector<1x1x1xf32>
    %323 = vector.extract %322[0, 0, 0] : f32 from vector<1x1x1xf32>
    %324 = vector.broadcast %323 : f32 to vector<1x1xf32>
    %cst_569 = arith.constant 2.000000e+00 : f32
    %325 = vector.broadcast %cst_569 : f32 to vector<1x1xf32>
    %326 = arith.divf %324, %325 : vector<1x1xf32>
    %c0_570 = arith.constant 0 : index
    %c0_571 = arith.constant 0 : index
    %327 = vector.load %arg13[%c0_570, %c0_571] : memref<1x1xf32, #tpu.memory_space<vmem>>, vector<1x1xf32>
    tpu.vector_store %arg13[%c0_570, %c0_571], %326 {strides = array<i32>} : memref<1x1xf32, #tpu.memory_space<vmem>>, vector<1x1xf32>,
    return
  }
  func.func @transform_0(%arg0: i32) -> (i32, i32, i32, i32, i32) {
    %c0_i32 = arith.constant 0 : i32
    %c0_i32_0 = arith.constant 0 : i32
    %c0_i32_1 = arith.constant 0 : i32
    %c0_i32_2 = arith.constant 0 : i32
    %c0_i32_3 = arith.constant 0 : i32
    %c0_i32_4 = arith.constant 0 : i32
    return %c0_i32, %c0_i32_0, %c0_i32_1, %c0_i32_2, %c0_i32_3 : i32, i32, i32, i32, i32
  }
  func.func @transform_1(%arg0: i32) -> (i32, i32) {
    %c0_i32 = arith.constant 0 : i32
    %c0_i32_0 = arith.constant 0 : i32
    %c0_i32_1 = arith.constant 0 : i32
    return %c0_i32, %c0_i32_0 : i32, i32
  }
  func.func @transform_2(%arg0: i32) -> (i32, i32) {
    %c0_i32 = arith.constant 0 : i32
    %c0_i32_0 = arith.constant 0 : i32
    %c0_i32_1 = arith.constant 0 : i32
    return %c0_i32, %c0_i32_0 : i32, i32
  }
  func.func @transform_3(%arg0: i32) -> (i32, i32) {
    %c0_i32 = arith.constant 0 : i32
    %c0_i32_0 = arith.constant 0 : i32
    %c0_i32_1 = arith.constant 0 : i32
    return %c0_i32, %c0_i32_0 : i32, i32
  }
  func.func @transform_4(%arg0: i32) -> (i32, i32) {
    %c0_i32 = arith.constant 0 : i32
    %c0_i32_0 = arith.constant 0 : i32
    %c0_i32_1 = arith.constant 0 : i32
    return %c0_i32, %c0_i32_0 : i32, i32
  }
  func.func @transform_5(%arg0: i32) -> (i32, i32) {
    %c0_i32 = arith.constant 0 : i32
    %c0_i32_0 = arith.constant 0 : i32
    %c0_i32_1 = arith.constant 0 : i32
    return %c0_i32, %c0_i32_0 : i32, i32
  }
  func.func @transform_6(%arg0: i32) -> (i32, i32) {
    %c0_i32 = arith.constant 0 : i32
    %c0_i32_0 = arith.constant 0 : i32
    %c0_i32_1 = arith.constant 0 : i32
    return %c0_i32, %c0_i32_0 : i32, i32
  }
  func.func @transform_7(%arg0: i32) -> (i32, i32) {
    %c0_i32 = arith.constant 0 : i32
    %c0_i32_0 = arith.constant 0 : i32
    %c0_i32_1 = arith.constant 0 : i32
    return %c0_i32, %c0_i32_0 : i32, i32
  }
  func.func @transform_8(%arg0: i32) -> (i32, i32) {
    %c0_i32 = arith.constant 0 : i32
    %c0_i32_0 = arith.constant 0 : i32
    %c0_i32_1 = arith.constant 0 : i32
    return %c0_i32, %c0_i32_0 : i32, i32
  }
  func.func @transform_9(%arg0: i32) -> (i32, i32) {
    %c0_i32 = arith.constant 0 : i32
    %c0_i32_0 = arith.constant 0 : i32
    %c0_i32_1 = arith.constant 0 : i32
    return %c0_i32, %c0_i32_0 : i32, i32
  }
  func.func @transform_10(%arg0: i32) -> (i32, i32) {
    %c0_i32 = arith.constant 0 : i32
    %c0_i32_0 = arith.constant 0 : i32
    %c0_i32_1 = arith.constant 0 : i32
    return %c0_i32, %c0_i32_0 : i32, i32
  }
  func.func @transform_11(%arg0: i32) -> (i32, i32) {
    %c0_i32 = arith.constant 0 : i32
    %c0_i32_0 = arith.constant 0 : i32
    %c0_i32_1 = arith.constant 0 : i32
    return %c0_i32, %c0_i32_0 : i32, i32
  }
  func.func @transform_12(%arg0: i32) -> (i32, i32) {
    %c0_i32 = arith.constant 0 : i32
    %c0_i32_0 = arith.constant 0 : i32
    %c0_i32_1 = arith.constant 0 : i32
    return %c0_i32, %c0_i32_0 : i32, i32
  }
}

</mosaic_0001>

<bundles_post_ra>
// kernel: policy_forward.1
= control target key start
LH: loop header
LB: loop body
LE: loop exit
PB: predicated region body
PF: predicated region fallthrough
CT: control target
= control target key end

     0   :  { %17 = vsyncpa [#allocation8], 0  ;;  %s18551_s0 = inlined_call_operand.vmem [shape: bf16[2,2,8,12,128], index: 0, kind: input, shape index: {}]   ;;  %s18552_s1 = inlined_call_operand.hbm [shape: bf16[2048,384], index: 1, kind: input, shape index: {}]   ;;  %s18553_s2 = inlined_call_operand.hbm [shape: f32[1,384], index: 2, kind: input, shape index: {}]   ;;  %s18554_s3 = inlined_call_operand.hbm [shape: bf16[1536,384], index: 3, kind: input, shape index: {}]   ;;  %s18555_s4 = inlined_call_operand.hbm [shape: f32[1,384], index: 4, kind: input, shape index: {}]   ;;  %s18556_s5 = inlined_call_operand.hbm [shape: bf16[3840,256], index: 5, kind: input, shape index: {}]   ;;  %s18557_s6 = inlined_call_operand.hbm [shape: f32[1,256], index: 6, kind: input, shape index: {}]   ;;  %s18558_s7 = inlined_call_operand.hbm [shape: bf16[256,128], index: 7, kind: input, shape index: {}]   ;;  %s18559_s8 = inlined_call_operand.hbm [shape: f32[1,128], index: 8, kind: input, shape index: {}]   ;;  %s18560_s9 = inlined_call_operand.vmem [shape: s32[2,1], index: 9, kind: input, shape index: {}]   ;;  %s18561_s10 = inlined_call_operand.vmem [shape: f32[2,1], index: 10, kind: input, shape index: {}]   ;;  %s18562_s11 = inlined_call_operand.vmem [shape: f32[2,1], index: 11, kind: input, shape index: {}]   ;;  %s18563_s12 = inlined_call_operand.hbm [shape: f32[1,1], index: 12, kind: output, shape index: {}]  }
   0x1   :  { %18 = vsyncpa [#allocation11], 0 }
   0x2   :  { %19 = vsyncpa [#allocation14], 0 }
   0x3   :  { %20 = vsyncpa [#allocation17], 0 }
   0x4   :  { %21 = vsyncpa [#allocation20], 0 }
   0x5   :  { %22 = vsyncpa [#allocation9], 0  ;;  %s16695_s21 = smov [#allocation10]   ;;  %s16696_s23 = smov [#allocation13]  }
   0x6   :  { %s43_s22 = sshll.u32 %s16695_s21, 4  ;;  %s65_s24 = sshll.u32 %s16696_s23, 4  ;;  %s44_s22 = int_to_ptr.vmem [resolvable:$true] %s43_s22  ;;  %s66_s24 = int_to_ptr.vmem [resolvable:$true] %s65_s24 }
   0x7   :  { %s16511_s25 = scalar_lea.vmem %s44_s22, 48  ;;  %s16515_s26 = scalar_lea.vmem %s44_s22, 64 }
   0x8   :  { %p16512_p0 = scmp.ne.s32.totalorder %s44_s22, %s16511_s25  ;;  %p16516_p1 = scmp.lt.s32.totalorder %s44_s22, %s44_s22 }
   0x9   :  { %p16517_p2 = scmp.lt.s32.totalorder %s16515_s26, %s16511_s25 }
   0xb   :  { %p16518_p3 = por %p16517_p2, %p16516_p1 }
   0xd   :  { %p16519_p4 = pnand %p16518_p3, %p16512_p0 }
   0xf   :  { %16522 = shalt.err (!%p16519_p4)
}
  0x10   :  { %46 = dma.hbm_to_vmem [thread:$0]  %s18553_s2, 48, %s44_s22, [#allocation11]  }
  0x11   :  { %s16531_s29 = scalar_lea.vmem %s66_s24, 48  ;;  %s16535_s30 = scalar_lea.vmem %s66_s24, 64 }
  0x12   :  { %p16532_p5 = scmp.ne.s32.totalorder %s66_s24, %s16531_s29  ;;  %p16536_p6 = scmp.lt.s32.totalorder %s66_s24, %s66_s24 }
  0x13   :  { %p16537_p7 = scmp.lt.s32.totalorder %s16535_s30, %s16531_s29 }
  0x15   :  { %p16538_p8 = por %p16537_p7, %p16536_p6 }
  0x17   :  { %p16539_p9 = pnand %p16538_p8, %p16532_p5 }
  0x19   :  { %16542 = shalt.err (!%p16539_p9)
}
  0x1a   :  { %68 = dma.hbm_to_vmem [thread:$0]  %s18555_s4, 48, %s66_s24, [#allocation14]  }
  0x1b   :  { %s16697_s15 = smov [#allocation16]   ;;  %s16698_s17 = smov [#allocation7]  }
  0x1c   :  { %s87_s16 = sshll.u32 %s16697_s15, 4  ;;  %s30_s18 = sshll.u32 %s16698_s17, 4  ;;  %s88_s16 = int_to_ptr.vmem [resolvable:$true] %s87_s16  ;;  %s31_s18 = int_to_ptr.vmem [resolvable:$true] %s30_s18 }
  0x1d   :  { %s16551_s19 = scalar_lea.vmem %s88_s16, 32  ;;  %p16556_p11 = scmp.lt.s32.totalorder %s88_s16, %s88_s16 }
  0x1e   :  { %p16552_p10 = scmp.ne.s32.totalorder %s88_s16, %s16551_s19  ;;  %p16557_p12 = scmp.lt.s32.totalorder %s16551_s19, %s16551_s19 }
  0x20   :  { %p16558_p13 = por %p16557_p12, %p16556_p11 }
  0x22   :  { %p16559_p0 = pnand %p16558_p13, %p16552_p10 }
  0x24   :  { %16562 = shalt.err (!%p16559_p0)
}
  0x25   :  { %90 = dma.hbm_to_vmem [thread:$0]  %s18557_s6, 32, %s88_s16, [#allocation17]  }
  0x26   :  { %s16571_s21 = scalar_lea.vmem %s31_s18, 49152  ;;  %p16576_p2 = scmp.lt.s32.totalorder %s31_s18, %s31_s18 }
  0x27   :  { %p16572_p1 = scmp.ne.s32.totalorder %s31_s18, %s16571_s21  ;;  %p16577_p3 = scmp.lt.s32.totalorder %s16571_s21, %s16571_s21 }
  0x29   :  { %p16578_p4 = por %p16577_p3, %p16576_p2 }
  0x2b   :  { %p16579_p5 = pnand %p16578_p4, %p16572_p1 }
  0x2d   :  { %16582 = shalt.err (!%p16579_p5)
}
  0x2e   :  { %s16699_s4 = smov 192   ;;  %s16700_s22 = smov 12  }
  0x2f   :  { %36 = dma.hbm_to_vmem [thread:$0]  %s18552_s1, 49152, %s31_s18, [#allocation8], %s16699_s4, %s16699_s4, %s16700_s22  }
  0x30   :  { %s16701_s25 = smov [#allocation12]   ;;  %s16702_s27 = smov [#allocation15]  }
  0x31   :  { %s52_s26 = sshll.u32 %s16701_s25, 4  ;;  %s74_s28 = sshll.u32 %s16702_s27, 4  ;;  %s53_s26 = int_to_ptr.vmem [resolvable:$true] %s52_s26  ;;  %s75_s28 = int_to_ptr.vmem [resolvable:$true] %s74_s28 }
  0x32   :  { %s16591_s6 = scalar_lea.vmem %s53_s26, 36864  ;;  %p16596_p7 = scmp.lt.s32.totalorder %s53_s26, %s53_s26 }
  0x33   :  { %p16592_p6 = scmp.ne.s32.totalorder %s53_s26, %s16591_s6  ;;  %p16597_p8 = scmp.lt.s32.totalorder %s16591_s6, %s16591_s6 }
  0x35   :  { %p16598_p9 = por %p16597_p8, %p16596_p7 }
  0x37   :  { %p16599_p10 = pnand %p16598_p9, %p16592_p6 }
  0x39   :  { %16602 = shalt.err (!%p16599_p10)
}
  0x3a   :  { %58 = dma.hbm_to_vmem [thread:$0]  %s18554_s3, 36864, %s53_s26, [#allocation11], %s16699_s4, %s16699_s4, %s16700_s22  }
  0x3b   :  { %s16611_s13 = scalar_lea.vmem %s75_s28, 61440  ;;  %p16616_p12 = scmp.lt.s32.totalorder %s75_s28, %s75_s28 }
  0x3c   :  { %p16612_p11 = scmp.ne.s32.totalorder %s75_s28, %s16611_s13  ;;  %p16617_p13 = scmp.lt.s32.totalorder %s16611_s13, %s16611_s13 }
  0x3e   :  { %p16618_p0 = por %p16617_p13, %p16616_p12 }
  0x40   :  { %p16619_p1 = pnand %p16618_p0, %p16612_p11 }
  0x42   :  { %16622 = shalt.err (!%p16619_p1)
}
  0x43   :  { %s16703_s1 = smov 128   ;;  %s16704_s14 = smov 8  }
  0x44   :  { %80 = dma.hbm_to_vmem [thread:$0]  %s18556_s5, 61440, %s75_s28, [#allocation14], %s16703_s1, %s16703_s1, %s16704_s14  }
  0x45   :  { %s16705_s17 = smov [#allocation18]  }
  0x46   :  { %s96_s18 = sshll.u32 %s16705_s17, 4  ;;  %s97_s18 = int_to_ptr.vmem [resolvable:$true] %s96_s18 }
  0x47   :  { %s16631_s19 = scalar_lea.vmem %s97_s18, 2048  ;;  %p16636_p3 = scmp.lt.s32.totalorder %s97_s18, %s97_s18 }
  0x48   :  { %p16632_p2 = scmp.ne.s32.totalorder %s97_s18, %s16631_s19  ;;  %p16637_p4 = scmp.lt.s32.totalorder %s16631_s19, %s16631_s19 }
  0x4a   :  { %p16638_p5 = por %p16637_p4, %p16636_p3 }
  0x4c   :  { %p16639_p6 = pnand %p16638_p5, %p16632_p2 }
  0x4e   :  { %16642 = shalt.err (!%p16639_p6)
}
  0x4f   :  { %s16706_s3 = smov 64   ;;  %s16707_s2 = smov 4  }
  0x50   :  { %102 = dma.hbm_to_vmem [thread:$0]  %s18558_s7, 2048, %s97_s18, [#allocation17], %s16706_s3, %s16706_s3, %s16707_s2  }
  0x51   :  { %s16708_s4 = smov [#allocation19]  }
  0x52   :  { %s109_s22 = sshll.u32 %s16708_s4, 4  ;;  %s110_s22 = int_to_ptr.vmem [resolvable:$true] %s109_s22 }
  0x53   :  { %s16651_s5 = scalar_lea.vmem %s110_s22, 16  ;;  %s16655_s23 = scalar_lea.vmem %s110_s22, 32 }
  0x54   :  { %p16652_p7 = scmp.ne.s32.totalorder %s110_s22, %s16651_s5  ;;  %p16656_p8 = scmp.lt.s32.totalorder %s110_s22, %s110_s22 }
  0x55   :  { %p16657_p9 = scmp.lt.s32.totalorder %s16655_s23, %s16651_s5 }
  0x57   :  { %p16658_p10 = por %p16657_p9, %p16656_p8 }
  0x59   :  { %p16659_p11 = pnand %p16658_p10, %p16652_p7 }
  0x5b   :  { %16662 = shalt.err (!%p16659_p11)
}
  0x5c   :  { %112 = dma.hbm_to_vmem [thread:$0]  %s18559_s8, 16, %s110_s22, [#allocation20]  }
  0x5d   :  { %16683 = dma.done.wait [#allocation8], 49152  }
  0x5e   :  { %16684 = vsyncadd [#allocation8], 4294918144 }
  0x5f   :  { %16685 = dma.done.wait [#allocation11], 36912  }
  0x60   :  { %16686 = vsyncadd [#allocation11], 4294930384 }
  0x61   :  { %16687 = dma.done.wait [#allocation14], 61488  }
  0x62   :  { %16688 = vsyncadd [#allocation14], 4294905808 }
  0x63   :  { %16689 = dma.done.wait [#allocation17], 2080  }
  0x64   :  { %16690 = vsyncadd [#allocation17], 4294965216 }
  0x65   :  { %16691 = dma.done.wait [#allocation20], 16  }
  0x66   :  { %16692 = vsyncadd [#allocation20], 4294967280  ;;  %v16709_v0 = vmov 0   ;;  %v14822_v1 = vld [vmem:[#allocation7 + $0xac] ss:$12 sps:$4 sm:$0xff]   ;;  %vm211_vm1 = vcmask 1041408  }
  0x67   :  { %144 = vst [vmem:[#allocation2] sm:$0xff] %v16709_v0  ;;  %152 = vst [vmem:[#allocation2 + $0x40] sm:$0xff] %v16709_v0  ;;  %14820 = vset.pattern.permute.xlu1 %v16709_v0  ;;  %14821 = vset.pattern.permute.xlu0 %v16709_v0  ;;  %v14824_v2 = vld [vmem:[#allocation7 + $0x22c] ss:$12 sps:$4 sm:$0xff]   ;;  %v14826_v3 = vld [vmem:[#allocation7 + $0xa8] ss:$12 sps:$4 sm:$0xff]  }
  0x68   :  { %145 = vst [vmem:[#allocation2 + $0x8] sm:$0xff] %v16709_v0  ;;  %146 = vst [vmem:[#allocation2 + $0x10] sm:$0xff] %v16709_v0  ;;  %3926 = vmatprep.subr.bf16.mxu0 %v14822_v1  ;;  %v14827_v4 = vld [vmem:[#allocation7 + $0x228] ss:$12 sps:$4 sm:$0xff]   ;;  %3999 = vmatprep.subr.bf16.mxu1 %v14824_v2  ;;  %v14832_v7 = vld [vmem:[#allocation7 + $0x90] ss:$12 sps:$4 sm:$0xff]  }
  0x69   :  { %147 = vst [vmem:[#allocation2 + $0x18] sm:$0xff] %v16709_v0  ;;  %148 = vst [vmem:[#allocation2 + $0x20] sm:$0xff] %v16709_v0  ;;  %v14828_v5 = vld [vmem:[#allocation7 + $0x94] ss:$12 sps:$4 sm:$0xff]   ;;  %3927 = vmatpush1.bf16.msra.mxu0 %v14826_v3  ;;  %4000 = vmatpush1.bf16.msra.mxu1 %v14827_v4  ;;  %v14833_v8 = vld [vmem:[#allocation7 + $0x210] ss:$12 sps:$4 sm:$0xff]  }
  0x6a   :  { %149 = vst [vmem:[#allocation2 + $0x28] sm:$0xff] %v16709_v0  ;;  %150 = vst [vmem:[#allocation2 + $0x30] sm:$0xff] %v16709_v0  ;;  %v14830_v6 = vld [vmem:[#allocation7 + $0x214] ss:$12 sps:$4 sm:$0xff]   ;;  %3928 = vmatprep.subr.bf16.mxu0 %v14828_v5  ;;  %v14834_v9 = vld [vmem:[#allocation7 + $0x7c] ss:$12 sps:$4 sm:$0xff]  }
  0x6b   :  { %151 = vst [vmem:[#allocation2 + $0x38] sm:$0xff] %v16709_v0  ;;  %153 = vst [vmem:[#allocation2 + $0x48] sm:$0xff] %v16709_v0  ;;  %4001 = vmatprep.subr.bf16.mxu1 %v14830_v6  ;;  %v14836_v10 = vld [vmem:[#allocation7 + $0x1fc] ss:$12 sps:$4 sm:$0xff]   ;;  %v14838_v11 = vld [vmem:[#allocation7 + $0x78] ss:$12 sps:$4 sm:$0xff]  }
  0x6c   :  { %154 = vst [vmem:[#allocation2 + $0x50] sm:$0xff] %v16709_v0  ;;  %155 = vst [vmem:[#allocation2 + $0x58] sm:$0xff] %v16709_v0  ;;  %v14839_v12 = vld [vmem:[#allocation7 + $0x1f8] ss:$12 sps:$4 sm:$0xff]   ;;  %v14844_v15 = vld [vmem:[#allocation7 + $0x60] ss:$12 sps:$4 sm:$0xff]  }
  0x6d   :  { %156 = vst [vmem:[#allocation2 + $0x60] sm:$0xff] %v16709_v0  ;;  %157 = vst [vmem:[#allocation2 + $0x68] sm:$0xff] %v16709_v0  ;;  %3929 = vmatpush1.bf16.msra.mxu0 %v14832_v7  ;;  %4002 = vmatpush1.bf16.msra.mxu1 %v14833_v8  ;;  %v14840_v13 = vld [vmem:[#allocation7 + $0x64] ss:$12 sps:$4 sm:$0xff]   ;;  %v14845_v16 = vld [vmem:[#allocation7 + $0x1e0] ss:$12 sps:$4 sm:$0xff]  }
  0x6e   :  { %158 = vst [vmem:[#allocation2 + $0x70] sm:$0xff] %v16709_v0  ;;  %159 = vst [vmem:[#allocation2 + $0x78] sm:$0xff] %v16709_v0  ;;  %3930 = vmatprep.subr.bf16.mxu0 %v14834_v9  ;;  %4003 = vmatprep.subr.bf16.mxu1 %v14836_v10  ;;  %v14842_v14 = vld [vmem:[#allocation7 + $0x1e4] ss:$12 sps:$4 sm:$0xff]   ;;  %v14846_v17 = vld [vmem:[#allocation7 + $0x4c] ss:$12 sps:$4 sm:$0xff]  }
  0x6f   :  { %160 = vst [vmem:[#allocation2 + $0x80] sm:$0xff] %v16709_v0  ;;  %161 = vst [vmem:[#allocation2 + $0x88] sm:$0xff] %v16709_v0  ;;  %v14848_v18 = vld [vmem:[#allocation7 + $0x1cc] ss:$12 sps:$4 sm:$0xff]   ;;  %v14850_v19 = vld [vmem:[#allocation7 + $0x48] ss:$12 sps:$4 sm:$0xff]  }
  0x70   :  { %162 = vst [vmem:[#allocation2 + $0x90] sm:$0xff] %v16709_v0  ;;  %163 = vst [vmem:[#allocation2 + $0x98] sm:$0xff] %v16709_v0  ;;  %v14851_v20 = vld [vmem:[#allocation7 + $0x1c8] ss:$12 sps:$4 sm:$0xff]   ;;  %v14856_v23 = vld [vmem:[#allocation7 + $0x30] ss:$12 sps:$4 sm:$0xff]  }
  0x71   :  { %164 = vst [vmem:[#allocation2 + $0xa0] sm:$0xff] %v16709_v0  ;;  %165 = vst [vmem:[#allocation2 + $0xa8] sm:$0xff] %v16709_v0  ;;  %3931 = vmatpush1.bf16.msra.mxu0 %v14838_v11  ;;  %4004 = vmatpush1.bf16.msra.mxu1 %v14839_v12  ;;  %v14852_v21 = vld [vmem:[#allocation7 + $0x34] ss:$12 sps:$4 sm:$0xff]   ;;  %v14857_v24 = vld [vmem:[#allocation7 + $0x1b0] ss:$12 sps:$4 sm:$0xff]  }
  0x72   :  { %166 = vst [vmem:[#allocation2 + $0xb0] sm:$0xff] %v16709_v0  ;;  %167 = vst [vmem:[#allocation2 + $0xb8] sm:$0xff] %v16709_v0  ;;  %3932 = vmatprep.subr.bf16.mxu0 %v14840_v13  ;;  %4005 = vmatprep.subr.bf16.mxu1 %v14842_v14  ;;  %v14854_v22 = vld [vmem:[#allocation7 + $0x1b4] ss:$12 sps:$4 sm:$0xff]   ;;  %v14858_v25 = vld [vmem:[#allocation7 + $0x1c] ss:$12 sps:$4 sm:$0xff]  }
  0x73   :  { %168 = vst [vmem:[#allocation2 + $0xc0] sm:$0xff] %v16709_v0  ;;  %169 = vst [vmem:[#allocation2 + $0xc8] sm:$0xff] %v16709_v0  ;;  %v14860_v26 = vld [vmem:[#allocation7 + $0x19c] ss:$12 sps:$4 sm:$0xff]   ;;  %v14862_v27 = vld [vmem:[#allocation7 + $0x18] ss:$12 sps:$4 sm:$0xff]  }
  0x74   :  { %170 = vst [vmem:[#allocation2 + $0xd0] sm:$0xff] %v16709_v0  ;;  %171 = vst [vmem:[#allocation2 + $0xd8] sm:$0xff] %v16709_v0  ;;  %v14863_v28 = vld [vmem:[#allocation7 + $0x198] ss:$12 sps:$4 sm:$0xff]   ;;  %v14868_v31 = vld [vmem:[#allocation7] ss:$12 sps:$4 sm:$0xff]  }
  0x75   :  { %172 = vst [vmem:[#allocation2 + $0xe0] sm:$0xff] %v16709_v0  ;;  %173 = vst [vmem:[#allocation2 + $0xe8] sm:$0xff] %v16709_v0  ;;  %3933 = vmatpush1.bf16.msra.mxu0 %v14844_v15  ;;  %4006 = vmatpush1.bf16.msra.mxu1 %v14845_v16  ;;  %v14864_v29 = vld [vmem:[#allocation7 + $0x4] ss:$12 sps:$4 sm:$0xff]   ;;  %v14869_v32 = vld [vmem:[#allocation7 + $0x180] ss:$12 sps:$4 sm:$0xff]  }
  0x76   :  { %174 = vst [vmem:[#allocation2 + $0xf0] sm:$0xff] %v16709_v0  ;;  %175 = vst [vmem:[#allocation2 + $0xf8] sm:$0xff] %v16709_v0  ;;  %3934 = vmatprep.subr.bf16.mxu0 %v14846_v17  ;;  %4007 = vmatprep.subr.bf16.mxu1 %v14848_v18  ;;  %v14866_v30 = vld [vmem:[#allocation7 + $0x184] ss:$12 sps:$4 sm:$0xff]   ;;  %v14870_v33 = vld [vmem:[#allocation7 + $0x16c] ss:$12 sps:$4 sm:$0xff]  }
  0x77   :  { %176 = vst [vmem:[#allocation2 + $0x100] sm:$0xff] %v16709_v0  ;;  %177 = vst [vmem:[#allocation2 + $0x108] sm:$0xff] %v16709_v0  ;;  %v14872_v34 = vld [vmem:[#allocation7 + $0x2ec] ss:$12 sps:$4 sm:$0xff]   ;;  %v14874_v35 = vld [vmem:[#allocation7 + $0x168] ss:$12 sps:$4 sm:$0xff]  }
  0x78   :  { %178 = vst [vmem:[#allocation2 + $0x110] sm:$0xff] %v16709_v0  ;;  %179 = vst [vmem:[#allocation2 + $0x118] sm:$0xff] %v16709_v0  ;;  %v14875_v36 = vld [vmem:[#allocation7 + $0x2e8] ss:$12 sps:$4 sm:$0xff]   ;;  %v14880_v39 = vld [vmem:[#allocation7 + $0x150] ss:$12 sps:$4 sm:$0xff]  }
  0x79   :  { %180 = vst [vmem:[#allocation2 + $0x120] sm:$0xff] %v16709_v0  ;;  %181 = vst [vmem:[#allocation2 + $0x128] sm:$0xff] %v16709_v0  ;;  %3935 = vmatpush1.bf16.msra.mxu0 %v14850_v19  ;;  %4008 = vmatpush1.bf16.msra.mxu1 %v14851_v20  ;;  %v14876_v37 = vld [vmem:[#allocation7 + $0x154] ss:$12 sps:$4 sm:$0xff]   ;;  %vm212_vm0 = vsmask.f32 1280 }
  0x7a   :  { %182 = vst [vmem:[#allocation2 + $0x130] sm:$0xff] %v16709_v0  ;;  %183 = vst [vmem:[#allocation2 + $0x138] sm:$0xff] %v16709_v0  ;;  %3936 = vmatprep.subr.bf16.mxu0 %v14852_v21  ;;  %4009 = vmatprep.subr.bf16.mxu1 %v14854_v22  ;;  %v14878_v38 = vld [vmem:[#allocation7 + $0x2d4] ss:$12 sps:$4 sm:$0xff]   ;;  %v14881_v40 = vld [vmem:[#allocation7 + $0x2d0] ss:$12 sps:$4 sm:$0xff]  }
  0x7b   :  { %184 = vst [vmem:[#allocation2 + $0x140] sm:$0xff] %v16709_v0  ;;  %185 = vst [vmem:[#allocation2 + $0x148] sm:$0xff] %v16709_v0  ;;  %v14882_v41 = vld [vmem:[#allocation7 + $0x13c] ss:$12 sps:$4 sm:$0xff]   ;;  %v14886_v43 = vld [vmem:[#allocation7 + $0x138] ss:$12 sps:$4 sm:$0xff]  }
  0x7c   :  { %186 = vst [vmem:[#allocation2 + $0x150] sm:$0xff] %v16709_v0  ;;  %187 = vst [vmem:[#allocation2 + $0x158] sm:$0xff] %v16709_v0  ;;  %v14884_v42 = vld [vmem:[#allocation7 + $0x2bc] ss:$12 sps:$4 sm:$0xff]   ;;  %v14887_v44 = vld [vmem:[#allocation7 + $0x2b8] ss:$12 sps:$4 sm:$0xff]  }
  0x7d   :  { %188 = vst [vmem:[#allocation2 + $0x160] sm:$0xff] %v16709_v0  ;;  %189 = vst [vmem:[#allocation2 + $0x168] sm:$0xff] %v16709_v0  ;;  %3937 = vmatpush1.bf16.msra.mxu0 %v14856_v23  ;;  %4010 = vmatpush1.bf16.msra.mxu1 %v14857_v24  ;;  %v14888_v46 = vld [vmem:[#allocation7 + $0x124] ss:$12 sps:$4 sm:$0xff]   ;;  %v14892_v48 = vld [vmem:[#allocation7 + $0x120] ss:$12 sps:$4 sm:$0xff]  }
  0x7e   :  { %190 = vst [vmem:[#allocation2 + $0x170] sm:$0xff] %v16709_v0  ;;  %191 = vst [vmem:[#allocation2 + $0x178] sm:$0xff] %v16709_v0  ;;  %3938 = vmatprep.subr.bf16.mxu0 %v14858_v25  ;;  %4011 = vmatprep.subr.bf16.mxu1 %v14860_v26  ;;  %v14890_v47 = vld [vmem:[#allocation7 + $0x2a4] ss:$12 sps:$4 sm:$0xff]   ;;  %v14893_v49 = vld [vmem:[#allocation7 + $0x2a0] ss:$12 sps:$4 sm:$0xff]  }
  0x7f   :  { %192 = vst [vmem:[#allocation2 + $0x180] sm:$0xff] %v16709_v0  ;;  %193 = vst [vmem:[#allocation2 + $0x188] sm:$0xff] %v16709_v0  ;;  %v208_v50 = vld [vmem:[%s18551_s0] sm:$0xf]  ;;  %v14894_v51 = vld [vmem:[#allocation7 + $0x10c] ss:$12 sps:$4 sm:$0xff]  }
  0x80   :  { %194 = vst [vmem:[#allocation2 + $0x190] sm:$0xff] %v16709_v0  ;;  %195 = vst [vmem:[#allocation2 + $0x198] sm:$0xff] %v16709_v0  ;;  %v14896_v52 = vld [vmem:[#allocation7 + $0x28c] ss:$12 sps:$4 sm:$0xff]   ;;  %v209_v53 = vld [vmem:[%s18551_s0 + $0x4] sm:$0x3] }
  0x81   :  { %196 = vst [vmem:[#allocation2 + $0x1a0] sm:$0xff] %v16709_v0  ;;  %197 = vst [vmem:[#allocation2 + $0x1a8] sm:$0xff] %v16709_v0  ;;  %3939 = vmatpush1.bf16.msra.mxu0 %v14862_v27  ;;  %4012 = vmatpush1.bf16.msra.mxu1 %v14863_v28  ;;  %v214_v54 = vld [vmem:[#allocation2 + $0x40] sm:$0x3]  ;;  %v12818_v57 = vld [vmem:[%s18551_s0 + $0x44] sm:$0x3] }
  0x82   :  { %198 = vst [vmem:[#allocation2 + $0x1b0] sm:$0xff] %v16709_v0  ;;  %199 = vst [vmem:[#allocation2 + $0x1b8] sm:$0xff] %v16709_v0  ;;  %3940 = vmatprep.subr.bf16.mxu0 %v14864_v29  ;;  %4013 = vmatprep.subr.bf16.mxu1 %v14866_v30  ;;  %v12817_v55 = vld [vmem:[%s18551_s0 + $0x40] sm:$0xf]  ;;  %v228_v58 = vld [vmem:[#allocation2 + $0x44] sm:$0x3] }
  0x83   :  { %200 = vst [vmem:[#allocation2 + $0x1c0] sm:$0xff] %v16709_v0  ;;  %201 = vst [vmem:[#allocation2 + $0x1c8] sm:$0xff] %v16709_v0  ;;  %v12821_v59 = vld [vmem:[%s18551_s0 + $0x8] sm:$0xf]  ;;  %v12822_v61 = vld [vmem:[%s18551_s0 + $0xc] sm:$0x3] }
  0x84   :  { %202 = vst [vmem:[#allocation2 + $0x1d0] sm:$0xff] %v16709_v0  ;;  %203 = vst [vmem:[#allocation2 + $0x1d8] sm:$0xff] %v16709_v0  ;;  %v242_v62 = vld [vmem:[#allocation2 + $0x48] sm:$0x3]  ;;  %v12826_v1 = vld [vmem:[%s18551_s0 + $0x4c] sm:$0x3] }
  0x85   :  { %204 = vst [vmem:[#allocation2 + $0x1e0] sm:$0xff] %v16709_v0  ;;  %205 = vst [vmem:[#allocation2 + $0x1e8] sm:$0xff] %v16709_v0  ;;  %3941 = vmatpush1.bf16.msra.mxu0 %v14868_v31  ;;  %4014 = vmatpush1.bf16.msra.mxu1 %v14869_v32  ;;  %v12825_v63 = vld [vmem:[%s18551_s0 + $0x48] sm:$0xf]  ;;  %v256_v2 = vld [vmem:[#allocation2 + $0x4c] sm:$0x3] }
  0x86   :  { %206 = vst [vmem:[#allocation2 + $0x1f0] sm:$0xff] %v16709_v0  ;;  %207 = vst [vmem:[#allocation2 + $0x1f8] sm:$0xff] %v16709_v0  ;;  %3942 = vmatprep.subr.bf16.mxu0 %v14870_v33  ;;  %4015 = vmatprep.subr.bf16.mxu1 %v14872_v34  ;;  %v14898_v3 = vld [vmem:[#allocation7 + $0x108] ss:$12 sps:$4 sm:$0xff]   ;;  %v14904_v8 = vld [vmem:[#allocation7 + $0xf0] ss:$12 sps:$4 sm:$0xff]  }
  0x87   :  { %5151 = vst [vmem:[#allocation4 + $0x8] sm:$0xff] %v16709_v0  ;;  %5152 = vst [vmem:[#allocation4 + $0x10] sm:$0xff] %v16709_v0  ;;  %v14899_v4 = vld [vmem:[#allocation7 + $0x288] ss:$12 sps:$4 sm:$0xff]   ;;  %v14905_v9 = vld [vmem:[#allocation7 + $0x270] ss:$12 sps:$4 sm:$0xff]  }
  0x88   :  { %5154 = vst [vmem:[#allocation4 + $0x20] sm:$0xff] %v16709_v0  ;;  %5155 = vst [vmem:[#allocation4 + $0x28] sm:$0xff] %v16709_v0  ;;  %v14900_v6 = vld [vmem:[#allocation7 + $0xf4] ss:$12 sps:$4 sm:$0xff]   ;;  %v14906_v11 = vld [vmem:[#allocation7 + $0xdc] ss:$12 sps:$4 sm:$0xff]  }
  0x89   :  { %5156 = vst [vmem:[#allocation4 + $0x30] sm:$0xff] %v16709_v0  ;;  %5157 = vst [vmem:[#allocation4 + $0x38] sm:$0xff] %v16709_v0  ;;  %3943 = vmatpush2.bf16.msra.mxu0 %v14874_v35  ;;  %4016 = vmatpush2.bf16.msra.mxu1 %v14875_v36  ;;  %v14902_v7 = vld [vmem:[#allocation7 + $0x274] ss:$12 sps:$4 sm:$0xff]   ;;  %v14908_v12 = vld [vmem:[#allocation7 + $0x25c] ss:$12 sps:$4 sm:$0xff]  }
  0x8a   :  { %5158 = vst [vmem:[#allocation4 + $0x40] sm:$0xff] %v16709_v0  ;;  %5159 = vst [vmem:[#allocation4 + $0x48] sm:$0xff] %v16709_v0  ;;  %3944 = vmatprep.subr.bf16.mxu0 %v14876_v37  ;;  %4017 = vmatprep.subr.bf16.mxu1 %v14878_v38  ;;  %v14910_v16 = vld [vmem:[#allocation7 + $0xd8] ss:$12 sps:$4 sm:$0xff]   ;;  %v14916_v22 = vld [vmem:[#allocation7 + $0xc0] ss:$12 sps:$4 sm:$0xff]  }
  0x8b   :  { %5160 = vst [vmem:[#allocation4 + $0x50] sm:$0xff] %v16709_v0  ;;  %5161 = vst [vmem:[#allocation4 + $0x58] sm:$0xff] %v16709_v0  ;;  %v14911_v17 = vld [vmem:[#allocation7 + $0x258] ss:$12 sps:$4 sm:$0xff]   ;;  %v14917_v23 = vld [vmem:[#allocation7 + $0x240] ss:$12 sps:$4 sm:$0xff]  }
  0x8c   :  { %5163 = vst [vmem:[#allocation4 + $0x68] sm:$0xff] %v16709_v0  ;;  %5164 = vst [vmem:[#allocation4 + $0x70] sm:$0xff] %v16709_v0  ;;  %v14912_v19 = vld [vmem:[#allocation7 + $0xc4] ss:$12 sps:$4 sm:$0xff]   ;;  %v14920_v24 = vld [vmem:[#allocation7 + $0x3ac] ss:$12 sps:$4 sm:$0xff]  }
  0x8d   :  { %5166 = vst [vmem:[#allocation4 + $0x80] sm:$0xff] %v16709_v0  ;;  %5167 = vst [vmem:[#allocation4 + $0x88] sm:$0xff] %v16709_v0  ;;  %3945 = vmatpush2.bf16.msra.mxu0 %v14880_v39  ;;  %4018 = vmatpush2.bf16.msra.mxu1 %v14881_v40  ;;  %v14914_v21 = vld [vmem:[#allocation7 + $0x244] ss:$12 sps:$4 sm:$0xff]   ;;  %v14923_v25 = vld [vmem:[#allocation7 + $0x52c] ss:$12 sps:$4 sm:$0xff]  }
  0x8e   :  { %5168 = vst [vmem:[#allocation4 + $0x90] sm:$0xff] %v16709_v0  ;;  %5169 = vst [vmem:[#allocation4 + $0x98] sm:$0xff] %v16709_v0  ;;  %3946 = vmatprep.subr.bf16.mxu0 %v14882_v41  ;;  %4019 = vmatprep.subr.bf16.mxu1 %v14884_v42  ;;  %v14918_v28 = vld [vmem:[#allocation7 + $0x3a8] ss:$12 sps:$4 sm:$0xff]   ;;  %v14924_v32 = vld [vmem:[#allocation7 + $0x390] ss:$12 sps:$4 sm:$0xff]  }
  0x8f   :  { %5170 = vst [vmem:[#allocation4 + $0xa0] sm:$0xff] %v16709_v0  ;;  %5171 = vst [vmem:[#allocation4 + $0xa8] sm:$0xff] %v16709_v0  ;;  %v14921_v29 = vld [vmem:[#allocation7 + $0x528] ss:$12 sps:$4 sm:$0xff]   ;;  %v14927_v33 = vld [vmem:[#allocation7 + $0x510] ss:$12 sps:$4 sm:$0xff]  }
  0x90   :  { %5172 = vst [vmem:[#allocation4 + $0xb0] sm:$0xff] %v16709_v0  ;;  %5173 = vst [vmem:[#allocation4 + $0xb8] sm:$0xff] %v16709_v0  ;;  %v14926_v30 = vld [vmem:[#allocation7 + $0x394] ss:$12 sps:$4 sm:$0xff]   ;;  %v14932_v34 = vld [vmem:[#allocation7 + $0x37c] ss:$12 sps:$4 sm:$0xff]  }
  0x91   :  { %vm16890_vm2 = vmand %vm211_vm1, %vm212_vm0  ;;  %210 = vst [vmem:[#allocation2] sm:$0xf] %v208_v50  ;;  %3947 = vmatpush2.bf16.msra.mxu0 %v14886_v43  ;;  %4020 = vmatpush2.bf16.msra.mxu1 %v14887_v44  ;;  %v14929_v31 = vld [vmem:[#allocation7 + $0x514] ss:$12 sps:$4 sm:$0xff]   ;;  %v14935_v35 = vld [vmem:[#allocation7 + $0x4fc] ss:$12 sps:$4 sm:$0xff]  }
  0x92   :  { %v215_v56 = vsel %vm16890_vm2, %v209_v53, %v214_v54  ;;  %227 = vst [vmem:[#allocation2 + $0x4] sm:$0xf] %v12817_v55  ;;  %3948 = vmatprep.subr.bf16.mxu0 %v14888_v46  ;;  %4021 = vmatprep.subr.bf16.mxu1 %v14890_v47  ;;  %v229_v60 = vsel %vm16890_vm2, %v12818_v57, %v228_v58  ;;  %241 = vst [vmem:[#allocation2 + $0x8] sm:$0xf] %v12821_v59  ;;  %v14930_v36 = vld [vmem:[#allocation7 + $0x378] ss:$12 sps:$4 sm:$0xff]  }
  0x93   :  { %216 = vst [vmem:[#allocation2 + $0x40] sm:$0x3] %v215_v56  ;;  %230 = vst [vmem:[#allocation2 + $0x44] sm:$0x3] %v229_v60  ;;  %v243_v0 = vsel %vm16890_vm2, %v12822_v61, %v242_v62  ;;  %v257_v5 = vsel %vm16890_vm2, %v12826_v1, %v256_v2  ;;  %v14933_v37 = vld [vmem:[#allocation7 + $0x4f8] ss:$12 sps:$4 sm:$0xff]  }
  0x94   :  { %255 = vst [vmem:[#allocation2 + $0xc] sm:$0xf] %v12825_v63  ;;  %244 = vst [vmem:[#allocation2 + $0x48] sm:$0x3] %v243_v0  ;;  %v14938_v38 = vld [vmem:[#allocation7 + $0x364] ss:$12 sps:$4 sm:$0xff]  }
  0x95   :  { %3949 = vmatpush2.bf16.msra.mxu0 %v14892_v48  ;;  %4022 = vmatpush2.bf16.msra.mxu1 %v14893_v49  ;;  %258 = vst [vmem:[#allocation2 + $0x4c] sm:$0x3] %v257_v5  ;;  %v14941_v39 = vld [vmem:[#allocation7 + $0x4e4] ss:$12 sps:$4 sm:$0xff]   ;;  %v12816_v41 = vld [vmem:[%s18551_s0 + $0x24] sm:$0x3] }
  0x96   :  { %3950 = vmatprep.subr.bf16.mxu0 %v14894_v51  ;;  %4023 = vmatprep.subr.bf16.mxu1 %v14896_v52  ;;  %v12815_v40 = vld [vmem:[%s18551_s0 + $0x20] sm:$0xf]  ;;  %v12820_v46 = vld [vmem:[%s18551_s0 + $0x64] sm:$0x3]  ;;  %v14936_v48 = vld [vmem:[#allocation7 + $0x360] ss:$12 sps:$4 sm:$0xff]  }
  0x97   :  { %v221_v42 = vld [vmem:[#allocation2 + $0xc0] sm:$0x3]  ;;  %220 = vst [vmem:[#allocation2 + $0x80] sm:$0xf] %v12815_v40  ;;  %v235_v47 = vld [vmem:[#allocation2 + $0xc4] sm:$0x3] }
  0x98   :  { %v222_v43 = vsel %vm16890_vm2, %v12816_v41, %v221_v42  ;;  %v12819_v44 = vld [vmem:[%s18551_s0 + $0x60] sm:$0xf]  ;;  %v14939_v49 = vld [vmem:[#allocation7 + $0x4e0] ss:$12 sps:$4 sm:$0xff]   ;;  %v236_v50 = vsel %vm16890_vm2, %v12820_v46, %v235_v47  ;;  %v12823_v51 = vld [vmem:[%s18551_s0 + $0x28] sm:$0xf] }
  0x99   :  { %v965_v10 = vld [vmem:[#allocation2] sm:$0xff]  ;;  %3951 = vmatpush2.bf16.msra.mxu0 %v14898_v3  ;;  %4024 = vmatpush2.bf16.msra.mxu1 %v14899_v4  ;;  %223 = vst [vmem:[#allocation2 + $0xc0] sm:$0x3] %v222_v43  ;;  %234 = vst [vmem:[#allocation2 + $0x84] sm:$0xf] %v12819_v44  ;;  %vm8186_vm6 = vcmask 1040384  }
  0x9a   :  { %3952 = vmatprep.subr.bf16.mxu0 %v14900_v6  ;;  %4025 = vmatprep.subr.bf16.mxu1 %v14902_v7  ;;  %v973_v13 = vld [vmem:[#allocation2 + $0x40] sm:$0xff]  ;;  %v12824_v52 = vld [vmem:[%s18551_s0 + $0x2c] sm:$0x3]  ;;  %v249_v53 = vld [vmem:[#allocation2 + $0xc8] sm:$0x3]  ;;  %vm8189_vm8 = vcmask 1041409  }
  0x9b   :  { %v966_v14 = vld [vmem:[#allocation2 + $0x8] sm:$0xff]  ;;  %v16926_v15 = vcombine.high %v965_v10, %v973_v13  ;;  %v16932_v26 = vcombine.low %v965_v10, %v973_v13  ;;  %237 = vst [vmem:[#allocation2 + $0xc4] sm:$0x3] %v236_v50  ;;  %248 = vst [vmem:[#allocation2 + $0x88] sm:$0xf] %v12823_v51  ;;  %v250_v54 = vsel %vm16890_vm2, %v12824_v52, %v249_v53  ;;  %vm8192_vm11 = vcmask 1042434  }
  0x9c   :  { %v974_v18 = vld [vmem:[#allocation2 + $0x48] sm:$0xff]  ;;  %251 = vst [vmem:[#allocation2 + $0xc8] sm:$0x3] %v250_v54  ;;  %v14942_v61 = vld [vmem:[#allocation7 + $0x348] ss:$12 sps:$4 sm:$0xff]   ;;  %vm18318_vm10 = vmand %vm8189_vm8, %vm212_vm0 }
  0x9d   :  { %3953 = vmatpush2.bf16.msra.mxu0 %v14904_v8  ;;  %4026 = vmatpush2.bf16.msra.mxu1 %v14905_v9  ;;  %v16928_v20 = vcombine.high %v966_v14, %v974_v18  ;;  %v16934_v27 = vcombine.low %v966_v14, %v974_v18  ;;  %v12827_v55 = vld [vmem:[%s18551_s0 + $0x68] sm:$0xf]  ;;  %v12828_v56 = vld [vmem:[%s18551_s0 + $0x6c] sm:$0x3]  ;;  %v14945_v62 = vld [vmem:[#allocation7 + $0x4c8] ss:$12 sps:$4 sm:$0xff]  }
  0x9e   :  { %3954 = vmatprep.subr.bf16.mxu0 %v14906_v11  ;;  %4027 = vmatprep.subr.bf16.mxu1 %v14908_v12  ;;  %v263_v57 = vld [vmem:[#allocation2 + $0xcc] sm:$0x3]  ;;  %v14944_v58 = vld [vmem:[#allocation7 + $0x34c] ss:$12 sps:$4 sm:$0xff]   ;;  %262 = vst [vmem:[#allocation2 + $0x8c] sm:$0xf] %v12827_v55 }
  0x9f   :  { %3958 = vmatprep.mubr.bf16.mxu0 %v16926_v15  ;;  %4031 = vmatprep.mubr.bf16.mxu1 %v16928_v20  ;;  %v264_v59 = vsel %vm16890_vm2, %v12828_v56, %v263_v57  ;;  %v14947_v60 = vld [vmem:[#allocation7 + $0x4cc] ss:$12 sps:$4 sm:$0xff]   ;;  %v14950_v63 = vld [vmem:[#allocation7 + $0x334] ss:$12 sps:$4 sm:$0xff]   ;;  %v14948_v3 = vld [vmem:[#allocation7 + $0x330] ss:$12 sps:$4 sm:$0xff]  }
  0xa0   :  { %265 = vst [vmem:[#allocation2 + $0xcc] sm:$0x3] %v264_v59  ;;  %v14953_v0 = vld [vmem:[#allocation7 + $0x4b4] ss:$12 sps:$4 sm:$0xff]   ;;  %v14951_v4 = vld [vmem:[#allocation7 + $0x4b0] ss:$12 sps:$4 sm:$0xff]  }
  0xa1   :  { %3955 = vmatpush2.bf16.msra.mxu0 %v14910_v16  ;;  %4028 = vmatpush2.bf16.msra.mxu1 %v14911_v17  ;;  %v981_v1 = vld [vmem:[#allocation2 + $0x80] sm:$0xff]  ;;  %v14956_v8 = vld [vmem:[#allocation7 + $0x31c] ss:$12 sps:$4 sm:$0xff]   ;;  %vm330_vm3 = vsmask.f32 3328 }
  0xa2   :  { %3956 = vmatprep.subr.bf16.mxu0 %v14912_v19  ;;  %4029 = vmatprep.subr.bf16.mxu1 %v14914_v21  ;;  %v12875_v2 = vld [vmem:[%s18551_s0 + $0x80] sm:$0xf]  ;;  %v12876_v6 = vld [vmem:[%s18551_s0 + $0x84] sm:$0x3]  ;;  %v14959_v9 = vld [vmem:[#allocation7 + $0x49c] ss:$12 sps:$4 sm:$0xff]  }
  0xa3   :  { %v989_v5 = vld [vmem:[#allocation2 + $0xc0] sm:$0xff]  ;;  %592 = vst [vmem:[#allocation2 + $0x100] sm:$0xf] %v12875_v2  ;;  %v12883_v19 = vld [vmem:[%s18551_s0 + $0x88] sm:$0xf] }
  0xa4   :  { %v593_v7 = vld [vmem:[#allocation2 + $0x140] sm:$0x3]  ;;  %v16976_v10 = vcombine.high %v981_v1, %v989_v5  ;;  %v16978_v11 = vcombine.low %v981_v1, %v989_v5  ;;  %v12880_v16 = vld [vmem:[%s18551_s0 + $0xc4] sm:$0x3]  ;;  %620 = vst [vmem:[#allocation2 + $0x108] sm:$0xf] %v12883_v19 }
  0xa5   :  { %3957 = vmatpush2.bf16.msra.mxu0 %v14916_v22  ;;  %4030 = vmatpush2.bf16.msra.mxu1 %v14917_v23  ;;  %v982_v12 = vld [vmem:[#allocation2 + $0x88] sm:$0xff]  ;;  %v594_v13 = vsel %vm16890_vm2, %v12876_v6, %v593_v7  ;;  %v12879_v14 = vld [vmem:[%s18551_s0 + $0xc0] sm:$0xf]  ;;  %v607_v18 = vld [vmem:[#allocation2 + $0x144] sm:$0x3] }
  0xa6   :  { %4072 = vmatprep.subr.bf16.mxu0 %v14920_v24  ;;  %4145 = vmatprep.subr.bf16.mxu1 %v14923_v25  ;;  %595 = vst [vmem:[#allocation2 + $0x140] sm:$0x3] %v594_v13  ;;  %606 = vst [vmem:[#allocation2 + $0x104] sm:$0xf] %v12879_v14  ;;  %v608_v22 = vsel %vm16890_vm2, %v12880_v16, %v607_v18  ;;  %v12884_v23 = vld [vmem:[%s18551_s0 + $0x8c] sm:$0x3] }
  0xa7   :  { %v990_v17 = vld [vmem:[#allocation2 + $0xc8] sm:$0xff]  ;;  %609 = vst [vmem:[#allocation2 + $0x144] sm:$0x3] %v608_v22  ;;  %v12877_v42 = vld [vmem:[%s18551_s0 + $0xa0] sm:$0xf] }
  0xa8   :  { %3959 = vmatmul.mubr.bf16.vlgmr.msra.gmra.mxu0 %v16932_v26  ;;  %4032 = vmatmul.mubr.bf16.vlgmr.msra.gmra.mxu1 %v16934_v27  ;;  %v16991_v21 = vcombine.high %v982_v12, %v990_v17  ;;  %v621_v24 = vld [vmem:[#allocation2 + $0x148] sm:$0x3]  ;;  %v12878_v43 = vld [vmem:[%s18551_s0 + $0xa4] sm:$0x3]  ;;  %599 = vst [vmem:[#allocation2 + $0x180] sm:$0xf] %v12877_v42 }
  0xa9   :  { %4073 = vmatpush1.bf16.msra.mxu0 %v14918_v28  ;;  %4146 = vmatpush1.bf16.msra.mxu1 %v14921_v29  ;;  %v12887_v25 = vld [vmem:[%s18551_s0 + $0xc8] sm:$0xf]  ;;  %v17002_v28 = vcombine.low %v982_v12, %v990_v17  ;;  %v622_v29 = vsel %vm16890_vm2, %v12884_v23, %v621_v24  ;;  %v600_v47 = vld [vmem:[#allocation2 + $0x1c0] sm:$0x3]  ;;  %v12882_v53 = vld [vmem:[%s18551_s0 + $0xe4] sm:$0x3] }
  0xaa   :  { %4074 = vmatprep.subr.bf16.mxu0 %v14926_v30  ;;  %4147 = vmatprep.subr.bf16.mxu1 %v14929_v31  ;;  %v12888_v30 = vld [vmem:[%s18551_s0 + $0xcc] sm:$0x3]  ;;  %634 = vst [vmem:[#allocation2 + $0x10c] sm:$0xf] %v12887_v25  ;;  %623 = vst [vmem:[#allocation2 + $0x148] sm:$0x3] %v622_v29  ;;  %v601_v51 = vsel %vm16890_vm2, %v12878_v43, %v600_v47 }
  0xab   :  { %3968 = vmatprep.mubr.bf16.mxu0 %v16976_v10  ;;  %v635_v31 = vld [vmem:[#allocation2 + $0x14c] sm:$0x3]  ;;  %4041 = vmatprep.mubr.bf16.mxu1 %v16991_v21  ;;  %v14971_v41 = vld [vmem:[#allocation7 + $0x5ec] ss:$12 sps:$4 sm:$0xff]   ;;  %v12881_v52 = vld [vmem:[%s18551_s0 + $0xe0] sm:$0xf] }
  0xac   :  { %v614_v54 = vld [vmem:[#allocation2 + $0x1c4] sm:$0x3]  ;;  %602 = vst [vmem:[#allocation2 + $0x1c0] sm:$0x3] %v601_v51  ;;  %613 = vst [vmem:[#allocation2 + $0x184] sm:$0xf] %v12881_v52 }
  0xad   :  { %4075 = vmatpush1.bf16.msra.mxu0 %v14924_v32  ;;  %4148 = vmatpush1.bf16.msra.mxu1 %v14927_v33  ;;  %v14954_v32 = vld [vmem:[#allocation7 + $0x318] ss:$12 sps:$4 sm:$0xff]   ;;  %v14974_v55 = vld [vmem:[#allocation7 + $0x454] ss:$12 sps:$4 sm:$0xff]   ;;  %v615_v59 = vsel %vm16890_vm2, %v12882_v53, %v614_v54  ;;  %v12890_v2 = vld [vmem:[%s18551_s0 + $0xec] sm:$0x3] }
  0xae   :  { %4076 = vmatprep.subr.bf16.mxu0 %v14932_v34  ;;  %4149 = vmatprep.subr.bf16.mxu1 %v14935_v35  ;;  %v14957_v33 = vld [vmem:[#allocation7 + $0x498] ss:$12 sps:$4 sm:$0xff]   ;;  %v636_v34 = vsel %vm16890_vm2, %v12888_v30, %v635_v31  ;;  %v14977_v56 = vld [vmem:[#allocation7 + $0x5d4] ss:$12 sps:$4 sm:$0xff]   ;;  %616 = vst [vmem:[#allocation2 + $0x1c4] sm:$0x3] %v615_v59 }
  0xaf   :  { %v14962_v35 = vld [vmem:[#allocation7 + $0x304] ss:$12 sps:$4 sm:$0xff]   ;;  %637 = vst [vmem:[#allocation2 + $0x14c] sm:$0x3] %v636_v34  ;;  %v12889_v1 = vld [vmem:[%s18551_s0 + $0xe8] sm:$0xf] }
  0xb0   :  { %3969 = vmatmul.mubr.bf16.gmra.mxu0 %v16978_v11  ;;  %4042 = vmatmul.mubr.bf16.gmra.mxu1 %v17002_v28  ;;  %v997_v40 = vld [vmem:[#allocation2 + $0x100] sm:$0xff]  ;;  %641 = vst [vmem:[#allocation2 + $0x18c] sm:$0xf] %v12889_v1  ;;  %v14984_v24 = vld [vmem:[#allocation7 + $0x420] ss:$12 sps:$4 sm:$0xff]  }
  0xb1   :  { %4077 = vmatpush1.bf16.msra.mxu0 %v14930_v36  ;;  %4150 = vmatpush1.bf16.msra.mxu1 %v14933_v37  ;;  %v14965_v36 = vld [vmem:[#allocation7 + $0x484] ss:$12 sps:$4 sm:$0xff]   ;;  %v14960_v37 = vld [vmem:[#allocation7 + $0x300] ss:$12 sps:$4 sm:$0xff]   ;;  %v14990_v51 = vld [vmem:[#allocation7 + $0x408] ss:$12 sps:$4 sm:$0xff]  }
  0xb2   :  { %4078 = vmatprep.subr.bf16.mxu0 %v14938_v38  ;;  %4151 = vmatprep.subr.bf16.mxu1 %v14941_v39  ;;  %v14963_v38 = vld [vmem:[#allocation7 + $0x480] ss:$12 sps:$4 sm:$0xff]   ;;  %v1005_v44 = vld [vmem:[#allocation2 + $0x140] sm:$0xff]  ;;  %v15004_v59 = vld [vmem:[#allocation7 + $0x3dc] ss:$12 sps:$4 sm:$0xff]  }
  0xb3   :  { %v14968_v39 = vld [vmem:[#allocation7 + $0x46c] ss:$12 sps:$4 sm:$0xff]   ;;  %v17020_v50 = vcombine.high %v997_v40, %v1005_v44  ;;  %v17030_v57 = vcombine.low %v997_v40, %v1005_v44  ;;  %v14972_v6 = vld [vmem:[#allocation7 + $0x450] ss:$12 sps:$4 sm:$0xff]   ;;  %v12829_v30 = vld [vmem:[%s18551_s0 + $0x10] sm:$0xf] }
  0xb4   :  { %v998_v46 = vld [vmem:[#allocation2 + $0x108] sm:$0xff]  ;;  %v1013_v13 = vld [vmem:[#allocation2 + $0x180] sm:$0xff]  ;;  %269 = vst [vmem:[#allocation2 + $0x10] sm:$0xf] %v12829_v30  ;;  %v284_v40 = vld [vmem:[#allocation2 + $0x54] sm:$0x3] }
  0xb5   :  { %4079 = vmatpush1.bf16.msra.mxu0 %v14936_v48  ;;  %4152 = vmatpush1.bf16.msra.mxu1 %v14939_v49  ;;  %v14966_v48 = vld [vmem:[#allocation7 + $0x468] ss:$12 sps:$4 sm:$0xff]   ;;  %v14975_v7 = vld [vmem:[#allocation7 + $0x5d0] ss:$12 sps:$4 sm:$0xff]   ;;  %v14978_v12 = vld [vmem:[#allocation7 + $0x438] ss:$12 sps:$4 sm:$0xff]  }
  0xb6   :  { %4080 = vmatprep.subr.bf16.mxu0 %v14944_v58  ;;  %4153 = vmatprep.subr.bf16.mxu1 %v14947_v60  ;;  %v14969_v49 = vld [vmem:[#allocation7 + $0x5e8] ss:$12 sps:$4 sm:$0xff]   ;;  %v1006_v58 = vld [vmem:[#allocation2 + $0x148] sm:$0xff]  ;;  %v14986_v17 = vld [vmem:[#allocation7 + $0x424] ss:$12 sps:$4 sm:$0xff]  }
  0xb7   :  { %v12885_v60 = vld [vmem:[%s18551_s0 + $0xa8] sm:$0xf]  ;;  %3978 = vmatprep.mubr.bf16.mxu0 %v17020_v50  ;;  %v1021_v14 = vld [vmem:[#allocation2 + $0x1c0] sm:$0xff]  ;;  %v14987_v25 = vld [vmem:[#allocation7 + $0x5a0] ss:$12 sps:$4 sm:$0xff]  }
  0xb8   :  { %627 = vst [vmem:[#allocation2 + $0x188] sm:$0xf] %v12885_v60  ;;  %3979 = vmatmul.mubr.bf16.gmra.mxu0 %v17030_v57  ;;  %v14981_v16 = vld [vmem:[#allocation7 + $0x5b8] ss:$12 sps:$4 sm:$0xff]   ;;  %v17058_v18 = vcombine.high %v1013_v13, %v1021_v14  ;;  %v17060_v19 = vcombine.low %v1013_v13, %v1021_v14  ;;  %v12838_v43 = vld [vmem:[%s18551_s0 + $0x1c] sm:$0x3] }
  0xb9   :  { %4081 = vmatpush1.bf16.msra.mxu0 %v14942_v61  ;;  %4154 = vmatpush1.bf16.msra.mxu1 %v14945_v62  ;;  %v12886_v61 = vld [vmem:[%s18551_s0 + $0xac] sm:$0x3]  ;;  %v17040_v62 = vcombine.high %v998_v46, %v1006_v58  ;;  %v14989_v23 = vld [vmem:[#allocation7 + $0x5a4] ss:$12 sps:$4 sm:$0xff]   ;;  %v14992_v31 = vld [vmem:[#allocation7 + $0x40c] ss:$12 sps:$4 sm:$0xff]  }
  0xba   :  { %4082 = vmatprep.subr.bf16.mxu0 %v14950_v63  ;;  %4155 = vmatprep.subr.bf16.mxu1 %v14953_v0  ;;  %v17042_v63 = vcombine.low %v998_v46, %v1006_v58  ;;  %v628_v0 = vld [vmem:[#allocation2 + $0x1c8] sm:$0x3]  ;;  %v298_v44 = vld [vmem:[#allocation2 + $0x58] sm:$0x3]  ;;  %v14998_v54 = vld [vmem:[#allocation7 + $0x3f4] ss:$12 sps:$4 sm:$0xff]  }
  0xbb   :  { %4051 = vmatprep.mubr.bf16.mxu1 %v17040_v62  ;;  %3988 = vmatprep.mubr.bf16.mxu0 %v17058_v18  ;;  %v12841_v46 = vld [vmem:[%s18551_s0 + $0x58] sm:$0xf]  ;;  %v299_v47 = vsel %vm16890_vm2, %v12838_v43, %v298_v44  ;;  %v14999_v58 = vld [vmem:[#allocation7 + $0x570] ss:$12 sps:$4 sm:$0xff]   ;;  %v12832_v1 = vld [vmem:[%s18551_s0 + $0x34] sm:$0x3] }
  0xbc   :  { %4052 = vmatmul.mubr.bf16.gmra.mxu1 %v17042_v63  ;;  %311 = vst [vmem:[#allocation2 + $0x1c] sm:$0xf] %v12841_v46  ;;  %v14993_v52 = vld [vmem:[#allocation7 + $0x588] ss:$12 sps:$4 sm:$0xff]   ;;  %300 = vst [vmem:[#allocation2 + $0x58] sm:$0x3] %v299_v47 }
  0xbd   :  { %4083 = vmatpush1.bf16.msra.mxu0 %v14948_v3  ;;  %4156 = vmatpush1.bf16.msra.mxu1 %v14951_v4  ;;  %v629_v3 = vsel %vm16890_vm2, %v12886_v61, %v628_v0  ;;  %v642_v4 = vld [vmem:[#allocation2 + $0x1cc] sm:$0x3]  ;;  %v12831_v0 = vld [vmem:[%s18551_s0 + $0x30] sm:$0xf]  ;;  %v12840_v30 = vld [vmem:[%s18551_s0 + $0x3c] sm:$0x3] }
  0xbe   :  { %4084 = vmatprep.subr.bf16.mxu0 %v14956_v8  ;;  %4157 = vmatprep.subr.bf16.mxu1 %v14959_v9  ;;  %630 = vst [vmem:[#allocation2 + $0x1c8] sm:$0x3] %v629_v3  ;;  %v643_v5 = vsel %vm16890_vm2, %v12890_v2, %v642_v4  ;;  %v14980_v8 = vld [vmem:[#allocation7 + $0x43c] ss:$12 sps:$4 sm:$0xff]   ;;  %276 = vst [vmem:[#allocation2 + $0x90] sm:$0xf] %v12831_v0 }
  0xbf   :  { %644 = vst [vmem:[#allocation2 + $0x1cc] sm:$0x3] %v643_v5  ;;  %v14983_v9 = vld [vmem:[#allocation7 + $0x5bc] ss:$12 sps:$4 sm:$0xff]   ;;  %v277_v4 = vld [vmem:[#allocation2 + $0xd0] sm:$0x3] }
  0xc0   :  { %v1014_v22 = vld [vmem:[#allocation2 + $0x188] sm:$0xff]  ;;  %3989 = vmatmul.mubr.bf16.gmra.mxu0 %v17060_v19  ;;  %vm331_vm4 = vsmask.f32 7440  ;;  %vm8187_vm7 = vsmask.f32 256 }
  0xc1   :  { %4085 = vmatpush1.bf16.msra.mxu0 %v14954_v32  ;;  %4158 = vmatpush1.bf16.msra.mxu1 %v14957_v33  ;;  %v14995_v32 = vld [vmem:[#allocation7 + $0x58c] ss:$12 sps:$4 sm:$0xff]   ;;  %v15007_v61 = vld [vmem:[#allocation7 + $0x55c] ss:$12 sps:$4 sm:$0xff]   ;;  %v15022_v47 = vld [vmem:[#allocation7 + $0x694] ss:$12 sps:$4 sm:$0xff]  }
  0xc2   :  { %4086 = vmatprep.subr.bf16.mxu0 %v14962_v35  ;;  %4159 = vmatprep.subr.bf16.mxu1 %v14965_v36  ;;  %v12830_v35 = vld [vmem:[%s18551_s0 + $0x14] sm:$0x3]  ;;  %v270_v36 = vld [vmem:[#allocation2 + $0x50] sm:$0x3]  ;;  %vm17296_vm5 = vmor %vm330_vm3, %vm331_vm4  ;;  %vm8193_vm12 = vsmask.f32 2304 }
  0xc3   :  { %v15002_v14 = vld [vmem:[#allocation7 + $0x3d8] ss:$12 sps:$4 sm:$0xff]   ;;  %vm18312_vm9 = vmand %vm8186_vm6, %vm8187_vm7  ;;  %vm8528_vm0 = vsmask.f32 7938 }
  0xc4   :  { %vm8191_vm13 = vmor %vm18318_vm10, %vm18312_vm9 }
  0xc5   :  { %4087 = vmatpush1.bf16.msra.mxu0 %v14960_v37  ;;  %4160 = vmatpush1.bf16.msra.mxu1 %v14963_v38  ;;  %v12833_v37 = vld [vmem:[%s18551_s0 + $0x50] sm:$0xf]  ;;  %v271_v38 = vsel %vm16890_vm2, %v12830_v35, %v270_v36  ;;  %v12843_v35 = vld [vmem:[%s18551_s0 + $0x78] sm:$0xf]  ;;  %v12844_v36 = vld [vmem:[%s18551_s0 + $0x7c] sm:$0x3] }
  0xc6   :  { %4088 = vmatprep.subr.bf16.mxu0 %v14968_v39  ;;  %4161 = vmatprep.subr.bf16.mxu1 %v14971_v41  ;;  %v1022_v29 = vld [vmem:[#allocation2 + $0x1c8] sm:$0xff]  ;;  %v12834_v39 = vld [vmem:[%s18551_s0 + $0x54] sm:$0x3]  ;;  %283 = vst [vmem:[#allocation2 + $0x14] sm:$0xf] %v12833_v37  ;;  %vm8194_vm14 = vmand %vm8192_vm11, %vm8193_vm12 }
  0xc7   :  { %v17067_v33 = vcombine.high %v1014_v22, %v1022_v29  ;;  %v17069_v34 = vcombine.low %v1014_v22, %v1022_v29  ;;  %v12837_v41 = vld [vmem:[%s18551_s0 + $0x18] sm:$0xf]  ;;  %272 = vst [vmem:[#allocation2 + $0x50] sm:$0x3] %v271_v38  ;;  %v285_v42 = vsel %vm16890_vm2, %v12834_v39, %v284_v40  ;;  %v15010_v22 = vld [vmem:[#allocation7 + $0x3c4] ss:$12 sps:$4 sm:$0xff]   ;;  %vm18335_vm15 = vmor %vm8194_vm14, %vm8191_vm13 }
  0xc8   :  { %297 = vst [vmem:[#allocation2 + $0x18] sm:$0xf] %v12837_v41  ;;  %286 = vst [vmem:[#allocation2 + $0x54] sm:$0x3] %v285_v42  ;;  %v12839_v29 = vld [vmem:[%s18551_s0 + $0x38] sm:$0xf] }
  0xc9   :  { %4089 = vmatpush2.bf16.msra.mxu0 %v14966_v48  ;;  %4162 = vmatpush2.bf16.msra.mxu1 %v14969_v49  ;;  %v12842_v48 = vld [vmem:[%s18551_s0 + $0x5c] sm:$0x3]  ;;  %304 = vst [vmem:[#allocation2 + $0x98] sm:$0xf] %v12839_v29  ;;  %318 = vst [vmem:[#allocation2 + $0x9c] sm:$0xf] %v12843_v35 }
  0xca   :  { %4090 = vmatprep.subr.bf16.mxu0 %v14974_v55  ;;  %4163 = vmatprep.subr.bf16.mxu1 %v14977_v56  ;;  %v312_v49 = vld [vmem:[#allocation2 + $0x5c] sm:$0x3]  ;;  %v15001_v55 = vld [vmem:[#allocation7 + $0x574] ss:$12 sps:$4 sm:$0xff]   ;;  %v14996_v56 = vld [vmem:[#allocation7 + $0x3f0] ss:$12 sps:$4 sm:$0xff]  }
  0xcb   :  { %4061 = vmatprep.mubr.bf16.mxu1 %v17067_v33  ;;  %v313_v53 = vsel %vm16890_vm2, %v12842_v48, %v312_v49  ;;  %v319_v37 = vld [vmem:[#allocation2 + $0xdc] sm:$0x3]  ;;  %v15014_v41 = vld [vmem:[#allocation7 + $0x6a8] ss:$12 sps:$4 sm:$0xff]   ;;  %v12893_v35 = vld [vmem:[%s18551_s0 + $0xb0] sm:$0xf] }
  0xcc   :  { %4062 = vmatmul.mubr.bf16.gmra.mxu1 %v17069_v34  ;;  %314 = vst [vmem:[#allocation2 + $0x5c] sm:$0x3] %v313_v53  ;;  %v15016_v38 = vld [vmem:[#allocation7 + $0x6ac] ss:$12 sps:$4 sm:$0xff]   ;;  %v320_v39 = vsel %vm16890_vm2, %v12844_v36, %v319_v37  ;;  %v15017_v42 = vld [vmem:[#allocation7 + $0x828] ss:$12 sps:$4 sm:$0xff]   ;;  %vm18346_vm3 = vmand %vm8186_vm6, %vm8528_vm0 }
  0xcd   :  { %4091 = vmatpush2.bf16.msra.mxu0 %v14972_v6  ;;  %4164 = vmatpush2.bf16.msra.mxu1 %v14975_v7  ;;  %v967_v60 = vld [vmem:[#allocation2 + $0x10] sm:$0xff]  ;;  %v278_v6 = vsel %vm16890_vm2, %v12832_v1, %v277_v4  ;;  %v15019_v40 = vld [vmem:[#allocation7 + $0x82c] ss:$12 sps:$4 sm:$0xff]   ;;  %321 = vst [vmem:[#allocation2 + $0xdc] sm:$0x3] %v320_v39 }
  0xce   :  { %4092 = vmatprep.subr.bf16.mxu0 %v14980_v8  ;;  %4165 = vmatprep.subr.bf16.mxu1 %v14983_v9  ;;  %v12835_v7 = vld [vmem:[%s18551_s0 + $0x70] sm:$0xf]  ;;  %v12836_v8 = vld [vmem:[%s18551_s0 + $0x74] sm:$0x3]  ;;  %279 = vst [vmem:[#allocation2 + $0xd0] sm:$0x3] %v278_v6 }
  0xcf   :  { %v975_v2 = vld [vmem:[#allocation2 + $0x50] sm:$0xff]  ;;  %v968_v3 = vld [vmem:[#allocation2 + $0x18] sm:$0xff]  ;;  %290 = vst [vmem:[#allocation2 + $0x94] sm:$0xf] %v12835_v7  ;;  %655 = vst [vmem:[#allocation2 + $0x190] sm:$0xf] %v12893_v35 }
  0xd0   :  { %v17108_v5 = vcombine.high %v967_v60, %v975_v2  ;;  %v291_v9 = vld [vmem:[#allocation2 + $0xd4] sm:$0x3]  ;;  %v17140_v44 = vcombine.low %v967_v60, %v975_v2  ;;  %v15025_v48 = vld [vmem:[#allocation7 + $0x814] ss:$12 sps:$4 sm:$0xff]   ;;  %v15023_v60 = vld [vmem:[#allocation7 + $0x810] ss:$12 sps:$4 sm:$0xff]  }
  0xd1   :  { %4093 = vmatpush2.bf16.msra.mxu0 %v14978_v12  ;;  %4166 = vmatpush2.bf16.msra.mxu1 %v14981_v16  ;;  %v292_v13 = vsel %vm16890_vm2, %v12836_v8, %v291_v9  ;;  %v15005_v16 = vld [vmem:[#allocation7 + $0x558] ss:$12 sps:$4 sm:$0xff]   ;;  %v649_v53 = vld [vmem:[#allocation2 + $0x150] sm:$0x3]  ;;  %v15028_v1 = vld [vmem:[#allocation7 + $0x67c] ss:$12 sps:$4 sm:$0xff]  }
  0xd2   :  { %4094 = vmatprep.subr.bf16.mxu0 %v14986_v17  ;;  %4167 = vmatprep.subr.bf16.mxu1 %v14989_v23  ;;  %293 = vst [vmem:[#allocation2 + $0xd4] sm:$0x3] %v292_v13  ;;  %v15013_v23 = vld [vmem:[#allocation7 + $0x544] ss:$12 sps:$4 sm:$0xff]   ;;  %v12899_v6 = vld [vmem:[%s18551_s0 + $0x98] sm:$0xf] }
  0xd3   :  { %v976_v12 = vld [vmem:[#allocation2 + $0x58] sm:$0xff]  ;;  %4104 = vmatprep.mubr.bf16.mxu0 %v17108_v5  ;;  %676 = vst [vmem:[#allocation2 + $0x118] sm:$0xf] %v12899_v6  ;;  %v12894_v39 = vld [vmem:[%s18551_s0 + $0xb4] sm:$0x3] }
  0xd4   :  { %v17120_v17 = vcombine.high %v968_v3, %v976_v12  ;;  %v17142_v46 = vcombine.low %v968_v3, %v976_v12  ;;  %v984_v2 = vld [vmem:[#allocation2 + $0x98] sm:$0xff]  ;;  %v15050_v35 = vld [vmem:[#allocation7 + $0x618] ss:$12 sps:$4 sm:$0xff]  }
  0xd5   :  { %4095 = vmatpush2.bf16.msra.mxu0 %v14984_v24  ;;  %4168 = vmatpush2.bf16.msra.mxu1 %v14987_v25  ;;  %v15008_v24 = vld [vmem:[#allocation7 + $0x3c0] ss:$12 sps:$4 sm:$0xff]   ;;  %v15031_v3 = vld [vmem:[#allocation7 + $0x7fc] ss:$12 sps:$4 sm:$0xff]  }
  0xd6   :  { %4096 = vmatprep.subr.bf16.mxu0 %v14992_v31  ;;  %4169 = vmatprep.subr.bf16.mxu1 %v14995_v32  ;;  %v15011_v25 = vld [vmem:[#allocation7 + $0x540] ss:$12 sps:$4 sm:$0xff]   ;;  %v305_v31 = vld [vmem:[#allocation2 + $0xd8] sm:$0x3] }
  0xd7   :  { %4177 = vmatprep.mubr.bf16.mxu1 %v17120_v17  ;;  %v306_v32 = vsel %vm16890_vm2, %v12840_v30, %v305_v31  ;;  %v983_v43 = vld [vmem:[#allocation2 + $0x90] sm:$0xff]  ;;  %v12900_v8 = vld [vmem:[%s18551_s0 + $0x9c] sm:$0x3]  ;;  %v677_v9 = vld [vmem:[#allocation2 + $0x158] sm:$0x3] }
  0xd8   :  { %307 = vst [vmem:[#allocation2 + $0xd8] sm:$0x3] %v306_v32  ;;  %v12903_v12 = vld [vmem:[%s18551_s0 + $0xd8] sm:$0xf]  ;;  %v678_v13 = vsel %vm16890_vm2, %v12900_v8, %v677_v9  ;;  %v15034_v31 = vld [vmem:[#allocation7 + $0x664] ss:$12 sps:$4 sm:$0xff]  }
  0xd9   :  { %4097 = vmatpush2.bf16.msra.mxu0 %v14990_v51  ;;  %4170 = vmatpush2.bf16.msra.mxu1 %v14993_v52  ;;  %v991_v49 = vld [vmem:[#allocation2 + $0xd0] sm:$0xff]  ;;  %690 = vst [vmem:[#allocation2 + $0x11c] sm:$0xf] %v12903_v12  ;;  %679 = vst [vmem:[#allocation2 + $0x158] sm:$0x3] %v678_v13 }
  0xda   :  { %4098 = vmatprep.subr.bf16.mxu0 %v14998_v54  ;;  %4171 = vmatprep.subr.bf16.mxu1 %v15001_v55  ;;  %v12891_v51 = vld [vmem:[%s18551_s0 + $0x90] sm:$0xf]  ;;  %v12892_v52 = vld [vmem:[%s18551_s0 + $0x94] sm:$0x3]  ;;  %v12905_v6 = vld [vmem:[%s18551_s0 + $0xf8] sm:$0xf] }
  0xdb   :  { %648 = vst [vmem:[#allocation2 + $0x110] sm:$0xf] %v12891_v51  ;;  %v12895_v54 = vld [vmem:[%s18551_s0 + $0xd0] sm:$0xf]  ;;  %v12896_v55 = vld [vmem:[%s18551_s0 + $0xd4] sm:$0x3] }
  0xdc   :  { %662 = vst [vmem:[#allocation2 + $0x114] sm:$0xf] %v12895_v54  ;;  %v15037_v32 = vld [vmem:[#allocation7 + $0x7e4] ss:$12 sps:$4 sm:$0xff]   ;;  %v15032_v36 = vld [vmem:[#allocation7 + $0x660] ss:$12 sps:$4 sm:$0xff]  }
  0xdd   :  { %4099 = vmatpush2.bf16.msra.mxu0 %v14996_v56  ;;  %4172 = vmatpush2.bf16.msra.mxu1 %v14999_v58  ;;  %v650_v56 = vsel %vm16890_vm2, %v12892_v52, %v649_v53  ;;  %v663_v58 = vld [vmem:[#allocation2 + $0x154] sm:$0x3]  ;;  %v15035_v37 = vld [vmem:[#allocation7 + $0x7e0] ss:$12 sps:$4 sm:$0xff]   ;;  %v15038_v54 = vld [vmem:[#allocation7 + $0x648] ss:$12 sps:$4 sm:$0xff]  }
  0xde   :  { %4100 = vmatprep.subr.bf16.mxu0 %v15004_v59  ;;  %4173 = vmatprep.subr.bf16.mxu1 %v15007_v61  ;;  %v15020_v59 = vld [vmem:[#allocation7 + $0x690] ss:$12 sps:$4 sm:$0xff]   ;;  %v17158_v61 = vcombine.high %v983_v43, %v991_v49  ;;  %651 = vst [vmem:[#allocation2 + $0x150] sm:$0x3] %v650_v56  ;;  %v664_v0 = vsel %vm16890_vm2, %v12896_v55, %v663_v58  ;;  %v15043_v52 = vld [vmem:[#allocation7 + $0x7cc] ss:$12 sps:$4 sm:$0xff]  }
  0xdf   :  { %665 = vst [vmem:[#allocation2 + $0x154] sm:$0x3] %v664_v0  ;;  %v992_v4 = vld [vmem:[#allocation2 + $0xd8] sm:$0xff]  ;;  %697 = vst [vmem:[#allocation2 + $0x19c] sm:$0xf] %v12905_v6 }
  0xe0   :  { %v17167_v7 = vcombine.high %v984_v2, %v992_v4  ;;  %v1000_v53 = vld [vmem:[#allocation2 + $0x118] sm:$0xff] }
  0xe1   :  { %4101 = vmatpush2.bf16.msra.mxu0 %v15002_v14  ;;  %4174 = vmatpush2.bf16.msra.mxu1 %v15005_v16  ;;  %v12904_v14 = vld [vmem:[%s18551_s0 + $0xdc] sm:$0x3]  ;;  %v15041_v55 = vld [vmem:[#allocation7 + $0x7c8] ss:$12 sps:$4 sm:$0xff]   ;;  %v15082_v6 = vld [vmem:[#allocation7 + $0x724] ss:$12 sps:$4 sm:$0xff]  }
  0xe2   :  { %4102 = vmatprep.subr.bf16.mxu0 %v15010_v22  ;;  %4175 = vmatprep.subr.bf16.mxu1 %v15013_v23  ;;  %v691_v16 = vld [vmem:[#allocation2 + $0x15c] sm:$0x3]  ;;  %v17181_v22 = vcombine.low %v983_v43, %v991_v49  ;;  %v15026_v23 = vld [vmem:[#allocation7 + $0x678] ss:$12 sps:$4 sm:$0xff]   ;;  %v12901_v0 = vld [vmem:[%s18551_s0 + $0xb8] sm:$0xf] }
  0xe3   :  { %v692_v29 = vsel %vm16890_vm2, %v12904_v14, %v691_v16  ;;  %v999_v30 = vld [vmem:[#allocation2 + $0x110] sm:$0xff]  ;;  %v15040_v49 = vld [vmem:[#allocation7 + $0x64c] ss:$12 sps:$4 sm:$0xff]   ;;  %683 = vst [vmem:[#allocation2 + $0x198] sm:$0xf] %v12901_v0 }
  0xe4   :  { %693 = vst [vmem:[#allocation2 + $0x15c] sm:$0x3] %v692_v29  ;;  %v12897_v43 = vld [vmem:[%s18551_s0 + $0xf0] sm:$0xf]  ;;  %v12906_v8 = vld [vmem:[%s18551_s0 + $0xfc] sm:$0x3] }
  0xe5   :  { %4103 = vmatpush2.bf16.msra.mxu0 %v15008_v24  ;;  %4176 = vmatpush2.bf16.msra.mxu1 %v15011_v25  ;;  %v15029_v24 = vld [vmem:[#allocation7 + $0x7f8] ss:$12 sps:$4 sm:$0xff]   ;;  %v17184_v25 = vcombine.low %v984_v2, %v992_v4  ;;  %669 = vst [vmem:[#allocation2 + $0x194] sm:$0xf] %v12897_v43  ;;  %v684_v4 = vld [vmem:[#allocation2 + $0x1d8] sm:$0x3] }
  0xe6   :  { %4218 = vmatprep.subr.bf16.mxu0 %v15016_v38  ;;  %4291 = vmatprep.subr.bf16.mxu1 %v15019_v40  ;;  %v1007_v38 = vld [vmem:[#allocation2 + $0x150] sm:$0xff]  ;;  %v698_v12 = vld [vmem:[#allocation2 + $0x1dc] sm:$0x3]  ;;  %v15044_v14 = vld [vmem:[#allocation7 + $0x630] ss:$12 sps:$4 sm:$0xff]  }
  0xe7   :  { %18618 = vst [vmem:[#allocation28_spill] sm:$0xff] %v17184_v25  ;;  %v656_v40 = vld [vmem:[#allocation2 + $0x1d0] sm:$0x3]  ;;  %v17209_v56 = vcombine.low %v999_v30, %v1007_v38  ;;  %v699_v13 = vsel %vm16890_vm2, %v12906_v8, %v698_v12  ;;  %v15079_v0 = vld [vmem:[#allocation7 + $0x8bc] ss:$12 sps:$4 sm:$0xff]  }
  0xe8   :  { %4105 = vmatmul.mubr.bf16.vlgmr.msra.gmra.mxu0 %v17140_v44  ;;  %4178 = vmatmul.mubr.bf16.vlgmr.msra.gmra.mxu1 %v17142_v46  ;;  %700 = vst [vmem:[#allocation2 + $0x1dc] sm:$0x3] %v699_v13  ;;  %v15085_v8 = vld [vmem:[#allocation7 + $0x8a4] ss:$12 sps:$4 sm:$0xff]   ;;  %v15083_v12 = vld [vmem:[#allocation7 + $0x8a0] ss:$12 sps:$4 sm:$0xff]  }
  0xe9   :  { %4219 = vmatpush1.bf16.msra.mxu0 %v15014_v41  ;;  %4292 = vmatpush1.bf16.msra.mxu1 %v15017_v42  ;;  %v17196_v41 = vcombine.high %v999_v30, %v1007_v38  ;;  %v657_v42 = vsel %vm16890_vm2, %v12894_v39, %v656_v40  ;;  %18620 = vst [vmem:[#allocation30_spill] sm:$0xff] %v17209_v56  ;;  %v15052_v30 = vld [vmem:[#allocation7 + $0x61c] ss:$12 sps:$4 sm:$0xff]   ;;  %v15058_v38 = vld [vmem:[#allocation7 + $0x604] ss:$12 sps:$4 sm:$0xff]  }
  0xea   :  { %4220 = vmatprep.subr.bf16.mxu0 %v15022_v47  ;;  %4293 = vmatprep.subr.bf16.mxu1 %v15025_v48  ;;  %v12898_v47 = vld [vmem:[%s18551_s0 + $0xf4] sm:$0x3]  ;;  %658 = vst [vmem:[#allocation2 + $0x1d0] sm:$0x3] %v657_v42  ;;  %v12845_v13 = vld [vmem:[%s18551_s0 + $0x20] sm:$0xf] }
  0xeb   :  { %4114 = vmatprep.mubr.bf16.mxu0 %v17158_v61  ;;  %4187 = vmatprep.mubr.bf16.mxu1 %v17167_v7  ;;  %18619 = vst [vmem:[#allocation29_spill] sm:$0xff] %v17196_v41  ;;  %v670_v48 = vld [vmem:[#allocation2 + $0x1d4] sm:$0x3]  ;;  %v1008_v58 = vld [vmem:[#allocation2 + $0x158] sm:$0xff]  ;;  %324 = vst [vmem:[#allocation2 + $0x20] sm:$0xf] %v12845_v13 }
  0xec   :  { %v671_v51 = vsel %vm16890_vm2, %v12898_v47, %v670_v48  ;;  %v17217_v2 = vcombine.high %v1000_v53, %v1008_v58  ;;  %v1015_v16 = vld [vmem:[#allocation2 + $0x190] sm:$0xff] }
  0xed   :  { %4221 = vmatpush1.bf16.msra.mxu0 %v15020_v59  ;;  %4294 = vmatpush1.bf16.msra.mxu1 %v15023_v60  ;;  %672 = vst [vmem:[#allocation2 + $0x1d4] sm:$0x3] %v671_v51  ;;  %v15046_v59 = vld [vmem:[#allocation7 + $0x634] ss:$12 sps:$4 sm:$0xff]   ;;  %v15061_v40 = vld [vmem:[#allocation7 + $0x784] ss:$12 sps:$4 sm:$0xff]  }
  0xee   :  { %4222 = vmatprep.subr.bf16.mxu0 %v15028_v1  ;;  %4295 = vmatprep.subr.bf16.mxu1 %v15031_v3  ;;  %v15049_v60 = vld [vmem:[#allocation7 + $0x7b4] ss:$12 sps:$4 sm:$0xff]   ;;  %v12902_v1 = vld [vmem:[%s18551_s0 + $0xbc] sm:$0x3]  ;;  %18621 = vst [vmem:[#allocation31_spill] sm:$0xff] %v17217_v2  ;;  %v17219_v3 = vcombine.low %v1000_v53, %v1008_v58 }
  0xef   :  { %v685_v9 = vsel %vm16890_vm2, %v12902_v1, %v684_v4  ;;  %v15056_v47 = vld [vmem:[#allocation7 + $0x600] ss:$12 sps:$4 sm:$0xff]   ;;  %v15065_v53 = vld [vmem:[#allocation7 + $0x8e8] ss:$12 sps:$4 sm:$0xff]   ;;  %v15068_v58 = vld [vmem:[#allocation7 + $0x750] ss:$12 sps:$4 sm:$0xff]  }
  0xf0   :  { %4115 = vmatmul.mubr.bf16.gmra.mxu0 %v17181_v22  ;;  %4188 = vmatmul.mubr.bf16.gmra.mxu1 %v17184_v25  ;;  %18622 = vst [vmem:[#allocation32_spill] sm:$0xff] %v17219_v3  ;;  %686 = vst [vmem:[#allocation2 + $0x1d8] sm:$0x3] %v685_v9  ;;  %v15059_v48 = vld [vmem:[#allocation7 + $0x780] ss:$12 sps:$4 sm:$0xff]  }
  0xf1   :  { %4223 = vmatpush1.bf16.msra.mxu0 %v15026_v23  ;;  %4296 = vmatpush1.bf16.msra.mxu1 %v15029_v24  ;;  %v15047_v23 = vld [vmem:[#allocation7 + $0x7b0] ss:$12 sps:$4 sm:$0xff]   ;;  %v15067_v51 = vld [vmem:[#allocation7 + $0x8ec] ss:$12 sps:$4 sm:$0xff]  }
  0xf2   :  { %4224 = vmatprep.subr.bf16.mxu0 %v15034_v31  ;;  %4297 = vmatprep.subr.bf16.mxu1 %v15037_v32  ;;  %v15055_v31 = vld [vmem:[#allocation7 + $0x79c] ss:$12 sps:$4 sm:$0xff]   ;;  %v15074_v1 = vld [vmem:[#allocation7 + $0x738] ss:$12 sps:$4 sm:$0xff]   ;;  %v15080_v9 = vld [vmem:[#allocation7 + $0x720] ss:$12 sps:$4 sm:$0xff]  }
  0xf3   :  { %4124 = vmatprep.mubr.bf16.mxu0 %v17196_v41  ;;  %4197 = vmatprep.mubr.bf16.mxu1 %v17217_v2  ;;  %v15077_v4 = vld [vmem:[#allocation7 + $0x8b8] ss:$12 sps:$4 sm:$0xff]   ;;  %v929_v2 = vld [vmem:[#allocation2 + $0x1f8] sm:$0x3] }
  0xf4   :  { %v1023_v24 = vld [vmem:[#allocation2 + $0x1d0] sm:$0xff] }
  0xf5   :  { %4225 = vmatpush1.bf16.msra.mxu0 %v15032_v36  ;;  %4298 = vmatpush1.bf16.msra.mxu1 %v15035_v37  ;;  %v17234_v29 = vcombine.high %v1015_v16, %v1023_v24  ;;  %v17237_v32 = vcombine.low %v1015_v16, %v1023_v24  ;;  %v15053_v36 = vld [vmem:[#allocation7 + $0x798] ss:$12 sps:$4 sm:$0xff]   ;;  %v1016_v37 = vld [vmem:[#allocation2 + $0x198] sm:$0xff]  ;;  %v325_v24 = vld [vmem:[#allocation2 + $0x60] sm:$0x3] }
  0xf6   :  { %4226 = vmatprep.subr.bf16.mxu0 %v15040_v49  ;;  %4299 = vmatprep.subr.bf16.mxu1 %v15043_v52  ;;  %v15064_v49 = vld [vmem:[#allocation7 + $0x76c] ss:$12 sps:$4 sm:$0xff]   ;;  %v15062_v52 = vld [vmem:[#allocation7 + $0x768] ss:$12 sps:$4 sm:$0xff]  }
  0xf7   :  { %18623 = vst [vmem:[#allocation33_spill] sm:$0xff] %v17234_v29  ;;  %18624 = vst [vmem:[#allocation34_spill] sm:$0xff] %v17237_v32  ;;  %v1024_v39 = vld [vmem:[#allocation2 + $0x1d8] sm:$0xff] }
  0xf8   :  { %4125 = vmatmul.mubr.bf16.gmra.mxu0 %v17209_v56  ;;  %4198 = vmatmul.mubr.bf16.gmra.mxu1 %v17219_v3  ;;  %v17240_v42 = vcombine.high %v1016_v37, %v1024_v39  ;;  %v17242_v43 = vcombine.low %v1016_v37, %v1024_v39  ;;  %v15091_v16 = vld [vmem:[#allocation7 + $0x88c] ss:$12 sps:$4 sm:$0xff]   ;;  %v12852_v39 = vld [vmem:[%s18551_s0 + $0x2c] sm:$0x3] }
  0xf9   :  { %4227 = vmatpush1.bf16.msra.mxu0 %v15038_v54  ;;  %4300 = vmatpush1.bf16.msra.mxu1 %v15041_v55  ;;  %v15070_v54 = vld [vmem:[#allocation7 + $0x754] ss:$12 sps:$4 sm:$0xff]   ;;  %v12851_v37 = vld [vmem:[%s18551_s0 + $0x28] sm:$0xf] }
  0xfa   :  { %4228 = vmatprep.subr.bf16.mxu0 %v15046_v59  ;;  %4301 = vmatprep.subr.bf16.mxu1 %v15049_v60  ;;  %18625 = vst [vmem:[#allocation35_spill] sm:$0xff] %v17240_v42  ;;  %18626 = vst [vmem:[#allocation36_spill] sm:$0xff] %v17242_v43  ;;  %v15073_v55 = vld [vmem:[#allocation7 + $0x8d4] ss:$12 sps:$4 sm:$0xff]   ;;  %v15071_v59 = vld [vmem:[#allocation7 + $0x8d0] ss:$12 sps:$4 sm:$0xff]  }
  0xfb   :  { %4134 = vmatprep.mubr.bf16.mxu0 %v17234_v29  ;;  %4207 = vmatprep.mubr.bf16.mxu1 %v17240_v42  ;;  %v15076_v60 = vld [vmem:[#allocation7 + $0x73c] ss:$12 sps:$4 sm:$0xff]   ;;  %393 = vst [vmem:[#allocation2 + $0x28] sm:$0xf] %v12851_v37 }
  0xfd   :  { %4229 = vmatpush1.bf16.msra.mxu0 %v15044_v14  ;;  %4302 = vmatpush1.bf16.msra.mxu1 %v15047_v23  ;;  %v15088_v14 = vld [vmem:[#allocation7 + $0x70c] ss:$12 sps:$4 sm:$0xff]   ;;  %v12846_v23 = vld [vmem:[%s18551_s0 + $0x24] sm:$0x3] }
  0xfe   :  { %4230 = vmatprep.subr.bf16.mxu0 %v15052_v30  ;;  %4303 = vmatprep.subr.bf16.mxu1 %v15055_v31  ;;  %v12847_v30 = vld [vmem:[%s18551_s0 + $0x60] sm:$0xf]  ;;  %v326_v31 = vsel %vm16890_vm2, %v12846_v23, %v325_v24  ;;  %v15098_v24 = vld [vmem:[#allocation7 + $0x6d8] ss:$12 sps:$4 sm:$0xff]  }
  0xff   :  { %360 = vst [vmem:[#allocation2 + $0x24] sm:$0xf] %v12847_v30  ;;  %327 = vst [vmem:[#allocation2 + $0x60] sm:$0x3] %v326_v31  ;;  %v12849_v31 = vld [vmem:[%s18551_s0 + $0x40] sm:$0xf] }
 0x100   :  { %4135 = vmatmul.mubr.bf16.gmra.mxu0 %v17237_v32  ;;  %4208 = vmatmul.mubr.bf16.gmra.mxu1 %v17242_v43  ;;  %v421_v32 = vld [vmem:[#allocation2 + $0xe8] sm:$0x3] }
 0x101   :  { %4231 = vmatpush1.bf16.msra.mxu0 %v15050_v35  ;;  %4304 = vmatpush1.bf16.msra.mxu1 %v15053_v36  ;;  %v12848_v35 = vld [vmem:[%s18551_s0 + $0x64] sm:$0x3] }
 0x102   :  { %4232 = vmatprep.subr.bf16.mxu0 %v15058_v38  ;;  %4305 = vmatprep.subr.bf16.mxu1 %v15061_v40  ;;  %v361_v36 = vld [vmem:[#allocation2 + $0x64] sm:$0x3]  ;;  %v394_v40 = vld [vmem:[#allocation2 + $0x68] sm:$0x3] }
 0x103   :  { %v362_v38 = vsel %vm16890_vm2, %v12848_v35, %v361_v36  ;;  %v12850_v35 = vld [vmem:[%s18551_s0 + $0x44] sm:$0x3] }
 0x104   :  { %363 = vst [vmem:[#allocation2 + $0x64] sm:$0x3] %v362_v38 }
 0x105   :  { %4233 = vmatpush1.bf16.msra.mxu0 %v15056_v47  ;;  %4306 = vmatpush1.bf16.msra.mxu1 %v15059_v48  ;;  %v12855_v47 = vld [vmem:[%s18551_s0 + $0x68] sm:$0xf]  ;;  %v395_v48 = vsel %vm16890_vm2, %v12852_v39, %v394_v40 }
 0x106   :  { %4234 = vmatprep.subr.bf16.mxu0 %v15064_v49  ;;  %4307 = vmatprep.subr.bf16.mxu1 %v15067_v51  ;;  %v12856_v49 = vld [vmem:[%s18551_s0 + $0x6c] sm:$0x3]  ;;  %426 = vst [vmem:[#allocation2 + $0x2c] sm:$0xf] %v12855_v47  ;;  %396 = vst [vmem:[#allocation2 + $0x68] sm:$0x3] %v395_v48 }
 0x107   :  { %v427_v51 = vld [vmem:[#allocation2 + $0x6c] sm:$0x3]  ;;  %v15101_v47 = vld [vmem:[#allocation7 + $0x858] ss:$12 sps:$4 sm:$0xff]  }
 0x109   :  { %4235 = vmatpush2.bf16.msra.mxu0 %v15062_v52  ;;  %4308 = vmatpush2.bf16.msra.mxu1 %v15065_v53  ;;  %v15086_v52 = vld [vmem:[#allocation7 + $0x708] ss:$12 sps:$4 sm:$0xff]  }
 0x10a   :  { %4236 = vmatprep.subr.bf16.mxu0 %v15070_v54  ;;  %4309 = vmatprep.subr.bf16.mxu1 %v15073_v55  ;;  %v15089_v53 = vld [vmem:[#allocation7 + $0x888] ss:$12 sps:$4 sm:$0xff]   ;;  %v428_v54 = vsel %vm16890_vm2, %v12856_v49, %v427_v51  ;;  %v367_v49 = vshrl.u32 %v12849_v31, 16  ;;  %v370_v51 = vshll.u32 %v12849_v31, 16 }
 0x10b   :  { %v15094_v55 = vld [vmem:[#allocation7 + $0x6f4] ss:$12 sps:$4 sm:$0xff]   ;;  %429 = vst [vmem:[#allocation2 + $0x6c] sm:$0x3] %v428_v54  ;;  %v18629_v54 = vmov 0 }
 0x10c   :  { %v18630_v54 = vsel %vm17296_vm5, 4294967295, %v18629_v54 }
 0x10d   :  { %4237 = vmatpush2.bf16.msra.mxu0 %v15068_v58  ;;  %4310 = vmatpush2.bf16.msra.mxu1 %v15071_v59  ;;  %v15097_v58 = vld [vmem:[#allocation7 + $0x874] ss:$12 sps:$4 sm:$0xff]   ;;  %v15092_v59 = vld [vmem:[#allocation7 + $0x6f0] ss:$12 sps:$4 sm:$0xff]   ;;  %18631 = vst [vmem:[#allocation39_spill] sm:$0xff] %v18630_v54 }
 0x10e   :  { %4238 = vmatprep.subr.bf16.mxu0 %v15076_v60  ;;  %4311 = vmatprep.subr.bf16.mxu1 %v15079_v0  ;;  %v15095_v60 = vld [vmem:[#allocation7 + $0x870] ss:$12 sps:$4 sm:$0xff]  }
 0x10f   :  { %v15100_v0 = vld [vmem:[#allocation7 + $0x6dc] ss:$12 sps:$4 sm:$0xff]  }
 0x111   :  { %4239 = vmatpush2.bf16.msra.mxu0 %v15074_v1  ;;  %4312 = vmatpush2.bf16.msra.mxu1 %v15077_v4  ;;  %v969_v1 = vld [vmem:[#allocation2 + $0x20] sm:$0xff]  ;;  %v15103_v4 = vld [vmem:[#allocation7 + $0x85c] ss:$12 sps:$4 sm:$0xff]  }
 0x112   :  { %4240 = vmatprep.subr.bf16.mxu0 %v15082_v6  ;;  %4313 = vmatprep.subr.bf16.mxu1 %v15085_v8  ;;  %v328_v6 = vld [vmem:[%s18551_s0] sm:$0xf]  ;;  %v329_v8 = vld [vmem:[%s18551_s0 + $0x4] sm:$0x3]  ;;  %v978_v36 = vld [vmem:[#allocation2 + $0x68] sm:$0xff] }
 0x113   :  { %v334_v13 = vshrl.u32 %v328_v6, 16  ;;  %v347_v23 = vshrl.u32 %v329_v8, 16 }
 0x115   :  { %4241 = vmatpush2.bf16.msra.mxu0 %v15080_v9  ;;  %4314 = vmatpush2.bf16.msra.mxu1 %v15083_v12  ;;  %v977_v9 = vld [vmem:[#allocation2 + $0x60] sm:$0xff]  ;;  %v970_v12 = vld [vmem:[#allocation2 + $0x28] sm:$0xff]  ;;  %v336_v37 = vrot.slane %v334_v13, 4  ;;  %v349_v40 = vrot.slane %v347_v23, 4  ;;  %v372_v13 = vrot.slane %v370_v51, 5 }
 0x116   :  { %4242 = vmatprep.subr.bf16.mxu0 %v15088_v14  ;;  %4315 = vmatprep.subr.bf16.mxu1 %v15091_v16  ;;  %v337_v14 = vshll.u32 %v328_v6, 16  ;;  %v343_v16 = vshll.u32 %v329_v8, 16  ;;  %v17284_v30 = vcombine.high %v969_v1, %v977_v9  ;;  %v17292_v48 = vcombine.high %v970_v12, %v978_v36  ;;  %v15107_v8 = vld [vmem:[#allocation7 + $0x840] ss:$12 sps:$4 sm:$0xff]   ;;  %v15110_v51 = vld [vmem:[#allocation7 + $0x9a8] ss:$12 sps:$4 sm:$0xff]  }
 0x117   :  { %v376_v6 = vshll.u32 %v12850_v35, 16 }
 0x118   :  { %18627 = vst [vmem:[#allocation37_spill] sm:$0xff] %v17284_v30  ;;  %v339_v38 = vrot.slane %v337_v14, 5  ;;  %v345_v39 = vrot.slane %v343_v16, 5  ;;  %18628 = vst [vmem:[#allocation38_spill] sm:$0xff] %v17292_v48  ;;  %4250 = vmatprep.mubr.bf16.mxu0 %v17284_v30  ;;  %4323 = vmatprep.mubr.bf16.mxu1 %v17292_v48  ;;  %v15112_v14 = vld [vmem:[#allocation7 + $0x9ac] ss:$12 sps:$4 sm:$0xff]  }
 0x119   :  { %4243 = vmatpush2.bf16.msra.mxu0 %v15086_v52  ;;  %4316 = vmatpush2.bf16.msra.mxu1 %v15089_v53  ;;  %v15106_v52 = vld [vmem:[#allocation7 + $0x6c4] ss:$12 sps:$4 sm:$0xff]   ;;  %v378_v31 = vrot.slane %v376_v6, 5  ;;  %v12853_v48 = vld [vmem:[%s18551_s0 + $0x8] sm:$0xf] }
 0x11a   :  { %4244 = vmatprep.subr.bf16.mxu0 %v15094_v55  ;;  %4317 = vmatprep.subr.bf16.mxu1 %v15097_v58  ;;  %v15109_v53 = vld [vmem:[#allocation7 + $0x844] ss:$12 sps:$4 sm:$0xff]   ;;  %v340_v55 = vor.u32 %v339_v38, %v336_v37  ;;  %v350_v58 = vor.u32 %v349_v40, %v345_v39  ;;  %v17302_v37 = vcombine.low %v969_v1, %v977_v9  ;;  %v15113_v6 = vld [vmem:[#allocation7 + $0xb28] ss:$12 sps:$4 sm:$0xff]  }
 0x11b   :  { %v17304_v38 = vcombine.low %v970_v12, %v978_v36  ;;  %v388_v12 = vld [vmem:[#allocation2 + $0xe4] sm:$0x3]  ;;  %v400_v36 = vshrl.u32 %v12853_v48, 16 }
 0x11c   :  { %v341_v16 = vrot.slane %v340_v55, 4  ;;  %v351_v23 = vrot.slane %v350_v58, 4  ;;  %18632 = vst [vmem:[#allocation40_spill] sm:$0xff] %v17302_v37  ;;  %v403_v58 = vshll.u32 %v12853_v48, 16 }
 0x11d   :  { %4245 = vmatpush2.bf16.msra.mxu0 %v15092_v59  ;;  %4318 = vmatpush2.bf16.msra.mxu1 %v15095_v60  ;;  %v380_v59 = vshrl.u32 %v12850_v35, 16  ;;  %v15104_v60 = vld [vmem:[#allocation7 + $0x6c0] ss:$12 sps:$4 sm:$0xff]   ;;  %18633 = vst [vmem:[#allocation41_spill] sm:$0xff] %v17304_v38 }
 0x11e   :  { %4246 = vmatprep.subr.bf16.mxu0 %v15100_v0  ;;  %4319 = vmatprep.subr.bf16.mxu1 %v15103_v4  ;;  %v355_v0 = vld [vmem:[#allocation2 + $0xe0] sm:$0x3]  ;;  %v369_v4 = vrot.slane %v367_v49, 4  ;;  %v15115_v35 = vld [vmem:[#allocation7 + $0xb2c] ss:$12 sps:$4 sm:$0xff]  }
 0x11f   :  { %v382_v43 = vrot.slane %v380_v59, 4  ;;  %v12854_v49 = vld [vmem:[%s18551_s0 + $0xc] sm:$0x3]  ;;  %v356_v1 = vsel %vm16890_vm2, %v351_v23, %v355_v0  ;;  %v405_v23 = vrot.slane %v403_v58, 5 }
 0x120   :  { %v373_v40 = vor.u32 %v372_v13, %v369_v4  ;;  %357 = vst [vmem:[#allocation2 + $0xe0] sm:$0x3] %v356_v1  ;;  %v15118_v13 = vld [vmem:[#allocation7 + $0x994] ss:$12 sps:$4 sm:$0xff]  }
 0x121   :  { %4247 = vmatpush2.bf16.msra.mxu0 %v15098_v24  ;;  %4320 = vmatpush2.bf16.msra.mxu1 %v15101_v47  ;;  %v346_v24 = vsel %vm17296_vm5, %v341_v16, %v345_v39  ;;  %v383_v9 = vor.u32 %v382_v43, %v378_v31  ;;  %v12857_v47 = vld [vmem:[%s18551_s0 + $0x48] sm:$0xf]  ;;  %v12858_v39 = vld [vmem:[%s18551_s0 + $0x4c] sm:$0x3]  ;;  %v402_v43 = vrot.slane %v400_v36, 4 }
 0x122   :  { %4248 = vmatprep.subr.bf16.mxu0 %v15106_v52  ;;  %4321 = vmatprep.subr.bf16.mxu1 %v15109_v53  ;;  %354 = vst [vmem:[#allocation2 + $0xa0] sm:$0xf] %v346_v24  ;;  %v374_v55 = vrot.slane %v373_v40, 4  ;;  %v409_v52 = vshll.u32 %v12854_v49, 16  ;;  %v413_v53 = vshrl.u32 %v12854_v49, 16  ;;  %v433_v0 = vshrl.u32 %v12857_v47, 16 }
 0x123   :  { %v384_v59 = vrot.slane %v383_v9, 4  ;;  %v436_v4 = vshll.u32 %v12857_v47, 16  ;;  %v15121_v49 = vld [vmem:[#allocation7 + $0xb14] ss:$12 sps:$4 sm:$0xff]   ;;  %v442_v36 = vshll.u32 %v12858_v39, 16 }
 0x124   :  { %v379_v16 = vsel %vm17296_vm5, %v374_v55, %v378_v31  ;;  %v411_v40 = vrot.slane %v409_v52, 5  ;;  %v415_v48 = vrot.slane %v413_v53, 4  ;;  %v435_v1 = vrot.slane %v433_v0, 4  ;;  %v15116_v47 = vld [vmem:[#allocation7 + $0x990] ss:$12 sps:$4 sm:$0xff]  }
 0x125   :  { %4249 = vmatpush2.bf16.msra.mxu0 %v15104_v60  ;;  %4322 = vmatpush2.bf16.msra.mxu1 %v15107_v8  ;;  %387 = vst [vmem:[#allocation2 + $0xa4] sm:$0xf] %v379_v16  ;;  %v389_v24 = vsel %vm16890_vm2, %v384_v59, %v388_v12  ;;  %v438_v9 = vrot.slane %v436_v4, 5  ;;  %v15119_v60 = vld [vmem:[#allocation7 + $0xb10] ss:$12 sps:$4 sm:$0xff]   ;;  %v406_v8 = vor.u32 %v405_v23, %v402_v43  ;;  %v446_v31 = vshrl.u32 %v12858_v39, 16 }
 0x126   :  { %4364 = vmatprep.subr.bf16.mxu0 %v15112_v14  ;;  %4437 = vmatprep.subr.bf16.mxu1 %v15115_v35  ;;  %390 = vst [vmem:[#allocation2 + $0xe4] sm:$0x3] %v389_v24  ;;  %v416_v30 = vor.u32 %v415_v48, %v411_v40  ;;  %v12907_v14 = vld [vmem:[%s18551_s0 + $0xa0] sm:$0xf]  ;;  %v15124_v35 = vld [vmem:[#allocation7 + $0x97c] ss:$12 sps:$4 sm:$0xff]  }
 0x127   :  { %v15127_v12 = vld [vmem:[#allocation7 + $0xafc] ss:$12 sps:$4 sm:$0xff]   ;;  %v439_v55 = vor.u32 %v438_v9, %v435_v1  ;;  %v444_v58 = vrot.slane %v442_v36, 5  ;;  %v12908_v52 = vld [vmem:[%s18551_s0 + $0xa4] sm:$0x3]  ;;  %v407_v39 = vrot.slane %v406_v8, 4 }
 0x128   :  { %4251 = vmatmul.mubr.bf16.vlgmr.msra.gmra.mxu0 %v17302_v37  ;;  %4324 = vmatmul.mubr.bf16.vlgmr.msra.gmra.mxu1 %v17304_v38  ;;  %703 = vst [vmem:[#allocation2 + $0x120] sm:$0xf] %v12907_v14  ;;  %v704_v53 = vld [vmem:[#allocation2 + $0x160] sm:$0x3]  ;;  %v417_v59 = vrot.slane %v416_v30, 4  ;;  %v448_v43 = vrot.slane %v446_v31, 4 }
 0x129   :  { %4365 = vmatpush1.bf16.msra.mxu0 %v15110_v51  ;;  %4438 = vmatpush1.bf16.msra.mxu1 %v15113_v6  ;;  %v705_v0 = vsel %vm16890_vm2, %v12908_v52, %v704_v53  ;;  %v12911_v4 = vld [vmem:[%s18551_s0 + $0xe0] sm:$0xf]  ;;  %v440_v16 = vrot.slane %v439_v55, 4  ;;  %v12912_v23 = vld [vmem:[%s18551_s0 + $0xe4] sm:$0x3]  ;;  %v412_v30 = vsel %vm17296_vm5, %v407_v39, %v411_v40 }
 0x12a   :  { %4366 = vmatprep.subr.bf16.mxu0 %v15118_v13  ;;  %4439 = vmatprep.subr.bf16.mxu1 %v15121_v49  ;;  %706 = vst [vmem:[#allocation2 + $0x160] sm:$0x3] %v705_v0  ;;  %736 = vst [vmem:[#allocation2 + $0x124] sm:$0xf] %v12911_v4  ;;  %v737_v51 = vld [vmem:[#allocation2 + $0x164] sm:$0x3]  ;;  %v422_v48 = vsel %vm16890_vm2, %v417_v59, %v421_v32  ;;  %v449_v24 = vor.u32 %v448_v43, %v444_v58 }
 0x12b   :  { %v15122_v6 = vld [vmem:[#allocation7 + $0x978] ss:$12 sps:$4 sm:$0xff]   ;;  %v738_v13 = vsel %vm16890_vm2, %v12912_v23, %v737_v51  ;;  %420 = vst [vmem:[#allocation2 + $0xa8] sm:$0xf] %v412_v30  ;;  %423 = vst [vmem:[#allocation2 + $0xe8] sm:$0x3] %v422_v48  ;;  %v445_v1 = vsel %vm17296_vm5, %v440_v16, %v444_v58 }
 0x12c   :  { %v15125_v49 = vld [vmem:[#allocation7 + $0xaf8] ss:$12 sps:$4 sm:$0xff]   ;;  %v454_v9 = vld [vmem:[#allocation2 + $0xec] sm:$0x3]  ;;  %739 = vst [vmem:[#allocation2 + $0x164] sm:$0x3] %v738_v13 }
 0x12d   :  { %v12915_v36 = vld [vmem:[%s18551_s0 + $0xa8] sm:$0xf]  ;;  %v12916_v32 = vld [vmem:[%s18551_s0 + $0xac] sm:$0x3]  ;;  %4367 = vmatpush1.bf16.msra.mxu0 %v15116_v47  ;;  %4440 = vmatpush1.bf16.msra.mxu1 %v15119_v60  ;;  %v985_v40 = vld [vmem:[#allocation2 + $0xa0] sm:$0xff]  ;;  %v450_v8 = vrot.slane %v449_v24, 4 }
 0x12e   :  { %453 = vst [vmem:[#allocation2 + $0xac] sm:$0xf] %v445_v1  ;;  %v15130_v31 = vld [vmem:[#allocation7 + $0x964] ss:$12 sps:$4 sm:$0xff]   ;;  %769 = vst [vmem:[#allocation2 + $0x128] sm:$0xf] %v12915_v36  ;;  %4368 = vmatprep.subr.bf16.mxu0 %v15124_v35  ;;  %4441 = vmatprep.subr.bf16.mxu1 %v15127_v12 }
 0x12f   :  { %v770_v14 = vld [vmem:[#allocation2 + $0x168] sm:$0x3]  ;;  %v993_v58 = vld [vmem:[#allocation2 + $0xe0] sm:$0xff]  ;;  %v12920_v47 = vld [vmem:[%s18551_s0 + $0xec] sm:$0x3]  ;;  %v455_v59 = vsel %vm16890_vm2, %v450_v8, %v454_v9 }
 0x130   :  { %v12919_v55 = vld [vmem:[%s18551_s0 + $0xe8] sm:$0xf]  ;;  %v771_v52 = vsel %vm16890_vm2, %v12916_v32, %v770_v14  ;;  %v803_v60 = vld [vmem:[#allocation2 + $0x16c] sm:$0x3]  ;;  %v17364_v53 = vcombine.high %v985_v40, %v993_v58  ;;  %v17366_v39 = vcombine.low %v985_v40, %v993_v58  ;;  %v15133_v43 = vld [vmem:[#allocation7 + $0xae4] ss:$12 sps:$4 sm:$0xff]  }
 0x131   :  { %802 = vst [vmem:[#allocation2 + $0x12c] sm:$0xf] %v12919_v55  ;;  %772 = vst [vmem:[#allocation2 + $0x168] sm:$0x3] %v771_v52  ;;  %v804_v35 = vsel %vm16890_vm2, %v12920_v47, %v803_v60  ;;  %v15128_v12 = vld [vmem:[#allocation7 + $0x960] ss:$12 sps:$4 sm:$0xff]   ;;  %4369 = vmatpush1.bf16.msra.mxu0 %v15122_v6  ;;  %4442 = vmatpush1.bf16.msra.mxu1 %v15125_v49 }
 0x132   :  { %18634 = vst [vmem:[#allocation42_spill] sm:$0xff] %v17364_v53  ;;  %18635 = vst [vmem:[#allocation43_spill] sm:$0xff] %v17366_v39  ;;  %4260 = vmatprep.mubr.bf16.mxu0 %v17364_v53  ;;  %v15131_v0 = vld [vmem:[#allocation7 + $0xae0] ss:$12 sps:$4 sm:$0xff]   ;;  %v1001_v4 = vld [vmem:[#allocation2 + $0x120] sm:$0xff]  ;;  %4370 = vmatprep.subr.bf16.mxu0 %v15130_v31 }
 0x133   :  { %456 = vst [vmem:[#allocation2 + $0xec] sm:$0x3] %v455_v59  ;;  %805 = vst [vmem:[#allocation2 + $0x16c] sm:$0x3] %v804_v35  ;;  %v15136_v16 = vld [vmem:[#allocation7 + $0x94c] ss:$12 sps:$4 sm:$0xff]   ;;  %4261 = vmatmul.mubr.bf16.gmra.mxu0 %v17366_v39  ;;  %4443 = vmatprep.subr.bf16.mxu1 %v15133_v43 }
 0x134   :  { %v15139_v23 = vld [vmem:[#allocation7 + $0xacc] ss:$12 sps:$4 sm:$0xff]   ;;  %v12909_v51 = vld [vmem:[%s18551_s0 + $0x80] sm:$0xf]  ;;  %v12910_v30 = vld [vmem:[%s18551_s0 + $0x84] sm:$0x3] }
 0x135   :  { %v1009_v48 = vld [vmem:[#allocation2 + $0x160] sm:$0xff]  ;;  %v710_v6 = vshrl.u32 %v12909_v51, 16  ;;  %v713_v13 = vshll.u32 %v12909_v51, 16  ;;  %v719_v1 = vshll.u32 %v12910_v30, 16  ;;  %v723_v9 = vshrl.u32 %v12910_v30, 16  ;;  %v986_v36 = vld [vmem:[#allocation2 + $0xa8] sm:$0xff]  ;;  %4371 = vmatpush1.bf16.msra.mxu0 %v15128_v12  ;;  %4444 = vmatpush1.bf16.msra.mxu1 %v15131_v0 }
 0x136   :  { %v15134_v24 = vld [vmem:[#allocation7 + $0x948] ss:$12 sps:$4 sm:$0xff]   ;;  %v17380_v32 = vcombine.high %v1001_v4, %v1009_v48  ;;  %v17382_v49 = vcombine.low %v1001_v4, %v1009_v48  ;;  %4372 = vmatprep.subr.bf16.mxu0 %v15136_v16  ;;  %4445 = vmatprep.subr.bf16.mxu1 %v15139_v23  ;;  %v15140_v30 = vld [vmem:[#allocation7 + $0x930] ss:$12 sps:$4 sm:$0xff]  }
 0x137   :  { %v12913_v40 = vld [vmem:[%s18551_s0 + $0xc0] sm:$0xf]  ;;  %v12914_v8 = vld [vmem:[%s18551_s0 + $0xc4] sm:$0x3]  ;;  %v712_v14 = vrot.slane %v710_v6, 4  ;;  %v715_v55 = vrot.slane %v713_v13, 5 }
 0x138   :  { %18636 = vst [vmem:[#allocation44_spill] sm:$0xff] %v17380_v32  ;;  %18637 = vst [vmem:[#allocation45_spill] sm:$0xff] %v17382_v49  ;;  %v1002_v31 = vld [vmem:[#allocation2 + $0x128] sm:$0xff]  ;;  %v721_v58 = vrot.slane %v719_v1, 5  ;;  %v725_v52 = vrot.slane %v723_v9, 4  ;;  %4270 = vmatprep.mubr.bf16.mxu0 %v17380_v32  ;;  %v743_v60 = vshrl.u32 %v12913_v40, 16 }
 0x139   :  { %v15137_v47 = vld [vmem:[#allocation7 + $0xac8] ss:$12 sps:$4 sm:$0xff]   ;;  %v746_v59 = vshll.u32 %v12913_v40, 16  ;;  %v752_v43 = vshll.u32 %v12914_v8, 16  ;;  %v756_v35 = vshrl.u32 %v12914_v8, 16  ;;  %v716_v12 = vor.u32 %v715_v55, %v712_v14  ;;  %4373 = vmatpush1.bf16.msra.mxu0 %v15134_v24 }
 0x13a   :  { %v994_v4 = vld [vmem:[#allocation2 + $0xe8] sm:$0xff]  ;;  %v726_v39 = vor.u32 %v725_v52, %v721_v58  ;;  %v731_v1 = vld [vmem:[#allocation2 + $0x1e0] sm:$0x3]  ;;  %v745_v8 = vrot.slane %v743_v60, 4  ;;  %4446 = vmatpush1.bf16.msra.mxu1 %v15137_v47 }
 0x13b   :  { %v1010_v51 = vld [vmem:[#allocation2 + $0x168] sm:$0xff]  ;;  %v17391_v6 = vcombine.high %v986_v36, %v994_v4  ;;  %v17393_v13 = vcombine.low %v986_v36, %v994_v4  ;;  %v717_v40 = vrot.slane %v716_v12, 4  ;;  %v748_v38 = vrot.slane %v746_v59, 5  ;;  %4271 = vmatmul.mubr.bf16.gmra.mxu0 %v17382_v49 }
 0x13c   :  { %v15142_v48 = vld [vmem:[#allocation7 + $0x934] ss:$12 sps:$4 sm:$0xff]   ;;  %v17395_v0 = vcombine.high %v1002_v31, %v1010_v51  ;;  %v727_v32 = vrot.slane %v726_v39, 4  ;;  %v17399_v16 = vcombine.low %v1002_v31, %v1010_v51  ;;  %v15143_v23 = vld [vmem:[#allocation7 + $0xab0] ss:$12 sps:$4 sm:$0xff]   ;;  %v754_v14 = vrot.slane %v752_v43, 5 }
 0x13d   :  { %18638 = vst [vmem:[#allocation46_spill] sm:$0xff] %v17391_v6  ;;  %18639 = vst [vmem:[#allocation47_spill] sm:$0xff] %v17393_v13  ;;  %v15145_v9 = vld [vmem:[#allocation7 + $0xab4] ss:$12 sps:$4 sm:$0xff]   ;;  %4333 = vmatprep.mubr.bf16.mxu1 %v17391_v6  ;;  %v758_v55 = vrot.slane %v756_v35, 4  ;;  %4374 = vmatprep.subr.bf16.mxu0 %v15142_v48  ;;  %v722_v39 = vsel %vm17296_vm5, %v717_v40, %v721_v58  ;;  %v749_v60 = vor.u32 %v748_v38, %v745_v8 }
 0x13e   :  { %18640 = vst [vmem:[#allocation48_spill] sm:$0xff] %v17395_v0  ;;  %18641 = vst [vmem:[#allocation49_spill] sm:$0xff] %v17399_v16  ;;  %v15148_v36 = vld [vmem:[#allocation7 + $0x91c] ss:$12 sps:$4 sm:$0xff]   ;;  %4334 = vmatmul.mubr.bf16.gmra.mxu1 %v17393_v13  ;;  %v732_v24 = vsel %vm16890_vm2, %v727_v32, %v731_v1  ;;  %v764_v31 = vld [vmem:[#allocation2 + $0x1e4] sm:$0x3]  ;;  %4447 = vmatprep.subr.bf16.mxu1 %v15145_v9 }
 0x13f   :  { %v12917_v52 = vld [vmem:[%s18551_s0 + $0x88] sm:$0xf]  ;;  %v12918_v43 = vld [vmem:[%s18551_s0 + $0x8c] sm:$0x3]  ;;  %4343 = vmatprep.mubr.bf16.mxu1 %v17395_v0  ;;  %730 = vst [vmem:[#allocation2 + $0x1a0] sm:$0xf] %v722_v39  ;;  %v759_v51 = vor.u32 %v758_v55, %v754_v14  ;;  %4375 = vmatpush1.bf16.msra.mxu0 %v15140_v30 }
 0x140   :  { %v15146_v59 = vld [vmem:[#allocation7 + $0x918] ss:$12 sps:$4 sm:$0xff]   ;;  %v15151_v4 = vld [vmem:[#allocation7 + $0xa9c] ss:$12 sps:$4 sm:$0xff]   ;;  %v776_v35 = vshrl.u32 %v12917_v52, 16  ;;  %v779_v48 = vshll.u32 %v12917_v52, 16  ;;  %4376 = vmatprep.subr.bf16.mxu0 %v15148_v36  ;;  %4448 = vmatpush1.bf16.msra.mxu1 %v15143_v23 }
 0x141   :  { %733 = vst [vmem:[#allocation2 + $0x1e0] sm:$0x3] %v732_v24  ;;  %v785_v58 = vshll.u32 %v12918_v43, 16  ;;  %v789_v12 = vshrl.u32 %v12918_v43, 16  ;;  %v12921_v38 = vld [vmem:[%s18551_s0 + $0xc8] sm:$0xf]  ;;  %4449 = vmatprep.subr.bf16.mxu1 %v15151_v4 }
 0x142   :  { %v750_v32 = vrot.slane %v749_v60, 4  ;;  %v778_v1 = vrot.slane %v776_v35, 4  ;;  %v12922_v40 = vld [vmem:[%s18551_s0 + $0xcc] sm:$0x3]  ;;  %v809_v8 = vshrl.u32 %v12921_v38, 16  ;;  %v812_v47 = vshll.u32 %v12921_v38, 16 }
 0x143   :  { %v760_v39 = vrot.slane %v759_v51, 4  ;;  %v15149_v55 = vld [vmem:[#allocation7 + $0xa98] ss:$12 sps:$4 sm:$0xff]   ;;  %v781_v52 = vrot.slane %v779_v48, 5  ;;  %v787_v24 = vrot.slane %v785_v58, 5  ;;  %v791_v43 = vrot.slane %v789_v12, 4  ;;  %4377 = vmatpush1.bf16.msra.mxu0 %v15146_v59 }
 0x144   :  { %v755_v49 = vsel %vm17296_vm5, %v750_v32, %v754_v14  ;;  %v797_v0 = vld [vmem:[#allocation2 + $0x1e8] sm:$0x3]  ;;  %v811_v9 = vrot.slane %v809_v8, 4  ;;  %v814_v30 = vrot.slane %v812_v47, 5  ;;  %v818_v60 = vshll.u32 %v12922_v40, 16  ;;  %4450 = vmatpush1.bf16.msra.mxu1 %v15149_v55 }
 0x145   :  { %763 = vst [vmem:[#allocation2 + $0x1a4] sm:$0xf] %v755_v49  ;;  %v765_v35 = vsel %vm16890_vm2, %v760_v39, %v764_v31  ;;  %v782_v13 = vor.u32 %v781_v52, %v778_v1  ;;  %v792_v38 = vor.u32 %v791_v43, %v787_v24  ;;  %v822_v51 = vshrl.u32 %v12922_v40, 16  ;;  %v15152_v36 = vld [vmem:[#allocation7 + $0x900] ss:$12 sps:$4 sm:$0xff]  }
 0x146   :  { %v15154_v6 = vld [vmem:[#allocation7 + $0x904] ss:$12 sps:$4 sm:$0xff]   ;;  %766 = vst [vmem:[#allocation2 + $0x1e4] sm:$0x3] %v765_v35  ;;  %v815_v48 = vor.u32 %v814_v30, %v811_v9  ;;  %v820_v58 = vrot.slane %v818_v60, 5  ;;  %4344 = vmatmul.mubr.bf16.gmra.mxu1 %v17399_v16 }
 0x147   :  { %v15157_v14 = vld [vmem:[#allocation7 + $0xa84] ss:$12 sps:$4 sm:$0xff]   ;;  %v783_v12 = vrot.slane %v782_v13, 4  ;;  %v793_v32 = vrot.slane %v792_v38, 4  ;;  %v824_v8 = vrot.slane %v822_v51, 4  ;;  %4378 = vmatprep.subr.bf16.mxu0 %v15154_v6 }
 0x148   :  { %v816_v49 = vrot.slane %v815_v48, 4  ;;  %v830_v23 = vld [vmem:[#allocation2 + $0x1ec] sm:$0x3]  ;;  %v15160_v31 = vld [vmem:[#allocation7 + $0xa6c] ss:$12 sps:$4 sm:$0xff]   ;;  %4451 = vmatprep.subr.bf16.mxu1 %v15157_v14  ;;  %4379 = vmatpush1.bf16.msra.mxu0 %v15152_v36 }
 0x149   :  { %v788_v1 = vsel %vm17296_vm5, %v783_v12, %v787_v24  ;;  %v798_v40 = vsel %vm16890_vm2, %v793_v32, %v797_v0  ;;  %v825_v4 = vor.u32 %v824_v8, %v820_v58  ;;  %v15155_v47 = vld [vmem:[#allocation7 + $0xa80] ss:$12 sps:$4 sm:$0xff]   ;;  %v15158_v6 = vld [vmem:[#allocation7 + $0xa68] ss:$12 sps:$4 sm:$0xff]   ;;  %4380 = vmatprep.subr.bf16.mxu0 %v15160_v31  ;;  %v15164_v9 = vld [vmem:[#allocation7 + $0xa50] ss:$12 sps:$4 sm:$0xff]   ;;  %v18575_v12 = vlaneseq }
 0x14a   :  { %796 = vst [vmem:[#allocation2 + $0x1a8] sm:$0xf] %v788_v1  ;;  %799 = vst [vmem:[#allocation2 + $0x1e8] sm:$0x3] %v798_v40  ;;  %v821_v13 = vsel %vm17296_vm5, %v816_v49, %v820_v58  ;;  %v15163_v59 = vld [vmem:[#allocation7 + $0xbec] ss:$12 sps:$4 sm:$0xff]   ;;  %4452 = vmatpush1.bf16.msra.mxu1 %v15155_v47 }
 0x14b   :  { %v826_v39 = vrot.slane %v825_v4, 4  ;;  %829 = vst [vmem:[#allocation2 + $0x1ac] sm:$0xf] %v821_v13  ;;  %v15166_v52 = vld [vmem:[#allocation7 + $0xa54] ss:$12 sps:$4 sm:$0xff]   ;;  %4453 = vmatprep.subr.bf16.mxu1 %v15163_v59  ;;  %v17444_v4 = vshrl.u32 %v18575_v12, 7 }
 0x14c   :  { %v1017_v24 = vld [vmem:[#allocation2 + $0x1a0] sm:$0xff]  ;;  %4381 = vmatpush2.bf16.msra.mxu0 %v15158_v6  ;;  %v15172_v38 = vld [vmem:[#allocation7 + $0xa3c] ss:$12 sps:$4 sm:$0xff]   ;;  %v15176_v31 = vld [vmem:[#allocation7 + $0xa20] ss:$12 sps:$4 sm:$0xff]  }
 0x14d   :  { %v1025_v43 = vld [vmem:[#allocation2 + $0x1e0] sm:$0xff]  ;;  %v831_v0 = vsel %vm16890_vm2, %v826_v39, %v830_v23  ;;  %4382 = vmatprep.subr.bf16.mxu0 %v15166_v52  ;;  %v15175_v48 = vld [vmem:[#allocation7 + $0xbbc] ss:$12 sps:$4 sm:$0xff]   ;;  %18646 = vst [vmem:[#allocation54_spill] sm:$0xff] %v17444_v4  ;;  %v15179_v47 = vld [vmem:[#allocation7 + $0xba0] ss:$12 sps:$4 sm:$0xff]  }
 0x14e   :  { %v15161_v55 = vld [vmem:[#allocation7 + $0xbe8] ss:$12 sps:$4 sm:$0xff]   ;;  %v17432_v30 = vcombine.high %v1017_v24, %v1025_v43  ;;  %v17434_v60 = vcombine.low %v1017_v24, %v1025_v43  ;;  %832 = vst [vmem:[#allocation2 + $0x1ec] sm:$0x3] %v831_v0  ;;  %v15167_v51 = vld [vmem:[#allocation7 + $0xbd0] ss:$12 sps:$4 sm:$0xff]  }
 0x14f   :  { %v15169_v35 = vld [vmem:[#allocation7 + $0xbd4] ss:$12 sps:$4 sm:$0xff]   ;;  %4454 = vmatpush2.bf16.msra.mxu1 %v15161_v55  ;;  %v15170_v36 = vld [vmem:[#allocation7 + $0xa38] ss:$12 sps:$4 sm:$0xff]   ;;  %v15188_v52 = vld [vmem:[#allocation7 + $0x9f0] ss:$12 sps:$4 sm:$0xff]  }
 0x150   :  { %18642 = vst [vmem:[#allocation50_spill] sm:$0xff] %v17432_v30  ;;  %18643 = vst [vmem:[#allocation51_spill] sm:$0xff] %v17434_v60  ;;  %4280 = vmatprep.mubr.bf16.mxu0 %v17432_v30  ;;  %4455 = vmatprep.subr.bf16.mxu1 %v15169_v35  ;;  %v15178_v14 = vld [vmem:[#allocation7 + $0xa24] ss:$12 sps:$4 sm:$0xff]   ;;  %v15184_v40 = vld [vmem:[#allocation7 + $0xa0c] ss:$12 sps:$4 sm:$0xff]  }
 0x151   :  { %4281 = vmatmul.mubr.bf16.gmra.mxu0 %v17434_v60  ;;  %v15173_v23 = vld [vmem:[#allocation7 + $0xbb8] ss:$12 sps:$4 sm:$0xff]   ;;  %v15182_v13 = vld [vmem:[#allocation7 + $0xa08] ss:$12 sps:$4 sm:$0xff]   ;;  %v17448_v24 = vsub.s32 0, %v17444_v4 }
 0x152   :  { %4383 = vmatpush2.bf16.msra.mxu0 %v15164_v9  ;;  %v1018_v58 = vld [vmem:[#allocation2 + $0x1a8] sm:$0xff]  ;;  %v15181_v1 = vld [vmem:[#allocation7 + $0xba4] ss:$12 sps:$4 sm:$0xff]   ;;  %v15185_v39 = vld [vmem:[#allocation7 + $0xb88] ss:$12 sps:$4 sm:$0xff]  }
 0x153   :  { %4384 = vmatprep.subr.bf16.mxu0 %v15172_v38  ;;  %4456 = vmatpush2.bf16.msra.mxu1 %v15167_v51  ;;  %v15187_v6 = vld [vmem:[#allocation7 + $0xb8c] ss:$12 sps:$4 sm:$0xff]   ;;  %v15190_v59 = vld [vmem:[#allocation7 + $0x9f4] ss:$12 sps:$4 sm:$0xff]   ;;  %18647 = vst [vmem:[#allocation55_spill] sm:$0xff] %v17448_v24 }
 0x154   :  { %4457 = vmatprep.subr.bf16.mxu1 %v15175_v48  ;;  %v15193_v43 = vld [vmem:[#allocation7 + $0xb74] ss:$12 sps:$4 sm:$0xff]   ;;  %v15196_v0 = vld [vmem:[#allocation7 + $0x9dc] ss:$12 sps:$4 sm:$0xff]   ;;  %v12860_v9 = vld [vmem:[%s18551_s0 + $0x34] sm:$0x3] }
 0x155   :  { %v1026_v32 = vld [vmem:[#allocation2 + $0x1e8] sm:$0xff]  ;;  %v12859_v55 = vld [vmem:[%s18551_s0 + $0x30] sm:$0xf]  ;;  %v12864_v51 = vld [vmem:[%s18551_s0 + $0x74] sm:$0x3] }
 0x156   :  { %v17438_v8 = vcombine.high %v1018_v58, %v1026_v32  ;;  %v17440_v49 = vcombine.low %v1018_v58, %v1026_v32  ;;  %4385 = vmatpush2.bf16.msra.mxu0 %v15170_v36  ;;  %459 = vst [vmem:[#allocation2 + $0x30] sm:$0xf] %v12859_v55  ;;  %v460_v35 = vld [vmem:[#allocation2 + $0x70] sm:$0x3]  ;;  %v493_v48 = vld [vmem:[#allocation2 + $0x74] sm:$0x3] }
 0x157   :  { %4386 = vmatprep.subr.bf16.mxu0 %v15178_v14  ;;  %4458 = vmatpush2.bf16.msra.mxu1 %v15173_v23  ;;  %v12863_v38 = vld [vmem:[%s18551_s0 + $0x70] sm:$0xf]  ;;  %v461_v36 = vsel %vm16890_vm2, %v12860_v9, %v460_v35  ;;  %v12867_v58 = vld [vmem:[%s18551_s0 + $0x38] sm:$0xf]  ;;  %v12868_v14 = vld [vmem:[%s18551_s0 + $0x3c] sm:$0x3]  ;;  %v494_v23 = vsel %vm16890_vm2, %v12864_v51, %v493_v48 }
 0x158   :  { %18644 = vst [vmem:[#allocation52_spill] sm:$0xff] %v17438_v8  ;;  %18645 = vst [vmem:[#allocation53_spill] sm:$0xff] %v17440_v49  ;;  %4353 = vmatprep.mubr.bf16.mxu1 %v17438_v8  ;;  %4459 = vmatprep.subr.bf16.mxu1 %v15181_v1  ;;  %v15191_v32 = vld [vmem:[#allocation7 + $0xb70] ss:$12 sps:$4 sm:$0xff]   ;;  %v12871_v1 = vld [vmem:[%s18551_s0 + $0x78] sm:$0xf] }
 0x159   :  { %4354 = vmatmul.mubr.bf16.gmra.mxu1 %v17440_v49  ;;  %492 = vst [vmem:[#allocation2 + $0x34] sm:$0xf] %v12863_v38  ;;  %462 = vst [vmem:[#allocation2 + $0x70] sm:$0x3] %v461_v36  ;;  %v15202_v9 = vld [vmem:[#allocation7 + $0x9c4] ss:$12 sps:$4 sm:$0xff]  }
 0x15a   :  { %4387 = vmatpush2.bf16.msra.mxu0 %v15176_v31  ;;  %525 = vst [vmem:[#allocation2 + $0x38] sm:$0xf] %v12867_v58  ;;  %v526_v31 = vld [vmem:[#allocation2 + $0x78] sm:$0x3]  ;;  %495 = vst [vmem:[#allocation2 + $0x74] sm:$0x3] %v494_v23 }
 0x15b   :  { %4388 = vmatprep.subr.bf16.mxu0 %v15184_v40  ;;  %4460 = vmatpush2.bf16.msra.mxu1 %v15179_v47  ;;  %v12872_v40 = vld [vmem:[%s18551_s0 + $0x7c] sm:$0x3]  ;;  %v15194_v47 = vld [vmem:[#allocation7 + $0x9d8] ss:$12 sps:$4 sm:$0xff]   ;;  %558 = vst [vmem:[#allocation2 + $0x3c] sm:$0xf] %v12871_v1 }
 0x15c   :  { %4461 = vmatprep.subr.bf16.mxu1 %v15187_v6  ;;  %v559_v6 = vld [vmem:[#allocation2 + $0x7c] sm:$0x3]  ;;  %v15197_v35 = vld [vmem:[#allocation7 + $0xb58] ss:$12 sps:$4 sm:$0xff]   ;;  %v1541_v48 = vld [vmem:[#allocation10] sm:$0x7] }
 0x15d   :  { %v560_v55 = vsel %vm16890_vm2, %v12872_v40, %v559_v6  ;;  %v15200_v38 = vld [vmem:[#allocation7 + $0x9c0] ss:$12 sps:$4 sm:$0xff]   ;;  %v15205_v51 = vld [vmem:[#allocation7 + $0xb44] ss:$12 sps:$4 sm:$0xff]   ;;  %v17483_v58 = vsub.s32 1, %v17444_v4  ;;  %v17490_v1 = vrot.slane %v1541_v48, %v17448_v24 }
 0x15e   :  { %4389 = vmatpush2.bf16.msra.mxu0 %v15182_v13  ;;  %v527_v13 = vsel %vm16890_vm2, %v12868_v14, %v526_v31  ;;  %561 = vst [vmem:[#allocation2 + $0x7c] sm:$0x3] %v560_v55  ;;  %v15207_v31 = vld [vmem:[#allocation7 + $0x2f0] ss:$12 sps:$4 sm:$0xff]   ;;  %v15210_v6 = vld [vmem:[#allocation7 + $0x158] ss:$12 sps:$4 sm:$0xff]  }
 0x15f   :  { %4390 = vmatprep.subr.bf16.mxu0 %v15190_v59  ;;  %4462 = vmatpush2.bf16.msra.mxu1 %v15185_v39  ;;  %v15199_v59 = vld [vmem:[#allocation7 + $0xb5c] ss:$12 sps:$4 sm:$0xff]   ;;  %528 = vst [vmem:[#allocation2 + $0x78] sm:$0x3] %v527_v13  ;;  %18648 = vst [vmem:[#allocation56_spill] sm:$0xff] %v17483_v58  ;;  %v17496_v13 = vrot.slane %v1541_v48, %v17483_v58 }
 0x160   :  { %4463 = vmatprep.subr.bf16.mxu1 %v15193_v43  ;;  %v971_v36 = vld [vmem:[#allocation2 + $0x30] sm:$0xff]  ;;  %v15206_v39 = vld [vmem:[#allocation7 + $0x170] ss:$12 sps:$4 sm:$0xff]  }
 0x161   :  { %v979_v14 = vld [vmem:[#allocation2 + $0x70] sm:$0xff]  ;;  %v15208_v40 = vld [vmem:[#allocation7 + $0xb0] ss:$12 sps:$4 sm:$0xff]  }
 0x162   :  { %4391 = vmatpush2.bf16.msra.mxu0 %v15188_v52  ;;  %v15203_v52 = vld [vmem:[#allocation7 + $0xb40] ss:$12 sps:$4 sm:$0xff]   ;;  %v17485_v43 = vcombine.low %v971_v36, %v979_v14  ;;  %v12862_v55 = vld [vmem:[%s18551_s0 + $0x14] sm:$0x3] }
 0x163   :  { %4392 = vmatprep.subr.bf16.mxu0 %v15196_v0  ;;  %4464 = vmatpush2.bf16.msra.mxu1 %v15191_v32  ;;  %v972_v23 = vld [vmem:[#allocation2 + $0x38] sm:$0xff]  ;;  %v17487_v0 = vcombine.high %v971_v36, %v979_v14  ;;  %v479_v36 = vshrl.u32 %v12862_v55, 16  ;;  %v12865_v48 = vld [vmem:[%s18551_s0 + $0x50] sm:$0xf] }
 0x164   :  { %4465 = vmatprep.subr.bf16.mxu1 %v15199_v59  ;;  %18649 = vst [vmem:[#allocation57_spill] sm:$0xff] %v17485_v43  ;;  %v12861_v59 = vld [vmem:[%s18551_s0 + $0x10] sm:$0xf]  ;;  %v502_v4 = vshll.u32 %v12865_v48, 16 }
 0x165   :  { %18650 = vst [vmem:[#allocation58_spill] sm:$0xff] %v17487_v0  ;;  %4396 = vmatprep.mubr.bf16.mxu0 %v17487_v0  ;;  %v15212_v24 = vld [vmem:[#allocation7 + $0x98] ss:$12 sps:$4 sm:$0xff]   ;;  %v481_v8 = vrot.slane %v479_v36, 4 }
 0x166   :  { %4393 = vmatpush2.bf16.msra.mxu0 %v15194_v47  ;;  %v980_v32 = vld [vmem:[#allocation2 + $0x78] sm:$0xff]  ;;  %v15211_v60 = vld [vmem:[#allocation7 + $0x2d8] ss:$12 sps:$4 sm:$0xff]   ;;  %v504_v30 = vrot.slane %v502_v4, 5 }
 0x167   :  { %4394 = vmatprep.subr.bf16.mxu0 %v15202_v9  ;;  %4466 = vmatpush2.bf16.msra.mxu1 %v15197_v35  ;;  %v17493_v47 = vcombine.high %v972_v23, %v980_v32  ;;  %v15209_v9 = vld [vmem:[#allocation7 + $0x230] ss:$12 sps:$4 sm:$0xff]   ;;  %v466_v35 = vshrl.u32 %v12861_v59, 16  ;;  %v17507_v14 = vcombine.low %v972_v23, %v980_v32 }
 0x168   :  { %4467 = vmatprep.subr.bf16.mxu1 %v15205_v51  ;;  %v475_v51 = vshll.u32 %v12862_v55, 16  ;;  %v3960_v12 = vpop.f32.mrf.mxu0  ;;  %v4033_v58 = vpop.f32.mrf.mxu1 }
 0x169   :  { %18651 = vst [vmem:[#allocation59_spill] sm:$0xff] %v17493_v47  ;;  %18652 = vst [vmem:[#allocation60_spill] sm:$0xff] %v17507_v14  ;;  %4469 = vmatprep.mubr.bf16.mxu1 %v17493_v47  ;;  %v3961_v55 = vadd.f32 %v3960_v12, %v17490_v1  ;;  %v468_v49 = vrot.slane %v466_v35, 4  ;;  %v12869_v47 = vld [vmem:[%s18551_s0 + $0x18] sm:$0xf] }
 0x16a   :  { %4395 = vmatpush2.bf16.msra.mxu0 %v15200_v38  ;;  %v469_v38 = vshll.u32 %v12861_v59, 16  ;;  %v499_v59 = vshrl.u32 %v12865_v48, 16  ;;  %v477_v32 = vrot.slane %v475_v51, 5  ;;  %v4035_v0 = vpop.f32.mrf.mxu1  ;;  %v532_v4 = vshrl.u32 %v12869_v47, 16 }
 0x16b   :  { %14290 = vmatprep.subr.bf16.mxu0 %v15206_v39  ;;  %v12866_v39 = vld [vmem:[%s18551_s0 + $0x54] sm:$0x3]  ;;  %4468 = vmatpush2.bf16.msra.mxu1 %v15203_v52  ;;  %v17518_v52 = vadd.f32 %v4033_v58, %v3961_v55  ;;  %v12873_v58 = vld [vmem:[%s18551_s0 + $0x58] sm:$0xf] }
 0x16c   :  { %v471_v23 = vrot.slane %v469_v38, 5  ;;  %14330 = vmatprep.subr.bf16.mxu1 %v15207_v31  ;;  %v501_v16 = vrot.slane %v499_v59, 4  ;;  %v508_v48 = vshll.u32 %v12866_v39, 16  ;;  %v487_v38 = vld [vmem:[#allocation2 + $0xf0] sm:$0x3]  ;;  %v512_v51 = vshrl.u32 %v12866_v39, 16 }
 0x16d   :  { %4397 = vmatmul.mubr.bf16.vlgmr.msra.gmra.mxu0 %v17485_v43  ;;  %v3962_v43 = vpop.f32.mrf.mxu0  ;;  %18653 = vst [vmem:[#allocation61_spill] sm:$0xff] %v17518_v52  ;;  %v482_v31 = vor.u32 %v481_v8, %v477_v32  ;;  %v520_v55 = vld [vmem:[#allocation2 + $0xf4] sm:$0x3]  ;;  %v15214_v52 = vld [vmem:[#allocation7 + $0x140] ss:$12 sps:$4 sm:$0xff]  }
 0x16e   :  { %14291 = vmatpush3.bf16.msra.mxu0 %v15208_v40  ;;  %v3963_v12 = vadd.f32 %v3962_v43, %v17496_v13  ;;  %v15213_v40 = vld [vmem:[#allocation7 + $0x218] ss:$12 sps:$4 sm:$0xff]   ;;  %v472_v35 = vor.u32 %v471_v23, %v468_v49  ;;  %4470 = vmatmul.mubr.bf16.vlgmr.msra.gmra.mxu1 %v17507_v14  ;;  %v505_v37 = vor.u32 %v504_v30, %v501_v16  ;;  %v510_v42 = vrot.slane %v508_v48, 5  ;;  %v12874_v16 = vld [vmem:[%s18551_s0 + $0x5c] sm:$0x3]  ;;  %v4037_v30 = vpop.f32.mrf.mxu1 }
 0x16f   :  { %14292 = vmatprep.subr.bf16.mxu0 %v15210_v6  ;;  %v3964_v53 = vpop.f32.mrf.mxu0  ;;  %v12870_v6 = vld [vmem:[%s18551_s0 + $0x1c] sm:$0x3]  ;;  %14331 = vmatpush3.bf16.msra.mxu1 %v15209_v9  ;;  %v514_v39 = vrot.slane %v512_v51, 4  ;;  %v483_v8 = vrot.slane %v482_v31, 4  ;;  %v534_v23 = vrot.slane %v532_v4, 4  ;;  %v535_v48 = vshll.u32 %v12869_v47, 16 }
 0x170   :  { %v17528_v43 = vadd.f32 %v4035_v0, %v3963_v12  ;;  %v3965_v49 = vadd.f32 %v3964_v53, %v17490_v1  ;;  %v473_v36 = vrot.slane %v472_v35, 4  ;;  %14332 = vmatprep.subr.bf16.mxu1 %v15211_v60  ;;  %v506_v59 = vrot.slane %v505_v37, 4  ;;  %v15215_v0 = vld [vmem:[#allocation7 + $0x2c0] ss:$12 sps:$4 sm:$0xff]  }
 0x171   :  { %v488_v12 = vsel %vm16890_vm2, %v483_v8, %v487_v38  ;;  %v537_v35 = vrot.slane %v535_v48, 5  ;;  %v541_v37 = vshll.u32 %v12870_v6, 16  ;;  %v545_v51 = vshrl.u32 %v12870_v6, 16  ;;  %v15216_v4 = vld [vmem:[#allocation7 + $0x80] ss:$12 sps:$4 sm:$0xff]  }
 0x172   :  { %18654 = vst [vmem:[#allocation62_spill] sm:$0xff] %v17528_v43  ;;  %14293 = vmatpush3.bf16.msra.mxu0 %v15212_v24  ;;  %v17534_v9 = vadd.f32 %v4037_v30, %v3965_v49  ;;  %v478_v53 = vsel %vm17296_vm5, %v473_v36, %v477_v32  ;;  %v515_v24 = vor.u32 %v514_v39, %v510_v42  ;;  %489 = vst [vmem:[#allocation2 + $0xf0] sm:$0x3] %v488_v12  ;;  %v15217_v6 = vld [vmem:[#allocation7 + $0x200] ss:$12 sps:$4 sm:$0xff]  }
 0x173   :  { %486 = vst [vmem:[#allocation2 + $0xb0] sm:$0xf] %v478_v53  ;;  %v511_v60 = vsel %vm17296_vm5, %v506_v59, %v510_v42  ;;  %14294 = vmatprep.subr.bf16.mxu0 %v15214_v52  ;;  %14333 = vmatpush3.bf16.msra.mxu1 %v15213_v40  ;;  %v565_v31 = vshrl.u32 %v12873_v58, 16  ;;  %v538_v32 = vor.u32 %v537_v35, %v534_v23  ;;  %v543_v49 = vrot.slane %v541_v37, 5  ;;  %v553_v40 = vld [vmem:[#allocation2 + $0xf8] sm:$0x3] }
 0x174   :  { %18655 = vst [vmem:[#allocation63_spill] sm:$0xff] %v17534_v9  ;;  %v516_v47 = vrot.slane %v515_v24, 4  ;;  %519 = vst [vmem:[#allocation2 + $0xb4] sm:$0xf] %v511_v60  ;;  %v568_v36 = vshll.u32 %v12873_v58, 16  ;;  %v574_v39 = vshll.u32 %v12874_v16, 16  ;;  %14334 = vmatprep.subr.bf16.mxu1 %v15215_v0 }
 0x175   :  { %v547_v30 = vrot.slane %v545_v51, 4  ;;  %v567_v42 = vrot.slane %v565_v31, 4  ;;  %v578_v8 = vshrl.u32 %v12874_v16, 16  ;;  %v539_v52 = vrot.slane %v538_v32, 4  ;;  %v586_v0 = vld [vmem:[#allocation2 + $0xfc] sm:$0x3] }
 0x176   :  { %v521_v38 = vsel %vm16890_vm2, %v516_v47, %v520_v55  ;;  %14295 = vmatpush3.bf16.msra.mxu0 %v15216_v4  ;;  %v570_v59 = vrot.slane %v568_v36, 5  ;;  %v576_v48 = vrot.slane %v574_v39, 5  ;;  %v15218_v12 = vld [vmem:[#allocation7 + $0x128] ss:$12 sps:$4 sm:$0xff]   ;;  %v17548_v4 = vpop.f32.mrf.mxu0  ;;  %v12923_v36 = vld [vmem:[%s18551_s0 + $0xb0] sm:$0xf] }
 0x177   :  { %522 = vst [vmem:[#allocation2 + $0xf4] sm:$0x3] %v521_v38  ;;  %v548_v53 = vor.u32 %v547_v30, %v543_v49  ;;  %v580_v24 = vrot.slane %v578_v8, 4  ;;  %v544_v58 = vsel %vm17296_vm5, %v539_v52, %v543_v49  ;;  %14335 = vmatpush3.bf16.msra.mxu1 %v15217_v6  ;;  %v15219_v16 = vld [vmem:[#allocation7 + $0x2a8] ss:$12 sps:$4 sm:$0xff]   ;;  %14296 = vmatprep.subr.bf16.mxu0 %v15218_v12  ;;  %18656 = vst [vmem:[#allocation64_spill] sm:$0xff] %v17548_v4 }
 0x178   :  { %v571_v23 = vor.u32 %v570_v59, %v567_v42  ;;  %552 = vst [vmem:[#allocation2 + $0xb8] sm:$0xf] %v544_v58  ;;  %v15220_v47 = vld [vmem:[#allocation7 + $0x68] ss:$12 sps:$4 sm:$0xff]   ;;  %14336 = vmatprep.subr.bf16.mxu1 %v15219_v16  ;;  %v12924_v39 = vld [vmem:[%s18551_s0 + $0xb4] sm:$0x3]  ;;  %v17575_v58 = vpop.f32.mrf.mxu1 }
 0x179   :  { %v549_v55 = vrot.slane %v548_v53, 4  ;;  %v581_v60 = vor.u32 %v580_v24, %v576_v48  ;;  %v15221_v49 = vld [vmem:[#allocation7 + $0x1e8] ss:$12 sps:$4 sm:$0xff]   ;;  %835 = vst [vmem:[#allocation2 + $0x130] sm:$0xf] %v12923_v36  ;;  %v3970_v24 = vpop.f32.mrf.mxu0  ;;  %18659 = vst [vmem:[#allocation67_spill] sm:$0xff] %v17575_v58 }
 0x17a   :  { %v572_v37 = vrot.slane %v571_v23, 4  ;;  %14297 = vmatpush3.bf16.msra.mxu0 %v15220_v47  ;;  %v836_v42 = vld [vmem:[#allocation2 + $0x170] sm:$0x3]  ;;  %v869_v6 = vld [vmem:[#allocation2 + $0x174] sm:$0x3] }
 0x17b   :  { %v987_v35 = vld [vmem:[#allocation2 + $0xb0] sm:$0xff]  ;;  %v554_v51 = vsel %vm16890_vm2, %v549_v55, %v553_v40  ;;  %v582_v31 = vrot.slane %v581_v60, 4  ;;  %14337 = vmatpush3.bf16.msra.mxu1 %v15221_v49  ;;  %v837_v59 = vsel %vm16890_vm2, %v12924_v39, %v836_v42  ;;  %v12931_v53 = vld [vmem:[%s18551_s0 + $0xb8] sm:$0xf]  ;;  %v3971_v60 = vadd.f32 %v3970_v24, %v17490_v1  ;;  %v3972_v47 = vpop.f32.mrf.mxu0  ;;  %v4043_v49 = vpop.f32.mrf.mxu1  ;;  %v15223_v36 = vld [vmem:[#allocation7 + $0x290] ss:$12 sps:$4 sm:$0xff]  }
 0x17c   :  { %555 = vst [vmem:[#allocation2 + $0xf8] sm:$0x3] %v554_v51  ;;  %v577_v32 = vsel %vm17296_vm5, %v572_v37, %v576_v48  ;;  %v12927_v8 = vld [vmem:[%s18551_s0 + $0xf0] sm:$0xf]  ;;  %v12928_v48 = vld [vmem:[%s18551_s0 + $0xf4] sm:$0x3]  ;;  %14338 = vmatprep.subr.bf16.mxu1 %v15223_v36 }
 0x17d   :  { %585 = vst [vmem:[#allocation2 + $0xbc] sm:$0xf] %v577_v32  ;;  %v587_v30 = vsel %vm16890_vm2, %v582_v31, %v586_v0  ;;  %868 = vst [vmem:[#allocation2 + $0x134] sm:$0xf] %v12927_v8  ;;  %v870_v23 = vsel %vm16890_vm2, %v12928_v48, %v869_v6  ;;  %v12932_v0 = vld [vmem:[%s18551_s0 + $0xbc] sm:$0x3]  ;;  %v3973_v32 = vadd.f32 %v3972_v47, %v17496_v13  ;;  %v4045_v8 = vpop.f32.mrf.mxu1 }
 0x17e   :  { %v995_v38 = vld [vmem:[#allocation2 + $0xf0] sm:$0xff]  ;;  %588 = vst [vmem:[#allocation2 + $0xfc] sm:$0x3] %v587_v30  ;;  %838 = vst [vmem:[#allocation2 + $0x170] sm:$0x3] %v837_v59  ;;  %v17596_v39 = vadd.f32 %v4043_v49, %v3971_v60 }
 0x17f   :  { %v17563_v52 = vcombine.high %v987_v35, %v995_v38  ;;  %v17565_v40 = vcombine.low %v987_v35, %v995_v38  ;;  %901 = vst [vmem:[#allocation2 + $0x138] sm:$0xf] %v12931_v53  ;;  %v902_v12 = vld [vmem:[#allocation2 + $0x178] sm:$0x3]  ;;  %871 = vst [vmem:[#allocation2 + $0x174] sm:$0x3] %v870_v23  ;;  %v3974_v38 = vpop.f32.mrf.mxu0  ;;  %v17599_v6 = vadd.f32 %v4045_v8, %v3973_v32  ;;  %v4047_v23 = vpop.f32.mrf.mxu1 }
 0x180   :  { %v12935_v55 = vld [vmem:[%s18551_s0 + $0xf8] sm:$0xf]  ;;  %v903_v16 = vsel %vm16890_vm2, %v12932_v0, %v902_v12  ;;  %v12936_v35 = vld [vmem:[%s18551_s0 + $0xfc] sm:$0x3]  ;;  %v15222_v31 = vld [vmem:[#allocation7 + $0x110] ss:$12 sps:$4 sm:$0xff]   ;;  %v3975_v42 = vadd.f32 %v3974_v38, %v17490_v1 }
 0x181   :  { %18657 = vst [vmem:[#allocation65_spill] sm:$0xff] %v17563_v52  ;;  %18658 = vst [vmem:[#allocation66_spill] sm:$0xff] %v17565_v40  ;;  %4406 = vmatprep.mubr.bf16.mxu0 %v17563_v52  ;;  %v935_v37 = vld [vmem:[#allocation2 + $0x17c] sm:$0x3]  ;;  %14298 = vmatprep.subr.bf16.mxu0 %v15222_v31  ;;  %v15224_v30 = vld [vmem:[#allocation7 + $0x50] ss:$12 sps:$4 sm:$0xff]   ;;  %v17605_v60 = vpop.f32.mrf.mxu0  ;;  %v17609_v47 = vpop.f32.mrf.mxu1 }
 0x182   :  { %934 = vst [vmem:[#allocation2 + $0x13c] sm:$0xf] %v12935_v55  ;;  %4407 = vmatmul.mubr.bf16.gmra.mxu0 %v17565_v40  ;;  %904 = vst [vmem:[#allocation2 + $0x178] sm:$0x3] %v903_v16  ;;  %v936_v51 = vsel %vm16890_vm2, %v12936_v35, %v935_v37  ;;  %v15225_v48 = vld [vmem:[#allocation7 + $0x1d0] ss:$12 sps:$4 sm:$0xff]   ;;  %v17607_v16 = vadd.f32 %v4047_v23, %v3975_v42 }
 0x183   :  { %937 = vst [vmem:[#allocation2 + $0x17c] sm:$0x3] %v936_v51  ;;  %14299 = vmatpush3.bf16.msra.mxu0 %v15224_v30  ;;  %14339 = vmatpush3.bf16.msra.mxu1 %v15225_v48  ;;  %v15226_v55 = vld [vmem:[#allocation7 + $0xf8] ss:$12 sps:$4 sm:$0xff]   ;;  %18662 = vst [vmem:[#allocation70_spill] sm:$0xff] %v17605_v60  ;;  %v3980_v8 = vpop.f32.mrf.mxu0 }
 0x184   :  { %v988_v59 = vld [vmem:[#allocation2 + $0xb8] sm:$0xff]  ;;  %v1003_v24 = vld [vmem:[#allocation2 + $0x130] sm:$0xff]  ;;  %18663 = vst [vmem:[#allocation71_spill] sm:$0xff] %v17609_v47  ;;  %14300 = vmatprep.subr.bf16.mxu0 %v15226_v55  ;;  %v17639_v60 = vadd.f32 %v3980_v8, %v17490_v1 }
 0x185   :  { %v996_v53 = vld [vmem:[#allocation2 + $0xf8] sm:$0xff]  ;;  %v15227_v32 = vld [vmem:[#allocation7 + $0x278] ss:$12 sps:$4 sm:$0xff]   ;;  %v17641_v9 = vpop.f32.mrf.mxu0 }
 0x186   :  { %v17601_v0 = vcombine.high %v988_v59, %v996_v53  ;;  %v17603_v12 = vcombine.low %v988_v59, %v996_v53  ;;  %v1011_v35 = vld [vmem:[#allocation2 + $0x170] sm:$0xff]  ;;  %14340 = vmatprep.subr.bf16.mxu1 %v15227_v32  ;;  %v17623_v59 = vpop.f32.mrf.mxu1 }
 0x187   :  { %v17612_v51 = vcombine.high %v1003_v24, %v1011_v35  ;;  %v17614_v31 = vcombine.low %v1003_v24, %v1011_v35  ;;  %v15228_v36 = vld [vmem:[#allocation7 + $0x38] ss:$12 sps:$4 sm:$0xff]  }
 0x188   :  { %18660 = vst [vmem:[#allocation68_spill] sm:$0xff] %v17601_v0  ;;  %18661 = vst [vmem:[#allocation69_spill] sm:$0xff] %v17603_v12  ;;  %4479 = vmatprep.mubr.bf16.mxu1 %v17601_v0  ;;  %v15229_v30 = vld [vmem:[#allocation7 + $0x1b8] ss:$12 sps:$4 sm:$0xff]   ;;  %14301 = vmatpush3.bf16.msra.mxu0 %v15228_v36 }
 0x189   :  { %v1004_v37 = vld [vmem:[#allocation2 + $0x138] sm:$0xff]  ;;  %18664 = vst [vmem:[#allocation72_spill] sm:$0xff] %v17612_v51  ;;  %18665 = vst [vmem:[#allocation73_spill] sm:$0xff] %v17614_v31  ;;  %4480 = vmatmul.mubr.bf16.gmra.mxu1 %v17603_v12  ;;  %4416 = vmatprep.mubr.bf16.mxu0 %v17612_v51  ;;  %v12925_v42 = vld [vmem:[%s18551_s0 + $0x90] sm:$0xf]  ;;  %v3984_v12 = vpop.f32.mrf.mxu0 }
 0x18a   :  { %v1012_v49 = vld [vmem:[#allocation2 + $0x178] sm:$0xff]  ;;  %4417 = vmatmul.mubr.bf16.gmra.mxu0 %v17614_v31  ;;  %v12926_v48 = vld [vmem:[%s18551_s0 + $0x94] sm:$0x3]  ;;  %v842_v53 = vshrl.u32 %v12925_v42, 16  ;;  %v845_v24 = vshll.u32 %v12925_v42, 16  ;;  %v17643_v42 = vpop.f32.mrf.mxu1  ;;  %14341 = vmatpush3.bf16.msra.mxu1 %v15229_v30 }
 0x18b   :  { %v17618_v38 = vcombine.high %v1004_v37, %v1012_v49  ;;  %v17630_v23 = vcombine.low %v1004_v37, %v1012_v49  ;;  %v851_v55 = vshll.u32 %v12926_v48, 16  ;;  %v855_v35 = vshrl.u32 %v12926_v48, 16  ;;  %v12929_v32 = vld [vmem:[%s18551_s0 + $0xd0] sm:$0xf]  ;;  %v12930_v47 = vld [vmem:[%s18551_s0 + $0xd4] sm:$0x3]  ;;  %v17653_v14 = vpop.f32.mrf.mxu0 }
 0x18c   :  { %v844_v37 = vrot.slane %v842_v53, 4  ;;  %v847_v49 = vrot.slane %v845_v24, 5  ;;  %v875_v36 = vshrl.u32 %v12929_v32, 16  ;;  %v878_v48 = vshll.u32 %v12929_v32, 16  ;;  %v17648_v8 = vpop.f32.mrf.mxu1  ;;  %v12934_v30 = vld [vmem:[%s18551_s0 + $0x9c] sm:$0x3] }
 0x18d   :  { %18666 = vst [vmem:[#allocation74_spill] sm:$0xff] %v17618_v38  ;;  %4489 = vmatprep.mubr.bf16.mxu1 %v17618_v38  ;;  %18667 = vst [vmem:[#allocation75_spill] sm:$0xff] %v17630_v23  ;;  %v853_v58 = vrot.slane %v851_v55, 5  ;;  %v857_v43 = vrot.slane %v855_v35, 4  ;;  %v884_v4 = vshll.u32 %v12930_v47, 16  ;;  %v888_v31 = vshrl.u32 %v12930_v47, 16 }
 0x18e   :  { %v12933_v38 = vld [vmem:[%s18551_s0 + $0x98] sm:$0xf]  ;;  %v848_v51 = vor.u32 %v847_v49, %v844_v37  ;;  %v877_v40 = vrot.slane %v875_v36, 4  ;;  %v880_v0 = vrot.slane %v878_v48, 5  ;;  %v863_v55 = vld [vmem:[#allocation2 + $0x1f0] sm:$0x3] }
 0x18f   :  { %v908_v53 = vshrl.u32 %v12933_v38, 16  ;;  %v858_v24 = vor.u32 %v857_v43, %v853_v58  ;;  %v886_v35 = vrot.slane %v884_v4, 5  ;;  %v890_v32 = vrot.slane %v888_v31, 4  ;;  %18668 = vst [vmem:[#allocation76_spill] sm:$0xff] %v17653_v14  ;;  %v12937_v49 = vld [vmem:[%s18551_s0 + $0xd8] sm:$0xf]  ;;  %v3990_v31 = vpop.f32.mrf.mxu0 }
 0x190   :  { %v911_v47 = vshll.u32 %v12933_v38, 16  ;;  %v849_v52 = vrot.slane %v848_v51, 4  ;;  %v881_v3 = vor.u32 %v880_v0, %v877_v40  ;;  %v917_v37 = vshll.u32 %v12934_v30, 16  ;;  %v12938_v4 = vld [vmem:[%s18551_s0 + $0xdc] sm:$0x3]  ;;  %v17662_v38 = vpop.f32.mrf.mxu1 }
 0x191   :  { %4490 = vmatmul.mubr.bf16.gmra.mxu1 %v17630_v23  ;;  %v910_v29 = vrot.slane %v908_v53, 4  ;;  %v859_v36 = vrot.slane %v858_v24, 4  ;;  %v891_v48 = vor.u32 %v890_v32, %v886_v35  ;;  %v921_v43 = vshrl.u32 %v12934_v30, 16  ;;  %18669 = vst [vmem:[#allocation77_spill] sm:$0xff] %v17662_v38  ;;  %v896_v51 = vld [vmem:[#allocation2 + $0x1f4] sm:$0x3] }
 0x192   :  { %v913_v56 = vrot.slane %v911_v47, 5  ;;  %v854_v40 = vsel %vm17296_vm5, %v849_v52, %v853_v58  ;;  %v882_v0 = vrot.slane %v881_v3, 4  ;;  %v919_v53 = vrot.slane %v917_v37, 5  ;;  %v15230_v52 = vld [vmem:[#allocation7 + $0xe0] ss:$12 sps:$4 sm:$0xff]  }
 0x193   :  { %v941_v14 = vshrl.u32 %v12937_v49, 16  ;;  %862 = vst [vmem:[#allocation2 + $0x1b0] sm:$0xf] %v854_v40  ;;  %v864_v24 = vsel %vm16890_vm2, %v859_v36, %v863_v55  ;;  %v892_v32 = vrot.slane %v891_v48, 4  ;;  %v923_v47 = vrot.slane %v921_v43, 4  ;;  %v3992_v55 = vpop.f32.mrf.mxu0  ;;  %v4063_v36 = vpop.f32.mrf.mxu1  ;;  %14302 = vmatprep.subr.bf16.mxu0 %v15230_v52 }
 0x194   :  { %v914_v30 = vor.u32 %v913_v56, %v910_v29  ;;  %865 = vst [vmem:[#allocation2 + $0x1f0] sm:$0x3] %v864_v24  ;;  %v887_v23 = vsel %vm17296_vm5, %v882_v0, %v886_v35  ;;  %v944_v25 = vshll.u32 %v12937_v49, 16  ;;  %v950_v41 = vshll.u32 %v12938_v4, 16  ;;  %v15231_v48 = vld [vmem:[#allocation7 + $0x260] ss:$12 sps:$4 sm:$0xff]  }
 0x195   :  { %v943_v38 = vrot.slane %v941_v14, 4  ;;  %895 = vst [vmem:[#allocation2 + $0x1b4] sm:$0xf] %v887_v23  ;;  %v897_v3 = vsel %vm16890_vm2, %v892_v32, %v896_v51  ;;  %v924_v37 = vor.u32 %v923_v47, %v919_v53  ;;  %v954_v40 = vshrl.u32 %v12938_v4, 16  ;;  %v15232_v4 = vld [vmem:[#allocation7 + $0x20] ss:$12 sps:$4 sm:$0xff]   ;;  %v4065_v51 = vpop.f32.mrf.mxu1  ;;  %14342 = vmatprep.subr.bf16.mxu1 %v15231_v48 }
 0x196   :  { %v915_v58 = vrot.slane %v914_v30, 4  ;;  %898 = vst [vmem:[#allocation2 + $0x1f4] sm:$0x3] %v897_v3  ;;  %v946_v56 = vrot.slane %v944_v25, 5  ;;  %v952_v29 = vrot.slane %v950_v41, 5  ;;  %v3983_v14 = vadd.f32 %v17641_v9, %v17496_v13  ;;  %14303 = vmatpush3.bf16.msra.mxu0 %v15232_v4 }
 0x197   :  { %v17676_v35 = vadd.f32 %v17623_v59, %v17639_v60  ;;  %v925_v49 = vrot.slane %v924_v37, 4  ;;  %v956_v43 = vrot.slane %v954_v40, 4  ;;  %v3985_v0 = vadd.f32 %v3984_v12, %v17490_v1  ;;  %v962_v41 = vld [vmem:[#allocation2 + $0x1fc] sm:$0x3]  ;;  %v15234_v32 = vld [vmem:[#allocation7 + $0xc8] ss:$12 sps:$4 sm:$0xff]  }
 0x198   :  { %v920_v23 = vsel %vm17296_vm5, %v915_v58, %v919_v53  ;;  %v947_v25 = vor.u32 %v946_v56, %v943_v38  ;;  %v15233_v24 = vld [vmem:[#allocation7 + $0x1a0] ss:$12 sps:$4 sm:$0xff]   ;;  %v17682_v9 = vadd.f32 %v17643_v42, %v3983_v14  ;;  %v3991_v60 = vadd.f32 %v3990_v31, %v17490_v1  ;;  %v3994_v38 = vpop.f32.mrf.mxu0  ;;  %14304 = vmatprep.subr.bf16.mxu0 %v15234_v32  ;;  %v15235_v3 = vld [vmem:[#allocation7 + $0x248] ss:$12 sps:$4 sm:$0xff]   ;;  %v4067_v58 = vpop.f32.mrf.mxu1 }
 0x199   :  { %928 = vst [vmem:[#allocation2 + $0x1b8] sm:$0xf] %v920_v23  ;;  %v930_v59 = vsel %vm16890_vm2, %v925_v49, %v929_v2  ;;  %v957_v53 = vor.u32 %v956_v43, %v952_v29  ;;  %v17688_v30 = vadd.f32 %v17648_v8, %v3985_v0  ;;  %v3993_v12 = vadd.f32 %v3992_v55, %v17496_v13  ;;  %v15236_v40 = vld [vmem:[#allocation7 + $0x8] ss:$12 sps:$4 sm:$0xff]   ;;  %v15238_v23 = vld [vmem:[#allocation7 + $0x470] ss:$12 sps:$4 sm:$0xff]  }
 0x19a   :  { %931 = vst [vmem:[#allocation2 + $0x1f8] sm:$0x3] %v930_v59  ;;  %v948_v47 = vrot.slane %v947_v25, 4  ;;  %14343 = vmatpush3.bf16.msra.mxu1 %v15233_v24  ;;  %v17691_v52 = vadd.f32 %v4063_v36, %v3991_v60  ;;  %v3995_v42 = vadd.f32 %v3994_v38, %v17490_v1  ;;  %14305 = vmatpush3.bf16.msra.mxu0 %v15236_v40  ;;  %v15237_v14 = vld [vmem:[#allocation7 + $0x188] ss:$12 sps:$4 sm:$0xff]   ;;  %v17713_v25 = vpop.f32.mrf.mxu0 }
 0x19b   :  { %v958_v31 = vrot.slane %v957_v53, 4  ;;  %v17694_v2 = vadd.f32 %v4065_v51, %v3993_v12  ;;  %14344 = vmatprep.subr.bf16.mxu1 %v15235_v3  ;;  %14370 = vmatprep.subr.bf16.mxu0 %v15238_v23  ;;  %v15240_v0 = vld [vmem:[#allocation7 + $0x3b0] ss:$12 sps:$4 sm:$0xff]   ;;  %v15242_v51 = vld [vmem:[#allocation7 + $0x458] ss:$12 sps:$4 sm:$0xff]   ;;  %18670 = vst [vmem:[#allocation78_spill] sm:$0xff] %v17713_v25 }
 0x19c   :  { %v1019_v37 = vld [vmem:[#allocation2 + $0x1b0] sm:$0xff]  ;;  %v953_v8 = vsel %vm17296_vm5, %v948_v47, %v952_v29  ;;  %v17698_v55 = vadd.f32 %v4067_v58, %v3995_v42  ;;  %v15239_v29 = vld [vmem:[#allocation7 + $0x5f0] ss:$12 sps:$4 sm:$0xff]  }
 0x19d   :  { %v1027_v56 = vld [vmem:[#allocation2 + $0x1f0] sm:$0xff]  ;;  %961 = vst [vmem:[#allocation2 + $0x1bc] sm:$0xf] %v953_v8  ;;  %v963_v36 = vsel %vm16890_vm2, %v958_v31, %v962_v41  ;;  %v17715_v41 = vpop.f32.mrf.mxu1  ;;  %v15241_v12 = vld [vmem:[#allocation7 + $0x530] ss:$12 sps:$4 sm:$0xff]  }
 0x19e   :  { %v17702_v1 = vcombine.high %v1019_v37, %v1027_v56  ;;  %964 = vst [vmem:[#allocation2 + $0x1fc] sm:$0x3] %v963_v36  ;;  %v17704_v48 = vcombine.low %v1019_v37, %v1027_v56  ;;  %14345 = vmatpush3.bf16.msra.mxu1 %v15237_v14  ;;  %18671 = vst [vmem:[#allocation79_spill] sm:$0xff] %v17715_v41  ;;  %v15244_v60 = vld [vmem:[#allocation7 + $0x398] ss:$12 sps:$4 sm:$0xff]  }
 0x19f   :  { %14410 = vmatprep.subr.bf16.mxu1 %v15239_v29  ;;  %v15246_v59 = vld [vmem:[#allocation7 + $0x440] ss:$12 sps:$4 sm:$0xff]   ;;  %v15243_v47 = vld [vmem:[#allocation7 + $0x5d8] ss:$12 sps:$4 sm:$0xff]   ;;  %v15250_v3 = vld [vmem:[#allocation7 + $0x428] ss:$12 sps:$4 sm:$0xff]  }
 0x1a0   :  { %4426 = vmatprep.mubr.bf16.mxu0 %v17702_v1  ;;  %v15248_v42 = vld [vmem:[#allocation7 + $0x380] ss:$12 sps:$4 sm:$0xff]   ;;  %v15252_v56 = vld [vmem:[#allocation7 + $0x368] ss:$12 sps:$4 sm:$0xff]   ;;  %vm8530_vm2 = vsmask.f32 7942 }
 0x1a1   :  { %4427 = vmatmul.mubr.bf16.gmra.mxu0 %v17704_v48  ;;  %v15247_v8 = vld [vmem:[#allocation7 + $0x5c0] ss:$12 sps:$4 sm:$0xff]   ;;  %v15340_v41 = vld [vmem:[#allocation12 + $0x78] ss:$12 sps:$4 sm:$0xff]   ;;  %vm18355_vm4 = vmand %vm8189_vm8, %vm8530_vm2 }
 0x1a2   :  { %4542 = vmatprep.mubr.bf16.mxu0 %v16926_v15  ;;  %v15249_v29 = vld [vmem:[#allocation7 + $0x500] ss:$12 sps:$4 sm:$0xff]   ;;  %v15345_v25 = vld [vmem:[#allocation12 + $0x64] ss:$12 sps:$4 sm:$0xff]   ;;  %vm8532_vm6 = vmor %vm18355_vm4, %vm18346_vm3 }
 0x1a4   :  { %v1020_v45 = vld [vmem:[#allocation2 + $0x1b8] sm:$0xff] }
 0x1a5   :  { %v1028_v49 = vld [vmem:[#allocation2 + $0x1f8] sm:$0xff] }
 0x1a6   :  { %v17709_v43 = vcombine.high %v1020_v45, %v1028_v49  ;;  %v17711_v4 = vcombine.low %v1020_v45, %v1028_v49 }
 0x1a8   :  { %4499 = vmatprep.mubr.bf16.mxu1 %v17709_v43  ;;  %v17720_v15 = vpop.f32.mrf.mxu0  ;;  %v17722_v24 = vpop.f32.mrf.mxu1 }
 0x1a9   :  { %4500 = vmatmul.mubr.bf16.gmra.mxu1 %v17711_v4  ;;  %4543 = vmatmul.mubr.bf16.vlgmr.msra.gmra.mxu0 %v16932_v26 }
 0x1aa   :  { %4607 = vmatprep.mubr.bf16.mxu1 %v16928_v20  ;;  %14371 = vmatpush3.bf16.msra.mxu0 %v15240_v0  ;;  %v17726_v53 = vpop.f32.mrf.mxu0  ;;  %v17728_v32 = vpop.f32.mrf.mxu1 }
 0x1ab   :  { %14372 = vmatprep.subr.bf16.mxu0 %v15242_v51  ;;  %4550 = vmatprep.mubr.bf16.mxu0 %v16976_v10  ;;  %v15245_v10 = vld [vmem:[#allocation7 + $0x518] ss:$12 sps:$4 sm:$0xff]   ;;  %v15256_v51 = vld [vmem:[#allocation7 + $0x350] ss:$12 sps:$4 sm:$0xff]  }
 0x1ac   :  { %v17730_v38 = vpop.f32.mrf.mxu0  ;;  %v17732_v26 = vpop.f32.mrf.mxu1 }
 0x1ae   :  { %14373 = vmatpush3.bf16.msra.mxu0 %v15244_v60  ;;  %v17734_v20 = vpop.f32.mrf.mxu0  ;;  %v17736_v31 = vpop.f32.mrf.mxu1 }
 0x1af   :  { %14374 = vmatprep.subr.bf16.mxu0 %v15246_v59 }
 0x1b0   :  { %v4116_v58 = vpop.f32.mrf.mxu0  ;;  %v4189_v37 = vpop.f32.mrf.mxu1 }
 0x1b1   :  { %4608 = vmatmul.mubr.bf16.vlgmr.msra.gmra.mxu1 %v16934_v27  ;;  %4551 = vmatmul.mubr.bf16.gmra.mxu0 %v16978_v11  ;;  %v4117_v40 = vadd.f32 %v4116_v58, %v17596_v39  ;;  %v15254_v27 = vld [vmem:[#allocation7 + $0x410] ss:$12 sps:$4 sm:$0xff]  }
 0x1b2   :  { %14411 = vmatpush3.bf16.msra.mxu1 %v15241_v12  ;;  %4615 = vmatprep.mubr.bf16.mxu1 %v16991_v21  ;;  %v4118_v36 = vpop.f32.mrf.mxu0  ;;  %v4191_v14 = vpop.f32.mrf.mxu1  ;;  %v15251_v21 = vld [vmem:[#allocation7 + $0x5a8] ss:$12 sps:$4 sm:$0xff]  }
 0x1b3   :  { %14412 = vmatprep.subr.bf16.mxu1 %v15243_v47  ;;  %14375 = vmatpush3.bf16.msra.mxu0 %v15248_v42  ;;  %v4119_v23 = vadd.f32 %v4118_v36, %v17599_v6  ;;  %v17744_v11 = vadd.f32 %v4189_v37, %v4117_v40  ;;  %v15258_v6 = vld [vmem:[#allocation7 + $0x3f8] ss:$12 sps:$4 sm:$0xff]   ;;  %v15253_v12 = vld [vmem:[#allocation7 + $0x4e8] ss:$12 sps:$4 sm:$0xff]   ;;  %v15255_v42 = vld [vmem:[#allocation7 + $0x590] ss:$12 sps:$4 sm:$0xff]  }
 0x1b4   :  { %14376 = vmatprep.subr.bf16.mxu0 %v15250_v3  ;;  %4558 = vmatprep.mubr.bf16.mxu0 %v17020_v50  ;;  %v4120_v45 = vpop.f32.mrf.mxu0  ;;  %v4193_v49 = vpop.f32.mrf.mxu1  ;;  %v15257_v40 = vld [vmem:[#allocation7 + $0x4d0] ss:$12 sps:$4 sm:$0xff]  }
 0x1b5   :  { %v4121_v39 = vadd.f32 %v4120_v45, %v17607_v16  ;;  %v17747_v0 = vadd.f32 %v4191_v14, %v4119_v23  ;;  %v15261_v45 = vld [vmem:[#allocation7 + $0x4b8] ss:$12 sps:$4 sm:$0xff]  }
 0x1b6   :  { %14413 = vmatpush3.bf16.msra.mxu1 %v15245_v10  ;;  %v17749_v60 = vpop.f32.mrf.mxu0  ;;  %v17751_v50 = vpop.f32.mrf.mxu1  ;;  %v15260_v10 = vld [vmem:[#allocation7 + $0x338] ss:$12 sps:$4 sm:$0xff]  }
 0x1b7   :  { %14414 = vmatprep.subr.bf16.mxu1 %v15247_v8  ;;  %14377 = vmatpush3.bf16.msra.mxu0 %v15252_v56  ;;  %v17753_v59 = vadd.f32 %v4193_v49, %v4121_v39  ;;  %v15268_v39 = vld [vmem:[#allocation7 + $0x308] ss:$12 sps:$4 sm:$0xff]  }
 0x1b8   :  { %14378 = vmatprep.subr.bf16.mxu0 %v15254_v27  ;;  %v4126_v47 = vpop.f32.mrf.mxu0  ;;  %v4199_v16 = vpop.f32.mrf.mxu1  ;;  %v15264_v27 = vld [vmem:[#allocation7 + $0x320] ss:$12 sps:$4 sm:$0xff]  }
 0x1b9   :  { %4616 = vmatmul.mubr.bf16.gmra.mxu1 %v17002_v28  ;;  %4559 = vmatmul.mubr.bf16.gmra.mxu0 %v17030_v57  ;;  %v4127_v3 = vadd.f32 %v4126_v47, %v17676_v35  ;;  %v15262_v28 = vld [vmem:[#allocation7 + $0x3e0] ss:$12 sps:$4 sm:$0xff]  }
 0x1ba   :  { %14415 = vmatpush3.bf16.msra.mxu1 %v15249_v29  ;;  %4623 = vmatprep.mubr.bf16.mxu1 %v17040_v62  ;;  %v4128_v58 = vpop.f32.mrf.mxu0  ;;  %v4201_v37 = vpop.f32.mrf.mxu1  ;;  %v15259_v62 = vld [vmem:[#allocation7 + $0x578] ss:$12 sps:$4 sm:$0xff]  }
 0x1bb   :  { %14416 = vmatprep.subr.bf16.mxu1 %v15251_v21  ;;  %14379 = vmatpush3.bf16.msra.mxu0 %v15256_v51  ;;  %v4129_v8 = vadd.f32 %v4128_v58, %v17682_v9  ;;  %v17761_v57 = vadd.f32 %v4199_v16, %v4127_v3  ;;  %v15265_v16 = vld [vmem:[#allocation7 + $0x4a0] ss:$12 sps:$4 sm:$0xff]  }
 0x1bc   :  { %14380 = vmatprep.subr.bf16.mxu0 %v15258_v6  ;;  %4566 = vmatprep.mubr.bf16.mxu0 %v17058_v18  ;;  %v4130_v56 = vpop.f32.mrf.mxu0  ;;  %v4203_v36 = vpop.f32.mrf.mxu1  ;;  %v15266_v18 = vld [vmem:[#allocation7 + $0x3c8] ss:$12 sps:$4 sm:$0xff]   ;;  %v15270_v6 = vld [vmem:[#allocation7 + $0x770] ss:$12 sps:$4 sm:$0xff]  }
 0x1bd   :  { %v4131_v35 = vadd.f32 %v4130_v56, %v17688_v30  ;;  %v17764_v14 = vadd.f32 %v4201_v37, %v4129_v8  ;;  %v15263_v30 = vld [vmem:[#allocation7 + $0x560] ss:$12 sps:$4 sm:$0xff]   ;;  %v15269_v37 = vld [vmem:[#allocation7 + $0x488] ss:$12 sps:$4 sm:$0xff]  }
 0x1be   :  { %14417 = vmatpush3.bf16.msra.mxu1 %v15253_v12  ;;  %v17766_v23 = vpop.f32.mrf.mxu0  ;;  %v17770_v9 = vpop.f32.mrf.mxu1  ;;  %v15278_v8 = vld [vmem:[#allocation7 + $0x740] ss:$12 sps:$4 sm:$0xff]  }
 0x1bf   :  { %14418 = vmatprep.subr.bf16.mxu1 %v15255_v42  ;;  %14381 = vmatpush3.bf16.msra.mxu0 %v15260_v10  ;;  %v17768_v29 = vadd.f32 %v4203_v36, %v4131_v35  ;;  %v15272_v10 = vld [vmem:[#allocation7 + $0x6b0] ss:$12 sps:$4 sm:$0xff]   ;;  %v15280_v56 = vld [vmem:[#allocation7 + $0x680] ss:$12 sps:$4 sm:$0xff]   ;;  %v15277_v36 = vld [vmem:[#allocation7 + $0x818] ss:$12 sps:$4 sm:$0xff]  }
 0x1c0   :  { %14382 = vmatprep.subr.bf16.mxu0 %v15262_v28  ;;  %v4136_v49 = vpop.f32.mrf.mxu0  ;;  %v4209_v12 = vpop.f32.mrf.mxu1  ;;  %v15276_v28 = vld [vmem:[#allocation7 + $0x698] ss:$12 sps:$4 sm:$0xff]   ;;  %v15286_v35 = vld [vmem:[#allocation7 + $0x710] ss:$12 sps:$4 sm:$0xff]  }
 0x1c1   :  { %4624 = vmatmul.mubr.bf16.gmra.mxu1 %v17042_v63  ;;  %4567 = vmatmul.mubr.bf16.gmra.mxu0 %v17060_v19  ;;  %v4137_v21 = vadd.f32 %v4136_v49, %v17691_v52  ;;  %v15267_v52 = vld [vmem:[#allocation7 + $0x548] ss:$12 sps:$4 sm:$0xff]  }
 0x1c2   :  { %14419 = vmatpush3.bf16.msra.mxu1 %v15257_v40  ;;  %4631 = vmatprep.mubr.bf16.mxu1 %v17067_v33  ;;  %v4138_v51 = vpop.f32.mrf.mxu0  ;;  %v4211_v42 = vpop.f32.mrf.mxu1  ;;  %v15273_v40 = vld [vmem:[#allocation7 + $0x830] ss:$12 sps:$4 sm:$0xff]   ;;  %v15285_v49 = vld [vmem:[#allocation7 + $0x7e8] ss:$12 sps:$4 sm:$0xff]  }
 0x1c3   :  { %14420 = vmatprep.subr.bf16.mxu1 %v15259_v62  ;;  %14383 = vmatpush3.bf16.msra.mxu0 %v15264_v27  ;;  %v4139_v63 = vadd.f32 %v4138_v51, %v17694_v2  ;;  %v17778_v47 = vadd.f32 %v4209_v12, %v4137_v21  ;;  %v15274_v2 = vld [vmem:[#allocation7 + $0x758] ss:$12 sps:$4 sm:$0xff]   ;;  %v15281_v27 = vld [vmem:[#allocation7 + $0x800] ss:$12 sps:$4 sm:$0xff]   ;;  %v15287_v21 = vld [vmem:[#allocation7 + $0x890] ss:$12 sps:$4 sm:$0xff]  }
 0x1c4   :  { %14384 = vmatprep.subr.bf16.mxu0 %v15266_v18  ;;  %4672 = vmatprep.mubr.bf16.mxu0 %v17108_v5  ;;  %v4140_v19 = vpop.f32.mrf.mxu0  ;;  %v4213_v5 = vpop.f32.mrf.mxu1  ;;  %v18672_v62 = vld [vmem:[#allocation29_spill] sm:$0xff] }
 0x1c5   :  { %v4141_v33 = vadd.f32 %v4140_v19, %v17698_v55  ;;  %v17781_v3 = vadd.f32 %v4211_v42, %v4139_v63  ;;  %v15271_v55 = vld [vmem:[#allocation7 + $0x8f0] ss:$12 sps:$4 sm:$0xff]   ;;  %v15291_v12 = vld [vmem:[#allocation7 + $0x878] ss:$12 sps:$4 sm:$0xff]   ;;  %v15296_v19 = vld [vmem:[#allocation7 + $0x620] ss:$12 sps:$4 sm:$0xff]  }
 0x1c6   :  { %14421 = vmatpush3.bf16.msra.mxu1 %v15261_v45  ;;  %v15288_v18 = vld [vmem:[#allocation7 + $0x650] ss:$12 sps:$4 sm:$0xff]   ;;  %v15293_v42 = vld [vmem:[#allocation7 + $0x7b8] ss:$12 sps:$4 sm:$0xff]  }
 0x1c7   :  { %14422 = vmatprep.subr.bf16.mxu1 %v15263_v30  ;;  %14385 = vmatpush3.bf16.msra.mxu0 %v15268_v39  ;;  %v17784_v58 = vadd.f32 %v4213_v5, %v4141_v33  ;;  %v18673_v45 = vld [vmem:[#allocation28_spill] sm:$0xff]  ;;  %v18675_v30 = vld [vmem:[#allocation30_spill] sm:$0xff]  ;;  %v18676_v51 = vld [vmem:[#allocation33_spill] sm:$0xff] }
 0x1c8   :  { %14450 = vmatprep.subr.bf16.mxu0 %v15270_v6  ;;  %v15292_v39 = vld [vmem:[#allocation7 + $0x638] ss:$12 sps:$4 sm:$0xff]   ;;  %v15294_v6 = vld [vmem:[#allocation7 + $0x6e0] ss:$12 sps:$4 sm:$0xff]   ;;  %v15289_v63 = vld [vmem:[#allocation7 + $0x7d0] ss:$12 sps:$4 sm:$0xff]  }
 0x1c9   :  { %4632 = vmatmul.mubr.bf16.gmra.mxu1 %v17069_v34  ;;  %v15275_v34 = vld [vmem:[#allocation7 + $0x8d8] ss:$12 sps:$4 sm:$0xff]   ;;  %v15298_v33 = vld [vmem:[#allocation7 + $0x6c8] ss:$12 sps:$4 sm:$0xff]   ;;  %v15295_v5 = vld [vmem:[#allocation7 + $0x860] ss:$12 sps:$4 sm:$0xff]  }
 0x1ca   :  { %14423 = vmatpush3.bf16.msra.mxu1 %v15265_v16  ;;  %4737 = vmatprep.mubr.bf16.mxu1 %v17120_v17  ;;  %v15282_v17 = vld [vmem:[#allocation7 + $0x728] ss:$12 sps:$4 sm:$0xff]  }
 0x1cb   :  { %14424 = vmatprep.subr.bf16.mxu1 %v15267_v52  ;;  %4673 = vmatmul.mubr.bf16.vlgmr.msra.gmra.mxu0 %v17140_v44  ;;  %v15279_v44 = vld [vmem:[#allocation7 + $0x8c0] ss:$12 sps:$4 sm:$0xff]  }
 0x1cc   :  { %14451 = vmatpush3.bf16.msra.mxu0 %v15272_v10  ;;  %4680 = vmatprep.mubr.bf16.mxu0 %v17158_v61  ;;  %v15284_v61 = vld [vmem:[#allocation7 + $0x668] ss:$12 sps:$4 sm:$0xff]   ;;  %v18679_v10 = vld [vmem:[#allocation34_spill] sm:$0xff] }
 0x1cd   :  { %14452 = vmatprep.subr.bf16.mxu0 %v15274_v2  ;;  %v18677_v16 = vld [vmem:[#allocation32_spill] sm:$0xff]  ;;  %v18678_v52 = vld [vmem:[#allocation35_spill] sm:$0xff] }
 0x1ce   :  { %14425 = vmatpush3.bf16.msra.mxu1 %v15269_v37  ;;  %v15300_v2 = vld [vmem:[#allocation7 + $0x608] ss:$12 sps:$4 sm:$0xff]  }
 0x1cf   :  { %14490 = vmatprep.subr.bf16.mxu1 %v15271_v55  ;;  %v18680_v37 = vld [vmem:[#allocation37_spill] sm:$0xff] }
 0x1d0   :  { %14453 = vmatpush3.bf16.msra.mxu0 %v15276_v28  ;;  %v15302_v55 = vld [vmem:[#allocation7 + $0xa70] ss:$12 sps:$4 sm:$0xff]   ;;  %v15297_v28 = vld [vmem:[#allocation7 + $0x7a0] ss:$12 sps:$4 sm:$0xff]  }
 0x1d1   :  { %4738 = vmatmul.mubr.bf16.vlgmr.msra.gmra.mxu1 %v17142_v46  ;;  %14454 = vmatprep.subr.bf16.mxu0 %v15278_v8  ;;  %v15283_v46 = vld [vmem:[#allocation7 + $0x8a8] ss:$12 sps:$4 sm:$0xff]  }
 0x1d2   :  { %14491 = vmatpush3.bf16.msra.mxu1 %v15273_v40  ;;  %4745 = vmatprep.mubr.bf16.mxu1 %v17167_v7  ;;  %v15290_v7 = vld [vmem:[#allocation7 + $0x6f8] ss:$12 sps:$4 sm:$0xff]   ;;  %v15299_v8 = vld [vmem:[#allocation7 + $0x848] ss:$12 sps:$4 sm:$0xff]   ;;  %v17801_v40 = vpop.f32.mrf.mxu0 }
 0x1d3   :  { %14492 = vmatprep.subr.bf16.mxu1 %v15275_v34  ;;  %4681 = vmatmul.mubr.bf16.gmra.mxu0 %v17181_v22  ;;  %v18674_v22 = vld [vmem:[#allocation31_spill] sm:$0xff]  ;;  %18681 = vst [vmem:[#allocation29_spill] sm:$0xff] %v17801_v40  ;;  %v15304_v34 = vld [vmem:[#allocation7 + $0x9b0] ss:$12 sps:$4 sm:$0xff]  }
 0x1d4   :  { %14455 = vmatpush3.bf16.msra.mxu0 %v15280_v56  ;;  %4688 = vmatprep.mubr.bf16.mxu0 %v18672_v62  ;;  %v18682_v56 = vld [vmem:[#allocation36_spill] sm:$0xff] }
 0x1d5   :  { %14456 = vmatprep.subr.bf16.mxu0 %v15282_v17  ;;  %v15306_v17 = vld [vmem:[#allocation7 + $0xa58] ss:$12 sps:$4 sm:$0xff]   ;;  %v18684_v62 = vld [vmem:[#allocation40_spill] sm:$0xff] }
 0x1d6   :  { %14493 = vmatpush3.bf16.msra.mxu1 %v15277_v36  ;;  %v15342_v40 = vld [vmem:[#allocation12 + $0x7c] ss:$12 sps:$4 sm:$0xff]  }
 0x1d7   :  { %14494 = vmatprep.subr.bf16.mxu1 %v15279_v44  ;;  %v15301_v44 = vld [vmem:[#allocation7 + $0x788] ss:$12 sps:$4 sm:$0xff]  }
 0x1d8   :  { %14457 = vmatpush3.bf16.msra.mxu0 %v15284_v61  ;;  %v18683_v61 = vld [vmem:[#allocation38_spill] sm:$0xff] }
 0x1d9   :  { %4746 = vmatmul.mubr.bf16.gmra.mxu1 %v18673_v45  ;;  %14458 = vmatprep.subr.bf16.mxu0 %v15286_v35  ;;  %v15303_v35 = vld [vmem:[#allocation7 + $0xbf0] ss:$12 sps:$4 sm:$0xff]  }
 0x1da   :  { %14495 = vmatpush3.bf16.msra.mxu1 %v15281_v27  ;;  %4753 = vmatprep.mubr.bf16.mxu1 %v18674_v22  ;;  %v18686_v45 = vld [vmem:[#allocation42_spill] sm:$0xff] }
 0x1db   :  { %14496 = vmatprep.subr.bf16.mxu1 %v15283_v46  ;;  %4689 = vmatmul.mubr.bf16.gmra.mxu0 %v18675_v30  ;;  %v17810_v46 = vpop.f32.mrf.mxu1  ;;  %v15305_v22 = vld [vmem:[#allocation7 + $0xb30] ss:$12 sps:$4 sm:$0xff]  }
 0x1dc   :  { %14459 = vmatpush3.bf16.msra.mxu0 %v15288_v18  ;;  %4696 = vmatprep.mubr.bf16.mxu0 %v18676_v51  ;;  %18685 = vst [vmem:[#allocation28_spill] sm:$0xff] %v17810_v46  ;;  %v15308_v18 = vld [vmem:[#allocation7 + $0x998] ss:$12 sps:$4 sm:$0xff]   ;;  %v15312_v51 = vld [vmem:[#allocation7 + $0x980] ss:$12 sps:$4 sm:$0xff]  }
 0x1dd   :  { %14460 = vmatprep.subr.bf16.mxu0 %v15290_v7  ;;  %v15310_v7 = vld [vmem:[#allocation7 + $0xa40] ss:$12 sps:$4 sm:$0xff]   ;;  %v18702_v46 = vld [vmem:[#allocation57_spill] sm:$0xff] }
 0x1de   :  { %14497 = vmatpush3.bf16.msra.mxu1 %v15285_v49 }
 0x1df   :  { %14498 = vmatprep.subr.bf16.mxu1 %v15287_v21  ;;  %v15307_v21 = vld [vmem:[#allocation7 + $0xbd8] ss:$12 sps:$4 sm:$0xff]  }
 0x1e0   :  { %14461 = vmatpush3.bf16.msra.mxu0 %v15292_v39 }
 0x1e1   :  { %4754 = vmatmul.mubr.bf16.gmra.mxu1 %v18677_v16  ;;  %14462 = vmatprep.subr.bf16.mxu0 %v15294_v6  ;;  %v18687_v6 = vld [vmem:[#allocation41_spill] sm:$0xff] }
 0x1e2   :  { %14499 = vmatpush3.bf16.msra.mxu1 %v15289_v63  ;;  %4761 = vmatprep.mubr.bf16.mxu1 %v18678_v52  ;;  %v15314_v63 = vld [vmem:[#allocation7 + $0xa28] ss:$12 sps:$4 sm:$0xff]  }
 0x1e3   :  { %14500 = vmatprep.subr.bf16.mxu1 %v15291_v12  ;;  %4697 = vmatmul.mubr.bf16.gmra.mxu0 %v18679_v10  ;;  %v15309_v12 = vld [vmem:[#allocation7 + $0xb18] ss:$12 sps:$4 sm:$0xff]   ;;  %v15316_v10 = vld [vmem:[#allocation7 + $0x968] ss:$12 sps:$4 sm:$0xff]  }
 0x1e4   :  { %14463 = vmatpush3.bf16.msra.mxu0 %v15296_v19  ;;  %4802 = vmatprep.mubr.bf16.mxu0 %v18680_v37  ;;  %v18688_v19 = vld [vmem:[#allocation46_spill] sm:$0xff] }
 0x1e5   :  { %14464 = vmatprep.subr.bf16.mxu0 %v15298_v33  ;;  %v18689_v33 = vld [vmem:[#allocation43_spill] sm:$0xff] }
 0x1e6   :  { %14501 = vmatpush3.bf16.msra.mxu1 %v15293_v42  ;;  %v15311_v42 = vld [vmem:[#allocation7 + $0xbc0] ss:$12 sps:$4 sm:$0xff]  }
 0x1e7   :  { %14502 = vmatprep.subr.bf16.mxu1 %v15295_v5  ;;  %v18690_v5 = vld [vmem:[#allocation44_spill] sm:$0xff] }
 0x1e8   :  { %14465 = vmatpush3.bf16.msra.mxu0 %v15300_v2  ;;  %v17804_v36 = vpop.f32.mrf.mxu0  ;;  %v17815_v30 = vpop.f32.mrf.mxu1  ;;  %v15318_v2 = vld [vmem:[#allocation7 + $0xa10] ss:$12 sps:$4 sm:$0xff]  }
 0x1e9   :  { %4762 = vmatmul.mubr.bf16.gmra.mxu1 %v18682_v56  ;;  %14530 = vmatprep.subr.bf16.mxu0 %v15302_v55  ;;  %v15313_v55 = vld [vmem:[#allocation7 + $0xb00] ss:$12 sps:$4 sm:$0xff]   ;;  %v15320_v56 = vld [vmem:[#allocation7 + $0x950] ss:$12 sps:$4 sm:$0xff]  }
 0x1ea   :  { %14503 = vmatpush3.bf16.msra.mxu1 %v15297_v28  ;;  %4867 = vmatprep.mubr.bf16.mxu1 %v18683_v61  ;;  %v17808_v27 = vpop.f32.mrf.mxu0  ;;  %v17821_v16 = vpop.f32.mrf.mxu1 }
 0x1eb   :  { %14504 = vmatprep.subr.bf16.mxu1 %v15299_v8  ;;  %4803 = vmatmul.mubr.bf16.vlgmr.msra.gmra.mxu0 %v18684_v62  ;;  %v15315_v8 = vld [vmem:[#allocation7 + $0xba8] ss:$12 sps:$4 sm:$0xff]  }
 0x1ec   :  { %14531 = vmatpush3.bf16.msra.mxu0 %v15304_v34  ;;  %4810 = vmatprep.mubr.bf16.mxu0 %v18686_v45  ;;  %v17813_v49 = vpop.f32.mrf.mxu0  ;;  %v17829_v28 = vpop.f32.mrf.mxu1  ;;  %v15317_v62 = vld [vmem:[#allocation7 + $0xae8] ss:$12 sps:$4 sm:$0xff]  }
 0x1ed   :  { %14532 = vmatprep.subr.bf16.mxu0 %v15306_v17  ;;  %v18691_v17 = vld [vmem:[#allocation47_spill] sm:$0xff]  ;;  %v18693_v45 = vld [vmem:[#allocation45_spill] sm:$0xff] }
 0x1ee   :  { %14505 = vmatpush3.bf16.msra.mxu1 %v15301_v44  ;;  %v17817_v39 = vpop.f32.mrf.mxu0  ;;  %v15322_v44 = vld [vmem:[#allocation7 + $0x9f8] ss:$12 sps:$4 sm:$0xff]  }
 0x1ef   :  { %14570 = vmatprep.subr.bf16.mxu1 %v15303_v35  ;;  %v18692_v35 = vld [vmem:[#allocation48_spill] sm:$0xff] }
 0x1f0   :  { %14533 = vmatpush3.bf16.msra.mxu0 %v15308_v18  ;;  %v17837_v18 = vpop.f32.mrf.mxu1 }
 0x1f1   :  { %4868 = vmatmul.mubr.bf16.vlgmr.msra.gmra.mxu1 %v18687_v6  ;;  %14534 = vmatprep.subr.bf16.mxu0 %v15310_v7  ;;  %v15319_v7 = vld [vmem:[#allocation7 + $0xb90] ss:$12 sps:$4 sm:$0xff]   ;;  %v15326_v6 = vld [vmem:[#allocation7 + $0x9e0] ss:$12 sps:$4 sm:$0xff]  }
 0x1f2   :  { %14571 = vmatpush3.bf16.msra.mxu1 %v15305_v22  ;;  %4875 = vmatprep.mubr.bf16.mxu1 %v18688_v19  ;;  %v15324_v22 = vld [vmem:[#allocation7 + $0x938] ss:$12 sps:$4 sm:$0xff]  }
 0x1f3   :  { %14572 = vmatprep.subr.bf16.mxu1 %v15307_v21  ;;  %4811 = vmatmul.mubr.bf16.gmra.mxu0 %v18689_v33  ;;  %v17824_v52 = vpop.f32.mrf.mxu0  ;;  %v18694_v21 = vld [vmem:[#allocation50_spill] sm:$0xff] }
 0x1f4   :  { %14535 = vmatpush3.bf16.msra.mxu0 %v15312_v51  ;;  %4818 = vmatprep.mubr.bf16.mxu0 %v18690_v5  ;;  %v15323_v33 = vld [vmem:[#allocation7 + $0xb78] ss:$12 sps:$4 sm:$0xff]  }
 0x1f5   :  { %14536 = vmatprep.subr.bf16.mxu0 %v15314_v63  ;;  %v17827_v37 = vpop.f32.mrf.mxu0  ;;  %v18695_v5 = vld [vmem:[#allocation49_spill] sm:$0xff] }
 0x1f6   :  { %14573 = vmatpush3.bf16.msra.mxu1 %v15309_v12  ;;  %v15321_v12 = vld [vmem:[#allocation7 + $0xad0] ss:$12 sps:$4 sm:$0xff]  }
 0x1f7   :  { %14574 = vmatprep.subr.bf16.mxu1 %v15311_v42  ;;  %v17831_v34 = vpop.f32.mrf.mxu0  ;;  %v15328_v42 = vld [vmem:[#allocation7 + $0x920] ss:$12 sps:$4 sm:$0xff]  }
 0x1f8   :  { %14537 = vmatpush3.bf16.msra.mxu0 %v15316_v10 }
 0x1f9   :  { %4876 = vmatmul.mubr.bf16.gmra.mxu1 %v18691_v17  ;;  %14538 = vmatprep.subr.bf16.mxu0 %v15318_v2  ;;  %v17834_v61 = vpop.f32.mrf.mxu0  ;;  %v15330_v2 = vld [vmem:[#allocation7 + $0x9c8] ss:$12 sps:$4 sm:$0xff]  }
 0x1fa   :  { %14575 = vmatpush3.bf16.msra.mxu1 %v15313_v55  ;;  %4883 = vmatprep.mubr.bf16.mxu1 %v18692_v35  ;;  %v15332_v35 = vld [vmem:[#allocation7 + $0x908] ss:$12 sps:$4 sm:$0xff]  }
 0x1fb   :  { %14576 = vmatprep.subr.bf16.mxu1 %v15315_v8  ;;  %4819 = vmatmul.mubr.bf16.gmra.mxu0 %v18693_v45  ;;  %v17843_v63 = vpop.f32.mrf.mxu0  ;;  %v15325_v8 = vld [vmem:[#allocation7 + $0xab8] ss:$12 sps:$4 sm:$0xff]  }
 0x1fc   :  { %14539 = vmatpush3.bf16.msra.mxu0 %v15320_v56  ;;  %4826 = vmatprep.mubr.bf16.mxu0 %v18694_v21  ;;  %v18696_v56 = vld [vmem:[#allocation52_spill] sm:$0xff]  ;;  %v18698_v45 = vld [vmem:[#allocation58_spill] sm:$0xff] }
 0x1fd   :  { %14540 = vmatprep.subr.bf16.mxu0 %v15322_v44  ;;  %v17850_v55 = vpop.f32.mrf.mxu0  ;;  %v18697_v44 = vld [vmem:[#allocation51_spill] sm:$0xff]  ;;  %v15336_v21 = vld [vmem:[#allocation12 + $0xac] ss:$12 sps:$4 sm:$0xff]  }
 0x1fe   :  { %v17841_v51 = vpop.f32.mrf.mxu1  ;;  %14577 = vmatpush3.bf16.msra.mxu1 %v15317_v62  ;;  %v15327_v62 = vld [vmem:[#allocation7 + $0xb60] ss:$12 sps:$4 sm:$0xff]  }
 0x1ff   :  { %14578 = vmatprep.subr.bf16.mxu1 %v15319_v7 }
 0x200   :  { %v17845_v19 = vpop.f32.mrf.mxu1  ;;  %14541 = vmatpush3.bf16.msra.mxu0 %v15324_v22  ;;  %v17859_v22 = vpop.f32.mrf.mxu0 }
 0x201   :  { %4884 = vmatmul.mubr.bf16.gmra.mxu1 %v18695_v5  ;;  %14542 = vmatprep.subr.bf16.mxu0 %v15326_v6  ;;  %v15329_v6 = vld [vmem:[#allocation7 + $0xaa0] ss:$12 sps:$4 sm:$0xff]  }
 0x202   :  { %v17847_v10 = vpop.f32.mrf.mxu1  ;;  %14579 = vmatpush3.bf16.msra.mxu1 %v15321_v12  ;;  %4891 = vmatprep.mubr.bf16.mxu1 %v18696_v56  ;;  %v15331_v12 = vld [vmem:[#allocation7 + $0xb48] ss:$12 sps:$4 sm:$0xff]   ;;  %v15334_v5 = vld [vmem:[#allocation12 + $0xa8] ss:$12 sps:$4 sm:$0xff]  }
 0x203   :  { %14580 = vmatprep.subr.bf16.mxu1 %v15323_v33  ;;  %4827 = vmatmul.mubr.bf16.gmra.mxu0 %v18697_v44  ;;  %v18699_v33 = vld [vmem:[#allocation53_spill] sm:$0xff] }
 0x204   :  { %v17853_v17 = vpop.f32.mrf.mxu1  ;;  %14543 = vmatpush3.bf16.msra.mxu0 %v15328_v42  ;;  %4932 = vmatprep.mubr.bf16.mxu0 %v18698_v45  ;;  %v17864_v42 = vpop.f32.mrf.mxu0  ;;  %v15339_v44 = vld [vmem:[#allocation12 + $0x94] ss:$12 sps:$4 sm:$0xff]  }
 0x205   :  { %14544 = vmatprep.subr.bf16.mxu0 %v15330_v2  ;;  %v15333_v2 = vld [vmem:[#allocation7 + $0xa88] ss:$12 sps:$4 sm:$0xff]  }
 0x206   :  { %v17857_v7 = vpop.f32.mrf.mxu1  ;;  %14581 = vmatpush3.bf16.msra.mxu1 %v15325_v8  ;;  %v18701_v45 = vld [vmem:[#allocation59_spill] sm:$0xff]  ;;  %v18703_v8 = vld [vmem:[#allocation65_spill] sm:$0xff] }
 0x207   :  { %14582 = vmatprep.subr.bf16.mxu1 %v15327_v62  ;;  %v15337_v62 = vld [vmem:[#allocation12 + $0x90] ss:$12 sps:$4 sm:$0xff]  }
 0x208   :  { %14545 = vmatpush3.bf16.msra.mxu0 %v15332_v35  ;;  %v17862_v56 = vpop.f32.mrf.mxu1 }
 0x209   :  { %4892 = vmatmul.mubr.bf16.gmra.mxu1 %v18699_v33  ;;  %18700 = vst [vmem:[#allocation31_spill] sm:$0xff] %v17862_v56  ;;  %7487 = vmatprep.subr.bf16.mxu0 %v15336_v21 }
 0x20a   :  { %14583 = vmatpush3.bf16.msra.mxu1 %v15329_v6  ;;  %4997 = vmatprep.mubr.bf16.mxu1 %v18701_v45  ;;  %v17869_v35 = vpop.f32.mrf.mxu1 }
 0x20b   :  { %14584 = vmatprep.subr.bf16.mxu1 %v15331_v12  ;;  %4933 = vmatmul.mubr.bf16.vlgmr.msra.gmra.mxu0 %v18702_v46  ;;  %18704 = vst [vmem:[#allocation30_spill] sm:$0xff] %v17869_v35  ;;  %v18705_v12 = vld [vmem:[#allocation60_spill] sm:$0xff] }
 0x20c   :  { %4940 = vmatprep.mubr.bf16.mxu0 %v18703_v8  ;;  %7488 = vmatpush1.bf16.msra.mxu0 %v15334_v5  ;;  %v17874_v46 = vpop.f32.mrf.mxu1  ;;  %v18707_v8 = vld [vmem:[#allocation68_spill] sm:$0xff] }
 0x20d   :  { %7489 = vmatprep.subr.bf16.mxu0 %v15339_v44  ;;  %18706 = vst [vmem:[#allocation33_spill] sm:$0xff] %v17874_v46  ;;  %v15343_v35 = vld [vmem:[#allocation12 + $0x60] ss:$12 sps:$4 sm:$0xff]  }
 0x20e   :  { %14585 = vmatpush3.bf16.msra.mxu1 %v15333_v2  ;;  %v18708_v2 = vld [vmem:[#allocation66_spill] sm:$0xff] }
 0x210   :  { %7490 = vmatpush1.bf16.msra.mxu0 %v15337_v62  ;;  %v15346_v62 = vld [vmem:[#allocation12 + $0x48] ss:$12 sps:$4 sm:$0xff]  }
 0x211   :  { %v4282_v33 = vpop.f32.mrf.mxu0  ;;  %4998 = vmatmul.mubr.bf16.vlgmr.msra.gmra.mxu1 %v18705_v12  ;;  %7491 = vmatprep.subr.bf16.mxu0 %v15342_v40  ;;  %v15351_v12 = vld [vmem:[#allocation12 + $0x34] ss:$12 sps:$4 sm:$0xff]  }
 0x212   :  { %v4283_v21 = vadd.f32 %v4282_v33, %v17778_v47  ;;  %5005 = vmatprep.mubr.bf16.mxu1 %v18707_v8  ;;  %v15348_v47 = vld [vmem:[#allocation12 + $0x4c] ss:$12 sps:$4 sm:$0xff]  }
 0x213   :  { %v4284_v6 = vpop.f32.mrf.mxu0  ;;  %4941 = vmatmul.mubr.bf16.gmra.mxu0 %v18708_v2  ;;  %v18709_v33 = vld [vmem:[#allocation72_spill] sm:$0xff]  ;;  %v18710_v40 = vld [vmem:[#allocation69_spill] sm:$0xff] }
 0x214   :  { %v4285_v45 = vadd.f32 %v4284_v6, %v17781_v3  ;;  %4948 = vmatprep.mubr.bf16.mxu0 %v18709_v33  ;;  %7492 = vmatpush1.bf16.msra.mxu0 %v15340_v41  ;;  %v15349_v2 = vld [vmem:[#allocation12 + $0x30] ss:$12 sps:$4 sm:$0xff]   ;;  %v15352_v33 = vld [vmem:[#allocation12 + $0x18] ss:$12 sps:$4 sm:$0xff]  }
 0x215   :  { %v4286_v5 = vpop.f32.mrf.mxu0  ;;  %7493 = vmatprep.subr.bf16.mxu0 %v15345_v25  ;;  %v18712_v41 = vld [vmem:[#allocation73_spill] sm:$0xff]  ;;  %v15354_v25 = vld [vmem:[#allocation12 + $0x1c] ss:$12 sps:$4 sm:$0xff]  }
 0x216   :  { %v4287_v44 = vadd.f32 %v4286_v5, %v17784_v58  ;;  %v18711_v5 = vld [vmem:[#allocation74_spill] sm:$0xff] }
 0x218   :  { %7494 = vmatpush1.bf16.msra.mxu0 %v15343_v35  ;;  %v18714_v35 = vld [vmem:[#allocation61_spill] sm:$0xff] }
 0x219   :  { %v4355_v56 = vpop.f32.mrf.mxu1  ;;  %5006 = vmatmul.mubr.bf16.gmra.mxu1 %v18710_v40  ;;  %7495 = vmatprep.subr.bf16.mxu0 %v15348_v47  ;;  %v15357_v47 = vld [vmem:[#allocation12 + $0x4] ss:$12 sps:$4 sm:$0xff]  }
 0x21a   :  { %v17880_v3 = vadd.f32 %v4355_v56, %v4283_v21  ;;  %5013 = vmatprep.mubr.bf16.mxu1 %v18711_v5  ;;  %v18713_v56 = vld [vmem:[#allocation64_spill] sm:$0xff]  ;;  %v18716_v40 = vld [vmem:[#allocation75_spill] sm:$0xff] }
 0x21b   :  { %v4357_v6 = vpop.f32.mrf.mxu1  ;;  %4949 = vmatmul.mubr.bf16.gmra.mxu0 %v18712_v41  ;;  %v3967_v21 = vadd.f32 %v18713_v56, %v17496_v13  ;;  %v15355_v41 = vld [vmem:[#allocation12] ss:$12 sps:$4 sm:$0xff]  }
 0x21c   :  { %v17882_v46 = vadd.f32 %v4357_v6, %v4285_v45  ;;  %4956 = vmatprep.mubr.bf16.mxu0 %v17702_v1  ;;  %7496 = vmatpush1.bf16.msra.mxu0 %v15346_v62  ;;  %v4107_v45 = vadd.f32 %v17720_v15, %v18714_v35  ;;  %v18715_v6 = vld [vmem:[#allocation62_spill] sm:$0xff]  ;;  %v18718_v62 = vld [vmem:[#allocation63_spill] sm:$0xff] }
 0x21d   :  { %v4359_v58 = vpop.f32.mrf.mxu1  ;;  %7497 = vmatprep.subr.bf16.mxu0 %v15351_v12  ;;  %v4111_v12 = vadd.f32 %v17730_v38, %v18718_v62  ;;  %v15360_v15 = vld [vmem:[#allocation12 + $0x16c] ss:$12 sps:$4 sm:$0xff]   ;;  %v17908_v38 = vpop.f32.mrf.mxu0 }
 0x21e   :  { %v17886_v8 = vadd.f32 %v4359_v58, %v4287_v44  ;;  %v4109_v44 = vadd.f32 %v17726_v53, %v18715_v6  ;;  %v18717_v58 = vld [vmem:[#allocation67_spill] sm:$0xff]  ;;  %v4180_v1 = vadd.f32 %v17722_v24, %v4107_v45  ;;  %v15361_v45 = vld [vmem:[#allocation12 + $0x150] ss:$12 sps:$4 sm:$0xff]  }
 0x21f   :  { %v4040_v5 = vadd.f32 %v18717_v58, %v3967_v21  ;;  %v15358_v21 = vld [vmem:[#allocation12 + $0x168] ss:$12 sps:$4 sm:$0xff]  }
 0x220   :  { %7498 = vmatpush1.bf16.msra.mxu0 %v15349_v2  ;;  %v4182_v56 = vadd.f32 %v17728_v32, %v4109_v44  ;;  %v4253_v2 = vadd.f32 %v17804_v36, %v4180_v1  ;;  %v15366_v6 = vld [vmem:[#allocation12 + $0x13c] ss:$12 sps:$4 sm:$0xff]   ;;  %v15369_v1 = vld [vmem:[#allocation12 + $0x124] ss:$12 sps:$4 sm:$0xff]  }
 0x221   :  { %5014 = vmatmul.mubr.bf16.gmra.mxu1 %v18716_v40  ;;  %7499 = vmatprep.subr.bf16.mxu0 %v15354_v25  ;;  %v4113_v53 = vadd.f32 %v17734_v20, %v4040_v5  ;;  %v4184_v25 = vadd.f32 %v17732_v26, %v4111_v12 }
 0x222   :  { %5021 = vmatprep.mubr.bf16.mxu1 %v17709_v43  ;;  %v4255_v24 = vadd.f32 %v17808_v27, %v4182_v56  ;;  %v15363_v43 = vld [vmem:[#allocation12 + $0x154] ss:$12 sps:$4 sm:$0xff]  }
 0x223   :  { %4957 = vmatmul.mubr.bf16.gmra.mxu0 %v17704_v48  ;;  %v4186_v35 = vadd.f32 %v17736_v31, %v4113_v53  ;;  %v4326_v48 = vadd.f32 %v17815_v30, %v4253_v2  ;;  %v4257_v32 = vadd.f32 %v17813_v49, %v4184_v25  ;;  %v15367_v2 = vld [vmem:[#allocation12 + $0x120] ss:$12 sps:$4 sm:$0xff]   ;;  %v15382_v25 = vld [vmem:[#allocation12 + $0x228] ss:$12 sps:$4 sm:$0xff]  }
 0x224   :  { %7500 = vmatpush1.bf16.msra.mxu0 %v15352_v33  ;;  %v4328_v36 = vadd.f32 %v17821_v16, %v4255_v24  ;;  %v17916_v33 = vpop.f32.mrf.mxu1  ;;  %v15364_v16 = vld [vmem:[#allocation12 + $0x138] ss:$12 sps:$4 sm:$0xff]  }
 0x225   :  { %7501 = vmatprep.subr.bf16.mxu0 %v15357_v47  ;;  %v4259_v26 = vadd.f32 %v17817_v39, %v4186_v35  ;;  %v4330_v31 = vadd.f32 %v17829_v28, %v4257_v32  ;;  %v15387_v35 = vld [vmem:[#allocation12 + $0x214] ss:$12 sps:$4 sm:$0xff]  }
 0x228   :  { %7502 = vmatpush1.bf16.msra.mxu0 %v15355_v41 }
 0x229   :  { %5022 = vmatmul.mubr.bf16.gmra.mxu1 %v17711_v4  ;;  %7503 = vmatprep.subr.bf16.mxu0 %v15360_v15  ;;  %v4332_v4 = vadd.f32 %v17837_v18, %v4259_v26  ;;  %v15384_v15 = vld [vmem:[#allocation12 + $0x22c] ss:$12 sps:$4 sm:$0xff]  }
 0x22a   :  { %7540 = vmatprep.subr.bf16.mxu1 %v15384_v15 }
 0x22b   :  { %7541 = vmatpush1.bf16.msra.mxu1 %v15382_v25  ;;  %v4265_v25 = vadd.f32 %v17827_v37, %v17747_v0  ;;  %v18722_v0 = vld [vmem:[#allocation77_spill] sm:$0xff] }
 0x22c   :  { %7504 = vmatpush2.bf16.msra.mxu0 %v15358_v21  ;;  %v15372_v21 = vld [vmem:[#allocation12 + $0x10c] ss:$12 sps:$4 sm:$0xff]   ;;  %7542 = vmatprep.subr.bf16.mxu1 %v15387_v35 }
 0x22d   :  { %v4398_v20 = vpop.f32.mrf.mxu0  ;;  %7505 = vmatprep.subr.bf16.mxu0 %v15363_v43 }
 0x22e   :  { %v4399_v27 = vadd.f32 %v4398_v20, %v4326_v48  ;;  %v4471_v49 = vpop.f32.mrf.mxu1  ;;  %v15370_v20 = vld [vmem:[#allocation12 + $0x108] ss:$12 sps:$4 sm:$0xff]  }
 0x22f   :  { %v4400_v47 = vpop.f32.mrf.mxu0 }
 0x230   :  { %v4401_v30 = vadd.f32 %v4400_v47, %v4328_v36  ;;  %v4472_v40 = vadd.f32 %v4471_v49, %v4399_v27  ;;  %v4473_v5 = vpop.f32.mrf.mxu1  ;;  %7506 = vmatpush2.bf16.msra.mxu0 %v15361_v45  ;;  %v15385_v36 = vld [vmem:[#allocation12 + $0x210] ss:$12 sps:$4 sm:$0xff]  }
 0x231   :  { %v4402_v44 = vpop.f32.mrf.mxu0  ;;  %7507 = vmatprep.subr.bf16.mxu0 %v15366_v6  ;;  %7543 = vmatpush1.bf16.msra.mxu1 %v15385_v36  ;;  %v18719_v47 = vld [vmem:[#allocation70_spill] sm:$0xff] }
 0x232   :  { %v4403_v58 = vadd.f32 %v4402_v44, %v4330_v31  ;;  %v4474_v62 = vadd.f32 %v4473_v5, %v4401_v30  ;;  %v4475_v41 = vpop.f32.mrf.mxu1  ;;  %v5030_v28 = vmax.f32 %v4472_v40, 0.0  ;;  %v3977_v6 = vadd.f32 %v18719_v47, %v17496_v13  ;;  %v15375_v31 = vld [vmem:[#allocation12 + $0xf4] ss:$12 sps:$4 sm:$0xff]   ;;  %v15390_v30 = vld [vmem:[#allocation12 + $0x1fc] ss:$12 sps:$4 sm:$0xff]  }
 0x233   :  { %v4404_v39 = vpop.f32.mrf.mxu0  ;;  %v15373_v49 = vld [vmem:[#allocation12 + $0xf0] ss:$12 sps:$4 sm:$0xff]   ;;  %v15388_v44 = vld [vmem:[#allocation12 + $0x1f8] ss:$12 sps:$4 sm:$0xff]   ;;  %7544 = vmatprep.subr.bf16.mxu1 %v15390_v30  ;;  %v15408_v30 = vld [vmem:[#allocation12 + $0x1b4] ss:$12 sps:$4 sm:$0xff]  }
 0x234   :  { %v4405_v12 = vadd.f32 %v4404_v39, %v4332_v4  ;;  %v5031_v56 = vmax.f32 %v4474_v62, 0.0  ;;  %v4476_v53 = vadd.f32 %v4475_v41, %v4403_v58  ;;  %v4477_v24 = vpop.f32.mrf.mxu1  ;;  %7508 = vmatpush2.bf16.msra.mxu0 %v15364_v16  ;;  %v18720_v58 = vld [vmem:[#allocation71_spill] sm:$0xff]  ;;  %v4263_v41 = vadd.f32 %v17824_v52, %v17744_v11 }
 0x235   :  { %7509 = vmatprep.subr.bf16.mxu0 %v15369_v1  ;;  %7545 = vmatpush1.bf16.msra.mxu1 %v15388_v44  ;;  %v4050_v16 = vadd.f32 %v18720_v58, %v3977_v6  ;;  %v15378_v5 = vld [vmem:[#allocation12 + $0xdc] ss:$12 sps:$4 sm:$0xff]   ;;  %v15396_v39 = vld [vmem:[#allocation12 + $0x1e4] ss:$12 sps:$4 sm:$0xff]   ;;  %v15394_v62 = vld [vmem:[#allocation12 + $0x1e0] ss:$12 sps:$4 sm:$0xff]   ;;  %v4338_v6 = vadd.f32 %v17845_v19, %v4265_v25 }
 0x236   :  { %v17920_v18 = vpack.c.bf16 %v5031_v56, %v5030_v28  ;;  %v4478_v43 = vadd.f32 %v4477_v24, %v4405_v12  ;;  %v5033_v48 = vmax.f32 %v4476_v53, 0.0  ;;  %v15376_v1 = vld [vmem:[#allocation12 + $0xd8] ss:$12 sps:$4 sm:$0xff]   ;;  %7546 = vmatprep.subr.bf16.mxu1 %v15396_v39  ;;  %v18721_v56 = vld [vmem:[#allocation76_spill] sm:$0xff] }
 0x237   :  { %v4123_v12 = vadd.f32 %v17749_v60, %v4050_v16  ;;  %v15381_v28 = vld [vmem:[#allocation12 + $0xc4] ss:$12 sps:$4 sm:$0xff]   ;;  %v3987_v53 = vadd.f32 %v18721_v56, %v17496_v13  ;;  %v15400_v52 = vld [vmem:[#allocation12 + $0x1c8] ss:$12 sps:$4 sm:$0xff]  }
 0x238   :  { %v5034_v32 = vmax.f32 %v4478_v43, 0.0  ;;  %v5195_v26 = vshrl.u32 %v17920_v18, 16  ;;  %v5198_v27 = vshll.u32 %v17920_v18, 16  ;;  %7510 = vmatpush2.bf16.msra.mxu0 %v15367_v2  ;;  %v15402_v43 = vld [vmem:[#allocation12 + $0x1cc] ss:$12 sps:$4 sm:$0xff]  }
 0x239   :  { %7511 = vmatprep.subr.bf16.mxu0 %v15372_v21  ;;  %7547 = vmatpush1.bf16.msra.mxu1 %v15394_v62  ;;  %v4060_v37 = vadd.f32 %v18722_v0, %v3987_v53  ;;  %v15406_v44 = vld [vmem:[#allocation12 + $0x1b0] ss:$12 sps:$4 sm:$0xff]   ;;  %v15391_v62 = vld [vmem:[#allocation12 + $0x3a8] ss:$12 sps:$4 sm:$0xff]   ;;  %v15412_v56 = vld [vmem:[#allocation12 + $0x198] ss:$12 sps:$4 sm:$0xff]   ;;  %v4277_v53 = vadd.f32 %v17859_v22, %v17768_v29 }
 0x23a   :  { %v14268_v45 = vpack.c.bf16 %v5034_v32, %v5033_v48  ;;  %v5197_v4 = vrot.slane %v5195_v26, 4  ;;  %v5200_v40 = vrot.slane %v5198_v27, 5  ;;  %v4196_v48 = vadd.f32 %v17751_v50, %v4123_v12  ;;  %v15379_v26 = vld [vmem:[#allocation12 + $0xc0] ss:$12 sps:$4 sm:$0xff]   ;;  %7548 = vmatprep.subr.bf16.mxu1 %v15402_v43  ;;  %v15414_v12 = vld [vmem:[#allocation12 + $0x19c] ss:$12 sps:$4 sm:$0xff]  }
 0x23b   :  { %v4336_v32 = vadd.f32 %v17841_v51, %v4263_v41  ;;  %v15393_v51 = vld [vmem:[#allocation12 + $0x3ac] ss:$12 sps:$4 sm:$0xff]   ;;  %v4275_v41 = vadd.f32 %v17850_v55, %v17764_v14  ;;  %v18725_v29 = vld [vmem:[#allocation31_spill] sm:$0xff] }
 0x23c   :  { %5136 = vst [vmem:[#allocation3 + $0xc] sm:$0xff] %v14268_v45  ;;  %7512 = vmatpush2.bf16.msra.mxu0 %v15370_v20  ;;  %v5201_v15 = vor.u32 %v5200_v40, %v5197_v4  ;;  %v4267_v20 = vadd.f32 %v17831_v34, %v17753_v59  ;;  %v4133_v59 = vadd.f32 %v17766_v23, %v4060_v37  ;;  %v18727_v0 = vld [vmem:[#allocation33_spill] sm:$0xff] }
 0x23d   :  { %7513 = vmatprep.subr.bf16.mxu0 %v15375_v31  ;;  %7549 = vmatpush1.bf16.msra.mxu1 %v15400_v52  ;;  %v4269_v31 = vadd.f32 %v17834_v61, %v4196_v48  ;;  %v4273_v61 = vadd.f32 %v17843_v63, %v17761_v57  ;;  %v4348_v22 = vadd.f32 %v18725_v29, %v4275_v41 }
 0x23e   :  { %v5202_v36 = vrot.slane %v5201_v15, 4  ;;  %v4340_v40 = vadd.f32 %v17847_v10, %v4267_v20  ;;  %7550 = vmatprep.subr.bf16.mxu1 %v15408_v30  ;;  %v4206_v10 = vadd.f32 %v17770_v9, %v4133_v59  ;;  %v15426_v30 = vld [vmem:[#allocation12 + $0x2ec] ss:$12 sps:$4 sm:$0xff]  }
 0x23f   :  { %v4342_v23 = vadd.f32 %v17853_v17, %v4269_v31  ;;  %v15399_v17 = vld [vmem:[#allocation12 + $0x394] ss:$12 sps:$4 sm:$0xff]   ;;  %v4346_v9 = vadd.f32 %v17857_v7, %v4273_v61  ;;  %v15405_v7 = vld [vmem:[#allocation12 + $0x37c] ss:$12 sps:$4 sm:$0xff]   ;;  %v15411_v61 = vld [vmem:[#allocation12 + $0x364] ss:$12 sps:$4 sm:$0xff]  }
 0x240   :  { %7514 = vmatpush2.bf16.msra.mxu0 %v15373_v49  ;;  %v4279_v14 = vadd.f32 %v17864_v42, %v4206_v10  ;;  %v15418_v42 = vld [vmem:[#allocation12 + $0x180] ss:$12 sps:$4 sm:$0xff]  }
 0x241   :  { %7515 = vmatprep.subr.bf16.mxu0 %v15378_v5  ;;  %7551 = vmatpush1.bf16.msra.mxu1 %v15406_v44  ;;  %v15403_v44 = vld [vmem:[#allocation12 + $0x378] ss:$12 sps:$4 sm:$0xff]  }
 0x242   :  { %v4408_v2 = vpop.f32.mrf.mxu0  ;;  %7552 = vmatprep.subr.bf16.mxu1 %v15414_v12  ;;  %v4352_v37 = vadd.f32 %v18727_v0, %v4279_v14  ;;  %v18728_v14 = vld [vmem:[#allocation78_spill] sm:$0xff] }
 0x243   :  { %v5176_v24 = vld [vmem:[#allocation3 + $0xc] sm:$0x11]  ;;  %v4409_v50 = vadd.f32 %v4408_v2, %v4336_v32  ;;  %v15442_v0 = vld [vmem:[#allocation12 + $0x2a0] ss:$12 sps:$4 sm:$0xff]  }
 0x244   :  { %v5192_v21 = vld [vmem:[#allocation3 + $0xc] sm:$0x33]  ;;  %5180 = vst [vmem:[#allocation4 + $0x30] sm:$0x11] %v5176_v24  ;;  %v4410_v11 = vpop.f32.mrf.mxu0  ;;  %7516 = vmatpush2.bf16.msra.mxu0 %v15376_v1 }
 0x245   :  { %v5204_v60 = vshll.u32 %v5192_v21, 16  ;;  %v5222_v35 = vshrl.u32 %v5192_v21, 16  ;;  %7517 = vmatprep.subr.bf16.mxu0 %v15381_v28  ;;  %v4411_v58 = vadd.f32 %v4410_v11, %v4338_v6  ;;  %v15397_v21 = vld [vmem:[#allocation12 + $0x390] ss:$12 sps:$4 sm:$0xff]   ;;  %7553 = vmatpush1.bf16.msra.mxu1 %v15412_v56 }
 0x246   :  { %v4412_v47 = vpop.f32.mrf.mxu0  ;;  %v18726_v32 = vld [vmem:[#allocation30_spill] sm:$0xff] }
 0x247   :  { %v5206_v27 = vrot.slane %v5204_v60, 5  ;;  %v5224_v45 = vrot.slane %v5222_v35, 4  ;;  %v4413_v39 = vadd.f32 %v4412_v47, %v4340_v40  ;;  %v15420_v35 = vld [vmem:[#allocation12 + $0x184] ss:$12 sps:$4 sm:$0xff]   ;;  %v4350_v20 = vadd.f32 %v18726_v32, %v4277_v53  ;;  %v15415_v53 = vld [vmem:[#allocation12 + $0x348] ss:$12 sps:$4 sm:$0xff]  }
 0x248   :  { %v4414_v49 = vpop.f32.mrf.mxu0  ;;  %7518 = vmatpush2.bf16.msra.mxu0 %v15379_v26  ;;  %7554 = vmatprep.subr.bf16.mxu1 %v15420_v35 }
 0x249   :  { %v5225_v34 = vor.u32 %v5224_v45, %v5206_v27  ;;  %v5207_v4 = vsel %vm17296_vm5, %v5202_v36, %v5206_v27  ;;  %v4481_v19 = vpop.f32.mrf.mxu1  ;;  %7593 = vmatprep.subr.bf16.mxu0 %v15393_v51  ;;  %v4415_v25 = vadd.f32 %v4414_v49, %v4342_v23  ;;  %7555 = vmatpush1.bf16.msra.mxu1 %v15418_v42  ;;  %v15409_v23 = vld [vmem:[#allocation12 + $0x360] ss:$12 sps:$4 sm:$0xff]  }
 0x24a   :  { %5236 = vst [vmem:[#allocation4 + $0x18] sm:$0xff] %v5207_v4  ;;  %v4482_v5 = vadd.f32 %v4481_v19, %v4409_v50  ;;  %v4418_v28 = vpop.f32.mrf.mxu0  ;;  %v15424_v4 = vld [vmem:[#allocation12 + $0x2e8] ss:$12 sps:$4 sm:$0xff]   ;;  %7556 = vmatprep.subr.bf16.mxu1 %v15426_v30 }
 0x24b   :  { %v5226_v16 = vrot.slane %v5225_v34, 4  ;;  %v5412_v1 = vld [vmem:[#allocation4 + $0x30] sm:$0xff]  ;;  %v4483_v15 = vpop.f32.mrf.mxu1  ;;  %v4419_v52 = vadd.f32 %v4418_v28, %v4346_v9 }
 0x24c   :  { %v17952_v57 = vcombine.low %v17920_v18, %v5412_v1  ;;  %v17955_v63 = vcombine.high %v17920_v18, %v5412_v1  ;;  %v4484_v2 = vadd.f32 %v4483_v15, %v4411_v58  ;;  %v4420_v24 = vpop.f32.mrf.mxu0  ;;  %v5036_v18 = vmax.f32 %v4482_v5, 0.0  ;;  %v15432_v1 = vld [vmem:[#allocation12 + $0x2d4] ss:$12 sps:$4 sm:$0xff]   ;;  %v15430_v15 = vld [vmem:[#allocation12 + $0x2d0] ss:$12 sps:$4 sm:$0xff]  }
 0x24d   :  { %5238 = vst [vmem:[#allocation4 + $0x48] sm:$0x11] %v5226_v16  ;;  %v4485_v55 = vpop.f32.mrf.mxu1  ;;  %v4421_v45 = vadd.f32 %v4420_v24, %v4348_v22  ;;  %7557 = vmatpush2.bf16.msra.mxu1 %v15424_v4  ;;  %v15438_v9 = vld [vmem:[#allocation12 + $0x2bc] ss:$12 sps:$4 sm:$0xff]  }
 0x24e   :  { %18723 = vst [vmem:[#allocation32_spill] sm:$0xff] %v17952_v57  ;;  %18724 = vst [vmem:[#allocation35_spill] sm:$0xff] %v17955_v63  ;;  %7519 = vmatprep.mubr.bf16.mxu0 %v17955_v63  ;;  %v5037_v43 = vmax.f32 %v4484_v2, 0.0  ;;  %v4486_v60 = vadd.f32 %v4485_v55, %v4413_v39  ;;  %v4422_v48 = vpop.f32.mrf.mxu0  ;;  %7558 = vmatprep.subr.bf16.mxu1 %v15432_v1  ;;  %v3997_v55 = vadd.f32 %v18728_v14, %v17496_v13  ;;  %v15429_v13 = vld [vmem:[#allocation12 + $0x31c] ss:$12 sps:$4 sm:$0xff]  }
 0x24f   :  { %7520 = vmatmul.mubr.bf16.vlgmr.msra.gmra.mxu0 %v17952_v57  ;;  %v4487_v11 = vpop.f32.mrf.mxu1  ;;  %v4423_v51 = vadd.f32 %v4422_v48, %v4350_v20  ;;  %v18729_v42 = vld [vmem:[#allocation79_spill] sm:$0xff] }
 0x250   :  { %7594 = vmatpush1.bf16.msra.mxu0 %v15391_v62  ;;  %v14270_v36 = vpack.c.bf16 %v5037_v43, %v5036_v18  ;;  %v4488_v26 = vadd.f32 %v4487_v11, %v4415_v25  ;;  %v4424_v47 = vpop.f32.mrf.mxu0  ;;  %v5039_v31 = vmax.f32 %v4486_v60, 0.0  ;;  %v15423_v43 = vld [vmem:[#allocation12 + $0x334] ss:$12 sps:$4 sm:$0xff]   ;;  %v15436_v60 = vld [vmem:[#allocation12 + $0x2b8] ss:$12 sps:$4 sm:$0xff]   ;;  %v4070_v32 = vadd.f32 %v18729_v42, %v3997_v55 }
 0x251   :  { %7595 = vmatprep.subr.bf16.mxu0 %v15399_v17  ;;  %v4491_v27 = vpop.f32.mrf.mxu1  ;;  %v4425_v58 = vadd.f32 %v4424_v47, %v4352_v37  ;;  %v15417_v17 = vld [vmem:[#allocation12 + $0x34c] ss:$12 sps:$4 sm:$0xff]   ;;  %7559 = vmatpush2.bf16.msra.mxu1 %v15430_v15  ;;  %v15421_v11 = vld [vmem:[#allocation12 + $0x330] ss:$12 sps:$4 sm:$0xff]   ;;  %v15456_v1 = vld [vmem:[#allocation12 + $0x274] ss:$12 sps:$4 sm:$0xff]  }
 0x252   :  { %v5245_v6 = vshrl.u32 %v14270_v36, 16  ;;  %5186 = vst [vmem:[#allocation4 + $0xc] sm:$0xff] %v14270_v36  ;;  %v5040_v50 = vmax.f32 %v4488_v26, 0.0  ;;  %v5248_v59 = vshll.u32 %v14270_v36, 16  ;;  %v4492_v34 = vadd.f32 %v4491_v27, %v4419_v52  ;;  %7560 = vmatprep.subr.bf16.mxu1 %v15438_v9  ;;  %v15454_v15 = vld [vmem:[#allocation12 + $0x270] ss:$12 sps:$4 sm:$0xff]  }
 0x253   :  { %v4493_v49 = vpop.f32.mrf.mxu1  ;;  %v18732_v55 = vld [vmem:[#allocation54_spill] sm:$0xff] }
 0x254   :  { %7596 = vmatpush1.bf16.msra.mxu0 %v15397_v21  ;;  %v14272_v40 = vpack.c.bf16 %v5040_v50, %v5039_v31  ;;  %v4494_v19 = vadd.f32 %v4493_v49, %v4421_v45  ;;  %v5247_v5 = vrot.slane %v5245_v6, 4  ;;  %v5250_v62 = vrot.slane %v5248_v59, 5  ;;  %v18730_v45 = vld [vmem:[#allocation29_spill] sm:$0xff] }
 0x255   :  { %7597 = vmatprep.subr.bf16.mxu0 %v15405_v7  ;;  %v4495_v16 = vpop.f32.mrf.mxu1  ;;  %v5042_v12 = vmax.f32 %v4492_v34, 0.0  ;;  %7561 = vmatpush2.bf16.msra.mxu1 %v15436_v60  ;;  %v15444_v7 = vld [vmem:[#allocation12 + $0x2a4] ss:$12 sps:$4 sm:$0xff]   ;;  %v4143_v47 = vadd.f32 %v18730_v45, %v4070_v32  ;;  %v15448_v49 = vld [vmem:[#allocation12 + $0x288] ss:$12 sps:$4 sm:$0xff]  }
 0x256   :  { %5140 = vst [vmem:[#allocation3 + $0x24] sm:$0xff] %v14272_v40  ;;  %v4496_v39 = vadd.f32 %v4495_v16, %v4423_v51  ;;  %v5043_v10 = vmax.f32 %v4494_v19, 0.0  ;;  %v5251_v24 = vor.u32 %v5250_v62, %v5247_v5  ;;  %7562 = vmatprep.subr.bf16.mxu1 %v15444_v7  ;;  %v15427_v50 = vld [vmem:[#allocation12 + $0x318] ss:$12 sps:$4 sm:$0xff]   ;;  %v18731_v40 = vld [vmem:[#allocation28_spill] sm:$0xff] }
 0x257   :  { %v4497_v41 = vpop.f32.mrf.mxu1  ;;  %v15450_v51 = vld [vmem:[#allocation12 + $0x28c] ss:$12 sps:$4 sm:$0xff]   ;;  %v15435_v34 = vld [vmem:[#allocation12 + $0x304] ss:$12 sps:$4 sm:$0xff]   ;;  %v16488_v45 = vld [vmem:[#allocation10] sm:$0x7] }
 0x258   :  { %7598 = vmatpush1.bf16.msra.mxu0 %v15403_v44  ;;  %v4498_v28 = vadd.f32 %v4497_v41, %v4425_v58  ;;  %v17966_v56 = vpack.c.bf16 %v5043_v10, %v5042_v12  ;;  %v5045_v2 = vmax.f32 %v4496_v39, 0.0  ;;  %v5252_v20 = vrot.slane %v5251_v24, 4  ;;  %v15433_v39 = vld [vmem:[#allocation12 + $0x300] ss:$12 sps:$4 sm:$0xff]   ;;  %v15445_v42 = vld [vmem:[#allocation12 + $0x450] ss:$12 sps:$4 sm:$0xff]  }
 0x259   :  { %7599 = vmatprep.subr.bf16.mxu0 %v15411_v61  ;;  %7563 = vmatpush2.bf16.msra.mxu1 %v15442_v0  ;;  %v4216_v58 = vadd.f32 %v18731_v40, %v4143_v47  ;;  %v15441_v41 = vld [vmem:[#allocation12 + $0x46c] ss:$12 sps:$4 sm:$0xff]   ;;  %v18608_v24 = vsub.s32 2, %v18732_v55 }
 0x25a   :  { %v5046_v25 = vmax.f32 %v4498_v28, 0.0  ;;  %v5311_v21 = vshrl.u32 %v17966_v56, 16  ;;  %v5314_v18 = vshll.u32 %v17966_v56, 16  ;;  %7564 = vmatprep.subr.bf16.mxu1 %v15450_v51 }
 0x25b   :  { %v4289_v62 = vadd.f32 %v17908_v38, %v4216_v58  ;;  %v15439_v38 = vld [vmem:[#allocation12 + $0x468] ss:$12 sps:$4 sm:$0xff]   ;;  %v17993_v47 = vrot.slane %v16488_v45, %v18608_v24 }
 0x25c   :  { %7600 = vmatpush1.bf16.msra.mxu0 %v15409_v23  ;;  %v14276_v35 = vpack.c.bf16 %v5046_v25, %v5045_v2  ;;  %v5313_v36 = vrot.slane %v5311_v21, 4  ;;  %v5316_v26 = vrot.slane %v5314_v18, 5  ;;  %v15462_v21 = vld [vmem:[#allocation12 + $0x25c] ss:$12 sps:$4 sm:$0xff]  }
 0x25d   :  { %7601 = vmatprep.subr.bf16.mxu0 %v15417_v17  ;;  %v5184_v29 = vld [vmem:[#allocation3 + $0x24] sm:$0x11]  ;;  %7565 = vmatpush2.bf16.msra.mxu1 %v15448_v49  ;;  %v4362_v18 = vadd.f32 %v17916_v33, %v4289_v62  ;;  %v15480_v49 = vld [vmem:[#allocation12 + $0x52c] ss:$12 sps:$4 sm:$0xff]  }
 0x25e   :  { %v5242_v22 = vld [vmem:[#allocation3 + $0x24] sm:$0x33]  ;;  %5188 = vst [vmem:[#allocation4 + $0x3c] sm:$0x11] %v5184_v29  ;;  %5144 = vst [vmem:[#allocation3 + $0x3c] sm:$0xff] %v14276_v35  ;;  %v5317_v59 = vor.u32 %v5316_v26, %v5313_v36  ;;  %7566 = vmatprep.subr.bf16.mxu1 %v15456_v1 }
 0x25f   :  { %v5254_v52 = vshll.u32 %v5242_v22, 16  ;;  %v5272_v48 = vshrl.u32 %v5242_v22, 16  ;;  %v15447_v35 = vld [vmem:[#allocation12 + $0x454] ss:$12 sps:$4 sm:$0xff]   ;;  %v15460_v29 = vld [vmem:[#allocation12 + $0x258] ss:$12 sps:$4 sm:$0xff]  }
 0x260   :  { %7602 = vmatpush1.bf16.msra.mxu0 %v15415_v53  ;;  %v5318_v12 = vrot.slane %v5317_v59, 4  ;;  %v15453_v36 = vld [vmem:[#allocation12 + $0x43c] ss:$12 sps:$4 sm:$0xff]   ;;  %v15468_v26 = vld [vmem:[#allocation12 + $0x244] ss:$12 sps:$4 sm:$0xff]  }
 0x261   :  { %v5256_v37 = vrot.slane %v5254_v52, 5  ;;  %v5274_v27 = vrot.slane %v5272_v48, 4  ;;  %7603 = vmatprep.subr.bf16.mxu0 %v15423_v43  ;;  %v4428_v31 = vpop.f32.mrf.mxu0  ;;  %7567 = vmatpush2.bf16.msra.mxu1 %v15454_v15 }
 0x262   :  { %v4429_v10 = vadd.f32 %v4428_v31, %v17880_v3  ;;  %7568 = vmatprep.subr.bf16.mxu1 %v15462_v21 }
 0x263   :  { %v5275_v6 = vor.u32 %v5274_v27, %v5256_v37  ;;  %v5257_v30 = vsel %vm17296_vm5, %v5252_v20, %v5256_v37  ;;  %v4430_v4 = vpop.f32.mrf.mxu0 }
 0x264   :  { %7604 = vmatpush1.bf16.msra.mxu0 %v15421_v11  ;;  %5286 = vst [vmem:[#allocation4 + $0x24] sm:$0xff] %v5257_v30  ;;  %v4431_v2 = vadd.f32 %v4430_v4, %v17882_v46 }
 0x265   :  { %v5276_v44 = vrot.slane %v5275_v6, 4  ;;  %7605 = vmatprep.subr.bf16.mxu0 %v15429_v13  ;;  %v5292_v61 = vld [vmem:[#allocation3 + $0x3c] sm:$0x11]  ;;  %v4432_v5 = vpop.f32.mrf.mxu0  ;;  %7569 = vmatpush2.bf16.msra.mxu1 %v15460_v29 }
 0x266   :  { %v5308_v19 = vld [vmem:[#allocation3 + $0x3c] sm:$0x33]  ;;  %5296 = vst [vmem:[#allocation4 + $0x90] sm:$0x11] %v5292_v61  ;;  %v4433_v60 = vadd.f32 %v4432_v5, %v17886_v8  ;;  %7570 = vmatprep.subr.bf16.mxu1 %v15468_v26  ;;  %v15459_v61 = vld [vmem:[#allocation12 + $0x424] ss:$12 sps:$4 sm:$0xff]  }
 0x267   :  { %5288 = vst [vmem:[#allocation4 + $0x54] sm:$0x11] %v5276_v44  ;;  %v5320_v16 = vshll.u32 %v5308_v19, 16  ;;  %v5338_v23 = vshrl.u32 %v5308_v19, 16  ;;  %v4434_v53 = vpop.f32.mrf.mxu0  ;;  %v15466_v6 = vld [vmem:[#allocation12 + $0x240] ss:$12 sps:$4 sm:$0xff]  }
 0x268   :  { %7606 = vmatpush1.bf16.msra.mxu0 %v15427_v50  ;;  %v4435_v48 = vadd.f32 %v4434_v53, %v4362_v18 }
 0x269   :  { %v5322_v28 = vrot.slane %v5320_v16, 5  ;;  %v5340_v17 = vrot.slane %v5338_v23, 4  ;;  %7607 = vmatprep.subr.bf16.mxu0 %v15435_v34  ;;  %v4501_v9 = vpop.f32.mrf.mxu1  ;;  %v14306_v14 = vpop.f32.mrf.mxu0  ;;  %v15451_v34 = vld [vmem:[#allocation12 + $0x438] ss:$12 sps:$4 sm:$0xff]   ;;  %7571 = vmatpush2.bf16.msra.mxu1 %v15466_v6  ;;  %v15477_v6 = vld [vmem:[#allocation12 + $0x3dc] ss:$12 sps:$4 sm:$0xff]  }
 0x26a   :  { %v4502_v43 = vadd.f32 %v4501_v9, %v4429_v10  ;;  %7646 = vmatprep.subr.bf16.mxu1 %v15480_v49  ;;  %v15465_v9 = vld [vmem:[#allocation12 + $0x40c] ss:$12 sps:$4 sm:$0xff]  }
 0x26b   :  { %v5341_v25 = vor.u32 %v5340_v17, %v5322_v28  ;;  %v5323_v3 = vsel %vm17296_vm5, %v5318_v12, %v5322_v28  ;;  %v4503_v46 = vpop.f32.mrf.mxu1  ;;  %v14307_v22 = vpop.f32.mrf.mxu0  ;;  %v15457_v28 = vld [vmem:[#allocation12 + $0x420] ss:$12 sps:$4 sm:$0xff]  }
 0x26c   :  { %7608 = vmatpush1.bf16.msra.mxu0 %v15433_v39  ;;  %5352 = vst [vmem:[#allocation4 + $0x78] sm:$0xff] %v5323_v3  ;;  %v4504_v52 = vadd.f32 %v4503_v46, %v4431_v2  ;;  %v14308_v13 = vadd.f32 %v14307_v22, %v14306_v14  ;;  %v5048_v0 = vmax.f32 %v4502_v43, 0.0  ;;  %v15471_v22 = vld [vmem:[#allocation12 + $0x3f4] ss:$12 sps:$4 sm:$0xff]  }
 0x26d   :  { %7609 = vmatprep.subr.bf16.mxu0 %v15441_v41  ;;  %v5342_v11 = vrot.slane %v5341_v25, 4  ;;  %v5424_v7 = vld [vmem:[#allocation4 + $0x90] sm:$0xff]  ;;  %v4505_v32 = vpop.f32.mrf.mxu1  ;;  %v14309_v33 = vpop.f32.mrf.mxu0 }
 0x26e   :  { %v17986_v20 = vcombine.low %v17966_v56, %v5424_v7  ;;  %v17989_v8 = vcombine.high %v17966_v56, %v5424_v7  ;;  %v5049_v37 = vmax.f32 %v4504_v52, 0.0  ;;  %v4506_v27 = vadd.f32 %v4505_v32, %v4433_v60  ;;  %v15463_v60 = vld [vmem:[#allocation12 + $0x408] ss:$12 sps:$4 sm:$0xff]  }
 0x26f   :  { %5354 = vst [vmem:[#allocation4 + $0xa8] sm:$0x11] %v5342_v11  ;;  %v4507_v31 = vpop.f32.mrf.mxu1  ;;  %v14310_v50 = vpop.f32.mrf.mxu0  ;;  %v4545_v40 = vadd.f32 %v14308_v13, %v17993_v47 }
 0x270   :  { %18733 = vst [vmem:[#allocation34_spill] sm:$0xff] %v17986_v20  ;;  %18734 = vst [vmem:[#allocation37_spill] sm:$0xff] %v17989_v8  ;;  %7610 = vmatpush2.bf16.msra.mxu0 %v15439_v38  ;;  %7529 = vmatprep.mubr.bf16.mxu0 %v17989_v8  ;;  %v14278_v56 = vpack.c.bf16 %v5049_v37, %v5048_v0  ;;  %v4508_v51 = vadd.f32 %v4507_v31, %v4435_v48  ;;  %v5051_v44 = vmax.f32 %v4506_v27, 0.0  ;;  %v15469_v0 = vld [vmem:[#allocation12 + $0x3f0] ss:$12 sps:$4 sm:$0xff]  }
 0x271   :  { %7611 = vmatprep.subr.bf16.mxu0 %v15447_v35  ;;  %7530 = vmatmul.mubr.bf16.gmra.mxu0 %v17986_v20  ;;  %v14346_v30 = vpop.f32.mrf.mxu1  ;;  %v14312_v59 = vpop.f32.mrf.mxu0  ;;  %v14311_v58 = vadd.f32 %v14310_v50, %v14309_v33 }
 0x272   :  { %5302 = vst [vmem:[#allocation4 + $0x6c] sm:$0xff] %v14278_v56  ;;  %v5052_v4 = vmax.f32 %v4508_v51, 0.0  ;;  %v5361_v19 = vshrl.u32 %v14278_v56, 16  ;;  %v5364_v16 = vshll.u32 %v14278_v56, 16 }
 0x273   :  { %v14347_v23 = vpop.f32.mrf.mxu1  ;;  %v14313_v5 = vpop.f32.mrf.mxu0  ;;  %v4548_v15 = vadd.f32 %v14311_v58, %v17993_v47 }
 0x274   :  { %7612 = vmatpush2.bf16.msra.mxu0 %v15445_v42  ;;  %v14280_v39 = vpack.c.bf16 %v5052_v4, %v5051_v44  ;;  %v14348_v1 = vadd.f32 %v14347_v23, %v14346_v30  ;;  %v14314_v12 = vadd.f32 %v14313_v5, %v14312_v59  ;;  %v5363_v17 = vrot.slane %v5361_v19, 4  ;;  %v15475_v4 = vld [vmem:[#allocation12 + $0x3d8] ss:$12 sps:$4 sm:$0xff]  }
 0x275   :  { %7613 = vmatprep.subr.bf16.mxu0 %v15453_v36  ;;  %v14349_v62 = vpop.f32.mrf.mxu1  ;;  %v14315_v10 = vpop.f32.mrf.mxu0  ;;  %v5366_v53 = vrot.slane %v5364_v16, 5  ;;  %v15483_v19 = vld [vmem:[#allocation12 + $0x3c4] ss:$12 sps:$4 sm:$0xff]  }
 0x276   :  { %5148 = vst [vmem:[#allocation3 + $0x54] sm:$0xff] %v14280_v39  ;;  %v17998_v41 = vadd.f32 %v14348_v1, %v4545_v40  ;;  %v4553_v18 = vadd.f32 %v14314_v12, %v17993_v47 }
 0x277   :  { %v14350_v2 = vpop.f32.mrf.mxu1  ;;  %v14316_v25 = vpop.f32.mrf.mxu0  ;;  %v5367_v35 = vor.u32 %v5366_v53, %v5363_v17 }
 0x278   :  { %7614 = vmatpush2.bf16.msra.mxu0 %v15451_v34  ;;  %v14351_v14 = vadd.f32 %v14350_v2, %v14349_v62  ;;  %v14317_v43 = vadd.f32 %v14316_v25, %v14315_v10  ;;  %v15481_v10 = vld [vmem:[#allocation12 + $0x3c0] ss:$12 sps:$4 sm:$0xff]  }
 0x279   :  { %7615 = vmatprep.subr.bf16.mxu0 %v15459_v61  ;;  %v14352_v38 = vpop.f32.mrf.mxu1  ;;  %v14318_v21 = vpop.f32.mrf.mxu0  ;;  %v5368_v37 = vrot.slane %v5367_v35, 4 }
 0x27a   :  { %v18001_v3 = vadd.f32 %v14351_v14, %v4548_v15  ;;  %v4556_v26 = vadd.f32 %v14317_v43, %v17993_v47  ;;  %v15495_v15 = vld [vmem:[#allocation12 + $0x6ac] ss:$12 sps:$4 sm:$0xff]  }
 0x27b   :  { %v14353_v29 = vpop.f32.mrf.mxu1  ;;  %v14319_v46 = vpop.f32.mrf.mxu0 }
 0x27c   :  { %7616 = vmatpush2.bf16.msra.mxu0 %v15457_v28  ;;  %v14354_v11 = vadd.f32 %v14353_v29, %v14352_v38  ;;  %v14320_v52 = vadd.f32 %v14319_v46, %v14318_v21 }
 0x27d   :  { %7617 = vmatprep.subr.bf16.mxu0 %v15465_v9  ;;  %v5300_v48 = vld [vmem:[#allocation3 + $0x54] sm:$0x11]  ;;  %v14355_v7 = vpop.f32.mrf.mxu1  ;;  %v14321_v42 = vpop.f32.mrf.mxu0 }
 0x27e   :  { %v5358_v13 = vld [vmem:[#allocation3 + $0x54] sm:$0x33]  ;;  %5304 = vst [vmem:[#allocation4 + $0x9c] sm:$0x11] %v5300_v48  ;;  %v18004_v36 = vadd.f32 %v14354_v11, %v4553_v18  ;;  %v4561_v30 = vadd.f32 %v14320_v52, %v17993_v47 }
 0x27f   :  { %v5370_v32 = vshll.u32 %v5358_v13, 16  ;;  %v5388_v33 = vshrl.u32 %v5358_v13, 16  ;;  %v14356_v27 = vpop.f32.mrf.mxu1  ;;  %v14322_v45 = vpop.f32.mrf.mxu0 }
 0x280   :  { %7618 = vmatpush2.bf16.msra.mxu0 %v15463_v60  ;;  %v14357_v56 = vadd.f32 %v14356_v27, %v14355_v7  ;;  %v14323_v44 = vadd.f32 %v14322_v45, %v14321_v42 }
 0x281   :  { %7619 = vmatprep.subr.bf16.mxu0 %v15471_v22  ;;  %v5372_v31 = vrot.slane %v5370_v32, 5  ;;  %v5390_v50 = vrot.slane %v5388_v33, 4  ;;  %v14358_v51 = vpop.f32.mrf.mxu1  ;;  %v14324_v59 = vpop.f32.mrf.mxu0 }
 0x282   :  { %v18008_v49 = vadd.f32 %v14357_v56, %v4556_v26  ;;  %v4564_v12 = vadd.f32 %v14323_v44, %v17993_v47 }
 0x283   :  { %v5391_v34 = vor.u32 %v5390_v50, %v5372_v31  ;;  %v5373_v40 = vsel %vm17296_vm5, %v5368_v37, %v5372_v31  ;;  %v14359_v58 = vpop.f32.mrf.mxu1  ;;  %v14325_v61 = vpop.f32.mrf.mxu0 }
 0x284   :  { %7620 = vmatpush2.bf16.msra.mxu0 %v15469_v0  ;;  %5402 = vst [vmem:[#allocation4 + $0x84] sm:$0xff] %v5373_v40  ;;  %v14360_v23 = vadd.f32 %v14359_v58, %v14358_v51  ;;  %v14326_v5 = vadd.f32 %v14325_v61, %v14324_v59 }
 0x285   :  { %7621 = vmatprep.subr.bf16.mxu0 %v15477_v6  ;;  %v5392_v16 = vrot.slane %v5391_v34, 4  ;;  %v14361_v39 = vpop.f32.mrf.mxu1  ;;  %v14327_v1 = vpop.f32.mrf.mxu0 }
 0x286   :  { %v18012_v62 = vadd.f32 %v14360_v23, %v4561_v30  ;;  %v4569_v9 = vadd.f32 %v14326_v5, %v17993_v47 }
 0x287   :  { %5404 = vst [vmem:[#allocation4 + $0xb4] sm:$0x11] %v5392_v16  ;;  %v14362_v28 = vpop.f32.mrf.mxu1  ;;  %v14328_v17 = vpop.f32.mrf.mxu0 }
 0x288   :  { %7622 = vmatpush2.bf16.msra.mxu0 %v15475_v4  ;;  %v14363_v53 = vadd.f32 %v14362_v28, %v14361_v39  ;;  %v14329_v14 = vadd.f32 %v14328_v17, %v14327_v1 }
 0x289   :  { %7623 = vmatprep.subr.bf16.mxu0 %v15483_v19  ;;  %v14364_v2 = vpop.f32.mrf.mxu1 }
 0x28a   :  { %v18015_v25 = vadd.f32 %v14363_v53, %v4564_v12  ;;  %v4572_v29 = vadd.f32 %v14329_v14, %v17993_v47 }
 0x28b   :  { %v14365_v38 = vpop.f32.mrf.mxu1  ;;  %v14386_v21 = vpop.f32.mrf.mxu0 }
 0x28c   :  { %7624 = vmatpush2.bf16.msra.mxu0 %v15481_v10  ;;  %v14366_v18 = vadd.f32 %v14365_v38, %v14364_v2 }
 0x28d   :  { %7699 = vmatprep.subr.bf16.mxu0 %v15495_v15  ;;  %v14367_v43 = vpop.f32.mrf.mxu1  ;;  %v14387_v60 = vpop.f32.mrf.mxu0 }
 0x28e   :  { %v18018_v35 = vadd.f32 %v14366_v18, %v4569_v9  ;;  %v14388_v57 = vadd.f32 %v14387_v60, %v14386_v21 }
 0x28f   :  { %v14368_v46 = vpop.f32.mrf.mxu1  ;;  %v14389_v22 = vpop.f32.mrf.mxu0 }
 0x290   :  { %v14369_v11 = vadd.f32 %v14368_v46, %v14367_v43 }
 0x291   :  { %v14426_v52 = vpop.f32.mrf.mxu1  ;;  %v14390_v48 = vpop.f32.mrf.mxu0 }
 0x292   :  { %v18021_v13 = vadd.f32 %v14369_v11, %v4572_v29 }
 0x293   :  { %v14427_v7 = vpop.f32.mrf.mxu1  ;;  %v14392_v42 = vpop.f32.mrf.mxu0 }
 0x294   :  { %18735 = vst [vmem:[#allocation36_spill] sm:$0xff] %v18021_v13  ;;  %v4675_v13 = vadd.f32 %v14388_v57, %v17998_v41 }
 0x295   :  { %v18023_v32 = vpop.f32.mrf.mxu1  ;;  %v14393_v33 = vpop.f32.mrf.mxu0 }
 0x297   :  { %v14430_v26 = vpop.f32.mrf.mxu1  ;;  %v18025_v0 = vpop.f32.mrf.mxu0 }
 0x298   :  { %v14431_v57 = vadd.f32 %v14430_v26, %v18023_v32 }
 0x299   :  { %v18027_v37 = vpop.f32.mrf.mxu1  ;;  %v14396_v27 = vpop.f32.mrf.mxu0 }
 0x29b   :  { %v18029_v45 = vpop.f32.mrf.mxu1  ;;  %v18031_v47 = vpop.f32.mrf.mxu0 }
 0x29d   :  { %v18033_v6 = vpop.f32.mrf.mxu1  ;;  %v18035_v31 = vpop.f32.mrf.mxu0 }
 0x29f   :  { %v18037_v50 = vpop.f32.mrf.mxu1  ;;  %v18039_v56 = vpop.f32.mrf.mxu0 }
 0x2a1   :  { %v18041_v51 = vpop.f32.mrf.mxu1  ;;  %v18043_v30 = vpop.f32.mrf.mxu0 }
 0x2a3   :  { %v18045_v59 = vpop.f32.mrf.mxu1  ;;  %v18047_v34 = vpop.f32.mrf.mxu0 }
 0x2a5   :  { %v18049_v44 = vpop.f32.mrf.mxu1  ;;  %v18051_v4 = vpop.f32.mrf.mxu0 }
 0x2a7   :  { %v18053_v40 = vpop.f32.mrf.mxu1  ;;  %v18055_v58 = vpop.f32.mrf.mxu0 }
 0x2a8   :  { %18736 = vst [vmem:[#allocation38_spill] sm:$0xff] %v18055_v58 }
 0x2a9   :  { %v18057_v61 = vpop.f32.mrf.mxu1  ;;  %v18059_v19 = vpop.f32.mrf.mxu0 }
 0x2aa   :  { %18737 = vst [vmem:[#allocation40_spill] sm:$0xff] %v18057_v61  ;;  %18738 = vst [vmem:[#allocation42_spill] sm:$0xff] %v18059_v19  ;;  %v14391_v19 = vadd.f32 %v14390_v48, %v14389_v22  ;;  %v14428_v61 = vadd.f32 %v14427_v7, %v14426_v52  ;;  %v14397_v48 = vadd.f32 %v14396_v27, %v18025_v0 }
 0x2ab   :  { %v18061_v16 = vpop.f32.mrf.mxu1  ;;  %v14466_v23 = vpop.f32.mrf.mxu0  ;;  %v14400_v0 = vadd.f32 %v18035_v31, %v18031_v47 }
 0x2ac   :  { %18739 = vst [vmem:[#allocation41_spill] sm:$0xff] %v18061_v16  ;;  %v4740_v60 = vadd.f32 %v14428_v61, %v4675_v13  ;;  %v4686_v26 = vadd.f32 %v14397_v48, %v18008_v49 }
 0x2ad   :  { %v18063_v5 = vpop.f32.mrf.mxu1  ;;  %v14467_v39 = vpop.f32.mrf.mxu0  ;;  %v4691_v49 = vadd.f32 %v14400_v0, %v18012_v62 }
 0x2ae   :  { %18740 = vst [vmem:[#allocation46_spill] sm:$0xff] %v18063_v5 }
 0x2af   :  { %v18065_v1 = vpop.f32.mrf.mxu1  ;;  %v14469_v12 = vpop.f32.mrf.mxu0 }
 0x2b0   :  { %18741 = vst [vmem:[#allocation43_spill] sm:$0xff] %v18065_v1 }
 0x2b1   :  { %v14506_v10 = vpop.f32.mrf.mxu1  ;;  %v14470_v15 = vpop.f32.mrf.mxu0 }
 0x2b2   :  { %v14471_v22 = vadd.f32 %v14470_v15, %v14469_v12  ;;  %v14437_v12 = vadd.f32 %v18037_v50, %v18033_v6  ;;  %v14403_v6 = vadd.f32 %v18043_v30, %v18039_v56 }
 0x2b3   :  { %v14507_v28 = vpop.f32.mrf.mxu1  ;;  %v14472_v17 = vpop.f32.mrf.mxu0 }
 0x2b5   :  { %v14509_v53 = vpop.f32.mrf.mxu1  ;;  %v14473_v2 = vpop.f32.mrf.mxu0 }
 0x2b7   :  { %v14510_v9 = vpop.f32.mrf.mxu1  ;;  %v14475_v14 = vpop.f32.mrf.mxu0 }
 0x2b9   :  { %v18067_v38 = vpop.f32.mrf.mxu1  ;;  %v14476_v18 = vpop.f32.mrf.mxu0 }
 0x2bb   :  { %v14513_v43 = vpop.f32.mrf.mxu1  ;;  %v18069_v29 = vpop.f32.mrf.mxu0 }
 0x2bc   :  { %v14514_v31 = vadd.f32 %v14513_v43, %v18067_v38  ;;  %v14406_v38 = vadd.f32 %v18051_v4, %v18047_v34  ;;  %v14443_v34 = vadd.f32 %v18053_v40, %v18049_v44  ;;  %v18755_v44 = vld [vmem:[#allocation42_spill] sm:$0xff] }
 0x2bd   :  { %v18071_v46 = vpop.f32.mrf.mxu1  ;;  %v18073_v11 = vpop.f32.mrf.mxu0 }
 0x2be   :  { %v14480_v62 = vadd.f32 %v18073_v11, %v18069_v29 }
 0x2bf   :  { %v18075_v24 = vpop.f32.mrf.mxu1  ;;  %v18077_v55 = vpop.f32.mrf.mxu0 }
 0x2c0   :  { %18742 = vst [vmem:[#allocation44_spill] sm:$0xff] %v18077_v55  ;;  %v14468_v55 = vadd.f32 %v14467_v39, %v14466_v23  ;;  %v14508_v39 = vadd.f32 %v14507_v28, %v14506_v10  ;;  %v14477_v10 = vadd.f32 %v14476_v18, %v14475_v14  ;;  %v14517_v43 = vadd.f32 %v18075_v24, %v18071_v46 }
 0x2c1   :  { %v18079_v20 = vpop.f32.mrf.mxu1  ;;  %v18081_v8 = vpop.f32.mrf.mxu0  ;;  %v4699_v24 = vadd.f32 %v14406_v38, %v18018_v35 }
 0x2c2   :  { %18743 = vst [vmem:[#allocation47_spill] sm:$0xff] %v18079_v20  ;;  %18744 = vst [vmem:[#allocation48_spill] sm:$0xff] %v18081_v8  ;;  %v14394_v8 = vadd.f32 %v14393_v33, %v14392_v42  ;;  %v4805_v41 = vadd.f32 %v14468_v55, %v4740_v60  ;;  %v14434_v42 = vadd.f32 %v18029_v45, %v18027_v37 }
 0x2c3   :  { %v18083_v63 = vpop.f32.mrf.mxu1  ;;  %v18085_v54 = vpop.f32.mrf.mxu0  ;;  %v14474_v55 = vadd.f32 %v14473_v2, %v14472_v17  ;;  %v4751_v2 = vadd.f32 %v14437_v12, %v4686_v26  ;;  %v18752_v12 = vld [vmem:[#allocation40_spill] sm:$0xff] }
 0x2c4   :  { %18745 = vst [vmem:[#allocation45_spill] sm:$0xff] %v18085_v54  ;;  %v4678_v54 = vadd.f32 %v14391_v19, %v18001_v3  ;;  %v4683_v23 = vadd.f32 %v14394_v8, %v18004_v36  ;;  %v4870_v33 = vadd.f32 %v14508_v39, %v4805_v41  ;;  %v14511_v8 = vadd.f32 %v14510_v9, %v14509_v53 }
 0x2c5   :  { %v18087_v1 = vpop.f32.mrf.mxu1  ;;  %v18089_v5 = vpop.f32.mrf.mxu0  ;;  %v14440_v41 = vadd.f32 %v18045_v59, %v18041_v51  ;;  %v4816_v50 = vadd.f32 %v14477_v10, %v4751_v2  ;;  %v18753_v10 = vld [vmem:[#allocation41_spill] sm:$0xff] }
 0x2c6   :  { %18746 = vst [vmem:[#allocation50_spill] sm:$0xff] %v18087_v1  ;;  %18747 = vst [vmem:[#allocation49_spill] sm:$0xff] %v18089_v5  ;;  %v4743_v7 = vadd.f32 %v14431_v57, %v4678_v54  ;;  %v4748_v19 = vadd.f32 %v14434_v42, %v4683_v23 }
 0x2c7   :  { %v18092_v58 = vpop.f32.mrf.mxu1  ;;  %v18094_v16 = vpop.f32.mrf.mxu0  ;;  %v4881_v29 = vadd.f32 %v14517_v43, %v4816_v50  ;;  %v18758_v50 = vld [vmem:[#allocation36_spill] sm:$0xff] }
 0x2c8   :  { %18748 = vst [vmem:[#allocation52_spill] sm:$0xff] %v18094_v16  ;;  %v4808_v32 = vadd.f32 %v14471_v22, %v4743_v7  ;;  %v4813_v28 = vadd.f32 %v14474_v55, %v4748_v19  ;;  %v4756_v7 = vadd.f32 %v14440_v41, %v4691_v49  ;;  %v18750_v55 = vld [vmem:[#allocation44_spill] sm:$0xff] }
 0x2c9   :  { %v18096_v20 = vpop.f32.mrf.mxu1  ;;  %v18098_v21 = vpop.f32.mrf.mxu0  ;;  %v18749_v4 = vld [vmem:[#allocation47_spill] sm:$0xff]  ;;  %v18751_v26 = vld [vmem:[#allocation48_spill] sm:$0xff] }
 0x2ca   :  { %v4873_v45 = vadd.f32 %v14511_v8, %v4808_v32  ;;  %v4878_v22 = vadd.f32 %v14514_v31, %v4813_v28  ;;  %v4821_v11 = vadd.f32 %v14480_v62, %v4756_v7  ;;  %v14520_v46 = vadd.f32 %v18083_v63, %v18749_v4 }
 0x2cb   :  { %v18101_v1 = vpop.f32.mrf.mxu1  ;;  %v14546_v5 = vpop.f32.mrf.mxu0  ;;  %v14483_v0 = vadd.f32 %v18751_v26, %v18750_v55  ;;  %v18756_v35 = vld [vmem:[#allocation45_spill] sm:$0xff] }
 0x2cc   :  { %v4886_v2 = vadd.f32 %v14520_v46, %v4821_v11 }
 0x2cd   :  { %v18105_v16 = vpop.f32.mrf.mxu1  ;;  %v14547_v52 = vpop.f32.mrf.mxu0 }
 0x2ce   :  { %v14548_v13 = vadd.f32 %v14547_v52, %v14546_v5 }
 0x2cf   :  { %v18108_v61 = vpop.f32.mrf.mxu1  ;;  %v14549_v3 = vpop.f32.mrf.mxu0 }
 0x2d0   :  { %v4935_v36 = vadd.f32 %v14548_v13, %v4870_v33  ;;  %v4694_v13 = vadd.f32 %v14403_v6, %v18015_v25 }
 0x2d1   :  { %v14586_v27 = vpop.f32.mrf.mxu1  ;;  %v14550_v54 = vpop.f32.mrf.mxu0 }
 0x2d2   :  { %v14551_v5 = vadd.f32 %v14550_v54, %v14549_v3 }
 0x2d3   :  { %v14587_v15 = vpop.f32.mrf.mxu1  ;;  %v14552_v37 = vpop.f32.mrf.mxu0 }
 0x2d4   :  { %v14588_v17 = vadd.f32 %v14587_v15, %v14586_v27  ;;  %v4938_v53 = vadd.f32 %v14551_v5, %v4873_v45  ;;  %v4759_v5 = vadd.f32 %v14443_v34, %v4694_v13  ;;  %v14446_v15 = vadd.f32 %v18753_v10, %v18752_v12  ;;  %v18757_v45 = vld [vmem:[#allocation49_spill] sm:$0xff] }
 0x2d5   :  { %v14589_v60 = vpop.f32.mrf.mxu1  ;;  %v14553_v47 = vpop.f32.mrf.mxu0  ;;  %v14486_v28 = vadd.f32 %v18757_v45, %v18756_v35  ;;  %v14529_v45 = vadd.f32 %v18108_v61, %v18105_v16 }
 0x2d6   :  { %v5000_v57 = vadd.f32 %v14588_v17, %v4935_v36  ;;  %v14554_v9 = vadd.f32 %v14553_v47, %v14552_v37  ;;  %v18754_v37 = vld [vmem:[#allocation38_spill] sm:$0xff]  ;;  %v4764_v47 = vadd.f32 %v14446_v15, %v4699_v24  ;;  %v4824_v31 = vadd.f32 %v14483_v0, %v4759_v5 }
 0x2d7   :  { %v14590_v14 = vpop.f32.mrf.mxu1  ;;  %v14555_v18 = vpop.f32.mrf.mxu0  ;;  %v14409_v40 = vadd.f32 %v18755_v44, %v18754_v37 }
 0x2d8   :  { %v5032_v48 = vmax.f32 %v5000_v57, 0.0  ;;  %v14591_v52 = vadd.f32 %v14590_v14, %v14589_v60  ;;  %v4943_v30 = vadd.f32 %v14554_v9, %v4878_v22  ;;  %v4829_v62 = vadd.f32 %v14486_v28, %v4764_v47 }
 0x2d9   :  { %v14592_v51 = vpop.f32.mrf.mxu1  ;;  %v14556_v59 = vpop.f32.mrf.mxu0  ;;  %v4702_v14 = vadd.f32 %v14409_v40, %v18758_v50 }
 0x2da   :  { %v14267_v23 = vpack.c.bf16 %v5032_v48, %v5032_v48  ;;  %v5003_v56 = vadd.f32 %v14591_v52, %v4938_v53  ;;  %v14557_v39 = vadd.f32 %v14556_v59, %v14555_v18  ;;  %v18759_v18 = vld [vmem:[#allocation50_spill] sm:$0xff] }
 0x2db   :  { %v14593_v3 = vpop.f32.mrf.mxu1  ;;  %v14558_v42 = vpop.f32.mrf.mxu0  ;;  %v14523_v22 = vadd.f32 %v18092_v58, %v18759_v18  ;;  %v18762_v58 = vld [vmem:[#allocation52_spill] sm:$0xff] }
 0x2dc   :  { %5135 = vst [vmem:[#allocation3 + $0x8] sm:$0xf] %v14267_v23  ;;  %v5035_v33 = vmax.f32 %v5003_v56, 0.0  ;;  %v14594_v32 = vadd.f32 %v14593_v3, %v14592_v51  ;;  %v4946_v8 = vadd.f32 %v14557_v39, %v4881_v29  ;;  %v18761_v39 = vld [vmem:[#allocation43_spill] sm:$0xff]  ;;  %v14489_v29 = vadd.f32 %v18098_v21, %v18762_v58 }
 0x2dd   :  { %v14595_v27 = vpop.f32.mrf.mxu1  ;;  %v14559_v25 = vpop.f32.mrf.mxu0  ;;  %v4889_v3 = vadd.f32 %v14523_v22, %v4824_v31 }
 0x2de   :  { %v14269_v54 = vpack.c.bf16 %v5035_v33, %v5035_v33  ;;  %v5008_v19 = vadd.f32 %v14594_v32, %v4943_v30  ;;  %v14560_v36 = vadd.f32 %v14559_v25, %v14558_v42  ;;  %v18760_v30 = vld [vmem:[#allocation46_spill] sm:$0xff]  ;;  %v14526_v42 = vadd.f32 %v18101_v1, %v18096_v20 }
 0x2df   :  { %v14596_v63 = vpop.f32.mrf.mxu1  ;;  %v14561_v17 = vpop.f32.mrf.mxu0  ;;  %v14449_v13 = vadd.f32 %v18761_v39, %v18760_v30  ;;  %v15474_v30 = vld [vmem:[#allocation4 + $0xc] ss:$48 sps:$4 sm:$0xff]  }
 0x2e0   :  { %5137 = vst [vmem:[#allocation3 + $0x14] sm:$0xf] %v14269_v54  ;;  %v5038_v49 = vmax.f32 %v5008_v19, 0.0  ;;  %v14597_v60 = vadd.f32 %v14596_v63, %v14595_v27  ;;  %v4951_v6 = vadd.f32 %v14560_v36, %v4886_v2  ;;  %v4894_v55 = vadd.f32 %v14526_v42, %v4829_v62  ;;  %v15478_v39 = vld [vmem:[#allocation12 + $0x528] ss:$12 sps:$4 sm:$0xff]   ;;  %7572 = vmatprep.mubr.bf16.mxu1 %v15474_v30 }
 0x2e1   :  { %v14598_v57 = vpop.f32.mrf.mxu1  ;;  %v14562_v53 = vpop.f32.mrf.mxu0  ;;  %v4767_v46 = vadd.f32 %v14449_v13, %v4702_v14  ;;  %v18162_v30 = vld [vmem:[#allocation4 + $0x18] sm:$0xff] }
 0x2e2   :  { %v14271_v9 = vpack.c.bf16 %v5038_v49, %v5038_v49  ;;  %v5011_v41 = vadd.f32 %v14597_v60, %v4946_v8  ;;  %v14563_v38 = vadd.f32 %v14562_v53, %v14561_v17 }
 0x2e3   :  { %v5175_v48 = vld [vmem:[#allocation3 + $0x8] sm:$0xf]  ;;  %v14599_v7 = vpop.f32.mrf.mxu1  ;;  %v14564_v43 = vpop.f32.mrf.mxu0  ;;  %v4832_v21 = vadd.f32 %v14489_v29, %v4767_v46  ;;  %v15484_v46 = vld [vmem:[#allocation12 + $0x510] ss:$12 sps:$4 sm:$0xff]  }
 0x2e4   :  { %v5191_v52 = vld [vmem:[#allocation3 + $0x8] sm:$0xf]  ;;  %5179 = vst [vmem:[#allocation4 + $0x8] sm:$0xf] %v5175_v48  ;;  %5139 = vst [vmem:[#allocation3 + $0x20] sm:$0xf] %v14271_v9  ;;  %v14600_v56 = vadd.f32 %v14599_v7, %v14598_v57  ;;  %v4954_v27 = vadd.f32 %v14563_v38, %v4889_v3 }
 0x2e5   :  { %v5209_v51 = vshrl.u32 %v5191_v52, 16  ;;  %v5212_v59 = vshll.u32 %v5191_v52, 16  ;;  %v5041_v23 = vmax.f32 %v5011_v41, 0.0  ;;  %v14601_v11 = vpop.f32.mrf.mxu1  ;;  %v14565_v33 = vpop.f32.mrf.mxu0  ;;  %v4897_v53 = vadd.f32 %v14529_v45, %v4832_v21  ;;  %v15486_v29 = vld [vmem:[#allocation12 + $0x514] ss:$12 sps:$4 sm:$0xff]  }
 0x2e6   :  { %v5016_v4 = vadd.f32 %v14600_v56, %v4951_v6  ;;  %v14566_v54 = vadd.f32 %v14565_v33, %v14564_v43  ;;  %v15532_v6 = vld [vmem:[#allocation12 + $0x630] ss:$12 sps:$4 sm:$0xff]  }
 0x2e7   :  { %v5211_v32 = vrot.slane %v5209_v51, 4  ;;  %v5214_v34 = vrot.slane %v5212_v59, 5  ;;  %v14273_v24 = vpack.c.bf16 %v5041_v23, %v5041_v23  ;;  %v5177_v26 = vld [vmem:[#allocation3 + $0x14] sm:$0x1]  ;;  %v14602_v25 = vpop.f32.mrf.mxu1  ;;  %v14567_v19 = vpop.f32.mrf.mxu0 }
 0x2e8   :  { %v5193_v0 = vld [vmem:[#allocation3 + $0x14] sm:$0x3]  ;;  %5181 = vst [vmem:[#allocation4 + $0x38] sm:$0x1] %v5177_v26  ;;  %v5044_v1 = vmax.f32 %v5016_v4, 0.0  ;;  %v14603_v5 = vadd.f32 %v14602_v25, %v14601_v11  ;;  %v4959_v12 = vadd.f32 %v14566_v54, %v4894_v55 }
 0x2e9   :  { %v5215_v8 = vor.u32 %v5214_v34, %v5211_v32  ;;  %v5218_v36 = vshll.u32 %v5193_v0, 16  ;;  %v5227_v20 = vshrl.u32 %v5193_v0, 16  ;;  %5141 = vst [vmem:[#allocation3 + $0x2c] sm:$0xf] %v14273_v24  ;;  %v14604_v10 = vpop.f32.mrf.mxu1  ;;  %v14568_v15 = vpop.f32.mrf.mxu0  ;;  %v15492_v0 = vld [vmem:[#allocation12 + $0x4fc] ss:$12 sps:$4 sm:$0xff]  }
 0x2ea   :  { %v14275_v35 = vpack.c.bf16 %v5044_v1, %v5044_v1  ;;  %v5019_v17 = vadd.f32 %v14603_v5, %v4954_v27  ;;  %v14569_v49 = vadd.f32 %v14568_v15, %v14567_v19  ;;  %v15493_v27 = vld [vmem:[#allocation12 + $0x6a8] ss:$12 sps:$4 sm:$0xff]  }
 0x2eb   :  { %v5216_v37 = vrot.slane %v5215_v8, 4  ;;  %v5220_v44 = vrot.slane %v5218_v36, 5  ;;  %v5229_v40 = vrot.slane %v5227_v20, 4  ;;  %v5183_v28 = vld [vmem:[#allocation3 + $0x20] sm:$0xf]  ;;  %v14605_v2 = vpop.f32.mrf.mxu1 }
 0x2ec   :  { %v5241_v63 = vld [vmem:[#allocation3 + $0x20] sm:$0xf]  ;;  %5187 = vst [vmem:[#allocation4 + $0x14] sm:$0xf] %v5183_v28  ;;  %5143 = vst [vmem:[#allocation3 + $0x38] sm:$0xf] %v14275_v35  ;;  %v14606_v57 = vadd.f32 %v14605_v2, %v14604_v10  ;;  %v4962_v52 = vadd.f32 %v14569_v49, %v4897_v53 }
 0x2ed   :  { %v5230_v60 = vor.u32 %v5229_v40, %v5220_v44  ;;  %v5259_v47 = vshrl.u32 %v5241_v63, 16  ;;  %v5262_v31 = vshll.u32 %v5241_v63, 16  ;;  %v5047_v9 = vmax.f32 %v5019_v17, 0.0  ;;  %v14607_v41 = vpop.f32.mrf.mxu1  ;;  %v15501_v19 = vld [vmem:[#allocation12 + $0x694] ss:$12 sps:$4 sm:$0xff]  }
 0x2ee   :  { %v5221_v50 = vsel %vm17296_vm5, %v5216_v37, %v5220_v44  ;;  %v5024_v16 = vadd.f32 %v14606_v57, %v4959_v12  ;;  %v15487_v20 = vld [vmem:[#allocation4 + $0x10] ss:$48 sps:$4 sm:$0xff]   ;;  %v15490_v37 = vld [vmem:[#allocation12 + $0x4f8] ss:$12 sps:$4 sm:$0xff]  }
 0x2ef   :  { %v5261_v14 = vrot.slane %v5259_v47, 4  ;;  %v5264_v18 = vrot.slane %v5262_v31, 5  ;;  %v5231_v61 = vrot.slane %v5230_v60, 4  ;;  %5237 = vst [vmem:[#allocation4 + $0x20] sm:$0xf] %v5221_v50  ;;  %v14277_v48 = vpack.c.bf16 %v5047_v9, %v5047_v9  ;;  %v14608_v7 = vpop.f32.mrf.mxu1  ;;  %v18160_v50 = vld [vmem:[#allocation4 + $0x48] sm:$0xff] }
 0x2f0   :  { %v5185_v22 = vld [vmem:[#allocation3 + $0x2c] sm:$0x1]  ;;  %v5050_v59 = vmax.f32 %v5024_v16, 0.0  ;;  %v15472_v23 = vld [vmem:[#allocation4 + $0x8] ss:$48 sps:$4 sm:$0xff]   ;;  %v14609_v56 = vadd.f32 %v14608_v7, %v14607_v41 }
 0x2f1   :  { %v5243_v62 = vld [vmem:[#allocation3 + $0x2c] sm:$0x3]  ;;  %v5265_v38 = vor.u32 %v5264_v18, %v5261_v14  ;;  %5189 = vst [vmem:[#allocation4 + $0x44] sm:$0x1] %v5185_v22  ;;  %5239 = vst [vmem:[#allocation4 + $0x50] sm:$0x1] %v5231_v61  ;;  %7573 = vmatmul.mubr.bf16.vlgmr.msra.gmra.mxu1 %v15472_v23 }
 0x2f2   :  { %v5268_v43 = vshll.u32 %v5243_v62, 16  ;;  %v5277_v51 = vshrl.u32 %v5243_v62, 16  ;;  %5145 = vst [vmem:[#allocation3 + $0x44] sm:$0xf] %v14277_v48  ;;  %v14279_v58 = vpack.c.bf16 %v5050_v59, %v5050_v59  ;;  %v5027_v32 = vadd.f32 %v14609_v56, %v4962_v52  ;;  %7647 = vmatpush1.bf16.msra.mxu1 %v15478_v39  ;;  %v15498_v40 = vld [vmem:[#allocation12 + $0x4e4] ss:$12 sps:$4 sm:$0xff]  }
 0x2f3   :  { %v5266_v13 = vrot.slane %v5265_v38, 4  ;;  %v5291_v11 = vld [vmem:[#allocation3 + $0x38] sm:$0xf]  ;;  %7648 = vmatprep.subr.bf16.mxu1 %v15486_v29  ;;  %v15499_v35 = vld [vmem:[#allocation12 + $0x690] ss:$12 sps:$4 sm:$0xff]   ;;  %v18166_v39 = vcombine.high %v18162_v30, %v18160_v50 }
 0x2f4   :  { %v5270_v3 = vrot.slane %v5268_v43, 5  ;;  %v5279_v42 = vrot.slane %v5277_v51, 4  ;;  %v5307_v33 = vld [vmem:[#allocation3 + $0x38] sm:$0xf]  ;;  %5295 = vst [vmem:[#allocation4 + $0x68] sm:$0xf] %v5291_v11 }
 0x2f5   :  { %v5325_v24 = vshrl.u32 %v5307_v33, 16  ;;  %v5328_v4 = vshll.u32 %v5307_v33, 16  ;;  %5147 = vst [vmem:[#allocation3 + $0x50] sm:$0xf] %v14279_v58  ;;  %v5053_v26 = vmax.f32 %v5027_v32, 0.0 }
 0x2f6   :  { %v5280_v34 = vor.u32 %v5279_v42, %v5270_v3  ;;  %v5271_v55 = vsel %vm17296_vm5, %v5266_v13, %v5270_v3  ;;  %7649 = vmatpush1.bf16.msra.mxu1 %v15484_v46  ;;  %v15510_v60 = vld [vmem:[#allocation12 + $0x67c] ss:$12 sps:$4 sm:$0xff]   ;;  %v15496_v31 = vld [vmem:[#allocation12 + $0x4e0] ss:$12 sps:$4 sm:$0xff]   ;;  %v15508_v18 = vld [vmem:[#allocation12 + $0x678] ss:$12 sps:$4 sm:$0xff]  }
 0x2f7   :  { %5287 = vst [vmem:[#allocation4 + $0x2c] sm:$0xf] %v5271_v55  ;;  %v5327_v25 = vrot.slane %v5325_v24, 4  ;;  %v5330_v54 = vrot.slane %v5328_v4, 5  ;;  %v14281_v36 = vpack.c.bf16 %v5053_v26, %v5053_v26  ;;  %7650 = vmatprep.subr.bf16.mxu1 %v15492_v0  ;;  %v15507_v41 = vld [vmem:[#allocation12 + $0x4cc] ss:$12 sps:$4 sm:$0xff]  }
 0x2f8   :  { %v5281_v8 = vrot.slane %v5280_v34, 4  ;;  %v15489_v1 = vld [vmem:[#allocation4 + $0x14] ss:$48 sps:$4 sm:$0xff]   ;;  %v15504_v43 = vld [vmem:[#allocation4 + $0x6c] ss:$48 sps:$4 sm:$0xff]  }
 0x2f9   :  { %v5331_v21 = vor.u32 %v5330_v54, %v5327_v25  ;;  %v5293_v5 = vld [vmem:[#allocation3 + $0x44] sm:$0x1]  ;;  %5149 = vst [vmem:[#allocation3 + $0x5c] sm:$0xf] %v14281_v36  ;;  %7625 = vmatprep.mubr.bf16.mxu0 %v15489_v1  ;;  %v15505_v14 = vld [vmem:[#allocation12 + $0x4c8] ss:$12 sps:$4 sm:$0xff]   ;;  %7582 = vmatprep.mubr.bf16.mxu1 %v15504_v43 }
 0x2fa   :  { %v5309_v12 = vld [vmem:[#allocation3 + $0x44] sm:$0x3]  ;;  %5289 = vst [vmem:[#allocation4 + $0x5c] sm:$0x1] %v5281_v8  ;;  %5297 = vst [vmem:[#allocation4 + $0x98] sm:$0x1] %v5293_v5  ;;  %7626 = vmatmul.mubr.bf16.vlgmr.msra.gmra.mxu0 %v15487_v20  ;;  %7651 = vmatpush1.bf16.msra.mxu1 %v15490_v37 }
 0x2fb   :  { %v5334_v10 = vshll.u32 %v5309_v12, 16  ;;  %v5343_v15 = vshrl.u32 %v5309_v12, 16  ;;  %v5332_v44 = vrot.slane %v5331_v21, 4  ;;  %7700 = vmatpush1.bf16.msra.mxu0 %v15493_v27  ;;  %7652 = vmatprep.subr.bf16.mxu1 %v15498_v40  ;;  %v15516_v16 = vld [vmem:[#allocation12 + $0x664] ss:$12 sps:$4 sm:$0xff]  }
 0x2fc   :  { %v5299_v63 = vld [vmem:[#allocation3 + $0x50] sm:$0xf]  ;;  %7701 = vmatprep.subr.bf16.mxu0 %v15501_v19  ;;  %v15525_v3 = vld [vmem:[#allocation12 + $0x64c] ss:$12 sps:$4 sm:$0xff]   ;;  %v15523_v33 = vld [vmem:[#allocation12 + $0x648] ss:$12 sps:$4 sm:$0xff]  }
 0x2fd   :  { %v5336_v45 = vrot.slane %v5334_v10, 5  ;;  %v5345_v28 = vrot.slane %v5343_v15, 4  ;;  %v5357_v17 = vld [vmem:[#allocation3 + $0x50] sm:$0xf]  ;;  %5303 = vst [vmem:[#allocation4 + $0x74] sm:$0xf] %v5299_v63 }
 0x2fe   :  { %v5375_v2 = vshrl.u32 %v5357_v17, 16  ;;  %v5378_v49 = vshll.u32 %v5357_v17, 16  ;;  %7653 = vmatpush1.bf16.msra.mxu1 %v15496_v31  ;;  %v15513_v59 = vld [vmem:[#allocation12 + $0x4b4] ss:$12 sps:$4 sm:$0xff]   ;;  %v15511_v58 = vld [vmem:[#allocation12 + $0x4b0] ss:$12 sps:$4 sm:$0xff]  }
 0x2ff   :  { %v5346_v47 = vor.u32 %v5345_v28, %v5336_v45  ;;  %v5337_v57 = vsel %vm17296_vm5, %v5332_v44, %v5336_v45  ;;  %7702 = vmatpush1.bf16.msra.mxu0 %v15499_v35  ;;  %7654 = vmatprep.subr.bf16.mxu1 %v15507_v41  ;;  %v15514_v13 = vld [vmem:[#allocation12 + $0x660] ss:$12 sps:$4 sm:$0xff]   ;;  %v15522_v29 = vld [vmem:[#allocation12 + $0x49c] ss:$12 sps:$4 sm:$0xff]   ;;  %v15520_v4 = vld [vmem:[#allocation12 + $0x498] ss:$12 sps:$4 sm:$0xff]  }
 0x300   :  { %v5377_v53 = vrot.slane %v5375_v2, 4  ;;  %v5380_v9 = vrot.slane %v5378_v49, 5  ;;  %5353 = vst [vmem:[#allocation4 + $0x80] sm:$0xf] %v5337_v57  ;;  %v5301_v62 = vld [vmem:[#allocation3 + $0x5c] sm:$0x1]  ;;  %7703 = vmatprep.subr.bf16.mxu0 %v15510_v60 }
 0x301   :  { %v5347_v61 = vrot.slane %v5346_v47, 4  ;;  %v5359_v48 = vld [vmem:[#allocation3 + $0x5c] sm:$0x3]  ;;  %5305 = vst [vmem:[#allocation4 + $0xa4] sm:$0x1] %v5301_v62  ;;  %v5427_v62 = vld [vmem:[#allocation4 + $0xa8] sm:$0xff] }
 0x302   :  { %v5381_v22 = vor.u32 %v5380_v9, %v5377_v53  ;;  %v5384_v52 = vshll.u32 %v5359_v48, 16  ;;  %v5393_v7 = vshrl.u32 %v5359_v48, 16  ;;  %v15502_v38 = vld [vmem:[#allocation4 + $0x68] ss:$48 sps:$4 sm:$0xff]   ;;  %7655 = vmatpush1.bf16.msra.mxu1 %v15505_v14  ;;  %v15517_v34 = vld [vmem:[#allocation4 + $0x70] ss:$48 sps:$4 sm:$0xff]  }
 0x303   :  { %5355 = vst [vmem:[#allocation4 + $0xb0] sm:$0x1] %v5347_v61  ;;  %7704 = vmatpush1.bf16.msra.mxu0 %v15508_v18  ;;  %7583 = vmatmul.mubr.bf16.gmra.mxu1 %v15502_v38  ;;  %v15534_v46 = vld [vmem:[#allocation12 + $0x634] ss:$12 sps:$4 sm:$0xff]   ;;  %v15531_v26 = vld [vmem:[#allocation12 + $0x484] ss:$12 sps:$4 sm:$0xff]   ;;  %v18173_v38 = vcombine.low %v18162_v30, %v18160_v50 }
 0x304   :  { %v5382_v51 = vrot.slane %v5381_v22, 4  ;;  %v5386_v23 = vrot.slane %v5384_v52, 5  ;;  %v5395_v56 = vrot.slane %v5393_v7, 4  ;;  %7705 = vmatprep.subr.bf16.mxu0 %v15516_v16  ;;  %7678 = vmatprep.mubr.bf16.mxu1 %v18166_v39  ;;  %v15528_v55 = vld [vmem:[#allocation4 + $0x24] ss:$48 sps:$4 sm:$0xff]  }
 0x305   :  { %7656 = vmatprep.subr.bf16.mxu1 %v15513_v59  ;;  %v15529_v0 = vld [vmem:[#allocation12 + $0x480] ss:$12 sps:$4 sm:$0xff]   ;;  %v15540_v25 = vld [vmem:[#allocation12 + $0x61c] ss:$12 sps:$4 sm:$0xff]   ;;  %v15538_v19 = vld [vmem:[#allocation12 + $0x618] ss:$12 sps:$4 sm:$0xff]  }
 0x306   :  { %v5396_v42 = vor.u32 %v5395_v56, %v5386_v23  ;;  %v5387_v11 = vsel %vm17296_vm5, %v5382_v51, %v5386_v23  ;;  %7657 = vmatpush1.bf16.msra.mxu1 %v15511_v58  ;;  %v15537_v27 = vld [vmem:[#allocation12 + $0x5ec] ss:$12 sps:$4 sm:$0xff]   ;;  %v15535_v54 = vld [vmem:[#allocation12 + $0x5e8] ss:$12 sps:$4 sm:$0xff]   ;;  %v15546_v36 = vld [vmem:[#allocation12 + $0x604] ss:$12 sps:$4 sm:$0xff]  }
 0x307   :  { %5403 = vst [vmem:[#allocation4 + $0x8c] sm:$0xf] %v5387_v11  ;;  %7706 = vmatpush1.bf16.msra.mxu0 %v15514_v13  ;;  %7658 = vmatprep.subr.bf16.mxu1 %v15522_v29  ;;  %v15543_v8 = vld [vmem:[#allocation12 + $0x5d4] ss:$12 sps:$4 sm:$0xff]   ;;  %v15541_v20 = vld [vmem:[#allocation12 + $0x5d0] ss:$12 sps:$4 sm:$0xff]  }
 0x308   :  { %v5397_v32 = vrot.slane %v5396_v42, 4  ;;  %v15519_v24 = vld [vmem:[#allocation4 + $0x74] ss:$48 sps:$4 sm:$0xff]   ;;  %7707 = vmatprep.subr.bf16.mxu0 %v15525_v3  ;;  %v15549_v21 = vld [vmem:[#allocation12 + $0x5bc] ss:$12 sps:$4 sm:$0xff]  }
 0x309   :  { %7635 = vmatprep.mubr.bf16.mxu0 %v15519_v24  ;;  %v15544_v1 = vld [vmem:[#allocation12 + $0x600] ss:$12 sps:$4 sm:$0xff]   ;;  %v15547_v12 = vld [vmem:[#allocation12 + $0x5b8] ss:$12 sps:$4 sm:$0xff]   ;;  %v15550_v10 = vld [vmem:[#allocation12 + $0x768] ss:$12 sps:$4 sm:$0xff]  }
 0x30a   :  { %5405 = vst [vmem:[#allocation4 + $0xbc] sm:$0x1] %v5397_v32  ;;  %7636 = vmatmul.mubr.bf16.gmra.mxu0 %v15517_v34  ;;  %7659 = vmatpush1.bf16.msra.mxu1 %v15520_v4  ;;  %v15552_v5 = vld [vmem:[#allocation12 + $0x76c] ss:$12 sps:$4 sm:$0xff]   ;;  %v15555_v15 = vld [vmem:[#allocation12 + $0x5a4] ss:$12 sps:$4 sm:$0xff]  }
 0x30b   :  { %7708 = vmatpush1.bf16.msra.mxu0 %v15523_v33  ;;  %7731 = vmatprep.mubr.bf16.mxu0 %v15528_v55  ;;  %v15558_v37 = vld [vmem:[#allocation12 + $0x754] ss:$12 sps:$4 sm:$0xff]   ;;  %v15556_v44 = vld [vmem:[#allocation12 + $0x750] ss:$12 sps:$4 sm:$0xff]   ;;  %v15561_v35 = vld [vmem:[#allocation12 + $0x58c] ss:$12 sps:$4 sm:$0xff]  }
 0x30c   :  { %7709 = vmatprep.subr.bf16.mxu0 %v15534_v46  ;;  %7660 = vmatprep.subr.bf16.mxu1 %v15531_v26  ;;  %v15553_v40 = vld [vmem:[#allocation12 + $0x5a0] ss:$12 sps:$4 sm:$0xff]   ;;  %v15564_v45 = vld [vmem:[#allocation12 + $0x73c] ss:$12 sps:$4 sm:$0xff]   ;;  %v15562_v63 = vld [vmem:[#allocation12 + $0x738] ss:$12 sps:$4 sm:$0xff]  }
 0x30d   :  { %v15559_v28 = vld [vmem:[#allocation12 + $0x588] ss:$12 sps:$4 sm:$0xff]   ;;  %v15570_v2 = vld [vmem:[#allocation12 + $0x724] ss:$12 sps:$4 sm:$0xff]   ;;  %v15568_v49 = vld [vmem:[#allocation12 + $0x720] ss:$12 sps:$4 sm:$0xff]  }
 0x30e   :  { %7661 = vmatpush1.bf16.msra.mxu1 %v15529_v0  ;;  %v15567_v17 = vld [vmem:[#allocation12 + $0x574] ss:$12 sps:$4 sm:$0xff]   ;;  %v15565_v60 = vld [vmem:[#allocation12 + $0x570] ss:$12 sps:$4 sm:$0xff]   ;;  %v15576_v47 = vld [vmem:[#allocation12 + $0x70c] ss:$12 sps:$4 sm:$0xff]  }
 0x30f   :  { %7710 = vmatpush1.bf16.msra.mxu0 %v15532_v6  ;;  %7662 = vmatprep.subr.bf16.mxu1 %v15537_v27  ;;  %v15573_v31 = vld [vmem:[#allocation12 + $0x55c] ss:$12 sps:$4 sm:$0xff]   ;;  %v15571_v53 = vld [vmem:[#allocation12 + $0x558] ss:$12 sps:$4 sm:$0xff]   ;;  %v15582_v41 = vld [vmem:[#allocation12 + $0x6f4] ss:$12 sps:$4 sm:$0xff]  }
 0x310   :  { %7711 = vmatprep.subr.bf16.mxu0 %v15540_v25  ;;  %v15574_v57 = vld [vmem:[#allocation12 + $0x708] ss:$12 sps:$4 sm:$0xff]   ;;  %v15579_v9 = vld [vmem:[#allocation12 + $0x544] ss:$12 sps:$4 sm:$0xff]   ;;  %v15577_v18 = vld [vmem:[#allocation12 + $0x540] ss:$12 sps:$4 sm:$0xff]  }
 0x311   :  { %v15580_v14 = vld [vmem:[#allocation12 + $0x6f0] ss:$12 sps:$4 sm:$0xff]   ;;  %v15588_v61 = vld [vmem:[#allocation12 + $0x82c] ss:$12 sps:$4 sm:$0xff]   ;;  %v15586_v48 = vld [vmem:[#allocation12 + $0x828] ss:$12 sps:$4 sm:$0xff]  }
 0x312   :  { %7663 = vmatpush2.bf16.msra.mxu1 %v15535_v54  ;;  %v15585_v16 = vld [vmem:[#allocation12 + $0x6dc] ss:$12 sps:$4 sm:$0xff]   ;;  %v15583_v22 = vld [vmem:[#allocation12 + $0x6d8] ss:$12 sps:$4 sm:$0xff]   ;;  %v15594_v7 = vld [vmem:[#allocation12 + $0x814] ss:$12 sps:$4 sm:$0xff]  }
 0x313   :  { %7712 = vmatpush1.bf16.msra.mxu0 %v15538_v19  ;;  %7664 = vmatprep.subr.bf16.mxu1 %v15543_v8  ;;  %v15591_v52 = vld [vmem:[#allocation12 + $0x6c4] ss:$12 sps:$4 sm:$0xff]   ;;  %v15589_v43 = vld [vmem:[#allocation12 + $0x6c0] ss:$12 sps:$4 sm:$0xff]   ;;  %v15597_v56 = vld [vmem:[#allocation12 + $0x7fc] ss:$12 sps:$4 sm:$0xff]  }
 0x314   :  { %7713 = vmatprep.subr.bf16.mxu0 %v15546_v36  ;;  %v16490_v51 = vld [vmem:[#allocation4 + $0x78] sm:$0xff]  ;;  %v15592_v23 = vld [vmem:[#allocation12 + $0x810] ss:$12 sps:$4 sm:$0xff]   ;;  %v15618_v26 = vld [vmem:[#allocation12 + $0x7b4] ss:$12 sps:$4 sm:$0xff]  }
 0x315   :  { %v18175_v59 = vcombine.high %v16490_v51, %v5427_v62  ;;  %v15598_v13 = vld [vmem:[#allocation12 + $0x170] ss:$12 sps:$4 sm:$0xff]   ;;  %v15595_v42 = vld [vmem:[#allocation12 + $0x7f8] ss:$12 sps:$4 sm:$0xff]   ;;  %v18179_v33 = vcombine.low %v16490_v51, %v5427_v62  ;;  %v15606_v32 = vld [vmem:[#allocation12 + $0x7e0] ss:$12 sps:$4 sm:$0xff]  }
 0x316   :  { %7665 = vmatpush2.bf16.msra.mxu1 %v15541_v20  ;;  %v15526_v3 = vld [vmem:[#allocation4 + $0x20] ss:$48 sps:$4 sm:$0xff]   ;;  %v15601_v58 = vld [vmem:[#allocation4 + $0x84] ss:$48 sps:$4 sm:$0xff]   ;;  %v15604_v29 = vld [vmem:[#allocation4 + $0x2c] ss:$48 sps:$4 sm:$0xff]  }
 0x317   :  { %7714 = vmatpush1.bf16.msra.mxu0 %v15544_v1  ;;  %7666 = vmatprep.subr.bf16.mxu1 %v15549_v21  ;;  %v15605_v50 = vld [vmem:[#allocation12 + $0xb0] ss:$12 sps:$4 sm:$0xff]   ;;  %v15609_v11 = vld [vmem:[#allocation12 + $0x158] ss:$12 sps:$4 sm:$0xff]   ;;  %v15611_v4 = vld [vmem:[#allocation12 + $0x7c8] ss:$12 sps:$4 sm:$0xff]  }
 0x318   :  { %7715 = vmatprep.subr.bf16.mxu0 %v15552_v5  ;;  %v15608_v30 = vld [vmem:[#allocation12 + $0x7e4] ss:$12 sps:$4 sm:$0xff]   ;;  %v15613_v24 = vld [vmem:[#allocation12 + $0x7cc] ss:$12 sps:$4 sm:$0xff]   ;;  %v15619_v6 = vld [vmem:[#allocation12 + $0x128] ss:$12 sps:$4 sm:$0xff]  }
 0x319   :  { %v15610_v34 = vld [vmem:[#allocation12 + $0x98] ss:$12 sps:$4 sm:$0xff]   ;;  %v15614_v46 = vld [vmem:[#allocation12 + $0x140] ss:$12 sps:$4 sm:$0xff]   ;;  %v15616_v27 = vld [vmem:[#allocation12 + $0x7b0] ss:$12 sps:$4 sm:$0xff]  }
 0x31a   :  { %7667 = vmatpush2.bf16.msra.mxu1 %v15547_v12  ;;  %v15615_v55 = vld [vmem:[#allocation12 + $0x80] ss:$12 sps:$4 sm:$0xff]   ;;  %v15620_v54 = vld [vmem:[#allocation12 + $0x68] ss:$12 sps:$4 sm:$0xff]   ;;  %v15621_v8 = vld [vmem:[#allocation12 + $0x798] ss:$12 sps:$4 sm:$0xff]  }
 0x31b   :  { %7716 = vmatpush2.bf16.msra.mxu0 %v15550_v10  ;;  %7668 = vmatprep.subr.bf16.mxu1 %v15555_v15  ;;  %v18182_v0 = vld [vmem:[#allocation4 + $0x80] ss:$48 sps:$4 sm:$0xff]   ;;  %v18764_v25 = vld [vmem:[#allocation35_spill] sm:$0xff]  ;;  %vm8533_vm5 = vsmask.f32 7946 }
 0x31c   :  { %7717 = vmatprep.subr.bf16.mxu0 %v15558_v37  ;;  %v15623_v19 = vld [vmem:[#allocation12 + $0x79c] ss:$12 sps:$4 sm:$0xff]   ;;  %v15628_v1 = vld [vmem:[#allocation12 + $0x784] ss:$12 sps:$4 sm:$0xff]   ;;  %v15626_v21 = vld [vmem:[#allocation12 + $0x780] ss:$12 sps:$4 sm:$0xff]  }
 0x31d   :  { %v15624_v36 = vld [vmem:[#allocation12 + $0x110] ss:$12 sps:$4 sm:$0xff]   ;;  %v15629_v5 = vld [vmem:[#allocation12 + $0xf8] ss:$12 sps:$4 sm:$0xff]   ;;  %v15634_v15 = vld [vmem:[#allocation12 + $0xe0] ss:$12 sps:$4 sm:$0xff]  }
 0x31e   :  { %7669 = vmatpush2.bf16.msra.mxu1 %v15553_v40  ;;  %v15625_v20 = vld [vmem:[#allocation12 + $0x50] ss:$12 sps:$4 sm:$0xff]   ;;  %v15630_v12 = vld [vmem:[#allocation12 + $0x38] ss:$12 sps:$4 sm:$0xff]   ;;  %v15631_v37 = vld [vmem:[#allocation12 + $0x8e8] ss:$12 sps:$4 sm:$0xff]  }
 0x31f   :  { %7718 = vmatpush2.bf16.msra.mxu0 %v15556_v44  ;;  %7670 = vmatprep.subr.bf16.mxu1 %v15561_v35  ;;  %v15633_v10 = vld [vmem:[#allocation12 + $0x8ec] ss:$12 sps:$4 sm:$0xff]   ;;  %v15638_v40 = vld [vmem:[#allocation12 + $0x8d4] ss:$12 sps:$4 sm:$0xff]   ;;  %v15656_v62 = vld [vmem:[#allocation12 + $0x870] ss:$12 sps:$4 sm:$0xff]  }
 0x320   :  { %7719 = vmatprep.subr.bf16.mxu0 %v15564_v45  ;;  %v15635_v44 = vld [vmem:[#allocation12 + $0x20] ss:$12 sps:$4 sm:$0xff]   ;;  %v15639_v35 = vld [vmem:[#allocation12 + $0xc8] ss:$12 sps:$4 sm:$0xff]   ;;  %v15636_v45 = vld [vmem:[#allocation12 + $0x8d0] ss:$12 sps:$4 sm:$0xff]  }
 0x321   :  { %v16491_v51 = vld [vmem:[#allocation4 + $0x14] ss:$48 sps:$4 sm:$0xff]   ;;  %vm18376_vm7 = vmand %vm8192_vm11, %vm8533_vm5  ;;  %vm12780_vm11 = vcmask 1024  }
 0x322   :  { %7671 = vmatpush2.bf16.msra.mxu1 %v15559_v28  ;;  %v15640_v28 = vld [vmem:[#allocation12 + $0x8] ss:$12 sps:$4 sm:$0xff]   ;;  %vm18395_vm8 = vmor %vm18376_vm7, %vm8532_vm6 }
 0x323   :  { %7720 = vmatpush2.bf16.msra.mxu0 %v15562_v63  ;;  %7672 = vmatprep.subr.bf16.mxu1 %v15567_v17  ;;  %v15643_v63 = vld [vmem:[#allocation12 + $0x8bc] ss:$12 sps:$4 sm:$0xff]  }
 0x324   :  { %7721 = vmatprep.subr.bf16.mxu0 %v15570_v2  ;;  %v15644_v17 = vld [vmem:[#allocation12 + $0x470] ss:$12 sps:$4 sm:$0xff]   ;;  %v15641_v2 = vld [vmem:[#allocation12 + $0x8b8] ss:$12 sps:$4 sm:$0xff]  }
 0x326   :  { %7673 = vmatpush2.bf16.msra.mxu1 %v15565_v60  ;;  %v15648_v60 = vld [vmem:[#allocation12 + $0x8a4] ss:$12 sps:$4 sm:$0xff]  }
 0x327   :  { %7722 = vmatpush2.bf16.msra.mxu0 %v15568_v49  ;;  %7674 = vmatprep.subr.bf16.mxu1 %v15573_v31  ;;  %v15645_v49 = vld [vmem:[#allocation12 + $0x3b0] ss:$12 sps:$4 sm:$0xff]   ;;  %v15646_v31 = vld [vmem:[#allocation12 + $0x8a0] ss:$12 sps:$4 sm:$0xff]  }
 0x328   :  { %7723 = vmatprep.subr.bf16.mxu0 %v15576_v47  ;;  %v15649_v47 = vld [vmem:[#allocation12 + $0x458] ss:$12 sps:$4 sm:$0xff]  }
 0x32a   :  { %7675 = vmatpush2.bf16.msra.mxu1 %v15571_v53  ;;  %v15653_v53 = vld [vmem:[#allocation12 + $0x88c] ss:$12 sps:$4 sm:$0xff]  }
 0x32b   :  { %7724 = vmatpush2.bf16.msra.mxu0 %v15574_v57  ;;  %7676 = vmatprep.subr.bf16.mxu1 %v15579_v9  ;;  %v15650_v57 = vld [vmem:[#allocation12 + $0x398] ss:$12 sps:$4 sm:$0xff]   ;;  %v18765_v9 = vld [vmem:[#allocation32_spill] sm:$0xff] }
 0x32c   :  { %7725 = vmatprep.subr.bf16.mxu0 %v15582_v41  ;;  %v15654_v41 = vld [vmem:[#allocation12 + $0x440] ss:$12 sps:$4 sm:$0xff]  }
 0x32e   :  { %7677 = vmatpush2.bf16.msra.mxu1 %v15577_v18  ;;  %v15651_v18 = vld [vmem:[#allocation12 + $0x888] ss:$12 sps:$4 sm:$0xff]  }
 0x32f   :  { %7726 = vmatpush2.bf16.msra.mxu0 %v15580_v14  ;;  %7752 = vmatprep.subr.bf16.mxu1 %v15588_v61  ;;  %v18766_v14 = vld [vmem:[#allocation37_spill] sm:$0xff] }
 0x330   :  { %7727 = vmatprep.subr.bf16.mxu0 %v15585_v16  ;;  %v15655_v16 = vld [vmem:[#allocation12 + $0x380] ss:$12 sps:$4 sm:$0xff]  }
 0x331   :  { %7679 = vmatmul.mubr.bf16.vlgmr.msra.gmra.mxu1 %v18173_v38  ;;  %v15658_v61 = vld [vmem:[#allocation12 + $0x874] ss:$12 sps:$4 sm:$0xff]  }
 0x332   :  { %7688 = vmatprep.mubr.bf16.mxu1 %v18175_v59  ;;  %7753 = vmatpush1.bf16.msra.mxu1 %v15586_v48  ;;  %v15660_v48 = vld [vmem:[#allocation12 + $0x368] ss:$12 sps:$4 sm:$0xff]  }
 0x333   :  { %7728 = vmatpush2.bf16.msra.mxu0 %v15583_v22  ;;  %7754 = vmatprep.subr.bf16.mxu1 %v15594_v7  ;;  %v15659_v22 = vld [vmem:[#allocation12 + $0x428] ss:$12 sps:$4 sm:$0xff]   ;;  %v18767_v7 = vld [vmem:[#allocation34_spill] sm:$0xff] }
 0x334   :  { %7729 = vmatprep.subr.bf16.mxu0 %v15591_v52  ;;  %v15663_v52 = vld [vmem:[#allocation12 + $0x85c] ss:$12 sps:$4 sm:$0xff]  }
 0x336   :  { %7755 = vmatpush1.bf16.msra.mxu1 %v15592_v23  ;;  %v15661_v23 = vld [vmem:[#allocation12 + $0x858] ss:$12 sps:$4 sm:$0xff]  }
 0x337   :  { %7730 = vmatpush2.bf16.msra.mxu0 %v15589_v43  ;;  %7756 = vmatprep.subr.bf16.mxu1 %v15597_v56  ;;  %v15664_v43 = vld [vmem:[#allocation12 + $0x410] ss:$12 sps:$4 sm:$0xff]  }
 0x338   :  { %14610 = vmatprep.subr.bf16.mxu0 %v15598_v13  ;;  %v15665_v56 = vld [vmem:[#allocation12 + $0x350] ss:$12 sps:$4 sm:$0xff]  }
 0x339   :  { %7689 = vmatmul.mubr.bf16.gmra.mxu1 %v18179_v33  ;;  %v15668_v13 = vld [vmem:[#allocation12 + $0x844] ss:$12 sps:$4 sm:$0xff]  }
 0x33a   :  { %7732 = vmatmul.mubr.bf16.vlgmr.msra.gmra.mxu0 %v15526_v3  ;;  %7757 = vmatpush1.bf16.msra.mxu1 %v15595_v42  ;;  %v15669_v3 = vld [vmem:[#allocation12 + $0x3f8] ss:$12 sps:$4 sm:$0xff]   ;;  %v15666_v42 = vld [vmem:[#allocation12 + $0x840] ss:$12 sps:$4 sm:$0xff]  }
 0x33b   :  { %7741 = vmatprep.mubr.bf16.mxu0 %v15601_v58  ;;  %7784 = vmatprep.mubr.bf16.mxu1 %v15604_v29  ;;  %v15672_v58 = vld [vmem:[#allocation12 + $0x3e0] ss:$12 sps:$4 sm:$0xff]   ;;  %v15676_v29 = vld [vmem:[#allocation12 + $0x230] ss:$12 sps:$4 sm:$0xff]  }
 0x33c   :  { %14611 = vmatpush3.bf16.msra.mxu0 %v15605_v50  ;;  %7758 = vmatprep.subr.bf16.mxu1 %v15608_v30  ;;  %v15670_v50 = vld [vmem:[#allocation12 + $0x338] ss:$12 sps:$4 sm:$0xff]   ;;  %v15671_v30 = vld [vmem:[#allocation12 + $0x2f0] ss:$12 sps:$4 sm:$0xff]  }
 0x33d   :  { %14612 = vmatprep.subr.bf16.mxu0 %v15609_v11  ;;  %v18189_v11 = vld [vmem:[#allocation4 + $0x28] ss:$48 sps:$4 sm:$0xff]  }
 0x33e   :  { %7759 = vmatpush1.bf16.msra.mxu1 %v15606_v32  ;;  %v15677_v32 = vld [vmem:[#allocation12 + $0x320] ss:$12 sps:$4 sm:$0xff]  }
 0x33f   :  { %7760 = vmatprep.subr.bf16.mxu1 %v15613_v24  ;;  %v18191_v24 = vld [vmem:[#allocation4 + $0x8c] ss:$48 sps:$4 sm:$0xff]  }
 0x340   :  { %14613 = vmatpush3.bf16.msra.mxu0 %v15610_v34  ;;  %v15678_v34 = vld [vmem:[#allocation12 + $0x2d8] ss:$12 sps:$4 sm:$0xff]  }
 0x341   :  { %14614 = vmatprep.subr.bf16.mxu0 %v15614_v46  ;;  %v15680_v46 = vld [vmem:[#allocation12 + $0x218] ss:$12 sps:$4 sm:$0xff]  }
 0x342   :  { %7742 = vmatmul.mubr.bf16.gmra.mxu0 %v18182_v0  ;;  %7761 = vmatpush1.bf16.msra.mxu1 %v15611_v4  ;;  %v15679_v4 = vld [vmem:[#allocation12 + $0x3c8] ss:$12 sps:$4 sm:$0xff]  }
 0x343   :  { %7837 = vmatprep.mubr.bf16.mxu0 %v18764_v25  ;;  %7762 = vmatprep.subr.bf16.mxu1 %v15618_v26  ;;  %v15682_v26 = vld [vmem:[#allocation12 + $0x2c0] ss:$12 sps:$4 sm:$0xff]   ;;  %v18195_v25 = vld [vmem:[#allocation4 + $0x88] ss:$48 sps:$4 sm:$0xff]  }
 0x344   :  { %14615 = vmatpush3.bf16.msra.mxu0 %v15615_v55  ;;  %v15681_v55 = vld [vmem:[#allocation12 + $0x308] ss:$12 sps:$4 sm:$0xff]  }
 0x345   :  { %14616 = vmatprep.subr.bf16.mxu0 %v15619_v6  ;;  %v15683_v6 = vld [vmem:[#allocation12 + $0x770] ss:$12 sps:$4 sm:$0xff]  }
 0x346   :  { %7763 = vmatpush1.bf16.msra.mxu1 %v15616_v27  ;;  %v15684_v27 = vld [vmem:[#allocation12 + $0x200] ss:$12 sps:$4 sm:$0xff]  }
 0x347   :  { %7764 = vmatprep.subr.bf16.mxu1 %v15623_v19  ;;  %v15686_v19 = vld [vmem:[#allocation12 + $0x2a8] ss:$12 sps:$4 sm:$0xff]  }
 0x348   :  { %14617 = vmatpush3.bf16.msra.mxu0 %v15620_v54  ;;  %v15685_v54 = vld [vmem:[#allocation12 + $0x6b0] ss:$12 sps:$4 sm:$0xff]  }
 0x349   :  { %14618 = vmatprep.subr.bf16.mxu0 %v15624_v36  ;;  %v15688_v36 = vld [vmem:[#allocation12 + $0x1e8] ss:$12 sps:$4 sm:$0xff]  }
 0x34a   :  { %7765 = vmatpush1.bf16.msra.mxu1 %v15621_v8  ;;  %v15687_v8 = vld [vmem:[#allocation12 + $0x758] ss:$12 sps:$4 sm:$0xff]  }
 0x34b   :  { %7766 = vmatprep.subr.bf16.mxu1 %v15628_v1  ;;  %v16492_v1 = vld [vmem:[#allocation4 + $0x10] ss:$48 sps:$4 sm:$0xff]  }
 0x34c   :  { %14619 = vmatpush3.bf16.msra.mxu0 %v15625_v20  ;;  %v15690_v20 = vld [vmem:[#allocation12 + $0x290] ss:$12 sps:$4 sm:$0xff]  }
 0x34d   :  { %14620 = vmatprep.subr.bf16.mxu0 %v15629_v5  ;;  %v16493_v5 = vld [vmem:[#allocation4 + $0xc] ss:$48 sps:$4 sm:$0xff]  }
 0x34e   :  { %7767 = vmatpush1.bf16.msra.mxu1 %v15626_v21  ;;  %v15689_v21 = vld [vmem:[#allocation12 + $0x698] ss:$12 sps:$4 sm:$0xff]  }
 0x34f   :  { %7768 = vmatprep.subr.bf16.mxu1 %v15633_v10  ;;  %v15691_v10 = vld [vmem:[#allocation12 + $0x740] ss:$12 sps:$4 sm:$0xff]  }
 0x350   :  { %14621 = vmatpush3.bf16.msra.mxu0 %v15630_v12  ;;  %v16494_v12 = vld [vmem:[#allocation4 + $0x74] ss:$48 sps:$4 sm:$0xff]  }
 0x351   :  { %14622 = vmatprep.subr.bf16.mxu0 %v15634_v15  ;;  %v15692_v15 = vld [vmem:[#allocation12 + $0x1d0] ss:$12 sps:$4 sm:$0xff]  }
 0x352   :  { %7769 = vmatpush2.bf16.msra.mxu1 %v15631_v37  ;;  %v15694_v37 = vld [vmem:[#allocation12 + $0x278] ss:$12 sps:$4 sm:$0xff]  }
 0x353   :  { %7770 = vmatprep.subr.bf16.mxu1 %v15638_v40  ;;  %v15695_v40 = vld [vmem:[#allocation12 + $0x728] ss:$12 sps:$4 sm:$0xff]  }
 0x354   :  { %14623 = vmatpush3.bf16.msra.mxu0 %v15635_v44  ;;  %v15693_v44 = vld [vmem:[#allocation12 + $0x680] ss:$12 sps:$4 sm:$0xff]  }
 0x355   :  { %14624 = vmatprep.subr.bf16.mxu0 %v15639_v35  ;;  %v15696_v35 = vld [vmem:[#allocation12 + $0x1b8] ss:$12 sps:$4 sm:$0xff]  }
 0x356   :  { %7771 = vmatpush2.bf16.msra.mxu1 %v15636_v45  ;;  %v15698_v45 = vld [vmem:[#allocation12 + $0x260] ss:$12 sps:$4 sm:$0xff]  }
 0x357   :  { %7772 = vmatprep.subr.bf16.mxu1 %v15643_v63  ;;  %v15697_v63 = vld [vmem:[#allocation12 + $0x668] ss:$12 sps:$4 sm:$0xff]  }
 0x358   :  { %14625 = vmatpush3.bf16.msra.mxu0 %v15640_v28  ;;  %v16495_v28 = vld [vmem:[#allocation4 + $0x70] ss:$48 sps:$4 sm:$0xff]  }
 0x359   :  { %14666 = vmatprep.subr.bf16.mxu0 %v15644_v17  ;;  %v16496_v17 = vld [vmem:[#allocation4 + $0x24] ss:$48 sps:$4 sm:$0xff]  }
 0x35a   :  { %7773 = vmatpush2.bf16.msra.mxu1 %v15641_v2  ;;  %v15699_v2 = vld [vmem:[#allocation12 + $0x710] ss:$12 sps:$4 sm:$0xff]  }
 0x35b   :  { %7838 = vmatmul.mubr.bf16.vlgmr.msra.gmra.mxu0 %v18765_v9  ;;  %7774 = vmatprep.subr.bf16.mxu1 %v15648_v60  ;;  %v15702_v60 = vld [vmem:[#allocation12 + $0x248] ss:$12 sps:$4 sm:$0xff]   ;;  %v15705_v9 = vld [vmem:[#allocation12 + $0x638] ss:$12 sps:$4 sm:$0xff]  }
 0x35c   :  { %7845 = vmatprep.mubr.bf16.mxu0 %v18766_v14  ;;  %14667 = vmatpush3.bf16.msra.mxu0 %v15645_v49  ;;  %v15700_v49 = vld [vmem:[#allocation12 + $0x1a0] ss:$12 sps:$4 sm:$0xff]   ;;  %v15708_v14 = vld [vmem:[#allocation12 + $0x530] ss:$12 sps:$4 sm:$0xff]  }
 0x35d   :  { %14668 = vmatprep.subr.bf16.mxu0 %v15649_v47  ;;  %v15701_v47 = vld [vmem:[#allocation12 + $0x650] ss:$12 sps:$4 sm:$0xff]  }
 0x35e   :  { %7775 = vmatpush2.bf16.msra.mxu1 %v15646_v31  ;;  %v15703_v31 = vld [vmem:[#allocation12 + $0x6f8] ss:$12 sps:$4 sm:$0xff]  }
 0x35f   :  { %7776 = vmatprep.subr.bf16.mxu1 %v15653_v53  ;;  %v15706_v53 = vld [vmem:[#allocation12 + $0x5f0] ss:$12 sps:$4 sm:$0xff]  }
 0x360   :  { %14669 = vmatpush3.bf16.msra.mxu0 %v15650_v57  ;;  %v15704_v57 = vld [vmem:[#allocation12 + $0x188] ss:$12 sps:$4 sm:$0xff]  }
 0x361   :  { %14670 = vmatprep.subr.bf16.mxu0 %v15654_v41  ;;  %v15707_v41 = vld [vmem:[#allocation12 + $0x6e0] ss:$12 sps:$4 sm:$0xff]  }
 0x362   :  { %7777 = vmatpush2.bf16.msra.mxu1 %v15651_v18  ;;  %v15710_v18 = vld [vmem:[#allocation12 + $0x5d8] ss:$12 sps:$4 sm:$0xff]  }
 0x363   :  { %7846 = vmatmul.mubr.bf16.gmra.mxu0 %v18767_v7  ;;  %7778 = vmatprep.subr.bf16.mxu1 %v15658_v61  ;;  %v15711_v61 = vld [vmem:[#allocation12 + $0x6c8] ss:$12 sps:$4 sm:$0xff]  }
 0x364   :  { %14671 = vmatpush3.bf16.msra.mxu0 %v15655_v16  ;;  %7935 = vmatprep.mubr.bf16.mxu0 %v16491_v51  ;;  %v15709_v16 = vld [vmem:[#allocation12 + $0x620] ss:$12 sps:$4 sm:$0xff]   ;;  %v15713_v7 = vld [vmem:[#allocation12 + $0x608] ss:$12 sps:$4 sm:$0xff]  }
 0x365   :  { %14672 = vmatprep.subr.bf16.mxu0 %v15659_v22  ;;  %v15712_v22 = vld [vmem:[#allocation12 + $0x518] ss:$12 sps:$4 sm:$0xff]   ;;  %v15716_v51 = vld [vmem:[#allocation12 + $0x5a8] ss:$12 sps:$4 sm:$0xff]  }
 0x366   :  { %7779 = vmatpush2.bf16.msra.mxu1 %v15656_v62  ;;  %v16497_v62 = vld [vmem:[#allocation4 + $0x8] ss:$48 sps:$4 sm:$0xff]  }
 0x367   :  { %7780 = vmatprep.subr.bf16.mxu1 %v15663_v52  ;;  %v16498_v52 = vld [vmem:[#allocation4 + $0x6c] ss:$48 sps:$4 sm:$0xff]  }
 0x368   :  { %14673 = vmatpush3.bf16.msra.mxu0 %v15660_v48  ;;  %v15714_v48 = vld [vmem:[#allocation12 + $0x5c0] ss:$12 sps:$4 sm:$0xff]  }
 0x369   :  { %14674 = vmatprep.subr.bf16.mxu0 %v15664_v43  ;;  %v15715_v43 = vld [vmem:[#allocation12 + $0x500] ss:$12 sps:$4 sm:$0xff]  }
 0x36a   :  { %7781 = vmatpush2.bf16.msra.mxu1 %v15661_v23  ;;  %v15717_v23 = vld [vmem:[#allocation12 + $0x4e8] ss:$12 sps:$4 sm:$0xff]  }
 0x36b   :  { %7782 = vmatprep.subr.bf16.mxu1 %v15668_v13  ;;  %v15718_v13 = vld [vmem:[#allocation12 + $0x590] ss:$12 sps:$4 sm:$0xff]  }
 0x36c   :  { %14675 = vmatpush3.bf16.msra.mxu0 %v15665_v56  ;;  %v16499_v56 = vld [vmem:[#allocation4 + $0x68] ss:$48 sps:$4 sm:$0xff]  }
 0x36d   :  { %14676 = vmatprep.subr.bf16.mxu0 %v15669_v3  ;;  %v16500_v3 = vld [vmem:[#allocation4 + $0x20] ss:$48 sps:$4 sm:$0xff]  }
 0x36e   :  { %7783 = vmatpush2.bf16.msra.mxu1 %v15666_v42  ;;  %v16501_v42 = vld [vmem:[#allocation4 + $0x84] ss:$48 sps:$4 sm:$0xff]  }
 0x36f   :  { %14638 = vmatprep.subr.bf16.mxu1 %v15671_v30  ;;  %v15720_v30 = vld [vmem:[#allocation12 + $0x578] ss:$12 sps:$4 sm:$0xff]  }
 0x370   :  { %14677 = vmatpush3.bf16.msra.mxu0 %v15670_v50  ;;  %v15719_v50 = vld [vmem:[#allocation12 + $0x4d0] ss:$12 sps:$4 sm:$0xff]  }
 0x371   :  { %14678 = vmatprep.subr.bf16.mxu0 %v15672_v58  ;;  %7785 = vmatmul.mubr.bf16.vlgmr.msra.gmra.mxu1 %v18189_v11  ;;  %v15721_v58 = vld [vmem:[#allocation12 + $0x4b8] ss:$12 sps:$4 sm:$0xff]  }
 0x372   :  { %7794 = vmatprep.mubr.bf16.mxu1 %v18191_v24  ;;  %14639 = vmatpush3.bf16.msra.mxu1 %v15676_v29  ;;  %v15722_v29 = vld [vmem:[#allocation12 + $0x560] ss:$12 sps:$4 sm:$0xff]  }
 0x373   :  { %14640 = vmatprep.subr.bf16.mxu1 %v15678_v34  ;;  %v15724_v34 = vld [vmem:[#allocation12 + $0x548] ss:$12 sps:$4 sm:$0xff]  }
 0x374   :  { %14679 = vmatpush3.bf16.msra.mxu0 %v15677_v32  ;;  %v15723_v32 = vld [vmem:[#allocation12 + $0x4a0] ss:$12 sps:$4 sm:$0xff]  }
 0x375   :  { %14680 = vmatprep.subr.bf16.mxu0 %v15679_v4  ;;  %v15726_v4 = vld [vmem:[#allocation12 + $0x8f0] ss:$12 sps:$4 sm:$0xff]  }
 0x376   :  { %14641 = vmatpush3.bf16.msra.mxu1 %v15680_v46  ;;  %v15727_v46 = vld [vmem:[#allocation12 + $0x830] ss:$12 sps:$4 sm:$0xff]  }
 0x377   :  { %14642 = vmatprep.subr.bf16.mxu1 %v15682_v26  ;;  %v15730_v26 = vld [vmem:[#allocation12 + $0x8c0] ss:$12 sps:$4 sm:$0xff]  }
 0x378   :  { %14681 = vmatpush3.bf16.msra.mxu0 %v15681_v55  ;;  %v15728_v55 = vld [vmem:[#allocation12 + $0x8d8] ss:$12 sps:$4 sm:$0xff]  }
 0x379   :  { %14722 = vmatprep.subr.bf16.mxu0 %v15683_v6  ;;  %7795 = vmatmul.mubr.bf16.gmra.mxu1 %v18195_v25  ;;  %v15731_v6 = vld [vmem:[#allocation12 + $0x800] ss:$12 sps:$4 sm:$0xff]  }
 0x37a   :  { %14643 = vmatpush3.bf16.msra.mxu1 %v15684_v27  ;;  %7886 = vmatprep.mubr.bf16.mxu1 %v16493_v5  ;;  %v15732_v27 = vld [vmem:[#allocation12 + $0x8a8] ss:$12 sps:$4 sm:$0xff]   ;;  %v18206_v5 = vpop.f32.mrf.mxu0 }
 0x37b   :  { %7936 = vmatmul.mubr.bf16.vlgmr.msra.gmra.mxu0 %v16492_v1  ;;  %14644 = vmatprep.subr.bf16.mxu1 %v15686_v19  ;;  %v15733_v19 = vld [vmem:[#allocation12 + $0x7e8] ss:$12 sps:$4 sm:$0xff]   ;;  %v15739_v1 = vld [vmem:[#allocation12 + $0x7a0] ss:$12 sps:$4 sm:$0xff]  }
 0x37c   :  { %7943 = vmatprep.mubr.bf16.mxu0 %v16494_v12  ;;  %14723 = vmatpush3.bf16.msra.mxu0 %v15685_v54  ;;  %v16502_v54 = vld [vmem:[#allocation4 + $0x2c] ss:$48 sps:$4 sm:$0xff]   ;;  %v18208_v12 = vpop.f32.mrf.mxu0 }
 0x37d   :  { %14724 = vmatprep.subr.bf16.mxu0 %v15687_v8  ;;  %v15734_v8 = vld [vmem:[#allocation12 + $0x890] ss:$12 sps:$4 sm:$0xff]  }
 0x37e   :  { %14645 = vmatpush3.bf16.msra.mxu1 %v15688_v36  ;;  %v15737_v36 = vld [vmem:[#allocation12 + $0x7b8] ss:$12 sps:$4 sm:$0xff]  }
 0x37f   :  { %14646 = vmatprep.subr.bf16.mxu1 %v15690_v20  ;;  %v15738_v20 = vld [vmem:[#allocation12 + $0x860] ss:$12 sps:$4 sm:$0xff]  }
 0x380   :  { %14725 = vmatpush3.bf16.msra.mxu0 %v15689_v21  ;;  %v15740_v21 = vld [vmem:[#allocation12 + $0x848] ss:$12 sps:$4 sm:$0xff]  }
 0x381   :  { %14726 = vmatprep.subr.bf16.mxu0 %v15691_v10  ;;  %v18210_v10 = vpop.f32.mrf.mxu0 }
 0x382   :  { %14647 = vmatpush3.bf16.msra.mxu1 %v15692_v15 }
 0x383   :  { %7944 = vmatmul.mubr.bf16.gmra.mxu0 %v16495_v28  ;;  %14648 = vmatprep.subr.bf16.mxu1 %v15694_v37  ;;  %v18212_v15 = vpop.f32.mrf.mxu0  ;;  %v15744_v28 = vld [vmem:[#allocation15 + $0x74] ss:$8 sps:$4 sm:$0xff]  }
 0x384   :  { %8033 = vmatprep.mubr.bf16.mxu0 %v16496_v17  ;;  %14727 = vmatpush3.bf16.msra.mxu0 %v15693_v44 }
 0x385   :  { %14728 = vmatprep.subr.bf16.mxu0 %v15695_v40  ;;  %v18214_v37 = vpop.f32.mrf.mxu0 }
 0x386   :  { %14649 = vmatpush3.bf16.msra.mxu1 %v15696_v35 }
 0x387   :  { %14650 = vmatprep.subr.bf16.mxu1 %v15698_v45  ;;  %v18218_v40 = vpop.f32.mrf.mxu0  ;;  %v15742_v45 = vld [vmem:[#allocation15 + $0x70] ss:$8 sps:$4 sm:$0xff]  }
 0x388   :  { %14729 = vmatpush3.bf16.msra.mxu0 %v15697_v63  ;;  %v15745_v63 = vld [vmem:[#allocation15 + $0x170] ss:$8 sps:$4 sm:$0xff]  }
 0x389   :  { %14730 = vmatprep.subr.bf16.mxu0 %v15699_v2 }
 0x38a   :  { %14651 = vmatpush3.bf16.msra.mxu1 %v15700_v49  ;;  %v15747_v49 = vld [vmem:[#allocation15 + $0x174] ss:$8 sps:$4 sm:$0xff]  }
 0x38b   :  { %14652 = vmatprep.subr.bf16.mxu1 %v15702_v60  ;;  %v15750_v60 = vld [vmem:[#allocation15 + $0x64] ss:$8 sps:$4 sm:$0xff]  }
 0x38c   :  { %14731 = vmatpush3.bf16.msra.mxu0 %v15701_v47  ;;  %v15753_v47 = vld [vmem:[#allocation15 + $0x164] ss:$8 sps:$4 sm:$0xff]  }
 0x38d   :  { %14732 = vmatprep.subr.bf16.mxu0 %v15703_v31 }
 0x38e   :  { %14653 = vmatpush3.bf16.msra.mxu1 %v15704_v57  ;;  %v15748_v57 = vld [vmem:[#allocation15 + $0x60] ss:$8 sps:$4 sm:$0xff]  }
 0x38f   :  { %14694 = vmatprep.subr.bf16.mxu1 %v15706_v53  ;;  %v15751_v53 = vld [vmem:[#allocation15 + $0x160] ss:$8 sps:$4 sm:$0xff]  }
 0x390   :  { %14733 = vmatpush3.bf16.msra.mxu0 %v15705_v9  ;;  %v15756_v9 = vld [vmem:[#allocation15 + $0x54] ss:$8 sps:$4 sm:$0xff]  }
 0x391   :  { %7887 = vmatmul.mubr.bf16.vlgmr.msra.gmra.mxu1 %v16497_v62  ;;  %14734 = vmatprep.subr.bf16.mxu0 %v15707_v41 }
 0x392   :  { %7894 = vmatprep.mubr.bf16.mxu1 %v16498_v52  ;;  %14695 = vmatpush3.bf16.msra.mxu1 %v15708_v14  ;;  %v15759_v14 = vld [vmem:[#allocation15 + $0x154] ss:$8 sps:$4 sm:$0xff]  }
 0x393   :  { %14696 = vmatprep.subr.bf16.mxu1 %v15710_v18 }
 0x394   :  { %14735 = vmatpush3.bf16.msra.mxu0 %v15709_v16  ;;  %v15754_v16 = vld [vmem:[#allocation15 + $0x50] ss:$8 sps:$4 sm:$0xff]  }
 0x395   :  { %14736 = vmatprep.subr.bf16.mxu0 %v15711_v61  ;;  %v15757_v61 = vld [vmem:[#allocation15 + $0x150] ss:$8 sps:$4 sm:$0xff]  }
 0x396   :  { %14697 = vmatpush3.bf16.msra.mxu1 %v15712_v22  ;;  %v15762_v22 = vld [vmem:[#allocation15 + $0x44] ss:$8 sps:$4 sm:$0xff]  }
 0x397   :  { %14698 = vmatprep.subr.bf16.mxu1 %v15714_v48  ;;  %v15765_v48 = vld [vmem:[#allocation15 + $0x144] ss:$8 sps:$4 sm:$0xff]  }
 0x398   :  { %14737 = vmatpush3.bf16.msra.mxu0 %v15713_v7  ;;  %v15760_v7 = vld [vmem:[#allocation15 + $0x40] ss:$8 sps:$4 sm:$0xff]  }
 0x399   :  { %7895 = vmatmul.mubr.bf16.gmra.mxu1 %v16499_v56  ;;  %11949 = vmatprep.subr.bf16.mxu0 %v15744_v28  ;;  %v18768_v28 = vld [vmem:[#allocation55_spill] sm:$0xff] }
 0x39a   :  { %14699 = vmatpush3.bf16.msra.mxu1 %v15715_v43  ;;  %7984 = vmatprep.mubr.bf16.mxu1 %v18166_v39  ;;  %v15725_v39 = vld [vmem:[#allocation12 + $0x488] ss:$12 sps:$4 sm:$0xff]   ;;  %v15763_v43 = vld [vmem:[#allocation15 + $0x140] ss:$8 sps:$4 sm:$0xff]  }
 0x39b   :  { %8034 = vmatmul.mubr.bf16.vlgmr.msra.gmra.mxu0 %v16500_v3  ;;  %14700 = vmatprep.subr.bf16.mxu1 %v15716_v51  ;;  %v15768_v3 = vld [vmem:[#allocation15 + $0x34] ss:$8 sps:$4 sm:$0xff]  }
 0x39c   :  { %8041 = vmatprep.mubr.bf16.mxu0 %v16501_v42  ;;  %11950 = vmatpush1.bf16.msra.mxu0 %v15742_v45  ;;  %v15792_v45 = vld [vmem:[#allocation15 + $0xf4] ss:$8 sps:$4 sm:$0xff]  }
 0x39d   :  { %11951 = vmatprep.subr.bf16.mxu0 %v15750_v60  ;;  %v15795_v60 = vld [vmem:[#allocation15 + $0x1f4] ss:$8 sps:$4 sm:$0xff]  }
 0x39e   :  { %14701 = vmatpush3.bf16.msra.mxu1 %v15717_v23 }
 0x39f   :  { %14702 = vmatprep.subr.bf16.mxu1 %v15718_v13  ;;  %v15766_v13 = vld [vmem:[#allocation15 + $0x30] ss:$8 sps:$4 sm:$0xff]  }
 0x3a0   :  { %11952 = vmatpush1.bf16.msra.mxu0 %v15748_v57 }
 0x3a1   :  { %11953 = vmatprep.subr.bf16.mxu0 %v15756_v9 }
 0x3a2   :  { %14703 = vmatpush3.bf16.msra.mxu1 %v15719_v50 }
 0x3a3   :  { %8042 = vmatmul.mubr.bf16.gmra.mxu0 %v18182_v0  ;;  %14704 = vmatprep.subr.bf16.mxu1 %v15720_v30  ;;  %v15729_v0 = vld [vmem:[#allocation12 + $0x818] ss:$12 sps:$4 sm:$0xff]  }
 0x3a4   :  { %11954 = vmatpush1.bf16.msra.mxu0 %v15754_v16  ;;  %v15771_v30 = vld [vmem:[#allocation15 + $0x134] ss:$8 sps:$4 sm:$0xff]  }
 0x3a5   :  { %11955 = vmatprep.subr.bf16.mxu0 %v15762_v22  ;;  %v15798_v22 = vld [vmem:[#allocation15 + $0xe4] ss:$8 sps:$4 sm:$0xff]  }
 0x3a6   :  { %14705 = vmatpush3.bf16.msra.mxu1 %v15721_v58  ;;  %v15769_v58 = vld [vmem:[#allocation15 + $0x130] ss:$8 sps:$4 sm:$0xff]  }
 0x3a7   :  { %14706 = vmatprep.subr.bf16.mxu1 %v15722_v29 }
 0x3a8   :  { %11956 = vmatpush1.bf16.msra.mxu0 %v15760_v7 }
 0x3a9   :  { %11957 = vmatprep.subr.bf16.mxu0 %v15768_v3 }
 0x3aa   :  { %14707 = vmatpush3.bf16.msra.mxu1 %v15723_v32  ;;  %v15774_v32 = vld [vmem:[#allocation15 + $0x24] ss:$8 sps:$4 sm:$0xff]  }
 0x3ab   :  { %14708 = vmatprep.subr.bf16.mxu1 %v15724_v34  ;;  %v15772_v34 = vld [vmem:[#allocation15 + $0x20] ss:$8 sps:$4 sm:$0xff]  }
 0x3ac   :  { %11958 = vmatpush1.bf16.msra.mxu0 %v15766_v13  ;;  %v15799_v13 = vld [vmem:[#allocation15 + $0x1e0] ss:$8 sps:$4 sm:$0xff]  }
 0x3ad   :  { %11959 = vmatprep.subr.bf16.mxu0 %v15774_v32 }
 0x3ae   :  { %14709 = vmatpush3.bf16.msra.mxu1 %v15725_v39 }
 0x3af   :  { %14750 = vmatprep.subr.bf16.mxu1 %v15726_v4  ;;  %v15777_v4 = vld [vmem:[#allocation15 + $0x124] ss:$8 sps:$4 sm:$0xff]  }
 0x3b0   :  { %11960 = vmatpush1.bf16.msra.mxu0 %v15772_v34 }
 0x3b1   :  { %7985 = vmatmul.mubr.bf16.vlgmr.msra.gmra.mxu1 %v18173_v38  ;;  %v15735_v38 = vld [vmem:[#allocation12 + $0x7d0] ss:$12 sps:$4 sm:$0xff]   ;;  %v18216_v44 = vpop.f32.mrf.mxu1 }
 0x3b2   :  { %7992 = vmatprep.mubr.bf16.mxu1 %v18175_v59  ;;  %14751 = vmatpush3.bf16.msra.mxu1 %v15727_v46  ;;  %v15736_v59 = vld [vmem:[#allocation12 + $0x878] ss:$12 sps:$4 sm:$0xff]  }
 0x3b3   :  { %14752 = vmatprep.subr.bf16.mxu1 %v15728_v55  ;;  %v18220_v35 = vpop.f32.mrf.mxu1  ;;  %v15775_v46 = vld [vmem:[#allocation15 + $0x120] ss:$8 sps:$4 sm:$0xff]  }
 0x3b6   :  { %14753 = vmatpush3.bf16.msra.mxu1 %v15729_v0  ;;  %v15780_v0 = vld [vmem:[#allocation15 + $0x14] ss:$8 sps:$4 sm:$0xff]  }
 0x3b7   :  { %14754 = vmatprep.subr.bf16.mxu1 %v15730_v26  ;;  %v15778_v26 = vld [vmem:[#allocation15 + $0x10] ss:$8 sps:$4 sm:$0xff]   ;;  %11961 = vmatprep.subr.bf16.mxu0 %v15780_v0 }
 0x3b8   :  { %11962 = vmatpush1.bf16.msra.mxu0 %v15778_v26 }
 0x3b9   :  { %7993 = vmatmul.mubr.bf16.gmra.mxu1 %v18179_v33  ;;  %v15741_v33 = vld [vmem:[#allocation12 + $0x788] ss:$12 sps:$4 sm:$0xff]  }
 0x3ba   :  { %14755 = vmatpush3.bf16.msra.mxu1 %v15731_v6  ;;  %8082 = vmatprep.mubr.bf16.mxu1 %v16502_v54  ;;  %v15781_v54 = vld [vmem:[#allocation15 + $0x110] ss:$8 sps:$4 sm:$0xff]  }
 0x3bb   :  { %14756 = vmatprep.subr.bf16.mxu1 %v15732_v27  ;;  %v15783_v27 = vld [vmem:[#allocation15 + $0x114] ss:$8 sps:$4 sm:$0xff]  }
 0x3be   :  { %14757 = vmatpush3.bf16.msra.mxu1 %v15733_v19 }
 0x3bf   :  { %14758 = vmatprep.subr.bf16.mxu1 %v15734_v8 }
 0x3c2   :  { %14759 = vmatpush3.bf16.msra.mxu1 %v15735_v38  ;;  %v15786_v38 = vld [vmem:[#allocation15 + $0x4] ss:$8 sps:$4 sm:$0xff]  }
 0x3c3   :  { %14760 = vmatprep.subr.bf16.mxu1 %v15736_v59  ;;  %v15784_v59 = vld [vmem:[#allocation15] ss:$8 sps:$4 sm:$0xff]   ;;  %11963 = vmatprep.subr.bf16.mxu0 %v15786_v38 }
 0x3c4   :  { %11964 = vmatpush1.bf16.msra.mxu0 %v15784_v59 }
 0x3c5   :  { %11965 = vmatprep.subr.bf16.mxu0 %v15792_v45 }
 0x3c6   :  { %14761 = vmatpush3.bf16.msra.mxu1 %v15737_v36  ;;  %v18262_v36 = vld [vmem:[#allocation13] sm:$0x7] }
 0x3c7   :  { %14762 = vmatprep.subr.bf16.mxu1 %v15738_v20  ;;  %v15789_v20 = vld [vmem:[#allocation15 + $0x104] ss:$8 sps:$4 sm:$0xff]  }
 0x3ca   :  { %14763 = vmatpush3.bf16.msra.mxu1 %v15739_v1  ;;  %v15787_v1 = vld [vmem:[#allocation15 + $0x100] ss:$8 sps:$4 sm:$0xff]  }
 0x3cb   :  { %14764 = vmatprep.subr.bf16.mxu1 %v15740_v21 }
 0x3ce   :  { %14765 = vmatpush3.bf16.msra.mxu1 %v15741_v33 }
 0x3cf   :  { %11990 = vmatprep.subr.bf16.mxu1 %v15747_v49  ;;  %v15790_v49 = vld [vmem:[#allocation15 + $0xf0] ss:$8 sps:$4 sm:$0xff]  }
 0x3d0   :  { %11966 = vmatpush2.bf16.msra.mxu0 %v15790_v49 }
 0x3d1   :  { %8083 = vmatmul.mubr.bf16.vlgmr.msra.gmra.mxu1 %v18189_v11  ;;  %v18222_v11 = vpop.f32.mrf.mxu0  ;;  %11967 = vmatprep.subr.bf16.mxu0 %v15798_v22 }
 0x3d2   :  { %8090 = vmatprep.mubr.bf16.mxu1 %v18191_v24  ;;  %v18224_v24 = vpop.f32.mrf.mxu1  ;;  %11991 = vmatpush1.bf16.msra.mxu1 %v15745_v63  ;;  %v5819_v63 = vrot.slane %v18262_v36, %v18768_v28 }
 0x3d3   :  { %11992 = vmatprep.subr.bf16.mxu1 %v15753_v47  ;;  %v18769_v47 = vld [vmem:[#allocation56_spill] sm:$0xff] }
 0x3d4   :  { %v18228_v17 = vpop.f32.mrf.mxu1  ;;  %v5823_v57 = vrot.slane %v18262_v36, %v18769_v47  ;;  %v7522_v16 = vadd.f32 %v18206_v5, %v5819_v63  ;;  %v7526_v32 = vadd.f32 %v18210_v10, %v5819_v63 }
 0x3d6   :  { %v18232_v31 = vpop.f32.mrf.mxu1  ;;  %11993 = vmatpush1.bf16.msra.mxu1 %v15751_v53  ;;  %v7524_v7 = vadd.f32 %v18208_v12, %v5823_v57  ;;  %v15807_v12 = vld [vmem:[#allocation15 + $0x1d4] ss:$8 sps:$4 sm:$0xff]  }
 0x3d7   :  { %11994 = vmatprep.subr.bf16.mxu1 %v15759_v14  ;;  %v15793_v14 = vld [vmem:[#allocation15 + $0x1f0] ss:$8 sps:$4 sm:$0xff]  }
 0x3d8   :  { %v18236_v18 = vpop.f32.mrf.mxu1  ;;  %v7577_v5 = vadd.f32 %v18220_v35, %v7524_v7 }
 0x3d9   :  { %8091 = vmatmul.mubr.bf16.gmra.mxu1 %v18195_v25  ;;  %v18226_v25 = vpop.f32.mrf.mxu0 }
 0x3da   :  { %v18240_v52 = vpop.f32.mrf.mxu1  ;;  %11995 = vmatpush1.bf16.msra.mxu1 %v15757_v61  ;;  %v15796_v61 = vld [vmem:[#allocation15 + $0xe0] ss:$8 sps:$4 sm:$0xff]  }
 0x3db   :  { %v18230_v2 = vpop.f32.mrf.mxu0  ;;  %11996 = vmatprep.subr.bf16.mxu1 %v15765_v48  ;;  %v15801_v48 = vld [vmem:[#allocation15 + $0x1e4] ss:$8 sps:$4 sm:$0xff]   ;;  %11968 = vmatpush2.bf16.msra.mxu0 %v15796_v61  ;;  %v7538_v61 = vadd.f32 %v18226_v25, %v5823_v57 }
 0x3dc   :  { %v18244_v23 = vpop.f32.mrf.mxu1 }
 0x3dd   :  { %v18234_v41 = vpop.f32.mrf.mxu0 }
 0x3de   :  { %11997 = vmatpush1.bf16.msra.mxu1 %v15763_v43  ;;  %v7575_v43 = vadd.f32 %v18216_v44, %v7522_v16  ;;  %v7528_v44 = vadd.f32 %v18212_v15, %v5823_v57  ;;  %v7630_v0 = vadd.f32 %v18234_v41, %v7577_v5  ;;  %v7534_v41 = vadd.f32 %v18218_v40, %v5823_v57  ;;  %v15817_v57 = vld [vmem:[#allocation15 + $0x1b0] ss:$8 sps:$4 sm:$0xff]  }
 0x3df   :  { %v18238_v62 = vpop.f32.mrf.mxu0  ;;  %11998 = vmatprep.subr.bf16.mxu1 %v15771_v30 }
 0x3e0   :  { %v7628_v34 = vadd.f32 %v18230_v2, %v7575_v43  ;;  %v15810_v2 = vld [vmem:[#allocation15 + $0xc4] ss:$8 sps:$4 sm:$0xff]   ;;  %v7581_v38 = vadd.f32 %v18228_v17, %v7528_v44  ;;  %v15811_v17 = vld [vmem:[#allocation15 + $0x1c0] ss:$8 sps:$4 sm:$0xff]  }
 0x3e1   :  { %v18242_v51 = vpop.f32.mrf.mxu0 }
 0x3e2   :  { %11999 = vmatpush1.bf16.msra.mxu1 %v15769_v58  ;;  %v15804_v58 = vld [vmem:[#allocation15 + $0xd4] ss:$8 sps:$4 sm:$0xff]  }
 0x3e3   :  { %v18246_v56 = vpop.f32.mrf.mxu0  ;;  %12000 = vmatprep.subr.bf16.mxu1 %v15777_v4  ;;  %v15802_v4 = vld [vmem:[#allocation15 + $0xd0] ss:$8 sps:$4 sm:$0xff]   ;;  %11969 = vmatprep.subr.bf16.mxu0 %v15804_v58 }
 0x3e4   :  { %11970 = vmatpush2.bf16.msra.mxu0 %v15802_v4  ;;  %v15820_v4 = vld [vmem:[#allocation15 + $0xa0] ss:$8 sps:$4 sm:$0xff]  }
 0x3e5   :  { %v18250_v50 = vpop.f32.mrf.mxu0  ;;  %11971 = vmatprep.subr.bf16.mxu0 %v15810_v2  ;;  %v15826_v2 = vld [vmem:[#allocation15 + $0x90] ss:$8 sps:$4 sm:$0xff]  }
 0x3e6   :  { %12001 = vmatpush1.bf16.msra.mxu1 %v15775_v46  ;;  %v7579_v46 = vadd.f32 %v18224_v24, %v7526_v32 }
 0x3e7   :  { %v18254_v39 = vpop.f32.mrf.mxu0  ;;  %12002 = vmatprep.subr.bf16.mxu1 %v15783_v27  ;;  %v15805_v27 = vld [vmem:[#allocation15 + $0x1d0] ss:$8 sps:$4 sm:$0xff]  }
 0x3e8   :  { %v7632_v59 = vadd.f32 %v18238_v62, %v7579_v46  ;;  %v7536_v62 = vadd.f32 %v18222_v11, %v5819_v63 }
 0x3e9   :  { %v18258_v6 = vpop.f32.mrf.mxu0 }
 0x3ea   :  { %12003 = vmatpush1.bf16.msra.mxu1 %v15781_v54  ;;  %v7532_v54 = vadd.f32 %v18214_v37, %v5819_v63  ;;  %v7634_v37 = vadd.f32 %v18242_v51, %v7581_v38  ;;  %v15831_v38 = vld [vmem:[#allocation15 + $0x194] ss:$8 sps:$4 sm:$0xff]  }
 0x3eb   :  { %12004 = vmatprep.subr.bf16.mxu1 %v15789_v20  ;;  %v15808_v20 = vld [vmem:[#allocation15 + $0xc0] ss:$8 sps:$4 sm:$0xff]  }
 0x3ec   :  { %11972 = vmatpush2.bf16.msra.mxu0 %v15808_v20 }
 0x3ee   :  { %12005 = vmatpush1.bf16.msra.mxu1 %v15787_v1 }
 0x3ef   :  { %12006 = vmatprep.subr.bf16.mxu1 %v15795_v60 }
 0x3f1   :  { %v18248_v42 = vpop.f32.mrf.mxu1 }
 0x3f2   :  { %12007 = vmatpush2.bf16.msra.mxu1 %v15793_v14  ;;  %v7681_v26 = vadd.f32 %v18248_v42, %v7628_v34  ;;  %v7585_v42 = vadd.f32 %v18232_v31, %v7532_v54  ;;  %v15813_v14 = vld [vmem:[#allocation15 + $0x1c4] ss:$8 sps:$4 sm:$0xff]   ;;  %v15816_v31 = vld [vmem:[#allocation15 + $0xb4] ss:$8 sps:$4 sm:$0xff]  }
 0x3f3   :  { %v18252_v29 = vpop.f32.mrf.mxu1  ;;  %12008 = vmatprep.subr.bf16.mxu1 %v15801_v48  ;;  %v7589_v48 = vadd.f32 %v18240_v52, %v7536_v62  ;;  %11973 = vmatprep.subr.bf16.mxu0 %v15816_v31  ;;  %v15822_v52 = vld [vmem:[#allocation15 + $0xa4] ss:$8 sps:$4 sm:$0xff]   ;;  %v15828_v54 = vld [vmem:[#allocation15 + $0x94] ss:$8 sps:$4 sm:$0xff]   ;;  %v15835_v62 = vld [vmem:[#allocation15 + $0x180] ss:$8 sps:$4 sm:$0xff]  }
 0x3f4   :  { %v7683_v15 = vadd.f32 %v18252_v29, %v7630_v0  ;;  %v7587_v29 = vadd.f32 %v18236_v18, %v7534_v41  ;;  %v15829_v41 = vld [vmem:[#allocation15 + $0x190] ss:$8 sps:$4 sm:$0xff]   ;;  %v15840_v31 = vld [vmem:[#allocation15 + $0x274] ss:$8 sps:$4 sm:$0xff]  }
 0x3f5   :  { %v18256_v55 = vpop.f32.mrf.mxu1 }
 0x3f6   :  { %12009 = vmatpush2.bf16.msra.mxu1 %v15799_v13  ;;  %v7685_v45 = vadd.f32 %v18256_v55, %v7632_v59  ;;  %v7640_v11 = vadd.f32 %v18250_v50, %v7587_v29 }
 0x3f7   :  { %v18260_v19 = vpop.f32.mrf.mxu1  ;;  %12010 = vmatprep.subr.bf16.mxu1 %v15807_v12 }
 0x3f8   :  { %v7687_v51 = vadd.f32 %v18260_v19, %v7634_v37  ;;  %v7591_v19 = vadd.f32 %v18244_v23, %v7538_v61  ;;  %v15823_v23 = vld [vmem:[#allocation15 + $0x1a0] ss:$8 sps:$4 sm:$0xff]   ;;  %v15844_v61 = vld [vmem:[#allocation15 + $0x374] ss:$8 sps:$4 sm:$0xff]  }
 0x3f9   :  { %v18264_v21 = vpop.f32.mrf.mxu1 }
 0x3fa   :  { %v7733_v8 = vpop.f32.mrf.mxu0  ;;  %12011 = vmatpush2.bf16.msra.mxu1 %v15805_v27 }
 0x3fb   :  { %v18270_v53 = vpop.f32.mrf.mxu1  ;;  %v7734_v24 = vadd.f32 %v7733_v8, %v7681_v26  ;;  %v7638_v8 = vadd.f32 %v18246_v56, %v7585_v42  ;;  %12012 = vmatprep.subr.bf16.mxu1 %v15813_v14  ;;  %v15819_v56 = vld [vmem:[#allocation15 + $0x1b4] ss:$8 sps:$4 sm:$0xff]  }
 0x3fc   :  { %v7735_v33 = vpop.f32.mrf.mxu0  ;;  %v7693_v50 = vadd.f32 %v18270_v53, %v7640_v11 }
 0x3fd   :  { %v18275_v3 = vpop.f32.mrf.mxu1  ;;  %v7736_v49 = vadd.f32 %v7735_v33, %v7683_v15  ;;  %v15814_v33 = vld [vmem:[#allocation15 + $0xb0] ss:$8 sps:$4 sm:$0xff]   ;;  %v7691_v18 = vadd.f32 %v18264_v21, %v7638_v8 }
 0x3fe   :  { %v7737_v9 = vpop.f32.mrf.mxu0  ;;  %12013 = vmatpush2.bf16.msra.mxu1 %v15811_v17  ;;  %11974 = vmatpush2.bf16.msra.mxu0 %v15814_v33  ;;  %v15832_v17 = vld [vmem:[#allocation15 + $0x80] ss:$8 sps:$4 sm:$0xff]  }
 0x3ff   :  { %v18285_v10 = vpop.f32.mrf.mxu1  ;;  %v7738_v22 = vadd.f32 %v7737_v9, %v7685_v45  ;;  %v7642_v9 = vadd.f32 %v18254_v39, %v7589_v48  ;;  %12014 = vmatprep.subr.bf16.mxu1 %v15819_v56  ;;  %11975 = vmatprep.subr.bf16.mxu0 %v15822_v52  ;;  %v15825_v39 = vld [vmem:[#allocation15 + $0x1a4] ss:$8 sps:$4 sm:$0xff]  }
 0x400   :  { %v7739_v30 = vpop.f32.mrf.mxu0 }
 0x401   :  { %v7740_v7 = vadd.f32 %v7739_v30, %v7687_v51  ;;  %v7644_v30 = vadd.f32 %v18258_v6, %v7591_v19  ;;  %v7695_v12 = vadd.f32 %v18275_v3, %v7642_v9 }
 0x402   :  { %v7743_v35 = vpop.f32.mrf.mxu0  ;;  %12015 = vmatpush2.bf16.msra.mxu1 %v15817_v57  ;;  %11976 = vmatpush2.bf16.msra.mxu0 %v15820_v4 }
 0x403   :  { %v7744_v21 = vadd.f32 %v7743_v35, %v7691_v18  ;;  %12016 = vmatprep.subr.bf16.mxu1 %v15825_v39  ;;  %v7697_v6 = vadd.f32 %v18285_v10, %v7644_v30  ;;  %11977 = vmatprep.subr.bf16.mxu0 %v15828_v54 }
 0x404   :  { %v7745_v40 = vpop.f32.mrf.mxu0 }
 0x405   :  { %v7746_v46 = vadd.f32 %v7745_v40, %v7693_v50 }
 0x406   :  { %v7747_v58 = vpop.f32.mrf.mxu0  ;;  %12017 = vmatpush2.bf16.msra.mxu1 %v15823_v23  ;;  %11978 = vmatpush2.bf16.msra.mxu0 %v15826_v2 }
 0x407   :  { %v7748_v3 = vadd.f32 %v7747_v58, %v7695_v12  ;;  %12018 = vmatprep.subr.bf16.mxu1 %v15831_v38 }
 0x408   :  { %v7749_v53 = vpop.f32.mrf.mxu0 }
 0x409   :  { %v7750_v42 = vadd.f32 %v7749_v53, %v7697_v6 }
 0x40a   :  { %12019 = vmatpush2.bf16.msra.mxu1 %v15829_v41 }
 0x41b   :  { %v14626_v40 = vpop.f32.mrf.mxu0 }
 0x41d   :  { %v14627_v51 = vpop.f32.mrf.mxu0 }
 0x41e   :  { %v14628_v54 = vadd.f32 %v14627_v51, %v14626_v40 }
 0x431   :  { %v7786_v1 = vpop.f32.mrf.mxu1 }
 0x432   :  { %v7787_v60 = vadd.f32 %v7786_v1, %v7734_v24  ;;  %v15834_v24 = vld [vmem:[#allocation15 + $0x84] ss:$8 sps:$4 sm:$0xff]  }
 0x433   :  { %v7788_v16 = vpop.f32.mrf.mxu1  ;;  %11979 = vmatprep.subr.bf16.mxu0 %v15834_v24 }
 0x434   :  { %v7789_v55 = vadd.f32 %v7788_v16, %v7736_v49  ;;  %v8099_v43 = vmax.f32 %v7787_v60, 0.0  ;;  %v15837_v49 = vld [vmem:[#allocation15 + $0x184] ss:$8 sps:$4 sm:$0xff]   ;;  %11980 = vmatpush2.bf16.msra.mxu0 %v15832_v17 }
 0x435   :  { %v7790_v63 = vpop.f32.mrf.mxu1  ;;  %12020 = vmatprep.subr.bf16.mxu1 %v15837_v49  ;;  %12031 = vmatprep.subr.bf16.mxu0 %v15840_v31 }
 0x436   :  { %v8100_v13 = vmax.f32 %v7789_v55, 0.0  ;;  %v7791_v25 = vadd.f32 %v7790_v63, %v7738_v22  ;;  %12021 = vmatpush2.bf16.msra.mxu1 %v15835_v62  ;;  %v14629_v22 = vpop.f32.mrf.mxu0 }
 0x437   :  { %v7792_v32 = vpop.f32.mrf.mxu1  ;;  %12072 = vmatprep.subr.bf16.mxu1 %v15844_v61 }
 0x438   :  { %v14282_v5 = vpack.c.bf16 %v8100_v13, %v8099_v43  ;;  %v7793_v34 = vadd.f32 %v7792_v32, %v7740_v7  ;;  %v8102_v0 = vmax.f32 %v7791_v25, 0.0  ;;  %v14630_v55 = vpop.f32.mrf.mxu0 }
 0x439   :  { %v7796_v44 = vpop.f32.mrf.mxu1 }
 0x43a   :  { %8151 = vst [vmem:[#allocation5] sm:$0xff] %v14282_v5  ;;  %v8103_v26 = vmax.f32 %v7793_v34, 0.0  ;;  %v7797_v27 = vadd.f32 %v7796_v44, %v7744_v21  ;;  %v14632_v33 = vpop.f32.mrf.mxu0 }
 0x43b   :  { %v7798_v35 = vpop.f32.mrf.mxu1 }
 0x43c   :  { %v14284_v59 = vpack.c.bf16 %v8103_v26, %v8102_v0  ;;  %v7799_v15 = vadd.f32 %v7798_v35, %v7746_v46  ;;  %v8105_v1 = vmax.f32 %v7797_v27, 0.0  ;;  %v14633_v11 = vpop.f32.mrf.mxu0  ;;  %v18770_v0 = vld [vmem:[#allocation54_spill] sm:$0xff]  ;;  %v14631_v35 = vadd.f32 %v14630_v55, %v14629_v22 }
 0x43d   :  { %v7800_v20 = vpop.f32.mrf.mxu1  ;;  %v18771_v26 = vsub.s32 2, %v18770_v0  ;;  %v14634_v41 = vadd.f32 %v14633_v11, %v14632_v33 }
 0x43e   :  { %8153 = vst [vmem:[#allocation5 + $0xc] sm:$0xff] %v14284_v59  ;;  %v8106_v37 = vmax.f32 %v7799_v15, 0.0  ;;  %v7801_v45 = vadd.f32 %v7800_v20, %v7748_v3  ;;  %v14635_v63 = vpop.f32.mrf.mxu0 }
 0x43f   :  { %v7802_v60 = vpop.f32.mrf.mxu1  ;;  %v5827_v27 = vrot.slane %v18262_v36, %v18771_v26 }
 0x440   :  { %v14286_v14 = vpack.c.bf16 %v8106_v37, %v8105_v1  ;;  %v7803_v10 = vadd.f32 %v7802_v60, %v7750_v42  ;;  %v8108_v29 = vmax.f32 %v7801_v45, 0.0  ;;  %v14636_v7 = vpop.f32.mrf.mxu0 }
 0x441   :  { %v7840_v6 = vadd.f32 %v14628_v54, %v5827_v27  ;;  %v7843_v15 = vadd.f32 %v14631_v35, %v5827_v27  ;;  %v14637_v60 = vadd.f32 %v14636_v7, %v14635_v63  ;;  %v7848_v62 = vadd.f32 %v14634_v41, %v5827_v27 }
 0x442   :  { %8155 = vst [vmem:[#allocation5 + $0x18] sm:$0xff] %v14286_v14  ;;  %v8109_v8 = vmax.f32 %v7803_v10, 0.0  ;;  %v14682_v43 = vpop.f32.mrf.mxu0 }
 0x443   :  { %v7851_v51 = vadd.f32 %v14637_v60, %v5827_v27 }
 0x444   :  { %v14288_v16 = vpack.c.bf16 %v8109_v8, %v8108_v29  ;;  %v14683_v25 = vpop.f32.mrf.mxu0 }
 0x445   :  { %v14684_v42 = vadd.f32 %v14683_v25, %v14682_v43 }
 0x446   :  { %8157 = vst [vmem:[#allocation5 + $0x24] sm:$0xff] %v14288_v16  ;;  %v14685_v19 = vpop.f32.mrf.mxu0 }
 0x448   :  { %v14686_v58 = vpop.f32.mrf.mxu0 }
 0x449   :  { %v14687_v17 = vadd.f32 %v14686_v58, %v14685_v19 }
 0x44a   :  { %v14688_v52 = vpop.f32.mrf.mxu0 }
 0x44c   :  { %v14689_v5 = vpop.f32.mrf.mxu0 }
 0x44e   :  { %v14691_v4 = vpop.f32.mrf.mxu0 }
 0x450   :  { %v14692_v12 = vpop.f32.mrf.mxu0 }
 0x451   :  { %v14654_v48 = vpop.f32.mrf.mxu1 }
 0x453   :  { %v14655_v18 = vpop.f32.mrf.mxu1 }
 0x454   :  { %v14656_v53 = vadd.f32 %v14655_v18, %v14654_v48  ;;  %v14690_v48 = vadd.f32 %v14689_v5, %v14688_v52 }
 0x455   :  { %v14657_v56 = vpop.f32.mrf.mxu1 }
 0x456   :  { %v7889_v59 = vadd.f32 %v14656_v53, %v7840_v6 }
 0x457   :  { %v14658_v13 = vpop.f32.mrf.mxu1 }
 0x458   :  { %v14659_v3 = vadd.f32 %v14658_v13, %v14657_v56  ;;  %v7938_v49 = vadd.f32 %v14684_v42, %v7889_v59 }
 0x459   :  { %v14660_v57 = vpop.f32.mrf.mxu1 }
 0x45a   :  { %v7892_v37 = vadd.f32 %v14659_v3, %v7843_v15 }
 0x45b   :  { %v14661_v9 = vpop.f32.mrf.mxu1  ;;  %v14738_v44 = vpop.f32.mrf.mxu0 }
 0x45c   :  { %v14662_v45 = vadd.f32 %v14661_v9, %v14660_v57  ;;  %v7941_v8 = vadd.f32 %v14687_v17, %v7892_v37  ;;  %v14693_v57 = vadd.f32 %v14692_v12, %v14691_v4  ;;  %v13733_v17 = vld.sshfl [vmem:[#allocation5] sm:$0xa pattern:$0x75316420] }
 0x45d   :  { %v14663_v32 = vpop.f32.mrf.mxu1  ;;  %v14739_v39 = vpop.f32.mrf.mxu0 }
 0x45e   :  { %v7897_v16 = vadd.f32 %v14662_v45, %v7848_v62  ;;  %v14740_v31 = vadd.f32 %v14739_v39, %v14738_v44  ;;  %v13728_v45 = vld.sshfl [vmem:[#allocation5] sm:$0x50 pattern:$0x75316420] }
 0x45f   :  { %v14664_v50 = vpop.f32.mrf.mxu1  ;;  %v14741_v2 = vpop.f32.mrf.mxu0 }
 0x460   :  { %v14665_v61 = vadd.f32 %v14664_v50, %v14663_v32  ;;  %v7946_v13 = vadd.f32 %v14690_v48, %v7897_v16  ;;  %v13743_v16 = vld.sshfl [vmem:[#allocation5 + $0xc] sm:$0x5 pattern:$0x75316420] }
 0x461   :  { %v14742_v24 = vpop.f32.mrf.mxu0 }
 0x462   :  { %v14743_v63 = vadd.f32 %v14742_v24, %v14741_v2  ;;  %v7900_v43 = vadd.f32 %v14665_v61, %v7851_v51 }
 0x463   :  { %v14744_v36 = vpop.f32.mrf.mxu0 }
 0x465   :  { %v14745_v22 = vpop.f32.mrf.mxu0 }
 0x466   :  { %v14746_v5 = vadd.f32 %v14745_v22, %v14744_v36 }
 0x467   :  { %v14747_v19 = vpop.f32.mrf.mxu0 }
 0x469   :  { %v14748_v26 = vpop.f32.mrf.mxu0 }
 0x46a   :  { %v14749_v6 = vadd.f32 %v14748_v26, %v14747_v19  ;;  %v13756_v26 = vld.sshfl [vmem:[#allocation5 + $0x18] sm:$0xa pattern:$0x75316420] }
 0x471   :  { %v14710_v21 = vpop.f32.mrf.mxu1 }
 0x473   :  { %v14711_v34 = vpop.f32.mrf.mxu1 }
 0x474   :  { %v14712_v1 = vadd.f32 %v14711_v34, %v14710_v21 }
 0x475   :  { %v14713_v30 = vpop.f32.mrf.mxu1 }
 0x476   :  { %v7987_v29 = vadd.f32 %v14712_v1, %v7938_v49  ;;  %v13723_v1 = vld.sshfl [vmem:[#allocation5] sm:$0x5 pattern:$0x75316420] }
 0x477   :  { %v14714_v23 = vpop.f32.mrf.mxu1 }
 0x478   :  { %v14715_v14 = vadd.f32 %v14714_v23, %v14713_v30  ;;  %v8036_v18 = vadd.f32 %v14740_v31, %v7987_v29  ;;  %v16710_v30 = vmov 1966171168   ;;  %v7949_v23 = vadd.f32 %v14693_v57, %v7900_v43  ;;  %v8231_v31 = vld [vmem:[#allocation6 + $0x3] sm:$0x7]  ;;  %v8394_v57 = vld [vmem:[#allocation6 + $0x12] sm:$0x7] }
 0x479   :  { %v14716_v46 = vpop.f32.mrf.mxu1  ;;  %v8179_v44 = vunpack.c.l.s4 %v16710_v30 }
 0x47a   :  { %v7990_v55 = vadd.f32 %v14715_v14, %v7941_v8  ;;  %v8196_v14 = vld [vmem:[#allocation6] sm:$0x7]  ;;  %v8261_v8 = vld [vmem:[#allocation6 + $0x6] sm:$0x7] }
 0x47b   :  { %v14717_v38 = vpop.f32.mrf.mxu1 }
 0x47c   :  { %v14718_v11 = vadd.f32 %v14717_v38, %v14716_v46  ;;  %v8039_v9 = vadd.f32 %v14743_v63, %v7990_v55  ;;  %v8180_v38 = vunpack.c.0.s8 %v8179_v44  ;;  %v13748_v44 = vld.sshfl [vmem:[#allocation5 + $0x18] sm:$0x5 pattern:$0x75316420] }
 0x47d   :  { %v14719_v20 = vpop.f32.mrf.mxu1 }
 0x47e   :  { %v7995_v21 = vadd.f32 %v14718_v11, %v7946_v13  ;;  %v18327_v37 = vsub.s32 %v8180_v38, %v18770_v0 }
 0x47f   :  { %v14720_v10 = vpop.f32.mrf.mxu1 }
 0x480   :  { %v14721_v34 = vadd.f32 %v14720_v10, %v14719_v20  ;;  %v8044_v54 = vadd.f32 %v14746_v5, %v7995_v21  ;;  %v13738_v10 = vld.sshfl [vmem:[#allocation5] sm:$0xa0 pattern:$0x75316420] }
 0x482   :  { %v7998_v4 = vadd.f32 %v14721_v34, %v7949_v23  ;;  %v8363_v34 = vld [vmem:[#allocation6 + $0xf] sm:$0x7] }
 0x484   :  { %v8047_v41 = vadd.f32 %v14749_v6, %v7998_v4 }
 0x491   :  { %v14766_v40 = vpop.f32.mrf.mxu1 }
 0x493   :  { %v14767_v33 = vpop.f32.mrf.mxu1 }
 0x494   :  { %v14768_v56 = vadd.f32 %v14767_v33, %v14766_v40 }
 0x495   :  { %v14769_v7 = vpop.f32.mrf.mxu1 }
 0x496   :  { %v8085_v25 = vadd.f32 %v14768_v56, %v8036_v18  ;;  %v8296_v18 = vld [vmem:[#allocation6 + $0x9] sm:$0x7] }
 0x497   :  { %v14770_v58 = vpop.f32.mrf.mxu1 }
 0x498   :  { %v8101_v32 = vmax.f32 %v8085_v25, 0.0  ;;  %v14771_v50 = vadd.f32 %v14770_v58, %v14769_v7  ;;  %v8327_v25 = vld [vmem:[#allocation6 + $0xc] sm:$0x7] }
 0x499   :  { %v14772_v52 = vpop.f32.mrf.mxu1 }
 0x49a   :  { %v14283_v39 = vpack.c.bf16 %v8101_v32, %v8101_v32  ;;  %v8088_v46 = vadd.f32 %v14771_v50, %v8039_v9  ;;  %v8460_v50 = vld [vmem:[#allocation6 + $0x18] sm:$0x7] }
 0x49b   :  { %v14773_v27 = vpop.f32.mrf.mxu1 }
 0x49c   :  { %8152 = vst [vmem:[#allocation5 + $0x8] sm:$0xf] %v14283_v39  ;;  %v8104_v12 = vmax.f32 %v8088_v46, 0.0  ;;  %v14774_v53 = vadd.f32 %v14773_v27, %v14772_v52  ;;  %v8430_v39 = vld [vmem:[#allocation6 + $0x15] sm:$0x7] }
 0x49d   :  { %v14775_v2 = vpop.f32.mrf.mxu1  ;;  %v13752_v52 = vld.sshfl [vmem:[#allocation5 + $0x18] sm:$0x50 pattern:$0x75316420] }
 0x49e   :  { %v14285_v59 = vpack.c.bf16 %v8104_v12, %v8104_v12  ;;  %v8093_v15 = vadd.f32 %v14774_v53, %v8044_v54  ;;  %v8495_v12 = vld [vmem:[#allocation6 + $0x1b] sm:$0x7]  ;;  %v13760_v53 = vld.sshfl [vmem:[#allocation5 + $0x18] sm:$0xa0 pattern:$0x75316420] }
 0x49f   :  { %v14776_v24 = vpop.f32.mrf.mxu1 }
 0x4a0   :  { %8154 = vst [vmem:[#allocation5 + $0x14] sm:$0xf] %v14285_v59  ;;  %v8107_v20 = vmax.f32 %v8093_v15, 0.0  ;;  %v14777_v42 = vadd.f32 %v14776_v24, %v14775_v2 }
 0x4a1   :  { %v13764_v59 = vld.sshfl [vmem:[#allocation5 + $0x24] sm:$0x5 pattern:$0x75316420] }
 0x4a2   :  { %v14287_v49 = vpack.c.bf16 %v8107_v20, %v8107_v20  ;;  %v8096_v60 = vadd.f32 %v14777_v42, %v8047_v41 }
 0x4a3   :  { %v13724_v36 = vld.sshfl [vmem:[#allocation5 + $0x8] sm:$0x1 pattern:$0x75316420] }
 0x4a4   :  { %v8177_v62 = vcombine.low %v13723_v1, %v13724_v36  ;;  %v13729_v29 = vld.sshfl [vmem:[#allocation5 + $0x8] sm:$0x10 pattern:$0x75316420]  ;;  %8156 = vst [vmem:[#allocation5 + $0x20] sm:$0xf] %v14287_v49 }
 0x4a5   :  { %v8110_v40 = vmax.f32 %v8096_v60, 0.0  ;;  %v8252_v61 = vcombine.high %v13728_v45, %v13729_v29  ;;  %v13734_v51 = vld.sshfl [vmem:[#allocation5 + $0x8] sm:$0x2 pattern:$0x75316420] }
 0x4a6   :  { %v8184_v22 = vrot.slane %v8177_v62, %v18327_v37  ;;  %v8317_v55 = vcombine.low %v13733_v17, %v13734_v51  ;;  %v13739_v33 = vld.sshfl [vmem:[#allocation5 + $0x8] sm:$0x20 pattern:$0x75316420] }
 0x4a7   :  { %v14289_v48 = vpack.c.bf16 %v8110_v40, %v8110_v40  ;;  %v8259_v11 = vrot.slane %v8252_v61, %v18327_v37  ;;  %v8384_v56 = vcombine.high %v13738_v10, %v13739_v33  ;;  %v13744_v63 = vld.sshfl [vmem:[#allocation5 + $0x14] sm:$0x1 pattern:$0x75316420] }
 0x4a8   :  { %v8197_v7 = vsel %vm18335_vm15, %v8184_v22, %v8196_v14  ;;  %v8226_v43 = vshrl.u32 %v8184_v22, 16  ;;  %v8324_v13 = vrot.slane %v8317_v55, %v18327_v37  ;;  %v8451_v19 = vcombine.low %v13743_v16, %v13744_v63 }
 0x4a9   :  { %8158 = vst [vmem:[#allocation5 + $0x2c] sm:$0xf] %v14289_v48  ;;  %8198 = vst [vmem:[#allocation6] sm:$0x7] %v8197_v7  ;;  %v8262_v58 = vsel %vm18335_vm15, %v8259_v11, %v8261_v8  ;;  %v8291_v21 = vshrl.u32 %v8259_v11, 16  ;;  %v8391_v32 = vrot.slane %v8384_v56, %v18327_v37 }
 0x4aa   :  { %v8232_v5 = vsel %vm18335_vm15, %v8226_v43, %v8231_v31  ;;  %8263 = vst [vmem:[#allocation6 + $0x6] sm:$0x7] %v8262_v58  ;;  %v8325_v23 = vcombine.high %v8324_v13, %v8324_v13  ;;  %v8458_v46 = vrot.slane %v8451_v19, %v18327_v37  ;;  %v15853_v8 = vld [vmem:[#allocation15 + $0x254] ss:$8 sps:$4 sm:$0xff]  }
 0x4ab   :  { %8233 = vst [vmem:[#allocation6 + $0x3] sm:$0x7] %v8232_v5  ;;  %v8297_v27 = vsel %vm18335_vm15, %v8291_v21, %v8296_v18  ;;  %v8392_v4 = vcombine.high %v8391_v32, %v8391_v32  ;;  %v13749_v54 = vld.sshfl [vmem:[#allocation5 + $0x20] sm:$0x1 pattern:$0x75316420] }
 0x4ac   :  { %8298 = vst [vmem:[#allocation6 + $0x9] sm:$0x7] %v8297_v27  ;;  %v8328_v35 = vsel %vm18335_vm15, %v8325_v23, %v8327_v25  ;;  %v8358_v2 = vshrl.u32 %v8325_v23, 16  ;;  %v8461_v38 = vsel %vm18335_vm15, %v8458_v46, %v8460_v50  ;;  %v8490_v6 = vshrl.u32 %v8458_v46, 16 }
 0x4ad   :  { %v13753_v3 = vld.sshfl [vmem:[#allocation5 + $0x20] sm:$0x10 pattern:$0x75316420]  ;;  %8329 = vst [vmem:[#allocation6 + $0xc] sm:$0x7] %v8328_v35  ;;  %v8395_v15 = vsel %vm18335_vm15, %v8392_v4, %v8394_v57  ;;  %v8516_v20 = vcombine.low %v13748_v44, %v13749_v54 }
 0x4ae   :  { %v8425_v24 = vshrl.u32 %v8392_v4, 16  ;;  %8462 = vst [vmem:[#allocation6 + $0x18] sm:$0x7] %v8461_v38  ;;  %v8587_v42 = vcombine.high %v13752_v52, %v13753_v3  ;;  %v8364_v45 = vsel %vm18335_vm15, %v8358_v2, %v8363_v34  ;;  %8396 = vst [vmem:[#allocation6 + $0x12] sm:$0x7] %v8395_v15  ;;  %v8496_v49 = vsel %vm18335_vm15, %v8490_v6, %v8495_v12 }
 0x4af   :  { %v13757_v1 = vld.sshfl [vmem:[#allocation5 + $0x20] sm:$0x2 pattern:$0x75316420]  ;;  %8365 = vst [vmem:[#allocation6 + $0xf] sm:$0x7] %v8364_v45  ;;  %v8523_v14 = vrot.slane %v8516_v20, %v18327_v37 }
 0x4b0   :  { %v8650_v60 = vcombine.low %v13756_v26, %v13757_v1  ;;  %v13761_v17 = vld.sshfl [vmem:[#allocation5 + $0x20] sm:$0x20 pattern:$0x75316420]  ;;  %v8431_v36 = vsel %vm18335_vm15, %v8425_v24, %v8430_v39  ;;  %8497 = vst [vmem:[#allocation6 + $0x1b] sm:$0x7] %v8496_v49  ;;  %v8594_v10 = vrot.slane %v8587_v42, %v18327_v37 }
 0x4b1   :  { %v8715_v62 = vcombine.high %v13760_v53, %v13761_v17  ;;  %v13765_v29 = vld.sshfl [vmem:[#allocation5 + $0x2c] sm:$0x1 pattern:$0x75316420]  ;;  %8432 = vst [vmem:[#allocation6 + $0x15] sm:$0x7] %v8431_v36 }
 0x4b2   :  { %v8536_v40 = vld [vmem:[#allocation6] sm:$0x7]  ;;  %v8657_v16 = vrot.slane %v8650_v60, %v18327_v37  ;;  %v8780_v0 = vcombine.low %v13764_v59, %v13765_v29  ;;  %v8525_v31 = vshll.u32 %v8523_v14, 16  ;;  %v8596_v61 = vshll.u32 %v8594_v10, 16  ;;  %v8599_v51 = vld [vmem:[#allocation6 + $0x6] sm:$0x7] }
 0x4b3   :  { %v8722_v22 = vrot.slane %v8715_v62, %v18327_v37  ;;  %v8566_v55 = vld [vmem:[#allocation6 + $0x3] sm:$0x7]  ;;  %v8629_v63 = vld [vmem:[#allocation6 + $0x9] sm:$0x7]  ;;  %v15838_v35 = vld [vmem:[#allocation15 + $0x270] ss:$8 sps:$4 sm:$0xff]  }
 0x4b4   :  { %v8658_v33 = vcombine.high %v8657_v16, %v8657_v16  ;;  %v8787_v48 = vrot.slane %v8780_v0, %v18327_v37  ;;  %v8537_v11 = vsel %vm18395_vm8, %v8525_v31, %v8536_v40  ;;  %v8567_v18 = vsel %vm18395_vm8, %v8523_v14, %v8566_v55  ;;  %v8663_v25 = vld [vmem:[#allocation6 + $0xc] sm:$0x7]  ;;  %v15842_v42 = vld [vmem:[#allocation15 + $0x370] ss:$8 sps:$4 sm:$0xff]   ;;  %v15856_v31 = vld [vmem:[#allocation15 + $0x354] ss:$8 sps:$4 sm:$0xff]  }
 0x4b5   :  { %v8600_v56 = vsel %vm18395_vm8, %v8596_v61, %v8599_v51  ;;  %v8723_v7 = vcombine.high %v8722_v22, %v8722_v22  ;;  %v8630_v43 = vsel %vm18395_vm8, %v8594_v10, %v8629_v63  ;;  %8538 = vst [vmem:[#allocation6] sm:$0x7] %v8537_v11  ;;  %8568 = vst [vmem:[#allocation6 + $0x3] sm:$0x7] %v8567_v18  ;;  %v8792_v19 = vld [vmem:[#allocation6 + $0x18] sm:$0x7] }
 0x4b6   :  { %v8660_v13 = vshll.u32 %v8658_v33, 16  ;;  %8601 = vst [vmem:[#allocation6 + $0x6] sm:$0x7] %v8600_v56  ;;  %v8789_v57 = vshll.u32 %v8787_v48, 16  ;;  %v8728_v58 = vld [vmem:[#allocation6 + $0x12] sm:$0x7] }
 0x4b7   :  { %v8725_v9 = vshll.u32 %v8723_v7, 16  ;;  %8631 = vst [vmem:[#allocation6 + $0x9] sm:$0x7] %v8630_v43  ;;  %v8694_v34 = vld [vmem:[#allocation6 + $0xf] sm:$0x7] }
 0x4b8   :  { %v8664_v21 = vsel %vm18395_vm8, %v8660_v13, %v8663_v25  ;;  %v8793_v32 = vsel %vm18395_vm8, %v8789_v57, %v8792_v19  ;;  %v8822_v50 = vld [vmem:[#allocation6 + $0x1b] sm:$0x7]  ;;  %v8695_v30 = vsel %vm18395_vm8, %v8658_v33, %v8694_v34  ;;  %v8759_v52 = vld [vmem:[#allocation6 + $0x15] sm:$0x7]  ;;  %v15845_v14 = vld [vmem:[#allocation15 + $0x260] ss:$8 sps:$4 sm:$0xff]  }
 0x4b9   :  { %v8729_v44 = vsel %vm18395_vm8, %v8725_v9, %v8728_v58  ;;  %8665 = vst [vmem:[#allocation6 + $0xc] sm:$0x7] %v8664_v21  ;;  %v8823_v5 = vsel %vm18395_vm8, %v8787_v48, %v8822_v50  ;;  %8794 = vst [vmem:[#allocation6 + $0x18] sm:$0x7] %v8793_v32  ;;  %v8760_v23 = vsel %vm18395_vm8, %v8723_v7, %v8759_v52  ;;  %v15847_v1 = vld [vmem:[#allocation15 + $0x264] ss:$8 sps:$4 sm:$0xff]  }
 0x4ba   :  { %8696 = vst [vmem:[#allocation6 + $0xf] sm:$0x7] %v8695_v30  ;;  %8730 = vst [vmem:[#allocation6 + $0x12] sm:$0x7] %v8729_v44  ;;  %v15850_v60 = vld [vmem:[#allocation15 + $0x364] ss:$8 sps:$4 sm:$0xff]  }
 0x4bb   :  { %8824 = vst [vmem:[#allocation6 + $0x1b] sm:$0x7] %v8823_v5  ;;  %8761 = vst [vmem:[#allocation6 + $0x15] sm:$0x7] %v8760_v23  ;;  %v15848_v0 = vld [vmem:[#allocation15 + $0x360] ss:$8 sps:$4 sm:$0xff]  }
 0x4bc   :  { %v15851_v61 = vld [vmem:[#allocation15 + $0x250] ss:$8 sps:$4 sm:$0xff]   ;;  %v15859_v22 = vld [vmem:[#allocation15 + $0x244] ss:$8 sps:$4 sm:$0xff]   ;;  %v15857_v56 = vld [vmem:[#allocation15 + $0x240] ss:$8 sps:$4 sm:$0xff]  }
 0x4bd   :  { %v8825_v39 = vld [vmem:[#allocation6] sm:$0xff]  ;;  %v15862_v11 = vld [vmem:[#allocation15 + $0x344] ss:$8 sps:$4 sm:$0xff]  }
 0x4be   :  { %v9332_v46 = vrot.slane %v8825_v39, %v18327_v37  ;;  %v9325_v26 = vcombine.high %v8825_v39, %v8825_v39  ;;  %v15854_v48 = vld [vmem:[#allocation15 + $0x350] ss:$8 sps:$4 sm:$0xff]   ;;  %v15865_v63 = vld [vmem:[#allocation15 + $0x234] ss:$8 sps:$4 sm:$0xff]   ;;  %v15860_v43 = vld [vmem:[#allocation15 + $0x340] ss:$8 sps:$4 sm:$0xff]  }
 0x4bf   :  { %v15868_v13 = vld [vmem:[#allocation15 + $0x334] ss:$8 sps:$4 sm:$0xff]   ;;  %v15863_v25 = vld [vmem:[#allocation15 + $0x230] ss:$8 sps:$4 sm:$0xff]   ;;  %v15871_v57 = vld [vmem:[#allocation15 + $0x224] ss:$8 sps:$4 sm:$0xff]  }
 0x4c0   :  { %v9340_v27 = vcombine.high %v9332_v46, %v9332_v46  ;;  %v9339_v4 = vrot.slane %v9325_v26, %v18327_v37  ;;  %v9348_v12 = vrot.slane %v9332_v46, %v18327_v37  ;;  %v15866_v19 = vld [vmem:[#allocation15 + $0x330] ss:$8 sps:$4 sm:$0xff]   ;;  %v15874_v9 = vld [vmem:[#allocation15 + $0x324] ss:$8 sps:$4 sm:$0xff]   ;;  %v15869_v58 = vld [vmem:[#allocation15 + $0x220] ss:$8 sps:$4 sm:$0xff]  }
 0x4c1   :  { %v8826_v54 = vld [vmem:[#allocation6 + $0x8] sm:$0xff]  ;;  %v15877_v21 = vld [vmem:[#allocation15 + $0x214] ss:$8 sps:$4 sm:$0xff]   ;;  %v15875_v50 = vld [vmem:[#allocation15 + $0x210] ss:$8 sps:$4 sm:$0xff]  }
 0x4c2   :  { %v9362_v53 = vrot.slane %v9340_v27, %v18327_v37  ;;  %v9341_v2 = vcombine.high %v9339_v4, %v9339_v4  ;;  %v18427_v38 = vrot.slane %v9339_v4, %v18327_v37  ;;  %v8827_v6 = vld [vmem:[#allocation6 + $0x10] sm:$0xff]  ;;  %v18430_v3 = vrot.slane %v8826_v54, %v18327_v37  ;;  %v8828_v45 = vld [vmem:[#allocation6 + $0x18] sm:$0x3f] }
 0x4c3   :  { %v9374_v59 = vcombine.high %v8826_v54, %v8826_v54  ;;  %v18433_v15 = vrot.slane %v8827_v6, %v18327_v37  ;;  %v9423_v24 = vcombine.high %v8827_v6, %v8827_v6  ;;  %v9370_v49 = vcombine.high %v9348_v12, %v9348_v12  ;;  %v15872_v34 = vld [vmem:[#allocation15 + $0x320] ss:$8 sps:$4 sm:$0xff]   ;;  %v15880_v32 = vld [vmem:[#allocation15 + $0x314] ss:$8 sps:$4 sm:$0xff]   ;;  %v15883_v30 = vld [vmem:[#allocation15 + $0x204] ss:$8 sps:$4 sm:$0xff]  }
 0x4c4   :  { %11981 = vmatprep.mubr.bf16.mxu0 %v9362_v53  ;;  %v9372_v20 = vcombine.high %v9362_v53, %v9362_v53  ;;  %v9369_v41 = vrot.slane %v9341_v2, %v18327_v37  ;;  %v18438_v17 = vrot.slane %v18430_v3, %v18327_v37  ;;  %v18455_v16 = vrot.slane %v8828_v45, %v18327_v37  ;;  %v15878_v44 = vld [vmem:[#allocation15 + $0x310] ss:$8 sps:$4 sm:$0xff]   ;;  %v15886_v52 = vld [vmem:[#allocation15 + $0x304] ss:$8 sps:$4 sm:$0xff]   ;;  %v15881_v5 = vld [vmem:[#allocation15 + $0x200] ss:$8 sps:$4 sm:$0xff]  }
 0x4c5   :  { %11982 = vmatmul.mubr.bf16.vlgmr.msra.gmra.mxu0 %v9348_v12  ;;  %v18441_v36 = vrot.slane %v9374_v59, %v18327_v37  ;;  %v18445_v62 = vrot.slane %v18433_v15, %v18327_v37  ;;  %v18448_v29 = vrot.slane %v9423_v24, %v18327_v37  ;;  %v9472_v33 = vcombine.high %v8828_v45, %v8828_v45  ;;  %v15889_v23 = vld [vmem:[#allocation15 + $0x2f4] ss:$8 sps:$4 sm:$0xff]   ;;  %v15884_v39 = vld [vmem:[#allocation15 + $0x300] ss:$8 sps:$4 sm:$0xff]   ;;  %v15887_v26 = vld [vmem:[#allocation15 + $0x2f0] ss:$8 sps:$4 sm:$0xff]  }
 0x4c6   :  { %12032 = vmatpush1.bf16.msra.mxu0 %v15838_v35  ;;  %12022 = vmatprep.mubr.bf16.mxu1 %v9372_v20  ;;  %v9373_v10 = vcombine.high %v9369_v41, %v9369_v41  ;;  %v18463_v55 = vrot.slane %v18455_v16, %v18327_v37  ;;  %v15892_v46 = vld [vmem:[#allocation15 + $0x3f4] ss:$8 sps:$4 sm:$0xff]   ;;  %v15895_v27 = vld [vmem:[#allocation15 + $0x2e4] ss:$8 sps:$4 sm:$0xff]   ;;  %v15890_v4 = vld [vmem:[#allocation15 + $0x3f0] ss:$8 sps:$4 sm:$0xff]  }
 0x4c7   :  { %12063 = vmatprep.mubr.bf16.mxu0 %v9369_v41  ;;  %12023 = vmatmul.mubr.bf16.vlgmr.msra.gmra.mxu1 %v9370_v49  ;;  %v18452_v40 = vrot.slane %v18441_v36, %v18327_v37  ;;  %v18459_v51 = vrot.slane %v18448_v29, %v18327_v37  ;;  %v18466_v18 = vrot.slane %v9472_v33, %v18327_v37  ;;  %v15898_v12 = vld [vmem:[#allocation15 + $0x3e4] ss:$8 sps:$4 sm:$0xff]   ;;  %v15893_v54 = vld [vmem:[#allocation15 + $0x2e0] ss:$8 sps:$4 sm:$0xff]   ;;  %v15901_v53 = vld [vmem:[#allocation15 + $0x2d4] ss:$8 sps:$4 sm:$0xff]  }
 0x4c8   :  { %12073 = vmatpush1.bf16.msra.mxu1 %v15842_v42  ;;  %12033 = vmatprep.subr.bf16.mxu0 %v15847_v1  ;;  %v15896_v35 = vld [vmem:[#allocation15 + $0x3e0] ss:$8 sps:$4 sm:$0xff]   ;;  %v15904_v2 = vld [vmem:[#allocation15 + $0x3d4] ss:$8 sps:$4 sm:$0xff]   ;;  %v15899_v6 = vld [vmem:[#allocation15 + $0x2d0] ss:$8 sps:$4 sm:$0xff]  }
 0x4c9   :  { %12104 = vmatprep.mubr.bf16.mxu1 %v9373_v10  ;;  %12074 = vmatprep.subr.bf16.mxu1 %v15850_v60  ;;  %v9502_v7 = vrot.slane %v18466_v18, %v18327_v37  ;;  %v15907_v59 = vld [vmem:[#allocation15 + $0x2c4] ss:$8 sps:$4 sm:$0xff]   ;;  %v15902_v24 = vld [vmem:[#allocation15 + $0x3d0] ss:$8 sps:$4 sm:$0xff]   ;;  %v15905_v41 = vld [vmem:[#allocation15 + $0x2c0] ss:$8 sps:$4 sm:$0xff]  }
 0x4ca   :  { %12034 = vmatpush1.bf16.msra.mxu0 %v15845_v14  ;;  %v15910_v20 = vld [vmem:[#allocation15 + $0x3c4] ss:$8 sps:$4 sm:$0xff]   ;;  %v15913_v42 = vld [vmem:[#allocation15 + $0x2b4] ss:$8 sps:$4 sm:$0xff]   ;;  %v15908_v1 = vld [vmem:[#allocation15 + $0x3c0] ss:$8 sps:$4 sm:$0xff]  }
 0x4cb   :  { %12035 = vmatprep.subr.bf16.mxu0 %v15853_v8  ;;  %v15916_v45 = vld [vmem:[#allocation15 + $0x3b4] ss:$8 sps:$4 sm:$0xff]   ;;  %v15911_v49 = vld [vmem:[#allocation15 + $0x2b0] ss:$8 sps:$4 sm:$0xff]   ;;  %v15919_v60 = vld [vmem:[#allocation15 + $0x2a4] ss:$8 sps:$4 sm:$0xff]  }
 0x4cc   :  { %12075 = vmatpush1.bf16.msra.mxu1 %v15848_v0  ;;  %v15914_v14 = vld [vmem:[#allocation15 + $0x3b0] ss:$8 sps:$4 sm:$0xff]   ;;  %v15922_v10 = vld [vmem:[#allocation15 + $0x3a4] ss:$8 sps:$4 sm:$0xff]   ;;  %v15917_v8 = vld [vmem:[#allocation15 + $0x2a0] ss:$8 sps:$4 sm:$0xff]  }
 0x4cd   :  { %12076 = vmatprep.subr.bf16.mxu1 %v15856_v31  ;;  %v15925_v0 = vld [vmem:[#allocation15 + $0x294] ss:$8 sps:$4 sm:$0xff]   ;;  %v15920_v31 = vld [vmem:[#allocation15 + $0x3a0] ss:$8 sps:$4 sm:$0xff]   ;;  %v15931_v33 = vld [vmem:[#allocation15 + $0x284] ss:$8 sps:$4 sm:$0xff]  }
 0x4ce   :  { %12036 = vmatpush1.bf16.msra.mxu0 %v15851_v61  ;;  %v15928_v61 = vld [vmem:[#allocation15 + $0x394] ss:$8 sps:$4 sm:$0xff]  }
 0x4cf   :  { %12037 = vmatprep.subr.bf16.mxu0 %v15859_v22  ;;  %v15923_v22 = vld [vmem:[#allocation15 + $0x290] ss:$8 sps:$4 sm:$0xff]  }
 0x4d0   :  { %12077 = vmatpush1.bf16.msra.mxu1 %v15854_v48  ;;  %v15926_v48 = vld [vmem:[#allocation15 + $0x390] ss:$8 sps:$4 sm:$0xff]  }
 0x4d1   :  { %12078 = vmatprep.subr.bf16.mxu1 %v15862_v11  ;;  %v15934_v11 = vld [vmem:[#allocation15 + $0x384] ss:$8 sps:$4 sm:$0xff]  }
 0x4d2   :  { %12038 = vmatpush1.bf16.msra.mxu0 %v15857_v56  ;;  %v15929_v56 = vld [vmem:[#allocation15 + $0x280] ss:$8 sps:$4 sm:$0xff]  }
 0x4d3   :  { %12039 = vmatprep.subr.bf16.mxu0 %v15865_v63  ;;  %v9389_v63 = vcombine.high %v18430_v3, %v18430_v3  ;;  %v15946_v3 = vld [vmem:[#allocation15 + $0x564] ss:$8 sps:$4 sm:$0xff]  }
 0x4d4   :  { %12079 = vmatpush1.bf16.msra.mxu1 %v15860_v43  ;;  %v15937_v43 = vld [vmem:[#allocation15 + $0x474] ss:$8 sps:$4 sm:$0xff]  }
 0x4d5   :  { %12080 = vmatprep.subr.bf16.mxu1 %v15868_v13  ;;  %v15932_v13 = vld [vmem:[#allocation15 + $0x380] ss:$8 sps:$4 sm:$0xff]  }
 0x4d6   :  { %12040 = vmatpush1.bf16.msra.mxu0 %v15863_v25  ;;  %v15940_v25 = vld [vmem:[#allocation15 + $0x574] ss:$8 sps:$4 sm:$0xff]  }
 0x4d7   :  { %12041 = vmatprep.subr.bf16.mxu0 %v15871_v57  ;;  %v15935_v57 = vld [vmem:[#allocation15 + $0x470] ss:$8 sps:$4 sm:$0xff]  }
 0x4d8   :  { %12081 = vmatpush1.bf16.msra.mxu1 %v15866_v19  ;;  %v9411_v19 = vrot.slane %v9389_v63, %v18327_v37  ;;  %v16006_v63 = vld [vmem:[#allocation15 + $0x5c4] ss:$8 sps:$4 sm:$0xff]  }
 0x4d9   :  { %12082 = vmatprep.subr.bf16.mxu1 %v15874_v9  ;;  %v15943_v9 = vld [vmem:[#allocation15 + $0x464] ss:$8 sps:$4 sm:$0xff]  }
 0x4da   :  { %12042 = vmatpush1.bf16.msra.mxu0 %v15869_v58  ;;  %v15938_v58 = vld [vmem:[#allocation15 + $0x570] ss:$8 sps:$4 sm:$0xff]  }
 0x4db   :  { %12043 = vmatprep.subr.bf16.mxu0 %v15877_v21  ;;  %v9371_v21 = vcombine.high %v18427_v38, %v18427_v38 }
 0x4dc   :  { %12083 = vmatpush1.bf16.msra.mxu1 %v15872_v34  ;;  %v9421_v34 = vcombine.high %v9411_v19, %v9411_v19 }
 0x4dd   :  { %12084 = vmatprep.subr.bf16.mxu1 %v15880_v32  ;;  %v15941_v32 = vld [vmem:[#allocation15 + $0x460] ss:$8 sps:$4 sm:$0xff]  }
 0x4de   :  { %12044 = vmatpush1.bf16.msra.mxu0 %v15875_v50  ;;  %v15949_v50 = vld [vmem:[#allocation15 + $0x454] ss:$8 sps:$4 sm:$0xff]  }
 0x4df   :  { %12045 = vmatprep.subr.bf16.mxu0 %v15883_v30  ;;  %v15944_v30 = vld [vmem:[#allocation15 + $0x560] ss:$8 sps:$4 sm:$0xff]  }
 0x4e0   :  { %12085 = vmatpush1.bf16.msra.mxu1 %v15878_v44  ;;  %v15952_v44 = vld [vmem:[#allocation15 + $0x554] ss:$8 sps:$4 sm:$0xff]  }
 0x4e1   :  { %12086 = vmatprep.subr.bf16.mxu1 %v15886_v52  ;;  %v15947_v52 = vld [vmem:[#allocation15 + $0x450] ss:$8 sps:$4 sm:$0xff]  }
 0x4e2   :  { %12046 = vmatpush1.bf16.msra.mxu0 %v15881_v5  ;;  %v15955_v5 = vld [vmem:[#allocation15 + $0x444] ss:$8 sps:$4 sm:$0xff]  }
 0x4e3   :  { %12047 = vmatprep.subr.bf16.mxu0 %v15889_v23  ;;  %v15958_v23 = vld [vmem:[#allocation15 + $0x544] ss:$8 sps:$4 sm:$0xff]  }
 0x4e4   :  { %12087 = vmatpush1.bf16.msra.mxu1 %v15884_v39  ;;  %v15953_v39 = vld [vmem:[#allocation15 + $0x440] ss:$8 sps:$4 sm:$0xff]  }
 0x4e5   :  { %12088 = vmatprep.subr.bf16.mxu1 %v15892_v46  ;;  %v15961_v46 = vld [vmem:[#allocation15 + $0x434] ss:$8 sps:$4 sm:$0xff]  }
 0x4e6   :  { %12048 = vmatpush2.bf16.msra.mxu0 %v15887_v26  ;;  %v15956_v26 = vld [vmem:[#allocation15 + $0x540] ss:$8 sps:$4 sm:$0xff]  }
 0x4e7   :  { %12049 = vmatprep.subr.bf16.mxu0 %v15895_v27  ;;  %v15964_v27 = vld [vmem:[#allocation15 + $0x534] ss:$8 sps:$4 sm:$0xff]  }
 0x4e8   :  { %12089 = vmatpush2.bf16.msra.mxu1 %v15890_v4  ;;  %v15959_v4 = vld [vmem:[#allocation15 + $0x430] ss:$8 sps:$4 sm:$0xff]  }
 0x4e9   :  { %12090 = vmatprep.subr.bf16.mxu1 %v15898_v12  ;;  %v15967_v12 = vld [vmem:[#allocation15 + $0x424] ss:$8 sps:$4 sm:$0xff]  }
 0x4ea   :  { %12050 = vmatpush2.bf16.msra.mxu0 %v15893_v54  ;;  %v15962_v54 = vld [vmem:[#allocation15 + $0x530] ss:$8 sps:$4 sm:$0xff]  }
 0x4eb   :  { %12051 = vmatprep.subr.bf16.mxu0 %v15901_v53  ;;  %v15970_v53 = vld [vmem:[#allocation15 + $0x524] ss:$8 sps:$4 sm:$0xff]  }
 0x4ec   :  { %12091 = vmatpush2.bf16.msra.mxu1 %v15896_v35  ;;  %v15965_v35 = vld [vmem:[#allocation15 + $0x420] ss:$8 sps:$4 sm:$0xff]  }
 0x4ed   :  { %12092 = vmatprep.subr.bf16.mxu1 %v15904_v2  ;;  %v15973_v2 = vld [vmem:[#allocation15 + $0x414] ss:$8 sps:$4 sm:$0xff]  }
 0x4ee   :  { %12052 = vmatpush2.bf16.msra.mxu0 %v15899_v6  ;;  %v15968_v6 = vld [vmem:[#allocation15 + $0x520] ss:$8 sps:$4 sm:$0xff]  }
 0x4ef   :  { %12053 = vmatprep.subr.bf16.mxu0 %v15907_v59  ;;  %v15976_v59 = vld [vmem:[#allocation15 + $0x514] ss:$8 sps:$4 sm:$0xff]  }
 0x4f0   :  { %12093 = vmatpush2.bf16.msra.mxu1 %v15902_v24  ;;  %v15971_v24 = vld [vmem:[#allocation15 + $0x410] ss:$8 sps:$4 sm:$0xff]  }
 0x4f1   :  { %12094 = vmatprep.subr.bf16.mxu1 %v15910_v20  ;;  %v15979_v20 = vld [vmem:[#allocation15 + $0x404] ss:$8 sps:$4 sm:$0xff]  }
 0x4f2   :  { %12054 = vmatpush2.bf16.msra.mxu0 %v15905_v41  ;;  %v15974_v41 = vld [vmem:[#allocation15 + $0x510] ss:$8 sps:$4 sm:$0xff]  }
 0x4f3   :  { %12055 = vmatprep.subr.bf16.mxu0 %v15913_v42  ;;  %v15982_v42 = vld [vmem:[#allocation15 + $0x504] ss:$8 sps:$4 sm:$0xff]  }
 0x4f4   :  { %12095 = vmatpush2.bf16.msra.mxu1 %v15908_v1  ;;  %v15977_v1 = vld [vmem:[#allocation15 + $0x400] ss:$8 sps:$4 sm:$0xff]  }
 0x4f5   :  { %12096 = vmatprep.subr.bf16.mxu1 %v15916_v45  ;;  %v15985_v45 = vld [vmem:[#allocation15 + $0x4f4] ss:$8 sps:$4 sm:$0xff]  }
 0x4f6   :  { %12056 = vmatpush2.bf16.msra.mxu0 %v15911_v49  ;;  %v15980_v49 = vld [vmem:[#allocation15 + $0x500] ss:$8 sps:$4 sm:$0xff]  }
 0x4f7   :  { %12057 = vmatprep.subr.bf16.mxu0 %v15919_v60  ;;  %v15988_v60 = vld [vmem:[#allocation15 + $0x5f4] ss:$8 sps:$4 sm:$0xff]  }
 0x4f8   :  { %12097 = vmatpush2.bf16.msra.mxu1 %v15914_v14  ;;  %v15983_v14 = vld [vmem:[#allocation15 + $0x4f0] ss:$8 sps:$4 sm:$0xff]  }
 0x4f9   :  { %12098 = vmatprep.subr.bf16.mxu1 %v15922_v10  ;;  %v15991_v10 = vld [vmem:[#allocation15 + $0x4e4] ss:$8 sps:$4 sm:$0xff]  }
 0x4fa   :  { %12058 = vmatpush2.bf16.msra.mxu0 %v15917_v8  ;;  %v15986_v8 = vld [vmem:[#allocation15 + $0x5f0] ss:$8 sps:$4 sm:$0xff]  }
 0x4fb   :  { %12059 = vmatprep.subr.bf16.mxu0 %v15925_v0  ;;  %v15994_v0 = vld [vmem:[#allocation15 + $0x5e4] ss:$8 sps:$4 sm:$0xff]  }
 0x4fc   :  { %12099 = vmatpush2.bf16.msra.mxu1 %v15920_v31  ;;  %v15989_v31 = vld [vmem:[#allocation15 + $0x4e0] ss:$8 sps:$4 sm:$0xff]  }
 0x4fd   :  { %12100 = vmatprep.subr.bf16.mxu1 %v15928_v61  ;;  %v15997_v61 = vld [vmem:[#allocation15 + $0x4d4] ss:$8 sps:$4 sm:$0xff]  }
 0x4fe   :  { %12060 = vmatpush2.bf16.msra.mxu0 %v15923_v22  ;;  %v15992_v22 = vld [vmem:[#allocation15 + $0x5e0] ss:$8 sps:$4 sm:$0xff]  }
 0x4ff   :  { %12061 = vmatprep.subr.bf16.mxu0 %v15931_v33  ;;  %v16000_v33 = vld [vmem:[#allocation15 + $0x5d4] ss:$8 sps:$4 sm:$0xff]  }
 0x500   :  { %12101 = vmatpush2.bf16.msra.mxu1 %v15926_v48  ;;  %v15995_v48 = vld [vmem:[#allocation15 + $0x4d0] ss:$8 sps:$4 sm:$0xff]  }
 0x501   :  { %12102 = vmatprep.subr.bf16.mxu1 %v15934_v11  ;;  %v16003_v11 = vld [vmem:[#allocation15 + $0x4c4] ss:$8 sps:$4 sm:$0xff]  }
 0x502   :  { %12062 = vmatpush2.bf16.msra.mxu0 %v15929_v56  ;;  %v15998_v56 = vld [vmem:[#allocation15 + $0x5d0] ss:$8 sps:$4 sm:$0xff]  }
 0x503   :  { %12113 = vmatprep.subr.bf16.mxu0 %v15937_v43  ;;  %v16001_v43 = vld [vmem:[#allocation15 + $0x4c0] ss:$8 sps:$4 sm:$0xff]  }
 0x504   :  { %12103 = vmatpush2.bf16.msra.mxu1 %v15932_v13  ;;  %v16009_v13 = vld [vmem:[#allocation15 + $0x4b4] ss:$8 sps:$4 sm:$0xff]  }
 0x505   :  { %12064 = vmatmul.mubr.bf16.vlgmr.msra.gmra.mxu0 %v18427_v38  ;;  %12154 = vmatprep.subr.bf16.mxu1 %v15940_v25  ;;  %v15950_v38 = vld [vmem:[#allocation15 + $0x550] ss:$8 sps:$4 sm:$0xff]   ;;  %v16004_v25 = vld [vmem:[#allocation15 + $0x5c0] ss:$8 sps:$4 sm:$0xff]  }
 0x506   :  { %12114 = vmatpush1.bf16.msra.mxu0 %v15935_v57  ;;  %12145 = vmatprep.mubr.bf16.mxu0 %v9411_v19  ;;  %v16012_v57 = vld [vmem:[#allocation15 + $0x5b4] ss:$8 sps:$4 sm:$0xff]   ;;  %v16007_v19 = vld [vmem:[#allocation15 + $0x4b0] ss:$8 sps:$4 sm:$0xff]  }
 0x507   :  { %12105 = vmatmul.mubr.bf16.vlgmr.msra.gmra.mxu1 %v9371_v21  ;;  %12115 = vmatprep.subr.bf16.mxu0 %v15943_v9  ;;  %v16015_v9 = vld [vmem:[#allocation15 + $0x4a4] ss:$8 sps:$4 sm:$0xff]  }
 0x508   :  { %12155 = vmatpush1.bf16.msra.mxu1 %v15938_v58  ;;  %12186 = vmatprep.mubr.bf16.mxu1 %v9421_v34  ;;  %v16010_v58 = vld [vmem:[#allocation15 + $0x5b0] ss:$8 sps:$4 sm:$0xff]   ;;  %v16018_v21 = vld [vmem:[#allocation15 + $0x5a4] ss:$8 sps:$4 sm:$0xff]   ;;  %v16021_v34 = vld [vmem:[#allocation15 + $0x494] ss:$8 sps:$4 sm:$0xff]  }
 0x509   :  { %12156 = vmatprep.subr.bf16.mxu1 %v15946_v3  ;;  %v16013_v3 = vld [vmem:[#allocation15 + $0x4a0] ss:$8 sps:$4 sm:$0xff]  }
 0x50a   :  { %12116 = vmatpush1.bf16.msra.mxu0 %v15941_v32  ;;  %v16016_v32 = vld [vmem:[#allocation15 + $0x5a0] ss:$8 sps:$4 sm:$0xff]  }
 0x50b   :  { %12117 = vmatprep.subr.bf16.mxu0 %v15949_v50  ;;  %v16024_v50 = vld [vmem:[#allocation15 + $0x594] ss:$8 sps:$4 sm:$0xff]  }
 0x50c   :  { %12157 = vmatpush1.bf16.msra.mxu1 %v15944_v30  ;;  %v16019_v30 = vld [vmem:[#allocation15 + $0x490] ss:$8 sps:$4 sm:$0xff]  }
 0x50d   :  { %12158 = vmatprep.subr.bf16.mxu1 %v15952_v44  ;;  %v16027_v44 = vld [vmem:[#allocation15 + $0x484] ss:$8 sps:$4 sm:$0xff]  }
 0x50e   :  { %12118 = vmatpush1.bf16.msra.mxu0 %v15947_v52  ;;  %v16022_v52 = vld [vmem:[#allocation15 + $0x590] ss:$8 sps:$4 sm:$0xff]  }
 0x50f   :  { %12119 = vmatprep.subr.bf16.mxu0 %v15955_v5  ;;  %v16030_v5 = vld [vmem:[#allocation15 + $0x584] ss:$8 sps:$4 sm:$0xff]  }
 0x510   :  { %12159 = vmatpush1.bf16.msra.mxu1 %v15950_v38  ;;  %v16025_v38 = vld [vmem:[#allocation15 + $0x480] ss:$8 sps:$4 sm:$0xff]  }
 0x511   :  { %12160 = vmatprep.subr.bf16.mxu1 %v15958_v23  ;;  %v9390_v23 = vcombine.high %v18441_v36, %v18441_v36  ;;  %v16043_v36 = vld [vmem:[#allocation15 + $0x764] ss:$8 sps:$4 sm:$0xff]  }
 0x512   :  { %12120 = vmatpush1.bf16.msra.mxu0 %v15953_v39  ;;  %v16033_v39 = vld [vmem:[#allocation15 + $0x674] ss:$8 sps:$4 sm:$0xff]  }
 0x513   :  { %12121 = vmatprep.subr.bf16.mxu0 %v15961_v46  ;;  %v16028_v46 = vld [vmem:[#allocation15 + $0x580] ss:$8 sps:$4 sm:$0xff]  }
 0x514   :  { %12161 = vmatpush1.bf16.msra.mxu1 %v15956_v26  ;;  %v16037_v26 = vld [vmem:[#allocation15 + $0x774] ss:$8 sps:$4 sm:$0xff]  }
 0x515   :  { %12162 = vmatprep.subr.bf16.mxu1 %v15964_v27  ;;  %v16031_v27 = vld [vmem:[#allocation15 + $0x670] ss:$8 sps:$4 sm:$0xff]  }
 0x516   :  { %12122 = vmatpush1.bf16.msra.mxu0 %v15959_v4  ;;  %v9418_v4 = vrot.slane %v9390_v23, %v18327_v37  ;;  %v16106_v23 = vld [vmem:[#allocation15 + $0x6b4] ss:$8 sps:$4 sm:$0xff]  }
 0x517   :  { %12123 = vmatprep.subr.bf16.mxu0 %v15967_v12  ;;  %v16040_v12 = vld [vmem:[#allocation15 + $0x664] ss:$8 sps:$4 sm:$0xff]  }
 0x518   :  { %12163 = vmatpush1.bf16.msra.mxu1 %v15962_v54  ;;  %v16035_v54 = vld [vmem:[#allocation15 + $0x770] ss:$8 sps:$4 sm:$0xff]  }
 0x519   :  { %12164 = vmatprep.subr.bf16.mxu1 %v15970_v53  ;;  %v9419_v53 = vcombine.high %v18438_v17, %v18438_v17 }
 0x51a   :  { %12124 = vmatpush1.bf16.msra.mxu0 %v15965_v35  ;;  %v9422_v35 = vcombine.high %v9418_v4, %v9418_v4 }
 0x51b   :  { %12125 = vmatprep.subr.bf16.mxu0 %v15973_v2  ;;  %v16038_v2 = vld [vmem:[#allocation15 + $0x660] ss:$8 sps:$4 sm:$0xff]  }
 0x51c   :  { %12165 = vmatpush1.bf16.msra.mxu1 %v15968_v6  ;;  %v16046_v6 = vld [vmem:[#allocation15 + $0x654] ss:$8 sps:$4 sm:$0xff]  }
 0x51d   :  { %12166 = vmatprep.subr.bf16.mxu1 %v15976_v59  ;;  %v16041_v59 = vld [vmem:[#allocation15 + $0x760] ss:$8 sps:$4 sm:$0xff]  }
 0x51e   :  { %12126 = vmatpush1.bf16.msra.mxu0 %v15971_v24  ;;  %v16049_v24 = vld [vmem:[#allocation15 + $0x754] ss:$8 sps:$4 sm:$0xff]  }
 0x51f   :  { %12127 = vmatprep.subr.bf16.mxu0 %v15979_v20  ;;  %v16044_v20 = vld [vmem:[#allocation15 + $0x650] ss:$8 sps:$4 sm:$0xff]  }
 0x520   :  { %12167 = vmatpush1.bf16.msra.mxu1 %v15974_v41  ;;  %v16052_v41 = vld [vmem:[#allocation15 + $0x644] ss:$8 sps:$4 sm:$0xff]  }
 0x521   :  { %12168 = vmatprep.subr.bf16.mxu1 %v15982_v42  ;;  %v16055_v42 = vld [vmem:[#allocation15 + $0x744] ss:$8 sps:$4 sm:$0xff]  }
 0x522   :  { %12128 = vmatpush1.bf16.msra.mxu0 %v15977_v1  ;;  %v16050_v1 = vld [vmem:[#allocation15 + $0x640] ss:$8 sps:$4 sm:$0xff]  }
 0x523   :  { %12129 = vmatprep.subr.bf16.mxu0 %v15985_v45  ;;  %v16058_v45 = vld [vmem:[#allocation15 + $0x634] ss:$8 sps:$4 sm:$0xff]  }
 0x524   :  { %12169 = vmatpush1.bf16.msra.mxu1 %v15980_v49  ;;  %v16053_v49 = vld [vmem:[#allocation15 + $0x740] ss:$8 sps:$4 sm:$0xff]  }
 0x525   :  { %12170 = vmatprep.subr.bf16.mxu1 %v15988_v60  ;;  %v16061_v60 = vld [vmem:[#allocation15 + $0x734] ss:$8 sps:$4 sm:$0xff]  }
 0x526   :  { %12130 = vmatpush2.bf16.msra.mxu0 %v15983_v14  ;;  %v16056_v14 = vld [vmem:[#allocation15 + $0x630] ss:$8 sps:$4 sm:$0xff]  }
 0x527   :  { %12131 = vmatprep.subr.bf16.mxu0 %v15991_v10  ;;  %v16064_v10 = vld [vmem:[#allocation15 + $0x624] ss:$8 sps:$4 sm:$0xff]  }
 0x528   :  { %12171 = vmatpush2.bf16.msra.mxu1 %v15986_v8  ;;  %v16059_v8 = vld [vmem:[#allocation15 + $0x730] ss:$8 sps:$4 sm:$0xff]  }
 0x529   :  { %12172 = vmatprep.subr.bf16.mxu1 %v15994_v0  ;;  %v16067_v0 = vld [vmem:[#allocation15 + $0x724] ss:$8 sps:$4 sm:$0xff]  }
 0x52a   :  { %12132 = vmatpush2.bf16.msra.mxu0 %v15989_v31  ;;  %v16062_v31 = vld [vmem:[#allocation15 + $0x620] ss:$8 sps:$4 sm:$0xff]  }
 0x52b   :  { %12133 = vmatprep.subr.bf16.mxu0 %v15997_v61  ;;  %v16070_v61 = vld [vmem:[#allocation15 + $0x614] ss:$8 sps:$4 sm:$0xff]  }
 0x52c   :  { %12173 = vmatpush2.bf16.msra.mxu1 %v15992_v22  ;;  %v16065_v22 = vld [vmem:[#allocation15 + $0x720] ss:$8 sps:$4 sm:$0xff]  }
 0x52d   :  { %12174 = vmatprep.subr.bf16.mxu1 %v16000_v33  ;;  %v16073_v33 = vld [vmem:[#allocation15 + $0x714] ss:$8 sps:$4 sm:$0xff]  }
 0x52e   :  { %12134 = vmatpush2.bf16.msra.mxu0 %v15995_v48  ;;  %v16068_v48 = vld [vmem:[#allocation15 + $0x610] ss:$8 sps:$4 sm:$0xff]  }
 0x52f   :  { %12135 = vmatprep.subr.bf16.mxu0 %v16003_v11  ;;  %v16076_v11 = vld [vmem:[#allocation15 + $0x604] ss:$8 sps:$4 sm:$0xff]  }
 0x530   :  { %12175 = vmatpush2.bf16.msra.mxu1 %v15998_v56  ;;  %v16071_v56 = vld [vmem:[#allocation15 + $0x710] ss:$8 sps:$4 sm:$0xff]  }
 0x531   :  { %12176 = vmatprep.subr.bf16.mxu1 %v16006_v63  ;;  %v16079_v63 = vld [vmem:[#allocation15 + $0x704] ss:$8 sps:$4 sm:$0xff]  }
 0x532   :  { %12136 = vmatpush2.bf16.msra.mxu0 %v16001_v43  ;;  %v16074_v43 = vld [vmem:[#allocation15 + $0x600] ss:$8 sps:$4 sm:$0xff]  }
 0x533   :  { %12137 = vmatprep.subr.bf16.mxu0 %v16009_v13  ;;  %v16082_v13 = vld [vmem:[#allocation15 + $0x6f4] ss:$8 sps:$4 sm:$0xff]  }
 0x534   :  { %12177 = vmatpush2.bf16.msra.mxu1 %v16004_v25  ;;  %v16077_v25 = vld [vmem:[#allocation15 + $0x700] ss:$8 sps:$4 sm:$0xff]  }
 0x535   :  { %12178 = vmatprep.subr.bf16.mxu1 %v16012_v57  ;;  %v16085_v57 = vld [vmem:[#allocation15 + $0x7f4] ss:$8 sps:$4 sm:$0xff]  }
 0x536   :  { %12138 = vmatpush2.bf16.msra.mxu0 %v16007_v19  ;;  %v16080_v19 = vld [vmem:[#allocation15 + $0x6f0] ss:$8 sps:$4 sm:$0xff]  }
 0x537   :  { %12139 = vmatprep.subr.bf16.mxu0 %v16015_v9  ;;  %v16088_v9 = vld [vmem:[#allocation15 + $0x6e4] ss:$8 sps:$4 sm:$0xff]  }
 0x538   :  { %12179 = vmatpush2.bf16.msra.mxu1 %v16010_v58  ;;  %v16083_v58 = vld [vmem:[#allocation15 + $0x7f0] ss:$8 sps:$4 sm:$0xff]  }
 0x539   :  { %12180 = vmatprep.subr.bf16.mxu1 %v16018_v21  ;;  %v16091_v21 = vld [vmem:[#allocation15 + $0x7e4] ss:$8 sps:$4 sm:$0xff]  }
 0x53a   :  { %12140 = vmatpush2.bf16.msra.mxu0 %v16013_v3  ;;  %v16086_v3 = vld [vmem:[#allocation15 + $0x6e0] ss:$8 sps:$4 sm:$0xff]  }
 0x53b   :  { %12141 = vmatprep.subr.bf16.mxu0 %v16021_v34  ;;  %v16094_v34 = vld [vmem:[#allocation15 + $0x6d4] ss:$8 sps:$4 sm:$0xff]  }
 0x53c   :  { %12181 = vmatpush2.bf16.msra.mxu1 %v16016_v32  ;;  %v16089_v32 = vld [vmem:[#allocation15 + $0x7e0] ss:$8 sps:$4 sm:$0xff]  }
 0x53d   :  { %12182 = vmatprep.subr.bf16.mxu1 %v16024_v50  ;;  %v16097_v50 = vld [vmem:[#allocation15 + $0x7d4] ss:$8 sps:$4 sm:$0xff]  }
 0x53e   :  { %12142 = vmatpush2.bf16.msra.mxu0 %v16019_v30  ;;  %v16092_v30 = vld [vmem:[#allocation15 + $0x6d0] ss:$8 sps:$4 sm:$0xff]  }
 0x53f   :  { %12143 = vmatprep.subr.bf16.mxu0 %v16027_v44  ;;  %v16100_v44 = vld [vmem:[#allocation15 + $0x6c4] ss:$8 sps:$4 sm:$0xff]  }
 0x540   :  { %12183 = vmatpush2.bf16.msra.mxu1 %v16022_v52  ;;  %v16095_v52 = vld [vmem:[#allocation15 + $0x7d0] ss:$8 sps:$4 sm:$0xff]  }
 0x541   :  { %12184 = vmatprep.subr.bf16.mxu1 %v16030_v5  ;;  %v16103_v5 = vld [vmem:[#allocation15 + $0x7c4] ss:$8 sps:$4 sm:$0xff]  }
 0x542   :  { %12144 = vmatpush2.bf16.msra.mxu0 %v16025_v38  ;;  %v16098_v38 = vld [vmem:[#allocation15 + $0x6c0] ss:$8 sps:$4 sm:$0xff]  }
 0x543   :  { %12195 = vmatprep.subr.bf16.mxu0 %v16033_v39  ;;  %v16101_v39 = vld [vmem:[#allocation15 + $0x7c0] ss:$8 sps:$4 sm:$0xff]  }
 0x544   :  { %12185 = vmatpush2.bf16.msra.mxu1 %v16028_v46  ;;  %v16109_v46 = vld [vmem:[#allocation15 + $0x7b4] ss:$8 sps:$4 sm:$0xff]  }
 0x545   :  { %12146 = vmatmul.mubr.bf16.vlgmr.msra.gmra.mxu0 %v18438_v17  ;;  %12236 = vmatprep.subr.bf16.mxu1 %v16037_v26  ;;  %v16047_v17 = vld [vmem:[#allocation15 + $0x750] ss:$8 sps:$4 sm:$0xff]  }
 0x546   :  { %12196 = vmatpush1.bf16.msra.mxu0 %v16031_v27  ;;  %12227 = vmatprep.mubr.bf16.mxu0 %v9418_v4  ;;  %v16104_v26 = vld [vmem:[#allocation15 + $0x6b0] ss:$8 sps:$4 sm:$0xff]   ;;  %v16112_v27 = vld [vmem:[#allocation15 + $0x6a4] ss:$8 sps:$4 sm:$0xff]  }
 0x547   :  { %12187 = vmatmul.mubr.bf16.vlgmr.msra.gmra.mxu1 %v9419_v53  ;;  %12197 = vmatprep.subr.bf16.mxu0 %v16040_v12  ;;  %v16107_v4 = vld [vmem:[#allocation15 + $0x7b0] ss:$8 sps:$4 sm:$0xff]   ;;  %v16115_v12 = vld [vmem:[#allocation15 + $0x7a4] ss:$8 sps:$4 sm:$0xff]   ;;  %v16118_v53 = vld [vmem:[#allocation15 + $0x694] ss:$8 sps:$4 sm:$0xff]  }
 0x548   :  { %12237 = vmatpush1.bf16.msra.mxu1 %v16035_v54  ;;  %12268 = vmatprep.mubr.bf16.mxu1 %v9422_v35  ;;  %v16110_v54 = vld [vmem:[#allocation15 + $0x6a0] ss:$8 sps:$4 sm:$0xff]   ;;  %v16121_v35 = vld [vmem:[#allocation15 + $0x794] ss:$8 sps:$4 sm:$0xff]  }
 0x549   :  { %12238 = vmatprep.subr.bf16.mxu1 %v16043_v36  ;;  %v16113_v36 = vld [vmem:[#allocation15 + $0x7a0] ss:$8 sps:$4 sm:$0xff]  }
 0x54a   :  { %12198 = vmatpush1.bf16.msra.mxu0 %v16038_v2  ;;  %v16116_v2 = vld [vmem:[#allocation15 + $0x690] ss:$8 sps:$4 sm:$0xff]  }
 0x54b   :  { %12199 = vmatprep.subr.bf16.mxu0 %v16046_v6  ;;  %v16124_v6 = vld [vmem:[#allocation15 + $0x684] ss:$8 sps:$4 sm:$0xff]  }
 0x54c   :  { %12239 = vmatpush1.bf16.msra.mxu1 %v16041_v59  ;;  %v16119_v59 = vld [vmem:[#allocation15 + $0x790] ss:$8 sps:$4 sm:$0xff]  }
 0x54d   :  { %12240 = vmatprep.subr.bf16.mxu1 %v16049_v24  ;;  %v16127_v24 = vld [vmem:[#allocation15 + $0x784] ss:$8 sps:$4 sm:$0xff]  }
 0x54e   :  { %12200 = vmatpush1.bf16.msra.mxu0 %v16044_v20  ;;  %v16122_v20 = vld [vmem:[#allocation15 + $0x680] ss:$8 sps:$4 sm:$0xff]  }
 0x54f   :  { %12201 = vmatprep.subr.bf16.mxu0 %v16052_v41  ;;  %v9438_v41 = vcombine.high %v18433_v15, %v18433_v15 }
 0x550   :  { %12241 = vmatpush1.bf16.msra.mxu1 %v16047_v17  ;;  %v16130_v17 = vld [vmem:[#allocation15 + $0x874] ss:$8 sps:$4 sm:$0xff]  }
 0x551   :  { %12242 = vmatprep.subr.bf16.mxu1 %v16055_v42  ;;  %v9309_v42 = vld [vmem:[#allocation16] sm:$0x3] }
 0x552   :  { %12202 = vmatpush1.bf16.msra.mxu0 %v16050_v1  ;;  %v16125_v1 = vld [vmem:[#allocation15 + $0x780] ss:$8 sps:$4 sm:$0xff]  }
 0x553   :  { %12203 = vmatprep.subr.bf16.mxu0 %v16058_v45  ;;  %v16133_v45 = vld [vmem:[#allocation15 + $0x974] ss:$8 sps:$4 sm:$0xff]  }
 0x554   :  { %12243 = vmatpush1.bf16.msra.mxu1 %v16053_v49  ;;  %v16128_v49 = vld [vmem:[#allocation15 + $0x870] ss:$8 sps:$4 sm:$0xff]  }
 0x555   :  { %12244 = vmatprep.subr.bf16.mxu1 %v16061_v60  ;;  %v9314_v60 = vrot.slane %v9309_v42, %v18768_v28 }
 0x556   :  { %12204 = vmatpush1.bf16.msra.mxu0 %v16056_v14  ;;  %v9460_v14 = vrot.slane %v9438_v41, %v18327_v37  ;;  %v16179_v41 = vld [vmem:[#allocation15 + $0x9f0] ss:$8 sps:$4 sm:$0xff]  }
 0x557   :  { %12205 = vmatprep.subr.bf16.mxu0 %v16064_v10  ;;  %v16136_v10 = vld [vmem:[#allocation15 + $0x864] ss:$8 sps:$4 sm:$0xff]  }
 0x558   :  { %12245 = vmatpush1.bf16.msra.mxu1 %v16059_v8  ;;  %v16131_v8 = vld [vmem:[#allocation15 + $0x970] ss:$8 sps:$4 sm:$0xff]   ;;  %v9470_v28 = vcombine.high %v9460_v14, %v9460_v14 }
 0x559   :  { %12246 = vmatprep.subr.bf16.mxu1 %v16067_v0  ;;  %v9318_v0 = vrot.slane %v9309_v42, %v18769_v47  ;;  %v16182_v42 = vld [vmem:[#allocation15 + $0x8e0] ss:$8 sps:$4 sm:$0xff]  }
 0x55a   :  { %12206 = vmatpush1.bf16.msra.mxu0 %v16062_v31  ;;  %v9420_v31 = vcombine.high %v18452_v40, %v18452_v40 }
 0x55b   :  { %12207 = vmatprep.subr.bf16.mxu0 %v16070_v61  ;;  %v16139_v61 = vld [vmem:[#allocation15 + $0x964] ss:$8 sps:$4 sm:$0xff]  }
 0x55c   :  { %12247 = vmatpush1.bf16.msra.mxu1 %v16065_v22 }
 0x55d   :  { %12248 = vmatprep.subr.bf16.mxu1 %v16073_v33  ;;  %v16134_v33 = vld [vmem:[#allocation15 + $0x860] ss:$8 sps:$4 sm:$0xff]  }
 0x55e   :  { %12208 = vmatpush1.bf16.msra.mxu0 %v16068_v48 }
 0x55f   :  { %12209 = vmatprep.subr.bf16.mxu0 %v16076_v11 }
 0x560   :  { %12249 = vmatpush1.bf16.msra.mxu1 %v16071_v56  ;;  %v16142_v56 = vld [vmem:[#allocation15 + $0x854] ss:$8 sps:$4 sm:$0xff]  }
 0x561   :  { %12250 = vmatprep.subr.bf16.mxu1 %v16079_v63 }
 0x562   :  { %12210 = vmatpush1.bf16.msra.mxu0 %v16074_v43  ;;  %v16137_v43 = vld [vmem:[#allocation15 + $0x960] ss:$8 sps:$4 sm:$0xff]  }
 0x563   :  { %12211 = vmatprep.subr.bf16.mxu0 %v16082_v13 }
 0x564   :  { %12251 = vmatpush1.bf16.msra.mxu1 %v16077_v25  ;;  %v16145_v25 = vld [vmem:[#allocation15 + $0x954] ss:$8 sps:$4 sm:$0xff]  }
 0x565   :  { %12252 = vmatprep.subr.bf16.mxu1 %v16085_v57 }
 0x566   :  { %12212 = vmatpush2.bf16.msra.mxu0 %v16080_v19  ;;  %v16140_v19 = vld [vmem:[#allocation15 + $0x850] ss:$8 sps:$4 sm:$0xff]  }
 0x567   :  { %12213 = vmatprep.subr.bf16.mxu0 %v16088_v9 }
 0x568   :  { %12253 = vmatpush2.bf16.msra.mxu1 %v16083_v58 }
 0x569   :  { %12254 = vmatprep.subr.bf16.mxu1 %v16091_v21  ;;  %v16148_v21 = vld [vmem:[#allocation15 + $0x844] ss:$8 sps:$4 sm:$0xff]  }
 0x56a   :  { %12214 = vmatpush2.bf16.msra.mxu0 %v16086_v3  ;;  %v16143_v3 = vld [vmem:[#allocation15 + $0x950] ss:$8 sps:$4 sm:$0xff]  }
 0x56b   :  { %12215 = vmatprep.subr.bf16.mxu0 %v16094_v34 }
 0x56c   :  { %12255 = vmatpush2.bf16.msra.mxu1 %v16089_v32  ;;  %v16151_v32 = vld [vmem:[#allocation15 + $0x944] ss:$8 sps:$4 sm:$0xff]  }
 0x56d   :  { %12256 = vmatprep.subr.bf16.mxu1 %v16097_v50  ;;  %v16146_v50 = vld [vmem:[#allocation15 + $0x840] ss:$8 sps:$4 sm:$0xff]  }
 0x56e   :  { %12216 = vmatpush2.bf16.msra.mxu0 %v16092_v30  ;;  %v16154_v30 = vld [vmem:[#allocation15 + $0x834] ss:$8 sps:$4 sm:$0xff]  }
 0x56f   :  { %12217 = vmatprep.subr.bf16.mxu0 %v16100_v44  ;;  %v16149_v44 = vld [vmem:[#allocation15 + $0x940] ss:$8 sps:$4 sm:$0xff]  }
 0x570   :  { %12257 = vmatpush2.bf16.msra.mxu1 %v16095_v52  ;;  %v16157_v52 = vld [vmem:[#allocation15 + $0x934] ss:$8 sps:$4 sm:$0xff]  }
 0x571   :  { %12258 = vmatprep.subr.bf16.mxu1 %v16103_v5  ;;  %v16152_v5 = vld [vmem:[#allocation15 + $0x830] ss:$8 sps:$4 sm:$0xff]  }
 0x572   :  { %12218 = vmatpush2.bf16.msra.mxu0 %v16098_v38  ;;  %v16160_v38 = vld [vmem:[#allocation15 + $0x824] ss:$8 sps:$4 sm:$0xff]  }
 0x573   :  { %12219 = vmatprep.subr.bf16.mxu0 %v16106_v23  ;;  %v16155_v23 = vld [vmem:[#allocation15 + $0x930] ss:$8 sps:$4 sm:$0xff]  }
 0x574   :  { %12259 = vmatpush2.bf16.msra.mxu1 %v16101_v39  ;;  %v16163_v39 = vld [vmem:[#allocation15 + $0x924] ss:$8 sps:$4 sm:$0xff]  }
 0x575   :  { %12260 = vmatprep.subr.bf16.mxu1 %v16109_v46  ;;  %v16158_v46 = vld [vmem:[#allocation15 + $0x820] ss:$8 sps:$4 sm:$0xff]  }
 0x576   :  { %12220 = vmatpush2.bf16.msra.mxu0 %v16104_v26  ;;  %v16166_v26 = vld [vmem:[#allocation15 + $0x814] ss:$8 sps:$4 sm:$0xff]  }
 0x577   :  { %12221 = vmatprep.subr.bf16.mxu0 %v16112_v27  ;;  %v16161_v27 = vld [vmem:[#allocation15 + $0x920] ss:$8 sps:$4 sm:$0xff]  }
 0x578   :  { %12261 = vmatpush2.bf16.msra.mxu1 %v16107_v4  ;;  %v16169_v4 = vld [vmem:[#allocation15 + $0x914] ss:$8 sps:$4 sm:$0xff]  }
 0x579   :  { %12262 = vmatprep.subr.bf16.mxu1 %v16115_v12  ;;  %v16164_v12 = vld [vmem:[#allocation15 + $0x810] ss:$8 sps:$4 sm:$0xff]  }
 0x57a   :  { %12222 = vmatpush2.bf16.msra.mxu0 %v16110_v54  ;;  %v16172_v54 = vld [vmem:[#allocation15 + $0x804] ss:$8 sps:$4 sm:$0xff]  }
 0x57b   :  { %12223 = vmatprep.subr.bf16.mxu0 %v16118_v53  ;;  %v16167_v53 = vld [vmem:[#allocation15 + $0x910] ss:$8 sps:$4 sm:$0xff]  }
 0x57c   :  { %12263 = vmatpush2.bf16.msra.mxu1 %v16113_v36  ;;  %v16175_v36 = vld [vmem:[#allocation15 + $0x904] ss:$8 sps:$4 sm:$0xff]  }
 0x57d   :  { %12264 = vmatprep.subr.bf16.mxu1 %v16121_v35  ;;  %v16170_v35 = vld [vmem:[#allocation15 + $0x800] ss:$8 sps:$4 sm:$0xff]  }
 0x57e   :  { %12224 = vmatpush2.bf16.msra.mxu0 %v16116_v2  ;;  %v16178_v2 = vld [vmem:[#allocation15 + $0x8f4] ss:$8 sps:$4 sm:$0xff]  }
 0x57f   :  { %12225 = vmatprep.subr.bf16.mxu0 %v16124_v6  ;;  %v16173_v6 = vld [vmem:[#allocation15 + $0x900] ss:$8 sps:$4 sm:$0xff]  }
 0x580   :  { %12265 = vmatpush2.bf16.msra.mxu1 %v16119_v59  ;;  %v16181_v59 = vld [vmem:[#allocation15 + $0x9f4] ss:$8 sps:$4 sm:$0xff]  }
 0x581   :  { %12266 = vmatprep.subr.bf16.mxu1 %v16127_v24  ;;  %v16176_v24 = vld [vmem:[#allocation15 + $0x8f0] ss:$8 sps:$4 sm:$0xff]  }
 0x582   :  { %12226 = vmatpush2.bf16.msra.mxu0 %v16122_v20  ;;  %v16184_v20 = vld [vmem:[#allocation15 + $0x8e4] ss:$8 sps:$4 sm:$0xff]  }
 0x583   :  { %12277 = vmatprep.subr.bf16.mxu0 %v16130_v17  ;;  %v16187_v17 = vld [vmem:[#allocation15 + $0x9e4] ss:$8 sps:$4 sm:$0xff]  }
 0x584   :  { %12267 = vmatpush2.bf16.msra.mxu1 %v16125_v1  ;;  %v16190_v1 = vld [vmem:[#allocation15 + $0x8d4] ss:$8 sps:$4 sm:$0xff]  }
 0x585   :  { %12228 = vmatmul.mubr.bf16.vlgmr.msra.gmra.mxu0 %v18452_v40  ;;  %v11983_v15 = vpop.f32.mrf.mxu0  ;;  %12318 = vmatprep.subr.bf16.mxu1 %v16133_v45  ;;  %v16185_v45 = vld [vmem:[#allocation15 + $0x9e0] ss:$8 sps:$4 sm:$0xff]  }
 0x586   :  { %v11984_v22 = vadd.f32 %v11983_v15, %v9314_v60  ;;  %12278 = vmatpush1.bf16.msra.mxu0 %v16128_v49  ;;  %12309 = vmatprep.mubr.bf16.mxu0 %v9460_v14  ;;  %v16193_v49 = vld [vmem:[#allocation15 + $0x9d4] ss:$8 sps:$4 sm:$0xff]   ;;  %v16188_v60 = vld [vmem:[#allocation15 + $0x8d0] ss:$8 sps:$4 sm:$0xff]   ;;  %v16196_v14 = vld [vmem:[#allocation15 + $0x8c4] ss:$8 sps:$4 sm:$0xff]  }
 0x587   :  { %12269 = vmatmul.mubr.bf16.vlgmr.msra.gmra.mxu1 %v9420_v31  ;;  %v11985_v48 = vpop.f32.mrf.mxu0  ;;  %v12024_v11 = vpop.f32.mrf.mxu1  ;;  %12279 = vmatprep.subr.bf16.mxu0 %v16136_v10  ;;  %v16191_v10 = vld [vmem:[#allocation15 + $0x9d0] ss:$8 sps:$4 sm:$0xff]   ;;  %v16202_v15 = vld [vmem:[#allocation15 + $0x8b4] ss:$8 sps:$4 sm:$0xff]   ;;  %v16197_v31 = vld [vmem:[#allocation15 + $0x9c0] ss:$8 sps:$4 sm:$0xff]  }
 0x588   :  { %v11986_v63 = vadd.f32 %v11985_v48, %v9318_v0  ;;  %v18490_v47 = vadd.f32 %v12024_v11, %v11984_v22  ;;  %12319 = vmatpush1.bf16.msra.mxu1 %v16131_v8  ;;  %12350 = vmatprep.mubr.bf16.mxu1 %v9470_v28  ;;  %v16199_v8 = vld [vmem:[#allocation15 + $0x9c4] ss:$8 sps:$4 sm:$0xff]   ;;  %v16194_v0 = vld [vmem:[#allocation15 + $0x8c0] ss:$8 sps:$4 sm:$0xff]   ;;  %v16200_v22 = vld [vmem:[#allocation15 + $0x8b0] ss:$8 sps:$4 sm:$0xff]  }
 0x589   :  { %v11987_v13 = vpop.f32.mrf.mxu0  ;;  %v12026_v40 = vpop.f32.mrf.mxu1  ;;  %12320 = vmatprep.subr.bf16.mxu1 %v16139_v61  ;;  %v16205_v61 = vld [vmem:[#allocation15 + $0x9b4] ss:$8 sps:$4 sm:$0xff]   ;;  %v16208_v28 = vld [vmem:[#allocation15 + $0x8a4] ss:$8 sps:$4 sm:$0xff]   ;;  %v16206_v11 = vld [vmem:[#allocation15 + $0x8a0] ss:$8 sps:$4 sm:$0xff]  }
 0x58a   :  { %v18492_v57 = vadd.f32 %v12026_v40, %v11986_v63  ;;  %12280 = vmatpush1.bf16.msra.mxu0 %v16134_v33  ;;  %v16203_v33 = vld [vmem:[#allocation15 + $0x9b0] ss:$8 sps:$4 sm:$0xff]   ;;  %v16211_v48 = vld [vmem:[#allocation15 + $0x9a4] ss:$8 sps:$4 sm:$0xff]   ;;  %v16209_v63 = vld [vmem:[#allocation15 + $0x9a0] ss:$8 sps:$4 sm:$0xff]  }
 0x58b   :  { %v11988_v9 = vpop.f32.mrf.mxu0  ;;  %v12028_v58 = vpop.f32.mrf.mxu1  ;;  %12281 = vmatprep.subr.bf16.mxu0 %v16142_v56  ;;  %v16214_v56 = vld [vmem:[#allocation15 + $0x894] ss:$8 sps:$4 sm:$0xff]   ;;  %v16212_v13 = vld [vmem:[#allocation15 + $0x890] ss:$8 sps:$4 sm:$0xff]   ;;  %v16220_v40 = vld [vmem:[#allocation15 + $0x884] ss:$8 sps:$4 sm:$0xff]  }
 0x58c   :  { %12321 = vmatpush1.bf16.msra.mxu1 %v16137_v43  ;;  %v16217_v43 = vld [vmem:[#allocation15 + $0x994] ss:$8 sps:$4 sm:$0xff]   ;;  %v16218_v9 = vld [vmem:[#allocation15 + $0x880] ss:$8 sps:$4 sm:$0xff]   ;;  %v9439_v58 = vcombine.high %v18448_v29, %v18448_v29  ;;  %v9468_v29 = vcombine.high %v18445_v62, %v18445_v62 }
 0x58d   :  { %v12029_v34 = vpop.f32.mrf.mxu1  ;;  %12322 = vmatprep.subr.bf16.mxu1 %v16145_v25  ;;  %v16215_v25 = vld [vmem:[#allocation15 + $0x990] ss:$8 sps:$4 sm:$0xff]  }
 0x58e   :  { %12282 = vmatpush1.bf16.msra.mxu0 %v16140_v19  ;;  %v16223_v19 = vld [vmem:[#allocation15 + $0x984] ss:$8 sps:$4 sm:$0xff]   ;;  %v16230_v34 = vld [vmem:[#allocation15 + $0xb74] ss:$8 sps:$4 sm:$0xff]  }
 0x58f   :  { %12283 = vmatprep.subr.bf16.mxu0 %v16148_v21  ;;  %v16226_v21 = vld [vmem:[#allocation15 + $0xa74] ss:$8 sps:$4 sm:$0xff]  }
 0x590   :  { %12323 = vmatpush1.bf16.msra.mxu1 %v16143_v3  ;;  %v16221_v3 = vld [vmem:[#allocation15 + $0x980] ss:$8 sps:$4 sm:$0xff]  }
 0x591   :  { %12324 = vmatprep.subr.bf16.mxu1 %v16151_v32  ;;  %v16224_v32 = vld [vmem:[#allocation15 + $0xa70] ss:$8 sps:$4 sm:$0xff]  }
 0x592   :  { %12284 = vmatpush1.bf16.msra.mxu0 %v16146_v50  ;;  %v9467_v50 = vrot.slane %v9439_v58, %v18327_v37  ;;  %v16290_v58 = vld [vmem:[#allocation15 + $0xbd4] ss:$8 sps:$4 sm:$0xff]  }
 0x593   :  { %12285 = vmatprep.subr.bf16.mxu0 %v16154_v30  ;;  %v16233_v30 = vld [vmem:[#allocation15 + $0xa64] ss:$8 sps:$4 sm:$0xff]  }
 0x594   :  { %12325 = vmatpush1.bf16.msra.mxu1 %v16149_v44  ;;  %v16228_v44 = vld [vmem:[#allocation15 + $0xb70] ss:$8 sps:$4 sm:$0xff]  }
 0x595   :  { %12326 = vmatprep.subr.bf16.mxu1 %v16157_v52 }
 0x596   :  { %12286 = vmatpush1.bf16.msra.mxu0 %v16152_v5  ;;  %v16236_v5 = vld [vmem:[#allocation15 + $0xb64] ss:$8 sps:$4 sm:$0xff]  }
 0x597   :  { %12287 = vmatprep.subr.bf16.mxu0 %v16160_v38 }
 0x598   :  { %12327 = vmatpush1.bf16.msra.mxu1 %v16155_v23  ;;  %v9471_v23 = vcombine.high %v9467_v50, %v9467_v50 }
 0x599   :  { %12328 = vmatprep.subr.bf16.mxu1 %v16163_v39  ;;  %v16231_v39 = vld [vmem:[#allocation15 + $0xa60] ss:$8 sps:$4 sm:$0xff]  }
 0x59a   :  { %12288 = vmatpush1.bf16.msra.mxu0 %v16158_v46 }
 0x59b   :  { %12289 = vmatprep.subr.bf16.mxu0 %v16166_v26 }
 0x59c   :  { %12329 = vmatpush1.bf16.msra.mxu1 %v16161_v27  ;;  %v16239_v27 = vld [vmem:[#allocation15 + $0xa54] ss:$8 sps:$4 sm:$0xff]  }
 0x59d   :  { %12330 = vmatprep.subr.bf16.mxu1 %v16169_v4 }
 0x59e   :  { %12290 = vmatpush1.bf16.msra.mxu0 %v16164_v12 }
 0x59f   :  { %12291 = vmatprep.subr.bf16.mxu0 %v16172_v54 }
 0x5a0   :  { %12331 = vmatpush1.bf16.msra.mxu1 %v16167_v53 }
 0x5a1   :  { %12332 = vmatprep.subr.bf16.mxu1 %v16175_v36 }
 0x5a2   :  { %12292 = vmatpush1.bf16.msra.mxu0 %v16170_v35  ;;  %v16237_v35 = vld [vmem:[#allocation15 + $0xa50] ss:$8 sps:$4 sm:$0xff]  }
 0x5a3   :  { %12293 = vmatprep.subr.bf16.mxu0 %v16178_v2 }
 0x5a4   :  { %12333 = vmatpush1.bf16.msra.mxu1 %v16173_v6 }
 0x5a5   :  { %12334 = vmatprep.subr.bf16.mxu1 %v16181_v59  ;;  %v16245_v59 = vld [vmem:[#allocation15 + $0xa44] ss:$8 sps:$4 sm:$0xff]  }
 0x5a6   :  { %12294 = vmatpush2.bf16.msra.mxu0 %v16176_v24  ;;  %v16240_v24 = vld [vmem:[#allocation15 + $0xb50] ss:$8 sps:$4 sm:$0xff]  }
 0x5a7   :  { %12295 = vmatprep.subr.bf16.mxu0 %v16184_v20  ;;  %v16248_v20 = vld [vmem:[#allocation15 + $0xb44] ss:$8 sps:$4 sm:$0xff]  }
 0x5a8   :  { %12335 = vmatpush2.bf16.msra.mxu1 %v16179_v41  ;;  %v16243_v41 = vld [vmem:[#allocation15 + $0xa40] ss:$8 sps:$4 sm:$0xff]  }
 0x5a9   :  { %12336 = vmatprep.subr.bf16.mxu1 %v16187_v17  ;;  %v16251_v17 = vld [vmem:[#allocation15 + $0xa34] ss:$8 sps:$4 sm:$0xff]  }
 0x5aa   :  { %12296 = vmatpush2.bf16.msra.mxu0 %v16182_v42  ;;  %v16246_v42 = vld [vmem:[#allocation15 + $0xb40] ss:$8 sps:$4 sm:$0xff]  }
 0x5ab   :  { %12297 = vmatprep.subr.bf16.mxu0 %v16190_v1  ;;  %v16254_v1 = vld [vmem:[#allocation15 + $0xb34] ss:$8 sps:$4 sm:$0xff]  }
 0x5ac   :  { %12337 = vmatpush2.bf16.msra.mxu1 %v16185_v45  ;;  %v16249_v45 = vld [vmem:[#allocation15 + $0xa30] ss:$8 sps:$4 sm:$0xff]  }
 0x5ad   :  { %12338 = vmatprep.subr.bf16.mxu1 %v16193_v49  ;;  %v16257_v49 = vld [vmem:[#allocation15 + $0xa24] ss:$8 sps:$4 sm:$0xff]  }
 0x5ae   :  { %12298 = vmatpush2.bf16.msra.mxu0 %v16188_v60  ;;  %v16252_v60 = vld [vmem:[#allocation15 + $0xb30] ss:$8 sps:$4 sm:$0xff]  }
 0x5af   :  { %12299 = vmatprep.subr.bf16.mxu0 %v16196_v14  ;;  %v16260_v14 = vld [vmem:[#allocation15 + $0xb24] ss:$8 sps:$4 sm:$0xff]  }
 0x5b0   :  { %12339 = vmatpush2.bf16.msra.mxu1 %v16191_v10  ;;  %v16255_v10 = vld [vmem:[#allocation15 + $0xa20] ss:$8 sps:$4 sm:$0xff]  }
 0x5b1   :  { %12340 = vmatprep.subr.bf16.mxu1 %v16199_v8  ;;  %v16263_v8 = vld [vmem:[#allocation15 + $0xa14] ss:$8 sps:$4 sm:$0xff]  }
 0x5b2   :  { %12300 = vmatpush2.bf16.msra.mxu0 %v16194_v0  ;;  %v16258_v0 = vld [vmem:[#allocation15 + $0xb20] ss:$8 sps:$4 sm:$0xff]  }
 0x5b3   :  { %12301 = vmatprep.subr.bf16.mxu0 %v16202_v15  ;;  %v16266_v15 = vld [vmem:[#allocation15 + $0xb14] ss:$8 sps:$4 sm:$0xff]  }
 0x5b4   :  { %12341 = vmatpush2.bf16.msra.mxu1 %v16197_v31  ;;  %v16261_v31 = vld [vmem:[#allocation15 + $0xa10] ss:$8 sps:$4 sm:$0xff]  }
 0x5b5   :  { %12342 = vmatprep.subr.bf16.mxu1 %v16205_v61  ;;  %v16269_v61 = vld [vmem:[#allocation15 + $0xa04] ss:$8 sps:$4 sm:$0xff]  }
 0x5b6   :  { %12302 = vmatpush2.bf16.msra.mxu0 %v16200_v22  ;;  %v16264_v22 = vld [vmem:[#allocation15 + $0xb10] ss:$8 sps:$4 sm:$0xff]  }
 0x5b7   :  { %12303 = vmatprep.subr.bf16.mxu0 %v16208_v28  ;;  %v16272_v28 = vld [vmem:[#allocation15 + $0xb04] ss:$8 sps:$4 sm:$0xff]  }
 0x5b8   :  { %12343 = vmatpush2.bf16.msra.mxu1 %v16203_v33  ;;  %v16267_v33 = vld [vmem:[#allocation15 + $0xa00] ss:$8 sps:$4 sm:$0xff]  }
 0x5b9   :  { %12344 = vmatprep.subr.bf16.mxu1 %v16211_v48  ;;  %v16275_v48 = vld [vmem:[#allocation15 + $0xaf4] ss:$8 sps:$4 sm:$0xff]  }
 0x5ba   :  { %12304 = vmatpush2.bf16.msra.mxu0 %v16206_v11  ;;  %v16270_v11 = vld [vmem:[#allocation15 + $0xb00] ss:$8 sps:$4 sm:$0xff]  }
 0x5bb   :  { %12305 = vmatprep.subr.bf16.mxu0 %v16214_v56  ;;  %v16278_v56 = vld [vmem:[#allocation15 + $0xbf4] ss:$8 sps:$4 sm:$0xff]  }
 0x5bc   :  { %12345 = vmatpush2.bf16.msra.mxu1 %v16209_v63  ;;  %v16273_v63 = vld [vmem:[#allocation15 + $0xaf0] ss:$8 sps:$4 sm:$0xff]  }
 0x5bd   :  { %12346 = vmatprep.subr.bf16.mxu1 %v16217_v43  ;;  %v16281_v43 = vld [vmem:[#allocation15 + $0xae4] ss:$8 sps:$4 sm:$0xff]  }
 0x5be   :  { %12306 = vmatpush2.bf16.msra.mxu0 %v16212_v13  ;;  %v16276_v13 = vld [vmem:[#allocation15 + $0xbf0] ss:$8 sps:$4 sm:$0xff]  }
 0x5bf   :  { %12307 = vmatprep.subr.bf16.mxu0 %v16220_v40  ;;  %v16284_v40 = vld [vmem:[#allocation15 + $0xbe4] ss:$8 sps:$4 sm:$0xff]  }
 0x5c0   :  { %12347 = vmatpush2.bf16.msra.mxu1 %v16215_v25  ;;  %v16279_v25 = vld [vmem:[#allocation15 + $0xae0] ss:$8 sps:$4 sm:$0xff]  }
 0x5c1   :  { %12348 = vmatprep.subr.bf16.mxu1 %v16223_v19  ;;  %v16287_v19 = vld [vmem:[#allocation15 + $0xad4] ss:$8 sps:$4 sm:$0xff]  }
 0x5c2   :  { %12308 = vmatpush2.bf16.msra.mxu0 %v16218_v9  ;;  %v16282_v9 = vld [vmem:[#allocation15 + $0xbe0] ss:$8 sps:$4 sm:$0xff]  }
 0x5c3   :  { %12359 = vmatprep.subr.bf16.mxu0 %v16226_v21  ;;  %v16285_v21 = vld [vmem:[#allocation15 + $0xad0] ss:$8 sps:$4 sm:$0xff]  }
 0x5c4   :  { %12349 = vmatpush2.bf16.msra.mxu1 %v16221_v3  ;;  %v16293_v3 = vld [vmem:[#allocation15 + $0xac4] ss:$8 sps:$4 sm:$0xff]  }
 0x5c5   :  { %v12065_v52 = vpop.f32.mrf.mxu0  ;;  %12310 = vmatmul.mubr.bf16.vlgmr.msra.gmra.mxu0 %v18445_v62  ;;  %12400 = vmatprep.subr.bf16.mxu1 %v16230_v34  ;;  %v16234_v62 = vld [vmem:[#allocation15 + $0xb60] ss:$8 sps:$4 sm:$0xff]   ;;  %v16288_v34 = vld [vmem:[#allocation15 + $0xbd0] ss:$8 sps:$4 sm:$0xff]  }
 0x5c6   :  { %v12066_v38 = vadd.f32 %v12065_v52, %v18490_v47  ;;  %12360 = vmatpush1.bf16.msra.mxu0 %v16224_v32  ;;  %12391 = vmatprep.mubr.bf16.mxu0 %v9467_v50  ;;  %v16242_v47 = vld [vmem:[#allocation15 + $0xb54] ss:$8 sps:$4 sm:$0xff]   ;;  %v16296_v32 = vld [vmem:[#allocation15 + $0xbc4] ss:$8 sps:$4 sm:$0xff]   ;;  %v16291_v50 = vld [vmem:[#allocation15 + $0xac0] ss:$8 sps:$4 sm:$0xff]  }
 0x5c7   :  { %v12067_v46 = vpop.f32.mrf.mxu0  ;;  %v12106_v26 = vpop.f32.mrf.mxu1  ;;  %12351 = vmatmul.mubr.bf16.vlgmr.msra.gmra.mxu1 %v9468_v29  ;;  %12361 = vmatprep.subr.bf16.mxu0 %v16233_v30  ;;  %v16299_v30 = vld [vmem:[#allocation15 + $0xab4] ss:$8 sps:$4 sm:$0xff]   ;;  %v16297_v29 = vld [vmem:[#allocation15 + $0xab0] ss:$8 sps:$4 sm:$0xff]  }
 0x5c8   :  { %v12068_v4 = vadd.f32 %v12067_v46, %v18492_v57  ;;  %v18502_v12 = vadd.f32 %v12106_v26, %v12066_v38  ;;  %12401 = vmatpush1.bf16.msra.mxu1 %v16228_v44  ;;  %12432 = vmatprep.mubr.bf16.mxu1 %v9471_v23  ;;  %v16294_v44 = vld [vmem:[#allocation15 + $0xbc0] ss:$8 sps:$4 sm:$0xff]   ;;  %v16302_v52 = vld [vmem:[#allocation15 + $0xbb4] ss:$8 sps:$4 sm:$0xff]   ;;  %v16300_v38 = vld [vmem:[#allocation15 + $0xbb0] ss:$8 sps:$4 sm:$0xff]  }
 0x5c9   :  { %v12069_v54 = vpop.f32.mrf.mxu0  ;;  %v12108_v53 = vpop.f32.mrf.mxu1  ;;  %12402 = vmatprep.subr.bf16.mxu1 %v16236_v5  ;;  %v16305_v5 = vld [vmem:[#allocation15 + $0xaa4] ss:$8 sps:$4 sm:$0xff]   ;;  %v16311_v46 = vld [vmem:[#allocation15 + $0xa94] ss:$8 sps:$4 sm:$0xff]   ;;  %v16306_v26 = vld [vmem:[#allocation15 + $0xba0] ss:$8 sps:$4 sm:$0xff]  }
 0x5ca   :  { %v18504_v36 = vadd.f32 %v12108_v53, %v12068_v4  ;;  %12362 = vmatpush1.bf16.msra.mxu0 %v16231_v39  ;;  %v16308_v23 = vld [vmem:[#allocation15 + $0xba4] ss:$8 sps:$4 sm:$0xff]   ;;  %v16303_v39 = vld [vmem:[#allocation15 + $0xaa0] ss:$8 sps:$4 sm:$0xff]   ;;  %v16309_v4 = vld [vmem:[#allocation15 + $0xa90] ss:$8 sps:$4 sm:$0xff]  }
 0x5cb   :  { %v12070_v2 = vpop.f32.mrf.mxu0  ;;  %v12110_v6 = vpop.f32.mrf.mxu1  ;;  %12363 = vmatprep.subr.bf16.mxu0 %v16239_v27  ;;  %v16314_v27 = vld [vmem:[#allocation15 + $0xb94] ss:$8 sps:$4 sm:$0xff]   ;;  %v16312_v54 = vld [vmem:[#allocation15 + $0xb90] ss:$8 sps:$4 sm:$0xff]   ;;  %v16320_v53 = vld [vmem:[#allocation15 + $0xb84] ss:$8 sps:$4 sm:$0xff]  }
 0x5cc   :  { %12403 = vmatpush1.bf16.msra.mxu1 %v16234_v62  ;;  %v16317_v62 = vld [vmem:[#allocation15 + $0xa84] ss:$8 sps:$4 sm:$0xff]   ;;  %v16323_v2 = vld [vmem:[#allocation15 + $0xc74] ss:$8 sps:$4 sm:$0xff]   ;;  %v16318_v6 = vld [vmem:[#allocation15 + $0xb80] ss:$8 sps:$4 sm:$0xff]  }
 0x5cd   :  { %v12111_v57 = vpop.f32.mrf.mxu1  ;;  %12404 = vmatprep.subr.bf16.mxu1 %v16242_v47  ;;  %v16315_v47 = vld [vmem:[#allocation15 + $0xa80] ss:$8 sps:$4 sm:$0xff]  }
 0x5ce   :  { %12364 = vmatpush1.bf16.msra.mxu0 %v16237_v35  ;;  %v9487_v35 = vcombine.high %v18455_v16, %v18455_v16  ;;  %v9469_v16 = vcombine.high %v18459_v51, %v18459_v51 }
 0x5cf   :  { %12365 = vmatprep.subr.bf16.mxu0 %v16245_v59  ;;  %v16326_v59 = vld [vmem:[#allocation15 + $0xd74] ss:$8 sps:$4 sm:$0xff]  }
 0x5d0   :  { %12405 = vmatpush1.bf16.msra.mxu1 %v16240_v24  ;;  %v16321_v24 = vld [vmem:[#allocation15 + $0xc70] ss:$8 sps:$4 sm:$0xff]   ;;  %v9509_v57 = vrot.slane %v9487_v35, %v18327_v37  ;;  %v16389_v35 = vld [vmem:[#allocation15 + $0xcc4] ss:$8 sps:$4 sm:$0xff]  }
 0x5d1   :  { %12406 = vmatprep.subr.bf16.mxu1 %v16248_v20  ;;  %v16329_v20 = vld [vmem:[#allocation15 + $0xc64] ss:$8 sps:$4 sm:$0xff]  }
 0x5d2   :  { %12366 = vmatpush1.bf16.msra.mxu0 %v16243_v41  ;;  %v16324_v41 = vld [vmem:[#allocation15 + $0xd70] ss:$8 sps:$4 sm:$0xff]  }
 0x5d3   :  { %12367 = vmatprep.subr.bf16.mxu0 %v16251_v17 }
 0x5d4   :  { %12407 = vmatpush1.bf16.msra.mxu1 %v16246_v42  ;;  %v16332_v42 = vld [vmem:[#allocation15 + $0xd64] ss:$8 sps:$4 sm:$0xff]  }
 0x5d5   :  { %12408 = vmatprep.subr.bf16.mxu1 %v16254_v1 }
 0x5d6   :  { %12368 = vmatpush1.bf16.msra.mxu0 %v16249_v45  ;;  %v9518_v45 = vcombine.high %v9509_v57, %v9509_v57 }
 0x5d7   :  { %12369 = vmatprep.subr.bf16.mxu0 %v16257_v49  ;;  %v16327_v49 = vld [vmem:[#allocation15 + $0xc60] ss:$8 sps:$4 sm:$0xff]  }
 0x5d8   :  { %12409 = vmatpush1.bf16.msra.mxu1 %v16252_v60 }
 0x5d9   :  { %12410 = vmatprep.subr.bf16.mxu1 %v16260_v14 }
 0x5da   :  { %12370 = vmatpush1.bf16.msra.mxu0 %v16255_v10  ;;  %v16335_v10 = vld [vmem:[#allocation15 + $0xc54] ss:$8 sps:$4 sm:$0xff]  }
 0x5db   :  { %12371 = vmatprep.subr.bf16.mxu0 %v16263_v8 }
 0x5dc   :  { %12411 = vmatpush1.bf16.msra.mxu1 %v16258_v0 }
 0x5dd   :  { %12412 = vmatprep.subr.bf16.mxu1 %v16266_v15 }
 0x5de   :  { %12372 = vmatpush1.bf16.msra.mxu0 %v16261_v31 }
 0x5df   :  { %12373 = vmatprep.subr.bf16.mxu0 %v16269_v61 }
 0x5e0   :  { %12413 = vmatpush1.bf16.msra.mxu1 %v16264_v22  ;;  %v16333_v22 = vld [vmem:[#allocation15 + $0xc50] ss:$8 sps:$4 sm:$0xff]  }
 0x5e1   :  { %12414 = vmatprep.subr.bf16.mxu1 %v16272_v28 }
 0x5e2   :  { %12374 = vmatpush1.bf16.msra.mxu0 %v16267_v33 }
 0x5e3   :  { %12375 = vmatprep.subr.bf16.mxu0 %v16275_v48  ;;  %v16341_v48 = vld [vmem:[#allocation15 + $0xc44] ss:$8 sps:$4 sm:$0xff]  }
 0x5e4   :  { %12415 = vmatpush1.bf16.msra.mxu1 %v16270_v11  ;;  %v16336_v11 = vld [vmem:[#allocation15 + $0xd50] ss:$8 sps:$4 sm:$0xff]  }
 0x5e5   :  { %12416 = vmatprep.subr.bf16.mxu1 %v16278_v56  ;;  %v16344_v56 = vld [vmem:[#allocation15 + $0xd44] ss:$8 sps:$4 sm:$0xff]  }
 0x5e6   :  { %12376 = vmatpush2.bf16.msra.mxu0 %v16273_v63  ;;  %v16339_v63 = vld [vmem:[#allocation15 + $0xc40] ss:$8 sps:$4 sm:$0xff]  }
 0x5e7   :  { %12377 = vmatprep.subr.bf16.mxu0 %v16281_v43  ;;  %v16347_v43 = vld [vmem:[#allocation15 + $0xc34] ss:$8 sps:$4 sm:$0xff]  }
 0x5e8   :  { %12417 = vmatpush2.bf16.msra.mxu1 %v16276_v13  ;;  %v16342_v13 = vld [vmem:[#allocation15 + $0xd40] ss:$8 sps:$4 sm:$0xff]  }
 0x5e9   :  { %12418 = vmatprep.subr.bf16.mxu1 %v16284_v40  ;;  %v16350_v40 = vld [vmem:[#allocation15 + $0xd34] ss:$8 sps:$4 sm:$0xff]  }
 0x5ea   :  { %12378 = vmatpush2.bf16.msra.mxu0 %v16279_v25  ;;  %v16345_v25 = vld [vmem:[#allocation15 + $0xc30] ss:$8 sps:$4 sm:$0xff]  }
 0x5eb   :  { %12379 = vmatprep.subr.bf16.mxu0 %v16287_v19  ;;  %v16353_v19 = vld [vmem:[#allocation15 + $0xc24] ss:$8 sps:$4 sm:$0xff]  }
 0x5ec   :  { %12419 = vmatpush2.bf16.msra.mxu1 %v16282_v9  ;;  %v16348_v9 = vld [vmem:[#allocation15 + $0xd30] ss:$8 sps:$4 sm:$0xff]  }
 0x5ed   :  { %12420 = vmatprep.subr.bf16.mxu1 %v16290_v58  ;;  %v16356_v58 = vld [vmem:[#allocation15 + $0xd24] ss:$8 sps:$4 sm:$0xff]  }
 0x5ee   :  { %12380 = vmatpush2.bf16.msra.mxu0 %v16285_v21  ;;  %v16351_v21 = vld [vmem:[#allocation15 + $0xc20] ss:$8 sps:$4 sm:$0xff]  }
 0x5ef   :  { %12381 = vmatprep.subr.bf16.mxu0 %v16293_v3  ;;  %v16359_v3 = vld [vmem:[#allocation15 + $0xc14] ss:$8 sps:$4 sm:$0xff]  }
 0x5f0   :  { %12421 = vmatpush2.bf16.msra.mxu1 %v16288_v34  ;;  %v16354_v34 = vld [vmem:[#allocation15 + $0xd20] ss:$8 sps:$4 sm:$0xff]  }
 0x5f1   :  { %12422 = vmatprep.subr.bf16.mxu1 %v16296_v32  ;;  %v16362_v32 = vld [vmem:[#allocation15 + $0xd14] ss:$8 sps:$4 sm:$0xff]  }
 0x5f2   :  { %12382 = vmatpush2.bf16.msra.mxu0 %v16291_v50  ;;  %v16357_v50 = vld [vmem:[#allocation15 + $0xc10] ss:$8 sps:$4 sm:$0xff]  }
 0x5f3   :  { %12383 = vmatprep.subr.bf16.mxu0 %v16299_v30  ;;  %v16365_v30 = vld [vmem:[#allocation15 + $0xc04] ss:$8 sps:$4 sm:$0xff]  }
 0x5f4   :  { %12423 = vmatpush2.bf16.msra.mxu1 %v16294_v44  ;;  %v16360_v44 = vld [vmem:[#allocation15 + $0xd10] ss:$8 sps:$4 sm:$0xff]  }
 0x5f5   :  { %12424 = vmatprep.subr.bf16.mxu1 %v16302_v52  ;;  %v16368_v52 = vld [vmem:[#allocation15 + $0xd04] ss:$8 sps:$4 sm:$0xff]  }
 0x5f6   :  { %12384 = vmatpush2.bf16.msra.mxu0 %v16297_v29  ;;  %v16363_v29 = vld [vmem:[#allocation15 + $0xc00] ss:$8 sps:$4 sm:$0xff]  }
 0x5f7   :  { %12385 = vmatprep.subr.bf16.mxu0 %v16305_v5  ;;  %v16371_v5 = vld [vmem:[#allocation15 + $0xcf4] ss:$8 sps:$4 sm:$0xff]  }
 0x5f8   :  { %12425 = vmatpush2.bf16.msra.mxu1 %v16300_v38  ;;  %v16366_v38 = vld [vmem:[#allocation15 + $0xd00] ss:$8 sps:$4 sm:$0xff]  }
 0x5f9   :  { %12426 = vmatprep.subr.bf16.mxu1 %v16308_v23  ;;  %v16374_v23 = vld [vmem:[#allocation15 + $0xdf4] ss:$8 sps:$4 sm:$0xff]  }
 0x5fa   :  { %12386 = vmatpush2.bf16.msra.mxu0 %v16303_v39  ;;  %v16369_v39 = vld [vmem:[#allocation15 + $0xcf0] ss:$8 sps:$4 sm:$0xff]  }
 0x5fb   :  { %12387 = vmatprep.subr.bf16.mxu0 %v16311_v46  ;;  %v16377_v46 = vld [vmem:[#allocation15 + $0xce4] ss:$8 sps:$4 sm:$0xff]  }
 0x5fc   :  { %12427 = vmatpush2.bf16.msra.mxu1 %v16306_v26  ;;  %v16372_v26 = vld [vmem:[#allocation15 + $0xdf0] ss:$8 sps:$4 sm:$0xff]  }
 0x5fd   :  { %12428 = vmatprep.subr.bf16.mxu1 %v16314_v27  ;;  %v16380_v27 = vld [vmem:[#allocation15 + $0xde4] ss:$8 sps:$4 sm:$0xff]  }
 0x5fe   :  { %12388 = vmatpush2.bf16.msra.mxu0 %v16309_v4  ;;  %v16375_v4 = vld [vmem:[#allocation15 + $0xce0] ss:$8 sps:$4 sm:$0xff]  }
 0x5ff   :  { %12389 = vmatprep.subr.bf16.mxu0 %v16317_v62  ;;  %v16383_v62 = vld [vmem:[#allocation15 + $0xcd4] ss:$8 sps:$4 sm:$0xff]  }
 0x600   :  { %12429 = vmatpush2.bf16.msra.mxu1 %v16312_v54  ;;  %v16378_v54 = vld [vmem:[#allocation15 + $0xde0] ss:$8 sps:$4 sm:$0xff]  }
 0x601   :  { %12430 = vmatprep.subr.bf16.mxu1 %v16320_v53  ;;  %v16386_v53 = vld [vmem:[#allocation15 + $0xdd4] ss:$8 sps:$4 sm:$0xff]  }
 0x602   :  { %12390 = vmatpush2.bf16.msra.mxu0 %v16315_v47  ;;  %v16381_v47 = vld [vmem:[#allocation15 + $0xcd0] ss:$8 sps:$4 sm:$0xff]  }
 0x603   :  { %12441 = vmatprep.subr.bf16.mxu0 %v16323_v2  ;;  %v16384_v2 = vld [vmem:[#allocation15 + $0xdd0] ss:$8 sps:$4 sm:$0xff]  }
 0x604   :  { %12431 = vmatpush2.bf16.msra.mxu1 %v16318_v6  ;;  %v16392_v6 = vld [vmem:[#allocation15 + $0xdc4] ss:$8 sps:$4 sm:$0xff]  }
 0x605   :  { %v12147_v17 = vpop.f32.mrf.mxu0  ;;  %12392 = vmatmul.mubr.bf16.vlgmr.msra.gmra.mxu0 %v18459_v51  ;;  %12482 = vmatprep.subr.bf16.mxu1 %v16326_v59  ;;  %v16330_v51 = vld [vmem:[#allocation15 + $0xd60] ss:$8 sps:$4 sm:$0xff]  }
 0x606   :  { %v12148_v1 = vadd.f32 %v12147_v17, %v18502_v12  ;;  %12442 = vmatpush1.bf16.msra.mxu0 %v16321_v24  ;;  %12473 = vmatprep.mubr.bf16.mxu0 %v9509_v57  ;;  %v16338_v12 = vld [vmem:[#allocation15 + $0xd54] ss:$8 sps:$4 sm:$0xff]   ;;  %v16387_v59 = vld [vmem:[#allocation15 + $0xcc0] ss:$8 sps:$4 sm:$0xff]   ;;  %v16401_v17 = vld [vmem:[#allocation15 + $0xca4] ss:$8 sps:$4 sm:$0xff]  }
 0x607   :  { %v12149_v60 = vpop.f32.mrf.mxu0  ;;  %v12188_v14 = vpop.f32.mrf.mxu1  ;;  %12433 = vmatmul.mubr.bf16.vlgmr.msra.gmra.mxu1 %v9469_v16  ;;  %12443 = vmatprep.subr.bf16.mxu0 %v16329_v20  ;;  %v16395_v24 = vld [vmem:[#allocation15 + $0xcb4] ss:$8 sps:$4 sm:$0xff]   ;;  %v16390_v57 = vld [vmem:[#allocation15 + $0xdc0] ss:$8 sps:$4 sm:$0xff]   ;;  %v16396_v16 = vld [vmem:[#allocation15 + $0xdb0] ss:$8 sps:$4 sm:$0xff]  }
 0x608   :  { %v12150_v8 = vadd.f32 %v12149_v60, %v18504_v36  ;;  %v18514_v0 = vadd.f32 %v12188_v14, %v12148_v1  ;;  %12483 = vmatpush1.bf16.msra.mxu1 %v16324_v41  ;;  %12514 = vmatprep.mubr.bf16.mxu1 %v9518_v45  ;;  %v16398_v20 = vld [vmem:[#allocation15 + $0xdb4] ss:$8 sps:$4 sm:$0xff]   ;;  %v16393_v41 = vld [vmem:[#allocation15 + $0xcb0] ss:$8 sps:$4 sm:$0xff]   ;;  %v16399_v1 = vld [vmem:[#allocation15 + $0xca0] ss:$8 sps:$4 sm:$0xff]  }
 0x609   :  { %v12151_v15 = vpop.f32.mrf.mxu0  ;;  %v12190_v31 = vpop.f32.mrf.mxu1  ;;  %12484 = vmatprep.subr.bf16.mxu1 %v16332_v42  ;;  %v16404_v42 = vld [vmem:[#allocation15 + $0xda4] ss:$8 sps:$4 sm:$0xff]   ;;  %v16407_v45 = vld [vmem:[#allocation15 + $0xc94] ss:$8 sps:$4 sm:$0xff]   ;;  %v16405_v14 = vld [vmem:[#allocation15 + $0xc90] ss:$8 sps:$4 sm:$0xff]  }
 0x60a   :  { %v18516_v61 = vadd.f32 %v12190_v31, %v12150_v8  ;;  %12444 = vmatpush1.bf16.msra.mxu0 %v16327_v49  ;;  %v16402_v49 = vld [vmem:[#allocation15 + $0xda0] ss:$8 sps:$4 sm:$0xff]   ;;  %v16410_v60 = vld [vmem:[#allocation15 + $0xd94] ss:$8 sps:$4 sm:$0xff]   ;;  %v16408_v8 = vld [vmem:[#allocation15 + $0xd90] ss:$8 sps:$4 sm:$0xff]  }
 0x60b   :  { %v12152_v28 = vpop.f32.mrf.mxu0  ;;  %v12192_v33 = vpop.f32.mrf.mxu1  ;;  %12445 = vmatprep.subr.bf16.mxu0 %v16335_v10  ;;  %v16413_v10 = vld [vmem:[#allocation15 + $0xc84] ss:$8 sps:$4 sm:$0xff]   ;;  %v16411_v15 = vld [vmem:[#allocation15 + $0xc80] ss:$8 sps:$4 sm:$0xff]   ;;  %v16419_v31 = vld [vmem:[#allocation15 + $0xe74] ss:$8 sps:$4 sm:$0xff]  }
 0x60c   :  { %12485 = vmatpush1.bf16.msra.mxu1 %v16330_v51  ;;  %v16416_v51 = vld [vmem:[#allocation15 + $0xd84] ss:$8 sps:$4 sm:$0xff]   ;;  %v16417_v28 = vld [vmem:[#allocation15 + $0xe70] ss:$8 sps:$4 sm:$0xff]  }
 0x60d   :  { %v12193_v36 = vpop.f32.mrf.mxu1  ;;  %12486 = vmatprep.subr.bf16.mxu1 %v16338_v12  ;;  %v16414_v12 = vld [vmem:[#allocation15 + $0xd80] ss:$8 sps:$4 sm:$0xff]   ;;  %v16423_v33 = vld [vmem:[#allocation15 + $0xe64] ss:$8 sps:$4 sm:$0xff]  }
 0x60e   :  { %12446 = vmatpush1.bf16.msra.mxu0 %v16333_v22  ;;  %v9488_v22 = vcombine.high %v18466_v18, %v18466_v18  ;;  %v9517_v36 = vcombine.high %v18463_v55, %v18463_v55  ;;  %v16470_v18 = vld [vmem:[#allocation18 + $0x68] sm:$0xff]  }
 0x60f   :  { %12447 = vmatprep.subr.bf16.mxu0 %v16341_v48 }
 0x610   :  { %12487 = vmatpush1.bf16.msra.mxu1 %v16336_v11  ;;  %v9516_v48 = vrot.slane %v9488_v22, %v18327_v37  ;;  %v16469_v37 = vld [vmem:[#allocation18 + $0x30] sm:$0xff]   ;;  %v16472_v22 = vld [vmem:[#allocation18 + $0x60] sm:$0xff]  }
 0x611   :  { %12488 = vmatprep.subr.bf16.mxu1 %v16344_v56 }
 0x612   :  { %12448 = vmatpush1.bf16.msra.mxu0 %v16339_v63  ;;  %v16421_v63 = vld [vmem:[#allocation15 + $0xe60] ss:$8 sps:$4 sm:$0xff]  }
 0x613   :  { %12449 = vmatprep.subr.bf16.mxu0 %v16347_v43 }
 0x614   :  { %12489 = vmatpush1.bf16.msra.mxu1 %v16342_v13 }
 0x615   :  { %12490 = vmatprep.subr.bf16.mxu1 %v16350_v40  ;;  %v16426_v40 = vld [vmem:[#allocation15 + $0xe54] ss:$8 sps:$4 sm:$0xff]  }
 0x616   :  { %12450 = vmatpush1.bf16.msra.mxu0 %v16345_v25 }
 0x617   :  { %12451 = vmatprep.subr.bf16.mxu0 %v16353_v19 }
 0x618   :  { %12491 = vmatpush1.bf16.msra.mxu1 %v16348_v9 }
 0x619   :  { %12492 = vmatprep.subr.bf16.mxu1 %v16356_v58 }
 0x61a   :  { %12452 = vmatpush1.bf16.msra.mxu0 %v16351_v21 }
 0x61b   :  { %12453 = vmatprep.subr.bf16.mxu0 %v16359_v3 }
 0x61c   :  { %12493 = vmatpush1.bf16.msra.mxu1 %v16354_v34  ;;  %v16429_v34 = vld [vmem:[#allocation15 + $0xe44] ss:$8 sps:$4 sm:$0xff]  }
 0x61d   :  { %12494 = vmatprep.subr.bf16.mxu1 %v16362_v32 }
 0x61e   :  { %12454 = vmatpush1.bf16.msra.mxu0 %v16357_v50  ;;  %v16427_v50 = vld [vmem:[#allocation15 + $0xe40] ss:$8 sps:$4 sm:$0xff]  }
 0x61f   :  { %12455 = vmatprep.subr.bf16.mxu0 %v16365_v30  ;;  %v16432_v30 = vld [vmem:[#allocation15 + $0xe34] ss:$8 sps:$4 sm:$0xff]  }
 0x620   :  { %12495 = vmatpush1.bf16.msra.mxu1 %v16360_v44  ;;  %v16430_v44 = vld [vmem:[#allocation15 + $0xe30] ss:$8 sps:$4 sm:$0xff]  }
 0x621   :  { %12496 = vmatprep.subr.bf16.mxu1 %v16368_v52  ;;  %v16433_v52 = vld [vmem:[#allocation15 + $0xe20] ss:$8 sps:$4 sm:$0xff]  }
 0x622   :  { %12456 = vmatpush1.bf16.msra.mxu0 %v16363_v29  ;;  %v16438_v29 = vld [vmem:[#allocation15 + $0xe14] ss:$8 sps:$4 sm:$0xff]  }
 0x623   :  { %12457 = vmatprep.subr.bf16.mxu0 %v16371_v5  ;;  %v16436_v5 = vld [vmem:[#allocation15 + $0xe10] ss:$8 sps:$4 sm:$0xff]  }
 0x624   :  { %12497 = vmatpush1.bf16.msra.mxu1 %v16366_v38  ;;  %v16441_v38 = vld [vmem:[#allocation15 + $0xe04] ss:$8 sps:$4 sm:$0xff]  }
 0x625   :  { %12498 = vmatprep.subr.bf16.mxu1 %v16374_v23  ;;  %v16439_v23 = vld [vmem:[#allocation15 + $0xe00] ss:$8 sps:$4 sm:$0xff]  }
 0x626   :  { %12458 = vmatpush2.bf16.msra.mxu0 %v16369_v39  ;;  %v16444_v39 = vld [vmem:[#allocation15 + $0xef4] ss:$8 sps:$4 sm:$0xff]  }
 0x627   :  { %12459 = vmatprep.subr.bf16.mxu0 %v16377_v46  ;;  %v16442_v46 = vld [vmem:[#allocation15 + $0xef0] ss:$8 sps:$4 sm:$0xff]  }
 0x628   :  { %12499 = vmatpush2.bf16.msra.mxu1 %v16372_v26  ;;  %v16447_v26 = vld [vmem:[#allocation15 + $0xee4] ss:$8 sps:$4 sm:$0xff]  }
 0x629   :  { %12500 = vmatprep.subr.bf16.mxu1 %v16380_v27  ;;  %v16445_v27 = vld [vmem:[#allocation15 + $0xee0] ss:$8 sps:$4 sm:$0xff]  }
 0x62a   :  { %12460 = vmatpush2.bf16.msra.mxu0 %v16375_v4  ;;  %v16450_v4 = vld [vmem:[#allocation15 + $0xed4] ss:$8 sps:$4 sm:$0xff]  }
 0x62b   :  { %12461 = vmatprep.subr.bf16.mxu0 %v16383_v62  ;;  %v16448_v62 = vld [vmem:[#allocation15 + $0xed0] ss:$8 sps:$4 sm:$0xff]  }
 0x62c   :  { %12501 = vmatpush2.bf16.msra.mxu1 %v16378_v54  ;;  %v16453_v54 = vld [vmem:[#allocation15 + $0xec4] ss:$8 sps:$4 sm:$0xff]  }
 0x62d   :  { %12502 = vmatprep.subr.bf16.mxu1 %v16386_v53  ;;  %v16451_v53 = vld [vmem:[#allocation15 + $0xec0] ss:$8 sps:$4 sm:$0xff]  }
 0x62e   :  { %12462 = vmatpush2.bf16.msra.mxu0 %v16381_v47  ;;  %v16456_v47 = vld [vmem:[#allocation15 + $0xeb4] ss:$8 sps:$4 sm:$0xff]  }
 0x62f   :  { %12463 = vmatprep.subr.bf16.mxu0 %v16389_v35  ;;  %v16454_v35 = vld [vmem:[#allocation15 + $0xeb0] ss:$8 sps:$4 sm:$0xff]  }
 0x630   :  { %12503 = vmatpush2.bf16.msra.mxu1 %v16384_v2  ;;  %v16459_v2 = vld [vmem:[#allocation15 + $0xea4] ss:$8 sps:$4 sm:$0xff]  }
 0x631   :  { %12504 = vmatprep.subr.bf16.mxu1 %v16392_v6  ;;  %v16457_v6 = vld [vmem:[#allocation15 + $0xea0] ss:$8 sps:$4 sm:$0xff]  }
 0x632   :  { %12464 = vmatpush2.bf16.msra.mxu0 %v16387_v59  ;;  %v16462_v59 = vld [vmem:[#allocation15 + $0xe94] ss:$8 sps:$4 sm:$0xff]  }
 0x633   :  { %12465 = vmatprep.subr.bf16.mxu0 %v16395_v24  ;;  %v16460_v24 = vld [vmem:[#allocation15 + $0xe90] ss:$8 sps:$4 sm:$0xff]  }
 0x634   :  { %12505 = vmatpush2.bf16.msra.mxu1 %v16390_v57  ;;  %v16465_v57 = vld [vmem:[#allocation15 + $0xe84] ss:$8 sps:$4 sm:$0xff]  }
 0x635   :  { %12506 = vmatprep.subr.bf16.mxu1 %v16398_v20  ;;  %v16463_v20 = vld [vmem:[#allocation15 + $0xe80] ss:$8 sps:$4 sm:$0xff]  }
 0x636   :  { %12466 = vmatpush2.bf16.msra.mxu0 %v16393_v41 }
 0x637   :  { %12467 = vmatprep.subr.bf16.mxu0 %v16401_v17 }
 0x638   :  { %12507 = vmatpush2.bf16.msra.mxu1 %v16396_v16 }
 0x639   :  { %12508 = vmatprep.subr.bf16.mxu1 %v16404_v42 }
 0x63a   :  { %12468 = vmatpush2.bf16.msra.mxu0 %v16399_v1 }
 0x63b   :  { %12469 = vmatprep.subr.bf16.mxu0 %v16407_v45 }
 0x63c   :  { %12509 = vmatpush2.bf16.msra.mxu1 %v16402_v49 }
 0x63d   :  { %12510 = vmatprep.subr.bf16.mxu1 %v16410_v60 }
 0x63e   :  { %12470 = vmatpush2.bf16.msra.mxu0 %v16405_v14 }
 0x63f   :  { %12471 = vmatprep.subr.bf16.mxu0 %v16413_v10 }
 0x640   :  { %12511 = vmatpush2.bf16.msra.mxu1 %v16408_v8 }
 0x641   :  { %12512 = vmatprep.subr.bf16.mxu1 %v16416_v51 }
 0x642   :  { %12472 = vmatpush2.bf16.msra.mxu0 %v16411_v15  ;;  %v16466_v15 = vld [vmem:[#allocation18 + $0x78] sm:$0xff]  }
 0x643   :  { %12523 = vmatprep.subr.bf16.mxu0 %v16419_v31  ;;  %v16467_v31 = vld [vmem:[#allocation18 + $0x38] sm:$0xff]  }
 0x644   :  { %12513 = vmatpush2.bf16.msra.mxu1 %v16414_v12  ;;  %v16468_v12 = vld [vmem:[#allocation18 + $0x70] sm:$0xff]  }
 0x645   :  { %v12229_v11 = vpop.f32.mrf.mxu0  ;;  %12474 = vmatmul.mubr.bf16.vlgmr.msra.gmra.mxu0 %v18463_v55  ;;  %v16424_v55 = vld [vmem:[#allocation15 + $0xe50] ss:$8 sps:$4 sm:$0xff]   ;;  %14778 = vmatprep.subr.bf16.mxu1 %v16466_v15 }
 0x646   :  { %v12230_v56 = vadd.f32 %v12229_v11, %v18514_v0  ;;  %12524 = vmatpush1.bf16.msra.mxu0 %v16417_v28  ;;  %12555 = vmatprep.mubr.bf16.mxu0 %v9516_v48  ;;  %v16473_v28 = vld [vmem:[#allocation18 + $0x20] sm:$0xff]   ;;  %v16475_v48 = vld [vmem:[#allocation18 + $0x18] sm:$0xff]   ;;  %v16476_v11 = vld [vmem:[#allocation18 + $0x50] sm:$0xff]  }
 0x647   :  { %v12231_v43 = vpop.f32.mrf.mxu0  ;;  %v12270_v13 = vpop.f32.mrf.mxu1  ;;  %12515 = vmatmul.mubr.bf16.vlgmr.msra.gmra.mxu1 %v9517_v36  ;;  %12525 = vmatprep.subr.bf16.mxu0 %v16423_v33  ;;  %v16474_v33 = vld [vmem:[#allocation18 + $0x58] sm:$0xff]   ;;  %v16477_v36 = vld [vmem:[#allocation18 + $0x10] sm:$0xff]  }
 0x648   :  { %v12232_v25 = vadd.f32 %v12231_v43, %v18516_v61  ;;  %v18526_v19 = vadd.f32 %v12270_v13, %v12230_v56  ;;  %v16435_v61 = vld [vmem:[#allocation15 + $0xe24] ss:$8 sps:$4 sm:$0xff]   ;;  %14779 = vmatpush3.bf16.msra.mxu1 %v16467_v31 }
 0x649   :  { %v12233_v9 = vpop.f32.mrf.mxu0  ;;  %v12272_v58 = vpop.f32.mrf.mxu1  ;;  %14780 = vmatprep.subr.bf16.mxu1 %v16468_v12 }
 0x64a   :  { %v18528_v21 = vadd.f32 %v12272_v58, %v12232_v25  ;;  %12526 = vmatpush1.bf16.msra.mxu0 %v16421_v63 }
 0x64b   :  { %v12234_v3 = vpop.f32.mrf.mxu0  ;;  %v12274_v0 = vpop.f32.mrf.mxu1  ;;  %12527 = vmatprep.subr.bf16.mxu0 %v16426_v40 }
 0x64c   :  { %14781 = vmatpush3.bf16.msra.mxu1 %v16469_v37  ;;  %v16478_v3 = vld [vmem:[#allocation18 + $0x48] sm:$0xff]  }
 0x64d   :  { %v12275_v32 = vpop.f32.mrf.mxu1  ;;  %14782 = vmatprep.subr.bf16.mxu1 %v16470_v18  ;;  %v16479_v0 = vld [vmem:[#allocation18 + $0x8] sm:$0xff]  }
 0x64e   :  { %12528 = vmatpush1.bf16.msra.mxu0 %v16424_v55 }
 0x64f   :  { %12529 = vmatprep.subr.bf16.mxu0 %v16429_v34  ;;  %v16480_v34 = vld [vmem:[#allocation18 + $0x40] sm:$0xff]  }
 0x652   :  { %12530 = vmatpush1.bf16.msra.mxu0 %v16427_v50  ;;  %v16481_v50 = vld [vmem:[#allocation18] sm:$0xff]  }
 0x653   :  { %12531 = vmatprep.subr.bf16.mxu0 %v16432_v30 }
 0x656   :  { %12532 = vmatpush1.bf16.msra.mxu0 %v16430_v44 }
 0x657   :  { %12533 = vmatprep.subr.bf16.mxu0 %v16435_v61 }
 0x65a   :  { %12534 = vmatpush1.bf16.msra.mxu0 %v16433_v52 }
 0x65b   :  { %12535 = vmatprep.subr.bf16.mxu0 %v16438_v29 }
 0x65e   :  { %12536 = vmatpush1.bf16.msra.mxu0 %v16436_v5 }
 0x65f   :  { %12537 = vmatprep.subr.bf16.mxu0 %v16441_v38 }
 0x662   :  { %12538 = vmatpush1.bf16.msra.mxu0 %v16439_v23 }
 0x663   :  { %12539 = vmatprep.subr.bf16.mxu0 %v16444_v39 }
 0x666   :  { %12540 = vmatpush2.bf16.msra.mxu0 %v16442_v46 }
 0x667   :  { %12541 = vmatprep.subr.bf16.mxu0 %v16447_v26 }
 0x66a   :  { %12542 = vmatpush2.bf16.msra.mxu0 %v16445_v27 }
 0x66b   :  { %12543 = vmatprep.subr.bf16.mxu0 %v16450_v4 }
 0x66e   :  { %12544 = vmatpush2.bf16.msra.mxu0 %v16448_v62 }
 0x66f   :  { %12545 = vmatprep.subr.bf16.mxu0 %v16453_v54 }
 0x672   :  { %12546 = vmatpush2.bf16.msra.mxu0 %v16451_v53 }
 0x673   :  { %12547 = vmatprep.subr.bf16.mxu0 %v16456_v47 }
 0x676   :  { %12548 = vmatpush2.bf16.msra.mxu0 %v16454_v35 }
 0x677   :  { %12549 = vmatprep.subr.bf16.mxu0 %v16459_v2 }
 0x67a   :  { %12550 = vmatpush2.bf16.msra.mxu0 %v16457_v6 }
 0x67b   :  { %12551 = vmatprep.subr.bf16.mxu0 %v16462_v59 }
 0x67e   :  { %12552 = vmatpush2.bf16.msra.mxu0 %v16460_v24 }
 0x67f   :  { %12553 = vmatprep.subr.bf16.mxu0 %v16465_v57 }
 0x682   :  { %12554 = vmatpush2.bf16.msra.mxu0 %v16463_v20  ;;  %v18786_v20 = vlaneseq }
 0x685   :  { %v12311_v41 = vpop.f32.mrf.mxu0  ;;  %12556 = vmatmul.mubr.bf16.vlgmr.msra.gmra.mxu0 %v9502_v7  ;;  %v16471_v7 = vld [vmem:[#allocation18 + $0x28] sm:$0xff]  }
 0x686   :  { %v12312_v17 = vadd.f32 %v12311_v41, %v18526_v19  ;;  %14783 = vmatpush3.bf16.msra.mxu1 %v16471_v7  ;;  %v12744_v41 = vand.u32 127, %v18786_v20 }
 0x687   :  { %v12313_v16 = vpop.f32.mrf.mxu0  ;;  %v12352_v42 = vpop.f32.mrf.mxu1  ;;  %14784 = vmatprep.subr.bf16.mxu1 %v16472_v22  ;;  %v16711_v22 = vmov 0.0  }
 0x688   :  { %v12314_v1 = vadd.f32 %v12313_v16, %v18528_v21  ;;  %v12353_v45 = vadd.f32 %v12352_v42, %v12312_v17  ;;  %v14248_v17 = vld [vmem:[#allocation19] ss:$0 sm:$0xff]  ;;  %vm12745_vm9 = vcmp.lt.s32.totalorder %v12744_v41, 3 }
 0x689   :  { %v12315_v49 = vpop.f32.mrf.mxu0  ;;  %v12354_v60 = vpop.f32.mrf.mxu1 }
 0x68a   :  { %v12355_v14 = vadd.f32 %v12354_v60, %v12314_v1  ;;  %14785 = vmatpush3.bf16.msra.mxu1 %v16473_v28 }
 0x68b   :  { %v12316_v10 = vpop.f32.mrf.mxu0  ;;  %v12356_v8 = vpop.f32.mrf.mxu1  ;;  %14786 = vmatprep.subr.bf16.mxu1 %v16474_v33 }
 0x68c   :  { %v12759_v10 = vld [vmem:[%s18560_s9] sm:$0x3] }
 0x68d   :  { %v12357_v51 = vpop.f32.mrf.mxu1  ;;  %12761 = vperm.xlu1 %14820, %v12759_v10  }
 0x68e   :  { %14787 = vmatpush3.bf16.msra.mxu1 %v16475_v48 }
 0x68f   :  { %14788 = vmatprep.subr.bf16.mxu1 %v16476_v11 }
 0x692   :  { %14789 = vmatpush3.bf16.msra.mxu1 %v16477_v36  ;;  %v12770_v36 = vld [vmem:[%s18561_s10] sm:$0x3]  ;;  %s16712_s10 = smov [#allocation21]  }
 0x693   :  { %14790 = vmatprep.subr.bf16.mxu1 %v16478_v3  ;;  %s12802_s7 = sshll.u32 %s16712_s10, 4  ;;  %s12803_s7 = int_to_ptr.vmem [resolvable:$true] %s12802_s7 }
 0x694   :  { %s16667_s26 = scalar_lea.vmem %s12803_s7, 32  ;;  %p16668_p13 = scmp.lt.s32.totalorder %s12803_s7, %s12803_s7 }
 0x696   :  { %14791 = vmatpush3.bf16.msra.mxu1 %v16479_v0 }
 0x697   :  { %14792 = vmatprep.subr.bf16.mxu1 %v16480_v34 }
 0x69a   :  { %14793 = vmatpush3.bf16.msra.mxu1 %v16481_v50 }
 0x6c5   :  { %v12393_v56 = vpop.f32.mrf.mxu0 }
 0x6c6   :  { %v12394_v63 = vadd.f32 %v12393_v56, %v12353_v45 }
 0x6c7   :  { %v12395_v43 = vpop.f32.mrf.mxu0  ;;  %v12434_v13 = vpop.f32.mrf.mxu1 }
 0x6c8   :  { %v12396_v40 = vadd.f32 %v12395_v43, %v12355_v14  ;;  %v12435_v25 = vadd.f32 %v12434_v13, %v12394_v63 }
 0x6c9   :  { %v12397_v19 = vpop.f32.mrf.mxu0  ;;  %v12436_v9 = vpop.f32.mrf.mxu1 }
 0x6ca   :  { %v12437_v58 = vadd.f32 %v12436_v9, %v12396_v40  ;;  %v12773_v40 = vld [vmem:[%s18562_s11] sm:$0x3]  ;;  %s16663_s11 = scalar_lea.vmem %s12803_s7, 16 }
 0x6cb   :  { %v12398_v21 = vpop.f32.mrf.mxu0  ;;  %v12438_v55 = vpop.f32.mrf.mxu1  ;;  %p16664_p12 = scmp.ne.s32.totalorder %s12803_s7, %s16663_s11  ;;  %p16669_p0 = scmp.lt.s32.totalorder %s16667_s26, %s16663_s11 }
 0x6cd   :  { %v12439_v32 = vpop.f32.mrf.mxu1  ;;  %p16670_p1 = por %p16669_p0, %p16668_p13 }
 0x6cf   :  { %p16671_p2 = pnand %p16670_p1, %p16664_p12 }
 0x705   :  { %v12475_v30 = vpop.f32.mrf.mxu0 }
 0x706   :  { %v12476_v39 = vadd.f32 %v12475_v30, %v12435_v25 }
 0x707   :  { %v12477_v44 = vpop.f32.mrf.mxu0  ;;  %v12516_v61 = vpop.f32.mrf.mxu1 }
 0x708   :  { %v12478_v46 = vadd.f32 %v12477_v44, %v12437_v58  ;;  %v12517_v26 = vadd.f32 %v12516_v61, %v12476_v39  ;;  %v12762_v18 = vpop.permute.xlu1 %12761 }
 0x709   :  { %v12479_v52 = vpop.f32.mrf.mxu0  ;;  %v12518_v29 = vpop.f32.mrf.mxu1  ;;  %vm12763_vm10 = vcmp.eq.s32.totalorder %v12762_v18, %v12744_v41 }
 0x70a   :  { %v12519_v4 = vadd.f32 %v12518_v29, %v12478_v46  ;;  %v14265_v28 = vsel %vm12763_vm10, 1.0, %v16711_v22 }
 0x70b   :  { %v12480_v5 = vpop.f32.mrf.mxu0  ;;  %v12520_v38 = vpop.f32.mrf.mxu1 }
 0x70d   :  { %v12521_v23 = vpop.f32.mrf.mxu1 }
 0x745   :  { %v12557_v27 = vpop.f32.mrf.mxu0 }
 0x746   :  { %v12558_v62 = vadd.f32 %v12557_v27, %v12517_v26 }
 0x747   :  { %v12559_v54 = vpop.f32.mrf.mxu0 }
 0x748   :  { %v12560_v53 = vadd.f32 %v12559_v54, %v12519_v4  ;;  %v12564_v47 = vmax.f32 %v12558_v62, 0.0 }
 0x749   :  { %v12561_v35 = vpop.f32.mrf.mxu0 }
 0x74a   :  { %v12565_v2 = vmax.f32 %v12560_v53, 0.0  ;;  %v12566_v24 = vpack.c.bf16 %v12564_v47, %v12564_v47 }
 0x74b   :  { %v12562_v6 = vpop.f32.mrf.mxu0 }
 0x74c   :  { %v12567_v59 = vpack.c.bf16 %v12565_v2, %v12565_v2 }
 0x74e   :  { %12735 = vmatprep.mubr.bf16.mxu1 %v12567_v59 }
 0x74f   :  { %12736 = vmatmul.mubr.bf16.vlgmr.msra.gmra.mxu1 %v12566_v24 }
 0x80f   :  { %v14794_v57 = vpop.f32.mrf.mxu1 }
 0x811   :  { %v14795_v16 = vpop.f32.mrf.mxu1 }
 0x812   :  { %v14796_v42 = vadd.f32 %v14795_v16, %v14794_v57 }
 0x813   :  { %v14797_v1 = vpop.f32.mrf.mxu1 }
 0x814   :  { %v12738_v45 = vadd.f32 %v14796_v42, %v14248_v17 }
 0x815   :  { %v14798_v49 = vpop.f32.mrf.mxu1 }
 0x816   :  { %v12746_v60 = vsel %vm12745_vm9, %v12738_v45, -1e+30 }
 0x817   :  { %v12748_v14 = vsel %vm211_vm1, %v12746_v60, -inf }
 0x818   :  { %12749 = vmax.xlane.f32.xlu0 %v12748_v14 }
 0x8a1   :  { %v12750_v8 = vpop.xlane.xlu0 %12749 }
 0x8a2   :  { %v12751_v51 = vsub.f32 %v12746_v60, %v12750_v8 }
 0x8a4   :  { %v12752_v15 = vmul.f32 1.442695, %v12751_v51 }
 0x8a6   :  { %16482 = vpow2.f32 %v12752_v15 }
 0x8b3   :  { %v16483_v31 = vpop.eup %16482 }
 0x8b4   :  { %v12754_v12 = vsel %vm211_vm1, %v16483_v31, 0.0 }
 0x8b5   :  { %12755 = vadd.xlane.f32.xlu0 %v12754_v12 }
 0x93e   :  { %v12756_v37 = vpop.xlane.xlu0 %12755 }
 0x93f   :  { %16484 = vrcp.f32 %v12756_v37 }
 0x940   :  { %16486 = vrcp.f32 %v12770_v36 }
 0x94c   :  { %v16485_v7 = vpop.eup %16484 }
 0x94d   :  { %v12758_v33 = vmul.f32 %v16485_v7, %v16483_v31  ;;  %v16487_v56 = vpop.eup %16486 }
 0x94f   :  { %v12766_v48 = vmul.f32 %v14265_v28, %v12758_v33 }
 0x951   :  { %v12767_v11 = vsel %vm211_vm1, %v12766_v48, 0.0  ;;  %vm12794_vm1 = vcmask 0  }
 0x952   :  { %12768 = vadd.xlane.f32.xlu1 %v12767_v11 }
 0x9db   :  { %v12769_v63 = vpop.xlane.xlu1 %12768 }
 0x9dc   :  { %v12772_v43 = vmul.f32 %v16487_v56, %v12769_v63 }
 0x9de   :  { %v12775_v13 = vmax.f32 %v12772_v43, 0.9  ;;  %v12774_v19 = vmul.f32 %v12773_v40, %v12772_v43 }
 0x9e0   :  { %v12776_v25 = vmin.f32 %v12775_v13, 1.1 }
 0x9e2   :  { %v12777_v9 = vmul.f32 %v12776_v25, %v12773_v40 }
 0x9e4   :  { %v12778_v58 = vmin.f32 %v12774_v19, %v12777_v9 }
 0x9e6   :  { %v12779_v21 = vsub.f32 0.0, %v12778_v58 }
 0x9e8   :  { %v12781_v55 = vsel %vm12780_vm11, %v12779_v21, 0.0 }
 0x9e9   :  { %12782 = vadd.xlane.f32.xlu0 %v12781_v55 }
 0xa72   :  { %v12783_v3 = vpop.xlane.xlu0 %12782 }
 0xa73   :  { %v12784_v0 = vrot.slane %v12783_v3, 4 }
 0xa75   :  { %v12785_v34 = vadd.f32 %v12784_v0, %v12783_v3 }
 0xa77   :  { %v12786_v32 = vrot.slane %v12785_v34, 2 }
 0xa79   :  { %v12787_v50 = vadd.f32 %v12786_v32, %v12785_v34 }
 0xa7b   :  { %v12788_v30 = vrot.slane %v12787_v50, 1 }
 0xa7d   :  { %v12789_v44 = vadd.f32 %v12788_v30, %v12787_v50 }
 0xa7f   :  { %14800 = vpush %v12789_v44 }
 0xab0   :  { %s14801_s8 = spop %14800 }
 0xab1   :  { %v12791_v61 = vstv %s14801_s8 }
 0xab2   :  { %v12793_v52 = vmul.f32 0.5, %v12791_v61 }
 0xab4   :  { %12795 = vst.msk [vmem:[#allocation21] sm:$0x1] %vm12794_vm1, %v12793_v52 }
 0xab5   :  { %16674 = shalt.err (!%p16671_p2)
}
 0xab6   :  { %12805 = dma.vmem_to_hbm [thread:$0]  %s12803_s7, 16, %s18563_s12, [#allocation9]  }
 0xab7   :  { %16693 = dma.done.wait [#allocation9], 16  }
 0xab8   :  { %16694 = vsyncadd [#allocation9], 4294967280 }
 0xab9   :  { %12809 = vsyncpa [#allocation8], 1 }
 0xaba   :  { %12810 = vsyncpa [#allocation11], 1 }
 0xabb   :  { %12811 = vsyncpa [#allocation14], 1 }
 0xabc   :  { %12812 = vsyncpa [#allocation17], 1 }
 0xabd   :  { %12813 = vsyncpa [#allocation20], 1 }
 0xabe   :  { %12814 = vsyncpa [#allocation9], 1 }

</bundles_post_ra>
